<compile_context>
chip_gen: v6e
topology: v6e:2x2x1
jax: 0.10.0
libtpu: 0.0.40
codegen_flags: <defaults>
</compile_context>

<pallas_src>
import jax
import jax.numpy as jnp
from jax.experimental import pallas as pl
from jax.experimental.pallas import tpu as pltpu

BOS_TOKEN = 1
LANE = 128
BP = 8  # sublane-padded batch


def _round_up(d, m=LANE):
    return ((d + m - 1) // m) * m


# --------------------------------------------------------------------------
# One fused kernel: encoder GRU + attention keys + decode loop
# --------------------------------------------------------------------------

def _make_fused_kernel(T, steps, Bp, Hp, Ep, Vp, train_mode):
    f32 = jnp.float32
    bf16 = jnp.bfloat16

    def kernel(avi_ref, words_ref,
               wc_ref, bc_ref,
               enc_wih_ref, enc_whh_ref, enc_bih_ref, enc_bhh_ref,
               w1e_ref, b1_ref, w1h_ref, attv_ref,
               emb_ref,
               dec_wih_ref, dec_whh_ref, dec_bih_ref, dec_bhh_ref,
               outw_ref, outb_ref,
               logp_ref):
        # ----------------------------- encoder -----------------------------
        # Hoisted, batched input-side matmuls (M = T*Bp fills the MXU).
        x_all = (jnp.dot(avi_ref[...], wc_ref[...],
                         preferred_element_type=f32) + bc_ref[...])
        # TODO(synk): nn.Dropout(0.3) after compress omitted (identity in eval).
        gi_all = (jnp.dot(x_all.astype(bf16), enc_wih_ref[...],
                          preferred_element_type=f32) + enc_bih_ref[...])
        gi_all = gi_all.reshape(T, Bp, 3 * Hp)

        enc_whh = enc_whh_ref[...]
        enc_bhh = enc_bhh_ref[...]
        h = jnp.zeros((Bp, Hp), f32)
        hs = []
        for t in range(T):                      # fully unrolled GRU recurrence
            gi = gi_all[t]
            gh = (jnp.dot(h.astype(bf16), enc_whh,
                          preferred_element_type=f32) + enc_bhh)
            r = jax.nn.sigmoid(gi[:, 0 * Hp:1 * Hp] + gh[:, 0 * Hp:1 * Hp])
            z = jax.nn.sigmoid(gi[:, 1 * Hp:2 * Hp] + gh[:, 1 * Hp:2 * Hp])
            n = jnp.tanh(gi[:, 2 * Hp:3 * Hp] + r * gh[:, 2 * Hp:3 * Hp])
            h = (1.0 - z) * n + z * h
            hs.append(h)
        en_out = jnp.stack(hs, axis=0)                      # (T, Bp, Hp) f32

        # Attention keys hoisted out of the decode loop, batched over T*Bp.
        keys = (jnp.dot(en_out.reshape(T * Bp, Hp).astype(bf16), w1e_ref[...],
                        preferred_element_type=f32)
                + b1_ref[...]).reshape(T, Bp, Hp)

        # ----------------------------- decoder -----------------------------
        emb_w = emb_ref[...]
        w1h = w1h_ref[...]
        attv = attv_ref[...]
        dec_wih = dec_wih_ref[...]
        dec_whh = dec_whh_ref[...]
        dec_bih = dec_bih_ref[...]
        dec_bhh = dec_bhh_ref[...]
        outw = outw_ref[...]
        outb = outb_ref[...]
        lane2 = jax.lax.broadcasted_iota(jnp.int32, (Bp, Vp), 1)

        if train_mode:
            # Teacher forcing: all step embeddings in one batched one-hot matmul.
            lane3 = jax.lax.broadcasted_iota(jnp.int32, (steps, Bp, Vp), 2)
            oh_all = (lane3 == words_ref[...]).astype(bf16)
            emb_all = jnp.dot(oh_all.reshape(steps * Bp, Vp), emb_w,
                              preferred_element_type=f32).reshape(steps, Bp, Ep)
            onehot = None
        else:
            onehot = (lane2 == words_ref[0]).astype(bf16)   # <BOS> one-hot

        logps = []
        for t in range(steps):                   # fully unrolled decode loop
            if train_mode:
                emb = emb_all[t]
            else:
                emb = jnp.dot(onehot, emb_w, preferred_element_type=f32)

            # Bahdanau attention: score reduce on MXU, softmax recip on EUP.
            q = jnp.dot(h.astype(bf16), w1h, preferred_element_type=f32)
            e = jnp.tanh(keys + q[None, :, :])              # (T, Bp, Hp)
            scores = jnp.dot(e.reshape(T * Bp, Hp).astype(bf16), attv,
                             preferred_element_type=f32).reshape(T, Bp, 1)
            smax = jnp.max(scores, axis=0, keepdims=True)
            a = jnp.exp(scores - smax)
            wgt = a * pl.reciprocal(jnp.sum(a, axis=0, keepdims=True),
                                    approx=True)
            ctx = jnp.sum(wgt * en_out, axis=0)             # (Bp, Hp)

            # GRU cell: single fused K=256 input matmul on [ctx, emb].
            xcat = jnp.concatenate([ctx, emb], axis=1).astype(bf16)
            gi = (jnp.dot(xcat, dec_wih, preferred_element_type=f32) + dec_bih)
            gh = (jnp.dot(h.astype(bf16), dec_whh,
                          preferred_element_type=f32) + dec_bhh)
            r = jax.nn.sigmoid(gi[:, 0 * Hp:1 * Hp] + gh[:, 0 * Hp:1 * Hp])
            z = jax.nn.sigmoid(gi[:, 1 * Hp:2 * Hp] + gh[:, 1 * Hp:2 * Hp])
            n = jnp.tanh(gi[:, 2 * Hp:3 * Hp] + r * gh[:, 2 * Hp:3 * Hp])
            h = (1.0 - z) * n + z * h

            # Vocab projection + log_softmax (padded lanes carry a -1e9 bias).
            logits = (jnp.dot(h.astype(bf16), outw,
                              preferred_element_type=f32) + outb)
            mx = jnp.max(logits, axis=-1, keepdims=True)
            lse = jnp.log(jnp.sum(jnp.exp(logits - mx),
                                  axis=-1, keepdims=True)) + mx
            logp = logits - lse
            logps.append(logp)

            if not train_mode:
                # Greedy argmax (first-index tie break) -> next-step one-hot.
                rmax = jnp.max(logp, axis=-1, keepdims=True)
                amax = jnp.min(jnp.where(logp == rmax, lane2, Vp),
                               axis=-1, keepdims=True)
                onehot = (lane2 == amax).astype(bf16)

        logp_ref[...] = jnp.stack(logps, axis=0)            # one dense store
    return kernel


# --------------------------------------------------------------------------
# ModelMain.forward equivalent
# --------------------------------------------------------------------------

def model_main_forward(params, avi_feat, mode,
                       target_sentences=None, tr_steps=None, max_len=6):
    """Mirrors ModelMain.forward: returns (seq_logProb, seq_predictions)."""
    F, H, E, V = params["dims_logical"]
    Hp, Ep, Vp = params["dims_padded"]
    B, T, _ = avi_feat.shape
    Bp = BP

    if mode == "train":
        # TODO(synk): scheduled sampling via tr_steps not implemented; pure teacher forcing.
        steps = target_sentences.shape[1] - 1
        words = target_sentences[:, :steps].astype(jnp.int32)
        train_mode = True
    else:
        steps = max_len - 1
        words = jnp.full((B, steps), BOS_TOKEN, jnp.int32)
        train_mode = False

    # Pad batch to the 8-sublane width, go time-major, flatten for batched matmuls.
    avi = jnp.pad(avi_feat.astype(jnp.bfloat16), ((0, Bp - B), (0, 0), (0, 0)))
    avi = jnp.transpose(avi, (1, 0, 2)).reshape(T * Bp, F)
    words_p = jnp.pad(words, ((0, Bp - B), (0, 0)))
    words_p = jnp.transpose(words_p, (1, 0)).reshape(steps, Bp, 1)

    operands = (
        avi, words_p,
        params["enc_compress_w"], params["enc_compress_b"],
        params["enc_gru_wih"], params["enc_gru_whh"],
        params["enc_gru_bih"], params["enc_gru_bhh"],
        params["att_w1e"], params["att_b1"], params["att_w1h"], params["att_v"],
        params["dec_embedding"],
        params["dec_gru_wih"], params["dec_gru_whh"],
        params["dec_gru_bih"], params["dec_gru_bhh"],
        params["dec_out_w"], params["dec_out_b"],
    )
    vmem = pl.BlockSpec(memory_space=pltpu.MemorySpace.VMEM)

    kernel = _make_fused_kernel(T, steps, Bp, Hp, Ep, Vp, train_mode)
    logp = pl.pallas_call(
        kernel,
        out_shape=jax.ShapeDtypeStruct((steps, Bp, Vp), jnp.float32),
        in_specs=[vmem] * len(operands),
        out_specs=vmem,
    )(*operands)

    seq_logprob = jnp.transpose(logp, (1, 0, 2))[:B, :, :V]       # (B, steps, V)
    seq_pred = jnp.argmax(seq_logprob, axis=-1).astype(jnp.int32)  # (B, steps)
    return seq_logprob, seq_pred


# --------------------------------------------------------------------------
# Deterministic parameter init (bf16 matmul weights, f32 biases, 128-lane pad)
# --------------------------------------------------------------------------

def init_params(key, F, H, E, V):
    Hp, Ep, Vp = _round_up(H), _round_up(E), _round_up(V)
    ks = jax.random.split(key, 10)

    def nrm(k, shape, scale=0.1):
        return (scale * jax.random.normal(k, shape)).astype(jnp.float32)

    def pad2(x, rows, cols):
        return jnp.pad(x, ((0, rows - x.shape[0]), (0, cols - x.shape[1])))

    def pad_gates(w3, rows_p, cols_p):       # (3, din, H) -> (rows_p, 3*cols_p)
        return jnp.concatenate([pad2(w3[g], rows_p, cols_p) for g in range(3)],
                               axis=1)

    def pad_gate_bias(b3, cols_p):           # (3, H) -> (1, 3*cols_p)
        return jnp.concatenate([pad2(b3[g:g + 1], 1, cols_p) for g in range(3)],
                               axis=1)

    enc_wih = nrm(ks[1], (3, H, H))
    enc_whh = nrm(ks[2], (3, H, H))
    dec_wih = nrm(ks[7], (3, H + E, H))
    dec_whh = nrm(ks[8], (3, H, H))
    zeros3H = jnp.zeros((3, H), jnp.float32)

    # Padded vocab columns get a huge negative bias so softmax/argmax ignore them.
    dec_out_b = jnp.full((1, Vp), -1e9, jnp.float32).at[:, :V].set(0.0)

    bf = lambda x: x.astype(jnp.bfloat16)

    return {
        "dims_logical": (F, H, E, V),
        "dims_padded": (Hp, Ep, Vp),
        # encoder (matmul operands bf16, biases f32)
        "enc_compress_w": bf(pad2(nrm(ks[0], (F, H)), F, Hp)),   # F unpadded (K=64 OK)
        "enc_compress_b": jnp.zeros((1, Hp), jnp.float32),
        "enc_gru_wih": bf(pad_gates(enc_wih, Hp, Hp)),
        "enc_gru_whh": bf(pad_gates(enc_whh, Hp, Hp)),
        "enc_gru_bih": pad_gate_bias(zeros3H, Hp),
        "enc_gru_bhh": pad_gate_bias(zeros3H, Hp),
        # attention
        "att_w1h": bf(pad2(nrm(ks[4], (H, H)), Hp, Hp)),
        "att_w1e": bf(pad2(nrm(ks[5], (H, H)), Hp, Hp)),
        "att_b1": jnp.zeros((1, Hp), jnp.float32),
        "att_v": bf(pad2(nrm(ks[6], (H, 1)), Hp, 1)),            # (Hp, 1) for MXU reduce
        # decoder
        "dec_embedding": bf(pad2(nrm(ks[3], (V, E)), Vp, Ep)),
        "dec_gru_wih": bf(jnp.concatenate(
            [pad_gates(dec_wih[:, :H, :], Hp, Hp),               # ctx rows
             pad_gates(dec_wih[:, H:, :], Ep, Hp)], axis=0)),    # emb rows -> (Hp+Ep, 3Hp)
        "dec_gru_whh": bf(pad_gates(dec_whh, Hp, Hp)),
        "dec_gru_bih": pad_gate_bias(zeros3H, Hp),
        "dec_gru_bhh": pad_gate_bias(zeros3H, Hp),
        "dec_out_w": bf(pad2(nrm(ks[9], (H, V)), Hp, Vp)),
        "dec_out_b": dec_out_b,
    }


# --------------------------------------------------------------------------

if __name__ == "__main__":
    B, T, F, H, E, V, MAXLEN = 2, 8, 64, 32, 32, 48, 6

    key = jax.random.PRNGKey(0)
    k_feat, k_param, k_tgt = jax.random.split(key, 3)
    avi_feat = jax.random.normal(k_feat, (B, T, F), jnp.float32)
    params = init_params(k_param, F, H, E, V)

    # inference mode (greedy decode), like ModelMain.forward(..., mode='inference')
    seq_1, seq_2 = model_main_forward(params, avi_feat, mode="inference",
                                      max_len=MAXLEN)
    jax.block_until_ready((seq_1, seq_2))
    assert seq_1.shape == (B, MAXLEN - 1, V)
    assert seq_2.shape == (B, MAXLEN - 1)
    assert seq_1.dtype == jnp.float32
    assert seq_2.dtype == jnp.int32
    assert bool(jnp.all(jnp.isfinite(seq_1)))

    # train mode (teacher forcing), like ModelMain.forward(..., mode='train')
    targets = jax.random.randint(k_tgt, (B, MAXLEN), 1, V).astype(jnp.int32)
    tr_1, tr_2 = model_main_forward(params, avi_feat, mode="train",
                                    target_sentences=targets, tr_steps=1)
    jax.block_until_ready((tr_1, tr_2))
    assert tr_1.shape == (B, MAXLEN - 1, V)
    assert tr_2.shape == (B, MAXLEN - 1)

    print("KERNEL_OK")
</pallas_src>

<mosaic_0001>
module attributes {stable_mosaic.version = 11 : i64} {
  func.func @kernel(%arg0: memref<64x64xbf16, #tpu.memory_space<vmem>>, %arg1: memref<5x8x1xi32, #tpu.memory_space<vmem>>, %arg2: memref<64x128xbf16, #tpu.memory_space<vmem>>, %arg3: memref<1x128xf32, #tpu.memory_space<vmem>>, %arg4: memref<128x384xbf16, #tpu.memory_space<vmem>>, %arg5: memref<128x384xbf16, #tpu.memory_space<vmem>>, %arg6: memref<1x384xf32, #tpu.memory_space<vmem>>, %arg7: memref<1x384xf32, #tpu.memory_space<vmem>>, %arg8: memref<128x128xbf16, #tpu.memory_space<vmem>>, %arg9: memref<1x128xf32, #tpu.memory_space<vmem>>, %arg10: memref<128x128xbf16, #tpu.memory_space<vmem>>, %arg11: memref<128x1xbf16, #tpu.memory_space<vmem>>, %arg12: memref<128x128xbf16, #tpu.memory_space<vmem>>, %arg13: memref<256x384xbf16, #tpu.memory_space<vmem>>, %arg14: memref<128x384xbf16, #tpu.memory_space<vmem>>, %arg15: memref<1x384xf32, #tpu.memory_space<vmem>>, %arg16: memref<1x384xf32, #tpu.memory_space<vmem>>, %arg17: memref<128x128xbf16, #tpu.memory_space<vmem>>, %arg18: memref<1x128xf32, #tpu.memory_space<vmem>>, %arg19: memref<5x8x128xf32, #tpu.memory_space<vmem>>) attributes {dimension_semantics = [], scalar_prefetch = 0 : i64, scratch_operands = 0 : i64, tpu.core_type = #tpu.core_type<tc>} {
    %c0 = arith.constant 0 : index
    %c0_0 = arith.constant 0 : index
    %0 = vector.load %arg0[%c0, %c0_0] : memref<64x64xbf16, #tpu.memory_space<vmem>>, vector<64x64xbf16>
    %c0_1 = arith.constant 0 : index
    %c0_2 = arith.constant 0 : index
    %1 = vector.load %arg2[%c0_1, %c0_2] : memref<64x128xbf16, #tpu.memory_space<vmem>>, vector<64x128xbf16>
    %cst = arith.constant dense<0.000000e+00> : vector<64x128xf32>
    %2 = tpu.matmul %0, %1, %cst {dimension_numbers = #tpu.dot_dimension_numbers<[1], [0], [0], [1], [0, 0, 1, 1], [], []>} : vector<64x64xbf16>, vector<64x128xbf16>, vector<64x128xf32> -> vector<64x128xf32>
    %c0_3 = arith.constant 0 : index
    %c0_4 = arith.constant 0 : index
    %3 = vector.load %arg3[%c0_3, %c0_4] : memref<1x128xf32, #tpu.memory_space<vmem>>, vector<1x128xf32>
    %4 = vector.broadcast %3 : vector<1x128xf32> to vector<64x128xf32>
    %5 = arith.addf %2, %4 : vector<64x128xf32>
    %6 = arith.truncf %5 : vector<64x128xf32> to vector<64x128xbf16>
    %c0_5 = arith.constant 0 : index
    %c0_6 = arith.constant 0 : index
    %7 = vector.load %arg4[%c0_5, %c0_6] : memref<128x384xbf16, #tpu.memory_space<vmem>>, vector<128x384xbf16>
    %cst_7 = arith.constant dense<0.000000e+00> : vector<64x384xf32>
    %8 = tpu.matmul %6, %7, %cst_7 {dimension_numbers = #tpu.dot_dimension_numbers<[1], [0], [0], [1], [0, 0, 1, 1], [], []>} : vector<64x128xbf16>, vector<128x384xbf16>, vector<64x384xf32> -> vector<64x384xf32>
    %c0_8 = arith.constant 0 : index
    %c0_9 = arith.constant 0 : index
    %9 = vector.load %arg6[%c0_8, %c0_9] : memref<1x384xf32, #tpu.memory_space<vmem>>, vector<1x384xf32>
    %10 = vector.broadcast %9 : vector<1x384xf32> to vector<64x384xf32>
    %11 = arith.addf %8, %10 : vector<64x384xf32>
    %12 = vector.shape_cast %11 : vector<64x384xf32> to vector<8x8x384xf32>
    %c0_10 = arith.constant 0 : index
    %c0_11 = arith.constant 0 : index
    %13 = vector.load %arg5[%c0_10, %c0_11] : memref<128x384xbf16, #tpu.memory_space<vmem>>, vector<128x384xbf16>
    %c0_12 = arith.constant 0 : index
    %c0_13 = arith.constant 0 : index
    %14 = vector.load %arg7[%c0_12, %c0_13] : memref<1x384xf32, #tpu.memory_space<vmem>>, vector<1x384xf32>
    %cst_14 = arith.constant 0.000000e+00 : f32
    %15 = vector.broadcast %cst_14 : f32 to vector<8x128xf32>
    %16 = vector.extract_strided_slice %12 {offsets = [0, 0, 0], sizes = [1, 8, 384], strides = [1, 1, 1]} : vector<8x8x384xf32> to vector<1x8x384xf32>
    %17 = vector.shape_cast %16 : vector<1x8x384xf32> to vector<8x384xf32>
    %18 = arith.truncf %15 : vector<8x128xf32> to vector<8x128xbf16>
    %cst_15 = arith.constant dense<0.000000e+00> : vector<8x384xf32>
    %19 = tpu.matmul %18, %13, %cst_15 {dimension_numbers = #tpu.dot_dimension_numbers<[1], [0], [0], [1], [0, 0, 1, 1], [], []>} : vector<8x128xbf16>, vector<128x384xbf16>, vector<8x384xf32> -> vector<8x384xf32>
    %20 = vector.broadcast %14 : vector<1x384xf32> to vector<8x384xf32>
    %21 = arith.addf %19, %20 : vector<8x384xf32>
    %22 = vector.extract_strided_slice %17 {offsets = [0, 0], sizes = [8, 128], strides = [1, 1]} : vector<8x384xf32> to vector<8x128xf32>
    %23 = vector.extract_strided_slice %21 {offsets = [0, 0], sizes = [8, 128], strides = [1, 1]} : vector<8x384xf32> to vector<8x128xf32>
    %24 = arith.addf %22, %23 : vector<8x128xf32>
    %25 = arith.negf %24 : vector<8x128xf32>
    %26 = math.exp %25 : vector<8x128xf32>
    %cst_16 = arith.constant 1.000000e+00 : f32
    %27 = vector.broadcast %cst_16 : f32 to vector<8x128xf32>
    %28 = arith.addf %27, %26 : vector<8x128xf32>
    %29 = arith.divf %27, %28 : vector<8x128xf32>
    %30 = vector.extract_strided_slice %17 {offsets = [0, 128], sizes = [8, 128], strides = [1, 1]} : vector<8x384xf32> to vector<8x128xf32>
    %31 = vector.extract_strided_slice %21 {offsets = [0, 128], sizes = [8, 128], strides = [1, 1]} : vector<8x384xf32> to vector<8x128xf32>
    %32 = arith.addf %30, %31 : vector<8x128xf32>
    %33 = arith.negf %32 : vector<8x128xf32>
    %34 = math.exp %33 : vector<8x128xf32>
    %cst_17 = arith.constant 1.000000e+00 : f32
    %35 = vector.broadcast %cst_17 : f32 to vector<8x128xf32>
    %36 = arith.addf %35, %34 : vector<8x128xf32>
    %37 = arith.divf %35, %36 : vector<8x128xf32>
    %38 = vector.extract_strided_slice %17 {offsets = [0, 256], sizes = [8, 128], strides = [1, 1]} : vector<8x384xf32> to vector<8x128xf32>
    %39 = vector.extract_strided_slice %21 {offsets = [0, 256], sizes = [8, 128], strides = [1, 1]} : vector<8x384xf32> to vector<8x128xf32>
    %40 = arith.mulf %29, %39 : vector<8x128xf32>
    %41 = arith.addf %38, %40 : vector<8x128xf32>
    %42 = math.tanh %41 : vector<8x128xf32>
    %cst_18 = arith.constant 1.000000e+00 : f32
    %43 = vector.broadcast %cst_18 : f32 to vector<8x128xf32>
    %44 = arith.subf %43, %37 : vector<8x128xf32>
    %45 = arith.mulf %44, %42 : vector<8x128xf32>
    %46 = arith.mulf %37, %15 : vector<8x128xf32>
    %47 = arith.addf %45, %46 : vector<8x128xf32>
    %48 = vector.extract_strided_slice %12 {offsets = [1, 0, 0], sizes = [1, 8, 384], strides = [1, 1, 1]} : vector<8x8x384xf32> to vector<1x8x384xf32>
    %49 = vector.shape_cast %48 : vector<1x8x384xf32> to vector<8x384xf32>
    %50 = arith.truncf %47 : vector<8x128xf32> to vector<8x128xbf16>
    %cst_19 = arith.constant dense<0.000000e+00> : vector<8x384xf32>
    %51 = tpu.matmul %50, %13, %cst_19 {dimension_numbers = #tpu.dot_dimension_numbers<[1], [0], [0], [1], [0, 0, 1, 1], [], []>} : vector<8x128xbf16>, vector<128x384xbf16>, vector<8x384xf32> -> vector<8x384xf32>
    %52 = vector.broadcast %14 : vector<1x384xf32> to vector<8x384xf32>
    %53 = arith.addf %51, %52 : vector<8x384xf32>
    %54 = vector.extract_strided_slice %49 {offsets = [0, 0], sizes = [8, 128], strides = [1, 1]} : vector<8x384xf32> to vector<8x128xf32>
    %55 = vector.extract_strided_slice %53 {offsets = [0, 0], sizes = [8, 128], strides = [1, 1]} : vector<8x384xf32> to vector<8x128xf32>
    %56 = arith.addf %54, %55 : vector<8x128xf32>
    %57 = arith.negf %56 : vector<8x128xf32>
    %58 = math.exp %57 : vector<8x128xf32>
    %cst_20 = arith.constant 1.000000e+00 : f32
    %59 = vector.broadcast %cst_20 : f32 to vector<8x128xf32>
    %60 = arith.addf %59, %58 : vector<8x128xf32>
    %61 = arith.divf %59, %60 : vector<8x128xf32>
    %62 = vector.extract_strided_slice %49 {offsets = [0, 128], sizes = [8, 128], strides = [1, 1]} : vector<8x384xf32> to vector<8x128xf32>
    %63 = vector.extract_strided_slice %53 {offsets = [0, 128], sizes = [8, 128], strides = [1, 1]} : vector<8x384xf32> to vector<8x128xf32>
    %64 = arith.addf %62, %63 : vector<8x128xf32>
    %65 = arith.negf %64 : vector<8x128xf32>
    %66 = math.exp %65 : vector<8x128xf32>
    %cst_21 = arith.constant 1.000000e+00 : f32
    %67 = vector.broadcast %cst_21 : f32 to vector<8x128xf32>
    %68 = arith.addf %67, %66 : vector<8x128xf32>
    %69 = arith.divf %67, %68 : vector<8x128xf32>
    %70 = vector.extract_strided_slice %49 {offsets = [0, 256], sizes = [8, 128], strides = [1, 1]} : vector<8x384xf32> to vector<8x128xf32>
    %71 = vector.extract_strided_slice %53 {offsets = [0, 256], sizes = [8, 128], strides = [1, 1]} : vector<8x384xf32> to vector<8x128xf32>
    %72 = arith.mulf %61, %71 : vector<8x128xf32>
    %73 = arith.addf %70, %72 : vector<8x128xf32>
    %74 = math.tanh %73 : vector<8x128xf32>
    %cst_22 = arith.constant 1.000000e+00 : f32
    %75 = vector.broadcast %cst_22 : f32 to vector<8x128xf32>
    %76 = arith.subf %75, %69 : vector<8x128xf32>
    %77 = arith.mulf %76, %74 : vector<8x128xf32>
    %78 = arith.mulf %69, %47 : vector<8x128xf32>
    %79 = arith.addf %77, %78 : vector<8x128xf32>
    %80 = vector.extract_strided_slice %12 {offsets = [2, 0, 0], sizes = [1, 8, 384], strides = [1, 1, 1]} : vector<8x8x384xf32> to vector<1x8x384xf32>
    %81 = vector.shape_cast %80 : vector<1x8x384xf32> to vector<8x384xf32>
    %82 = arith.truncf %79 : vector<8x128xf32> to vector<8x128xbf16>
    %cst_23 = arith.constant dense<0.000000e+00> : vector<8x384xf32>
    %83 = tpu.matmul %82, %13, %cst_23 {dimension_numbers = #tpu.dot_dimension_numbers<[1], [0], [0], [1], [0, 0, 1, 1], [], []>} : vector<8x128xbf16>, vector<128x384xbf16>, vector<8x384xf32> -> vector<8x384xf32>
    %84 = vector.broadcast %14 : vector<1x384xf32> to vector<8x384xf32>
    %85 = arith.addf %83, %84 : vector<8x384xf32>
    %86 = vector.extract_strided_slice %81 {offsets = [0, 0], sizes = [8, 128], strides = [1, 1]} : vector<8x384xf32> to vector<8x128xf32>
    %87 = vector.extract_strided_slice %85 {offsets = [0, 0], sizes = [8, 128], strides = [1, 1]} : vector<8x384xf32> to vector<8x128xf32>
    %88 = arith.addf %86, %87 : vector<8x128xf32>
    %89 = arith.negf %88 : vector<8x128xf32>
    %90 = math.exp %89 : vector<8x128xf32>
    %cst_24 = arith.constant 1.000000e+00 : f32
    %91 = vector.broadcast %cst_24 : f32 to vector<8x128xf32>
    %92 = arith.addf %91, %90 : vector<8x128xf32>
    %93 = arith.divf %91, %92 : vector<8x128xf32>
    %94 = vector.extract_strided_slice %81 {offsets = [0, 128], sizes = [8, 128], strides = [1, 1]} : vector<8x384xf32> to vector<8x128xf32>
    %95 = vector.extract_strided_slice %85 {offsets = [0, 128], sizes = [8, 128], strides = [1, 1]} : vector<8x384xf32> to vector<8x128xf32>
    %96 = arith.addf %94, %95 : vector<8x128xf32>
    %97 = arith.negf %96 : vector<8x128xf32>
    %98 = math.exp %97 : vector<8x128xf32>
    %cst_25 = arith.constant 1.000000e+00 : f32
    %99 = vector.broadcast %cst_25 : f32 to vector<8x128xf32>
    %100 = arith.addf %99, %98 : vector<8x128xf32>
    %101 = arith.divf %99, %100 : vector<8x128xf32>
    %102 = vector.extract_strided_slice %81 {offsets = [0, 256], sizes = [8, 128], strides = [1, 1]} : vector<8x384xf32> to vector<8x128xf32>
    %103 = vector.extract_strided_slice %85 {offsets = [0, 256], sizes = [8, 128], strides = [1, 1]} : vector<8x384xf32> to vector<8x128xf32>
    %104 = arith.mulf %93, %103 : vector<8x128xf32>
    %105 = arith.addf %102, %104 : vector<8x128xf32>
    %106 = math.tanh %105 : vector<8x128xf32>
    %cst_26 = arith.constant 1.000000e+00 : f32
    %107 = vector.broadcast %cst_26 : f32 to vector<8x128xf32>
    %108 = arith.subf %107, %101 : vector<8x128xf32>
    %109 = arith.mulf %108, %106 : vector<8x128xf32>
    %110 = arith.mulf %101, %79 : vector<8x128xf32>
    %111 = arith.addf %109, %110 : vector<8x128xf32>
    %112 = vector.extract_strided_slice %12 {offsets = [3, 0, 0], sizes = [1, 8, 384], strides = [1, 1, 1]} : vector<8x8x384xf32> to vector<1x8x384xf32>
    %113 = vector.shape_cast %112 : vector<1x8x384xf32> to vector<8x384xf32>
    %114 = arith.truncf %111 : vector<8x128xf32> to vector<8x128xbf16>
    %cst_27 = arith.constant dense<0.000000e+00> : vector<8x384xf32>
    %115 = tpu.matmul %114, %13, %cst_27 {dimension_numbers = #tpu.dot_dimension_numbers<[1], [0], [0], [1], [0, 0, 1, 1], [], []>} : vector<8x128xbf16>, vector<128x384xbf16>, vector<8x384xf32> -> vector<8x384xf32>
    %116 = vector.broadcast %14 : vector<1x384xf32> to vector<8x384xf32>
    %117 = arith.addf %115, %116 : vector<8x384xf32>
    %118 = vector.extract_strided_slice %113 {offsets = [0, 0], sizes = [8, 128], strides = [1, 1]} : vector<8x384xf32> to vector<8x128xf32>
    %119 = vector.extract_strided_slice %117 {offsets = [0, 0], sizes = [8, 128], strides = [1, 1]} : vector<8x384xf32> to vector<8x128xf32>
    %120 = arith.addf %118, %119 : vector<8x128xf32>
    %121 = arith.negf %120 : vector<8x128xf32>
    %122 = math.exp %121 : vector<8x128xf32>
    %cst_28 = arith.constant 1.000000e+00 : f32
    %123 = vector.broadcast %cst_28 : f32 to vector<8x128xf32>
    %124 = arith.addf %123, %122 : vector<8x128xf32>
    %125 = arith.divf %123, %124 : vector<8x128xf32>
    %126 = vector.extract_strided_slice %113 {offsets = [0, 128], sizes = [8, 128], strides = [1, 1]} : vector<8x384xf32> to vector<8x128xf32>
    %127 = vector.extract_strided_slice %117 {offsets = [0, 128], sizes = [8, 128], strides = [1, 1]} : vector<8x384xf32> to vector<8x128xf32>
    %128 = arith.addf %126, %127 : vector<8x128xf32>
    %129 = arith.negf %128 : vector<8x128xf32>
    %130 = math.exp %129 : vector<8x128xf32>
    %cst_29 = arith.constant 1.000000e+00 : f32
    %131 = vector.broadcast %cst_29 : f32 to vector<8x128xf32>
    %132 = arith.addf %131, %130 : vector<8x128xf32>
    %133 = arith.divf %131, %132 : vector<8x128xf32>
    %134 = vector.extract_strided_slice %113 {offsets = [0, 256], sizes = [8, 128], strides = [1, 1]} : vector<8x384xf32> to vector<8x128xf32>
    %135 = vector.extract_strided_slice %117 {offsets = [0, 256], sizes = [8, 128], strides = [1, 1]} : vector<8x384xf32> to vector<8x128xf32>
    %136 = arith.mulf %125, %135 : vector<8x128xf32>
    %137 = arith.addf %134, %136 : vector<8x128xf32>
    %138 = math.tanh %137 : vector<8x128xf32>
    %cst_30 = arith.constant 1.000000e+00 : f32
    %139 = vector.broadcast %cst_30 : f32 to vector<8x128xf32>
    %140 = arith.subf %139, %133 : vector<8x128xf32>
    %141 = arith.mulf %140, %138 : vector<8x128xf32>
    %142 = arith.mulf %133, %111 : vector<8x128xf32>
    %143 = arith.addf %141, %142 : vector<8x128xf32>
    %144 = vector.extract_strided_slice %12 {offsets = [4, 0, 0], sizes = [1, 8, 384], strides = [1, 1, 1]} : vector<8x8x384xf32> to vector<1x8x384xf32>
    %145 = vector.shape_cast %144 : vector<1x8x384xf32> to vector<8x384xf32>
    %146 = arith.truncf %143 : vector<8x128xf32> to vector<8x128xbf16>
    %cst_31 = arith.constant dense<0.000000e+00> : vector<8x384xf32>
    %147 = tpu.matmul %146, %13, %cst_31 {dimension_numbers = #tpu.dot_dimension_numbers<[1], [0], [0], [1], [0, 0, 1, 1], [], []>} : vector<8x128xbf16>, vector<128x384xbf16>, vector<8x384xf32> -> vector<8x384xf32>
    %148 = vector.broadcast %14 : vector<1x384xf32> to vector<8x384xf32>
    %149 = arith.addf %147, %148 : vector<8x384xf32>
    %150 = vector.extract_strided_slice %145 {offsets = [0, 0], sizes = [8, 128], strides = [1, 1]} : vector<8x384xf32> to vector<8x128xf32>
    %151 = vector.extract_strided_slice %149 {offsets = [0, 0], sizes = [8, 128], strides = [1, 1]} : vector<8x384xf32> to vector<8x128xf32>
    %152 = arith.addf %150, %151 : vector<8x128xf32>
    %153 = arith.negf %152 : vector<8x128xf32>
    %154 = math.exp %153 : vector<8x128xf32>
    %cst_32 = arith.constant 1.000000e+00 : f32
    %155 = vector.broadcast %cst_32 : f32 to vector<8x128xf32>
    %156 = arith.addf %155, %154 : vector<8x128xf32>
    %157 = arith.divf %155, %156 : vector<8x128xf32>
    %158 = vector.extract_strided_slice %145 {offsets = [0, 128], sizes = [8, 128], strides = [1, 1]} : vector<8x384xf32> to vector<8x128xf32>
    %159 = vector.extract_strided_slice %149 {offsets = [0, 128], sizes = [8, 128], strides = [1, 1]} : vector<8x384xf32> to vector<8x128xf32>
    %160 = arith.addf %158, %159 : vector<8x128xf32>
    %161 = arith.negf %160 : vector<8x128xf32>
    %162 = math.exp %161 : vector<8x128xf32>
    %cst_33 = arith.constant 1.000000e+00 : f32
    %163 = vector.broadcast %cst_33 : f32 to vector<8x128xf32>
    %164 = arith.addf %163, %162 : vector<8x128xf32>
    %165 = arith.divf %163, %164 : vector<8x128xf32>
    %166 = vector.extract_strided_slice %145 {offsets = [0, 256], sizes = [8, 128], strides = [1, 1]} : vector<8x384xf32> to vector<8x128xf32>
    %167 = vector.extract_strided_slice %149 {offsets = [0, 256], sizes = [8, 128], strides = [1, 1]} : vector<8x384xf32> to vector<8x128xf32>
    %168 = arith.mulf %157, %167 : vector<8x128xf32>
    %169 = arith.addf %166, %168 : vector<8x128xf32>
    %170 = math.tanh %169 : vector<8x128xf32>
    %cst_34 = arith.constant 1.000000e+00 : f32
    %171 = vector.broadcast %cst_34 : f32 to vector<8x128xf32>
    %172 = arith.subf %171, %165 : vector<8x128xf32>
    %173 = arith.mulf %172, %170 : vector<8x128xf32>
    %174 = arith.mulf %165, %143 : vector<8x128xf32>
    %175 = arith.addf %173, %174 : vector<8x128xf32>
    %176 = vector.extract_strided_slice %12 {offsets = [5, 0, 0], sizes = [1, 8, 384], strides = [1, 1, 1]} : vector<8x8x384xf32> to vector<1x8x384xf32>
    %177 = vector.shape_cast %176 : vector<1x8x384xf32> to vector<8x384xf32>
    %178 = arith.truncf %175 : vector<8x128xf32> to vector<8x128xbf16>
    %cst_35 = arith.constant dense<0.000000e+00> : vector<8x384xf32>
    %179 = tpu.matmul %178, %13, %cst_35 {dimension_numbers = #tpu.dot_dimension_numbers<[1], [0], [0], [1], [0, 0, 1, 1], [], []>} : vector<8x128xbf16>, vector<128x384xbf16>, vector<8x384xf32> -> vector<8x384xf32>
    %180 = vector.broadcast %14 : vector<1x384xf32> to vector<8x384xf32>
    %181 = arith.addf %179, %180 : vector<8x384xf32>
    %182 = vector.extract_strided_slice %177 {offsets = [0, 0], sizes = [8, 128], strides = [1, 1]} : vector<8x384xf32> to vector<8x128xf32>
    %183 = vector.extract_strided_slice %181 {offsets = [0, 0], sizes = [8, 128], strides = [1, 1]} : vector<8x384xf32> to vector<8x128xf32>
    %184 = arith.addf %182, %183 : vector<8x128xf32>
    %185 = arith.negf %184 : vector<8x128xf32>
    %186 = math.exp %185 : vector<8x128xf32>
    %cst_36 = arith.constant 1.000000e+00 : f32
    %187 = vector.broadcast %cst_36 : f32 to vector<8x128xf32>
    %188 = arith.addf %187, %186 : vector<8x128xf32>
    %189 = arith.divf %187, %188 : vector<8x128xf32>
    %190 = vector.extract_strided_slice %177 {offsets = [0, 128], sizes = [8, 128], strides = [1, 1]} : vector<8x384xf32> to vector<8x128xf32>
    %191 = vector.extract_strided_slice %181 {offsets = [0, 128], sizes = [8, 128], strides = [1, 1]} : vector<8x384xf32> to vector<8x128xf32>
    %192 = arith.addf %190, %191 : vector<8x128xf32>
    %193 = arith.negf %192 : vector<8x128xf32>
    %194 = math.exp %193 : vector<8x128xf32>
    %cst_37 = arith.constant 1.000000e+00 : f32
    %195 = vector.broadcast %cst_37 : f32 to vector<8x128xf32>
    %196 = arith.addf %195, %194 : vector<8x128xf32>
    %197 = arith.divf %195, %196 : vector<8x128xf32>
    %198 = vector.extract_strided_slice %177 {offsets = [0, 256], sizes = [8, 128], strides = [1, 1]} : vector<8x384xf32> to vector<8x128xf32>
    %199 = vector.extract_strided_slice %181 {offsets = [0, 256], sizes = [8, 128], strides = [1, 1]} : vector<8x384xf32> to vector<8x128xf32>
    %200 = arith.mulf %189, %199 : vector<8x128xf32>
    %201 = arith.addf %198, %200 : vector<8x128xf32>
    %202 = math.tanh %201 : vector<8x128xf32>
    %cst_38 = arith.constant 1.000000e+00 : f32
    %203 = vector.broadcast %cst_38 : f32 to vector<8x128xf32>
    %204 = arith.subf %203, %197 : vector<8x128xf32>
    %205 = arith.mulf %204, %202 : vector<8x128xf32>
    %206 = arith.mulf %197, %175 : vector<8x128xf32>
    %207 = arith.addf %205, %206 : vector<8x128xf32>
    %208 = vector.extract_strided_slice %12 {offsets = [6, 0, 0], sizes = [1, 8, 384], strides = [1, 1, 1]} : vector<8x8x384xf32> to vector<1x8x384xf32>
    %209 = vector.shape_cast %208 : vector<1x8x384xf32> to vector<8x384xf32>
    %210 = arith.truncf %207 : vector<8x128xf32> to vector<8x128xbf16>
    %cst_39 = arith.constant dense<0.000000e+00> : vector<8x384xf32>
    %211 = tpu.matmul %210, %13, %cst_39 {dimension_numbers = #tpu.dot_dimension_numbers<[1], [0], [0], [1], [0, 0, 1, 1], [], []>} : vector<8x128xbf16>, vector<128x384xbf16>, vector<8x384xf32> -> vector<8x384xf32>
    %212 = vector.broadcast %14 : vector<1x384xf32> to vector<8x384xf32>
    %213 = arith.addf %211, %212 : vector<8x384xf32>
    %214 = vector.extract_strided_slice %209 {offsets = [0, 0], sizes = [8, 128], strides = [1, 1]} : vector<8x384xf32> to vector<8x128xf32>
    %215 = vector.extract_strided_slice %213 {offsets = [0, 0], sizes = [8, 128], strides = [1, 1]} : vector<8x384xf32> to vector<8x128xf32>
    %216 = arith.addf %214, %215 : vector<8x128xf32>
    %217 = arith.negf %216 : vector<8x128xf32>
    %218 = math.exp %217 : vector<8x128xf32>
    %cst_40 = arith.constant 1.000000e+00 : f32
    %219 = vector.broadcast %cst_40 : f32 to vector<8x128xf32>
    %220 = arith.addf %219, %218 : vector<8x128xf32>
    %221 = arith.divf %219, %220 : vector<8x128xf32>
    %222 = vector.extract_strided_slice %209 {offsets = [0, 128], sizes = [8, 128], strides = [1, 1]} : vector<8x384xf32> to vector<8x128xf32>
    %223 = vector.extract_strided_slice %213 {offsets = [0, 128], sizes = [8, 128], strides = [1, 1]} : vector<8x384xf32> to vector<8x128xf32>
    %224 = arith.addf %222, %223 : vector<8x128xf32>
    %225 = arith.negf %224 : vector<8x128xf32>
    %226 = math.exp %225 : vector<8x128xf32>
    %cst_41 = arith.constant 1.000000e+00 : f32
    %227 = vector.broadcast %cst_41 : f32 to vector<8x128xf32>
    %228 = arith.addf %227, %226 : vector<8x128xf32>
    %229 = arith.divf %227, %228 : vector<8x128xf32>
    %230 = vector.extract_strided_slice %209 {offsets = [0, 256], sizes = [8, 128], strides = [1, 1]} : vector<8x384xf32> to vector<8x128xf32>
    %231 = vector.extract_strided_slice %213 {offsets = [0, 256], sizes = [8, 128], strides = [1, 1]} : vector<8x384xf32> to vector<8x128xf32>
    %232 = arith.mulf %221, %231 : vector<8x128xf32>
    %233 = arith.addf %230, %232 : vector<8x128xf32>
    %234 = math.tanh %233 : vector<8x128xf32>
    %cst_42 = arith.constant 1.000000e+00 : f32
    %235 = vector.broadcast %cst_42 : f32 to vector<8x128xf32>
    %236 = arith.subf %235, %229 : vector<8x128xf32>
    %237 = arith.mulf %236, %234 : vector<8x128xf32>
    %238 = arith.mulf %229, %207 : vector<8x128xf32>
    %239 = arith.addf %237, %238 : vector<8x128xf32>
    %240 = vector.extract_strided_slice %12 {offsets = [7, 0, 0], sizes = [1, 8, 384], strides = [1, 1, 1]} : vector<8x8x384xf32> to vector<1x8x384xf32>
    %241 = vector.shape_cast %240 : vector<1x8x384xf32> to vector<8x384xf32>
    %242 = arith.truncf %239 : vector<8x128xf32> to vector<8x128xbf16>
    %cst_43 = arith.constant dense<0.000000e+00> : vector<8x384xf32>
    %243 = tpu.matmul %242, %13, %cst_43 {dimension_numbers = #tpu.dot_dimension_numbers<[1], [0], [0], [1], [0, 0, 1, 1], [], []>} : vector<8x128xbf16>, vector<128x384xbf16>, vector<8x384xf32> -> vector<8x384xf32>
    %244 = vector.broadcast %14 : vector<1x384xf32> to vector<8x384xf32>
    %245 = arith.addf %243, %244 : vector<8x384xf32>
    %246 = vector.extract_strided_slice %241 {offsets = [0, 0], sizes = [8, 128], strides = [1, 1]} : vector<8x384xf32> to vector<8x128xf32>
    %247 = vector.extract_strided_slice %245 {offsets = [0, 0], sizes = [8, 128], strides = [1, 1]} : vector<8x384xf32> to vector<8x128xf32>
    %248 = arith.addf %246, %247 : vector<8x128xf32>
    %249 = arith.negf %248 : vector<8x128xf32>
    %250 = math.exp %249 : vector<8x128xf32>
    %cst_44 = arith.constant 1.000000e+00 : f32
    %251 = vector.broadcast %cst_44 : f32 to vector<8x128xf32>
    %252 = arith.addf %251, %250 : vector<8x128xf32>
    %253 = arith.divf %251, %252 : vector<8x128xf32>
    %254 = vector.extract_strided_slice %241 {offsets = [0, 128], sizes = [8, 128], strides = [1, 1]} : vector<8x384xf32> to vector<8x128xf32>
    %255 = vector.extract_strided_slice %245 {offsets = [0, 128], sizes = [8, 128], strides = [1, 1]} : vector<8x384xf32> to vector<8x128xf32>
    %256 = arith.addf %254, %255 : vector<8x128xf32>
    %257 = arith.negf %256 : vector<8x128xf32>
    %258 = math.exp %257 : vector<8x128xf32>
    %cst_45 = arith.constant 1.000000e+00 : f32
    %259 = vector.broadcast %cst_45 : f32 to vector<8x128xf32>
    %260 = arith.addf %259, %258 : vector<8x128xf32>
    %261 = arith.divf %259, %260 : vector<8x128xf32>
    %262 = vector.extract_strided_slice %241 {offsets = [0, 256], sizes = [8, 128], strides = [1, 1]} : vector<8x384xf32> to vector<8x128xf32>
    %263 = vector.extract_strided_slice %245 {offsets = [0, 256], sizes = [8, 128], strides = [1, 1]} : vector<8x384xf32> to vector<8x128xf32>
    %264 = arith.mulf %253, %263 : vector<8x128xf32>
    %265 = arith.addf %262, %264 : vector<8x128xf32>
    %266 = math.tanh %265 : vector<8x128xf32>
    %cst_46 = arith.constant 1.000000e+00 : f32
    %267 = vector.broadcast %cst_46 : f32 to vector<8x128xf32>
    %268 = arith.subf %267, %261 : vector<8x128xf32>
    %269 = arith.mulf %268, %266 : vector<8x128xf32>
    %270 = arith.mulf %261, %239 : vector<8x128xf32>
    %271 = arith.addf %269, %270 : vector<8x128xf32>
    %272 = vector.shape_cast %47 : vector<8x128xf32> to vector<1x8x128xf32>
    %273 = vector.shape_cast %79 : vector<8x128xf32> to vector<1x8x128xf32>
    %274 = vector.shape_cast %111 : vector<8x128xf32> to vector<1x8x128xf32>
    %275 = vector.shape_cast %143 : vector<8x128xf32> to vector<1x8x128xf32>
    %276 = vector.shape_cast %175 : vector<8x128xf32> to vector<1x8x128xf32>
    %277 = vector.shape_cast %207 : vector<8x128xf32> to vector<1x8x128xf32>
    %278 = vector.shape_cast %239 : vector<8x128xf32> to vector<1x8x128xf32>
    %279 = vector.shape_cast %271 : vector<8x128xf32> to vector<1x8x128xf32>
    %280 = tpu.concatenate %272, %273, %274, %275, %276, %277, %278, %279 in 0 : vector<1x8x128xf32>, vector<1x8x128xf32>, vector<1x8x128xf32>, vector<1x8x128xf32>, vector<1x8x128xf32>, vector<1x8x128xf32>, vector<1x8x128xf32>, vector<1x8x128xf32> -> vector<8x8x128xf32>
    %281 = vector.shape_cast %280 : vector<8x8x128xf32> to vector<64x128xf32>
    %282 = arith.truncf %281 : vector<64x128xf32> to vector<64x128xbf16>
    %c0_47 = arith.constant 0 : index
    %c0_48 = arith.constant 0 : index
    %283 = vector.load %arg8[%c0_47, %c0_48] : memref<128x128xbf16, #tpu.memory_space<vmem>>, vector<128x128xbf16>
    %cst_49 = arith.constant dense<0.000000e+00> : vector<64x128xf32>
    %284 = tpu.matmul %282, %283, %cst_49 {dimension_numbers = #tpu.dot_dimension_numbers<[1], [0], [0], [1], [0, 0, 1, 1], [], []>} : vector<64x128xbf16>, vector<128x128xbf16>, vector<64x128xf32> -> vector<64x128xf32>
    %c0_50 = arith.constant 0 : index
    %c0_51 = arith.constant 0 : index
    %285 = vector.load %arg9[%c0_50, %c0_51] : memref<1x128xf32, #tpu.memory_space<vmem>>, vector<1x128xf32>
    %286 = vector.broadcast %285 : vector<1x128xf32> to vector<64x128xf32>
    %287 = arith.addf %284, %286 : vector<64x128xf32>
    %288 = vector.shape_cast %287 : vector<64x128xf32> to vector<8x8x128xf32>
    %c0_52 = arith.constant 0 : index
    %c0_53 = arith.constant 0 : index
    %289 = vector.load %arg12[%c0_52, %c0_53] : memref<128x128xbf16, #tpu.memory_space<vmem>>, vector<128x128xbf16>
    %c0_54 = arith.constant 0 : index
    %c0_55 = arith.constant 0 : index
    %290 = vector.load %arg10[%c0_54, %c0_55] : memref<128x128xbf16, #tpu.memory_space<vmem>>, vector<128x128xbf16>
    %c0_56 = arith.constant 0 : index
    %c0_57 = arith.constant 0 : index
    %291 = vector.load %arg11[%c0_56, %c0_57] : memref<128x1xbf16, #tpu.memory_space<vmem>>, vector<128x1xbf16>
    %c0_58 = arith.constant 0 : index
    %c0_59 = arith.constant 0 : index
    %292 = vector.load %arg13[%c0_58, %c0_59] : memref<256x384xbf16, #tpu.memory_space<vmem>>, vector<256x384xbf16>
    %c0_60 = arith.constant 0 : index
    %c0_61 = arith.constant 0 : index
    %293 = vector.load %arg14[%c0_60, %c0_61] : memref<128x384xbf16, #tpu.memory_space<vmem>>, vector<128x384xbf16>
    %c0_62 = arith.constant 0 : index
    %c0_63 = arith.constant 0 : index
    %294 = vector.load %arg15[%c0_62, %c0_63] : memref<1x384xf32, #tpu.memory_space<vmem>>, vector<1x384xf32>
    %c0_64 = arith.constant 0 : index
    %c0_65 = arith.constant 0 : index
    %295 = vector.load %arg16[%c0_64, %c0_65] : memref<1x384xf32, #tpu.memory_space<vmem>>, vector<1x384xf32>
    %c0_66 = arith.constant 0 : index
    %c0_67 = arith.constant 0 : index
    %296 = vector.load %arg17[%c0_66, %c0_67] : memref<128x128xbf16, #tpu.memory_space<vmem>>, vector<128x128xbf16>
    %c0_68 = arith.constant 0 : index
    %c0_69 = arith.constant 0 : index
    %297 = vector.load %arg18[%c0_68, %c0_69] : memref<1x128xf32, #tpu.memory_space<vmem>>, vector<1x128xf32>
    %298 = tpu.iota {dimensions = array<i32: 1>} : vector<8x128xi32>
    %c0_70 = arith.constant 0 : index
    %c0_71 = arith.constant 0 : index
    %c0_72 = arith.constant 0 : index
    %299 = vector.load %arg1[%c0_70, %c0_71, %c0_72] : memref<5x8x1xi32, #tpu.memory_space<vmem>>, vector<1x8x1xi32>
    %300 = vector.shape_cast %299 : vector<1x8x1xi32> to vector<8x1xi32>
    %301 = vector.broadcast %300 : vector<8x1xi32> to vector<8x128xi32>
    %302 = arith.cmpi eq, %298, %301 : vector<8x128xi32>
    %303 = arith.extui %302 : vector<8x128xi1> to vector<8x128xi32>
    %304 = arith.sitofp %303 : vector<8x128xi32> to vector<8x128xf32>
    %305 = arith.truncf %304 : vector<8x128xf32> to vector<8x128xbf16>
    %cst_73 = arith.constant dense<0.000000e+00> : vector<8x128xf32>
    %306 = tpu.matmul %305, %289, %cst_73 {dimension_numbers = #tpu.dot_dimension_numbers<[1], [0], [0], [1], [0, 0, 1, 1], [], []>} : vector<8x128xbf16>, vector<128x128xbf16>, vector<8x128xf32> -> vector<8x128xf32>
    %307 = arith.truncf %271 : vector<8x128xf32> to vector<8x128xbf16>
    %cst_74 = arith.constant dense<0.000000e+00> : vector<8x128xf32>
    %308 = tpu.matmul %307, %290, %cst_74 {dimension_numbers = #tpu.dot_dimension_numbers<[1], [0], [0], [1], [0, 0, 1, 1], [], []>} : vector<8x128xbf16>, vector<128x128xbf16>, vector<8x128xf32> -> vector<8x128xf32>
    %309 = vector.shape_cast %308 : vector<8x128xf32> to vector<1x8x128xf32>
    %310 = vector.broadcast %309 : vector<1x8x128xf32> to vector<8x8x128xf32>
    %311 = arith.addf %288, %310 : vector<8x8x128xf32>
    %312 = math.tanh %311 : vector<8x8x128xf32>
    %313 = vector.shape_cast %312 : vector<8x8x128xf32> to vector<64x128xf32>
    %314 = arith.truncf %313 : vector<64x128xf32> to vector<64x128xbf16>
    %cst_75 = arith.constant dense<0.000000e+00> : vector<64x1xf32>
    %315 = tpu.matmul %314, %291, %cst_75 {dimension_numbers = #tpu.dot_dimension_numbers<[1], [0], [0], [1], [0, 0, 1, 1], [], []>} : vector<64x128xbf16>, vector<128x1xbf16>, vector<64x1xf32> -> vector<64x1xf32>
    %316 = vector.shape_cast %315 : vector<64x1xf32> to vector<8x8x1xf32>
    %cst_76 = arith.constant dense<0xFF800000> : vector<8x1xf32>
    %317 = vector.multi_reduction <maximumf>, %316, %cst_76 [0] : vector<8x8x1xf32> to vector<8x1xf32>
    %318 = vector.shape_cast %317 : vector<8x1xf32> to vector<1x8x1xf32>
    %319 = vector.broadcast %318 : vector<1x8x1xf32> to vector<8x8x1xf32>
    %320 = arith.subf %316, %319 : vector<8x8x1xf32>
    %321 = math.exp %320 : vector<8x8x1xf32>
    %cst_77 = arith.constant dense<0.000000e+00> : vector<8x1xf32>
    %322 = vector.multi_reduction <add>, %321, %cst_77 [0] : vector<8x8x1xf32> to vector<8x1xf32>
    %323 = vector.shape_cast %322 : vector<8x1xf32> to vector<1x8x1xf32>
    %324 = tpu.reciprocal %323 {approx = true} : vector<1x8x1xf32> -> vector<1x8x1xf32>
    %325 = vector.broadcast %324 : vector<1x8x1xf32> to vector<8x8x1xf32>
    %326 = arith.mulf %321, %325 : vector<8x8x1xf32>
    %327 = vector.broadcast %326 : vector<8x8x1xf32> to vector<8x8x128xf32>
    %328 = arith.mulf %327, %280 : vector<8x8x128xf32>
    %cst_78 = arith.constant dense<0.000000e+00> : vector<8x128xf32>
    %329 = vector.multi_reduction <add>, %328, %cst_78 [0] : vector<8x8x128xf32> to vector<8x128xf32>
    %330 = tpu.concatenate %329, %306 in 1 : vector<8x128xf32>, vector<8x128xf32> -> vector<8x256xf32>
    %331 = arith.truncf %330 : vector<8x256xf32> to vector<8x256xbf16>
    %cst_79 = arith.constant dense<0.000000e+00> : vector<8x384xf32>
    %332 = tpu.matmul %331, %292, %cst_79 {dimension_numbers = #tpu.dot_dimension_numbers<[1], [0], [0], [1], [0, 0, 1, 1], [], []>} : vector<8x256xbf16>, vector<256x384xbf16>, vector<8x384xf32> -> vector<8x384xf32>
    %333 = vector.broadcast %294 : vector<1x384xf32> to vector<8x384xf32>
    %334 = arith.addf %332, %333 : vector<8x384xf32>
    %335 = arith.truncf %271 : vector<8x128xf32> to vector<8x128xbf16>
    %cst_80 = arith.constant dense<0.000000e+00> : vector<8x384xf32>
    %336 = tpu.matmul %335, %293, %cst_80 {dimension_numbers = #tpu.dot_dimension_numbers<[1], [0], [0], [1], [0, 0, 1, 1], [], []>} : vector<8x128xbf16>, vector<128x384xbf16>, vector<8x384xf32> -> vector<8x384xf32>
    %337 = vector.broadcast %295 : vector<1x384xf32> to vector<8x384xf32>
    %338 = arith.addf %336, %337 : vector<8x384xf32>
    %339 = vector.extract_strided_slice %334 {offsets = [0, 0], sizes = [8, 128], strides = [1, 1]} : vector<8x384xf32> to vector<8x128xf32>
    %340 = vector.extract_strided_slice %338 {offsets = [0, 0], sizes = [8, 128], strides = [1, 1]} : vector<8x384xf32> to vector<8x128xf32>
    %341 = arith.addf %339, %340 : vector<8x128xf32>
    %342 = arith.negf %341 : vector<8x128xf32>
    %343 = math.exp %342 : vector<8x128xf32>
    %cst_81 = arith.constant 1.000000e+00 : f32
    %344 = vector.broadcast %cst_81 : f32 to vector<8x128xf32>
    %345 = arith.addf %344, %343 : vector<8x128xf32>
    %346 = arith.divf %344, %345 : vector<8x128xf32>
    %347 = vector.extract_strided_slice %334 {offsets = [0, 128], sizes = [8, 128], strides = [1, 1]} : vector<8x384xf32> to vector<8x128xf32>
    %348 = vector.extract_strided_slice %338 {offsets = [0, 128], sizes = [8, 128], strides = [1, 1]} : vector<8x384xf32> to vector<8x128xf32>
    %349 = arith.addf %347, %348 : vector<8x128xf32>
    %350 = arith.negf %349 : vector<8x128xf32>
    %351 = math.exp %350 : vector<8x128xf32>
    %cst_82 = arith.constant 1.000000e+00 : f32
    %352 = vector.broadcast %cst_82 : f32 to vector<8x128xf32>
    %353 = arith.addf %352, %351 : vector<8x128xf32>
    %354 = arith.divf %352, %353 : vector<8x128xf32>
    %355 = vector.extract_strided_slice %334 {offsets = [0, 256], sizes = [8, 128], strides = [1, 1]} : vector<8x384xf32> to vector<8x128xf32>
    %356 = vector.extract_strided_slice %338 {offsets = [0, 256], sizes = [8, 128], strides = [1, 1]} : vector<8x384xf32> to vector<8x128xf32>
    %357 = arith.mulf %346, %356 : vector<8x128xf32>
    %358 = arith.addf %355, %357 : vector<8x128xf32>
    %359 = math.tanh %358 : vector<8x128xf32>
    %cst_83 = arith.constant 1.000000e+00 : f32
    %360 = vector.broadcast %cst_83 : f32 to vector<8x128xf32>
    %361 = arith.subf %360, %354 : vector<8x128xf32>
    %362 = arith.mulf %361, %359 : vector<8x128xf32>
    %363 = arith.mulf %354, %271 : vector<8x128xf32>
    %364 = arith.addf %362, %363 : vector<8x128xf32>
    %365 = arith.truncf %364 : vector<8x128xf32> to vector<8x128xbf16>
    %cst_84 = arith.constant dense<0.000000e+00> : vector<8x128xf32>
    %366 = tpu.matmul %365, %296, %cst_84 {dimension_numbers = #tpu.dot_dimension_numbers<[1], [0], [0], [1], [0, 0, 1, 1], [], []>} : vector<8x128xbf16>, vector<128x128xbf16>, vector<8x128xf32> -> vector<8x128xf32>
    %367 = vector.broadcast %297 : vector<1x128xf32> to vector<8x128xf32>
    %368 = arith.addf %366, %367 : vector<8x128xf32>
    %cst_85 = arith.constant dense<0xFF800000> : vector<8xf32>
    %369 = vector.multi_reduction <maximumf>, %368, %cst_85 [1] : vector<8x128xf32> to vector<8xf32>
    %370 = vector.shape_cast %369 : vector<8xf32> to vector<8x1xf32>
    %371 = vector.broadcast %370 : vector<8x1xf32> to vector<8x128xf32>
    %372 = arith.subf %368, %371 : vector<8x128xf32>
    %373 = math.exp %372 : vector<8x128xf32>
    %cst_86 = arith.constant dense<0.000000e+00> : vector<8xf32>
    %374 = vector.multi_reduction <add>, %373, %cst_86 [1] : vector<8x128xf32> to vector<8xf32>
    %375 = vector.shape_cast %374 : vector<8xf32> to vector<8x1xf32>
    %376 = math.log %375 : vector<8x1xf32>
    %377 = arith.addf %376, %370 : vector<8x1xf32>
    %378 = vector.broadcast %377 : vector<8x1xf32> to vector<8x128xf32>
    %379 = arith.subf %368, %378 : vector<8x128xf32>
    %cst_87 = arith.constant dense<0xFF800000> : vector<8xf32>
    %380 = vector.multi_reduction <maximumf>, %379, %cst_87 [1] : vector<8x128xf32> to vector<8xf32>
    %381 = vector.shape_cast %380 : vector<8xf32> to vector<8x1xf32>
    %382 = vector.broadcast %381 : vector<8x1xf32> to vector<8x128xf32>
    %383 = arith.cmpf oeq, %379, %382 : vector<8x128xf32>
    %c128_i32 = arith.constant 128 : i32
    %384 = vector.broadcast %c128_i32 : i32 to vector<8x128xi32>
    %385 = arith.select %383, %298, %384 : vector<8x128xi1>, vector<8x128xi32>
    %cst_88 = arith.constant dense<2147483647> : vector<8xi32>
    %386 = vector.multi_reduction <minsi>, %385, %cst_88 [1] : vector<8x128xi32> to vector<8xi32>
    %387 = vector.shape_cast %386 : vector<8xi32> to vector<8x1xi32>
    %388 = vector.broadcast %387 : vector<8x1xi32> to vector<8x128xi32>
    %389 = arith.cmpi eq, %298, %388 : vector<8x128xi32>
    %390 = arith.extui %389 : vector<8x128xi1> to vector<8x128xi32>
    %391 = arith.sitofp %390 : vector<8x128xi32> to vector<8x128xf32>
    %392 = arith.truncf %391 : vector<8x128xf32> to vector<8x128xbf16>
    %cst_89 = arith.constant dense<0.000000e+00> : vector<8x128xf32>
    %393 = tpu.matmul %392, %289, %cst_89 {dimension_numbers = #tpu.dot_dimension_numbers<[1], [0], [0], [1], [0, 0, 1, 1], [], []>} : vector<8x128xbf16>, vector<128x128xbf16>, vector<8x128xf32> -> vector<8x128xf32>
    %394 = arith.truncf %364 : vector<8x128xf32> to vector<8x128xbf16>
    %cst_90 = arith.constant dense<0.000000e+00> : vector<8x128xf32>
    %395 = tpu.matmul %394, %290, %cst_90 {dimension_numbers = #tpu.dot_dimension_numbers<[1], [0], [0], [1], [0, 0, 1, 1], [], []>} : vector<8x128xbf16>, vector<128x128xbf16>, vector<8x128xf32> -> vector<8x128xf32>
    %396 = vector.shape_cast %395 : vector<8x128xf32> to vector<1x8x128xf32>
    %397 = vector.broadcast %396 : vector<1x8x128xf32> to vector<8x8x128xf32>
    %398 = arith.addf %288, %397 : vector<8x8x128xf32>
    %399 = math.tanh %398 : vector<8x8x128xf32>
    %400 = vector.shape_cast %399 : vector<8x8x128xf32> to vector<64x128xf32>
    %401 = arith.truncf %400 : vector<64x128xf32> to vector<64x128xbf16>
    %cst_91 = arith.constant dense<0.000000e+00> : vector<64x1xf32>
    %402 = tpu.matmul %401, %291, %cst_91 {dimension_numbers = #tpu.dot_dimension_numbers<[1], [0], [0], [1], [0, 0, 1, 1], [], []>} : vector<64x128xbf16>, vector<128x1xbf16>, vector<64x1xf32> -> vector<64x1xf32>
    %403 = vector.shape_cast %402 : vector<64x1xf32> to vector<8x8x1xf32>
    %cst_92 = arith.constant dense<0xFF800000> : vector<8x1xf32>
    %404 = vector.multi_reduction <maximumf>, %403, %cst_92 [0] : vector<8x8x1xf32> to vector<8x1xf32>
    %405 = vector.shape_cast %404 : vector<8x1xf32> to vector<1x8x1xf32>
    %406 = vector.broadcast %405 : vector<1x8x1xf32> to vector<8x8x1xf32>
    %407 = arith.subf %403, %406 : vector<8x8x1xf32>
    %408 = math.exp %407 : vector<8x8x1xf32>
    %cst_93 = arith.constant dense<0.000000e+00> : vector<8x1xf32>
    %409 = vector.multi_reduction <add>, %408, %cst_93 [0] : vector<8x8x1xf32> to vector<8x1xf32>
    %410 = vector.shape_cast %409 : vector<8x1xf32> to vector<1x8x1xf32>
    %411 = tpu.reciprocal %410 {approx = true} : vector<1x8x1xf32> -> vector<1x8x1xf32>
    %412 = vector.broadcast %411 : vector<1x8x1xf32> to vector<8x8x1xf32>
    %413 = arith.mulf %408, %412 : vector<8x8x1xf32>
    %414 = vector.broadcast %413 : vector<8x8x1xf32> to vector<8x8x128xf32>
    %415 = arith.mulf %414, %280 : vector<8x8x128xf32>
    %cst_94 = arith.constant dense<0.000000e+00> : vector<8x128xf32>
    %416 = vector.multi_reduction <add>, %415, %cst_94 [0] : vector<8x8x128xf32> to vector<8x128xf32>
    %417 = tpu.concatenate %416, %393 in 1 : vector<8x128xf32>, vector<8x128xf32> -> vector<8x256xf32>
    %418 = arith.truncf %417 : vector<8x256xf32> to vector<8x256xbf16>
    %cst_95 = arith.constant dense<0.000000e+00> : vector<8x384xf32>
    %419 = tpu.matmul %418, %292, %cst_95 {dimension_numbers = #tpu.dot_dimension_numbers<[1], [0], [0], [1], [0, 0, 1, 1], [], []>} : vector<8x256xbf16>, vector<256x384xbf16>, vector<8x384xf32> -> vector<8x384xf32>
    %420 = vector.broadcast %294 : vector<1x384xf32> to vector<8x384xf32>
    %421 = arith.addf %419, %420 : vector<8x384xf32>
    %422 = arith.truncf %364 : vector<8x128xf32> to vector<8x128xbf16>
    %cst_96 = arith.constant dense<0.000000e+00> : vector<8x384xf32>
    %423 = tpu.matmul %422, %293, %cst_96 {dimension_numbers = #tpu.dot_dimension_numbers<[1], [0], [0], [1], [0, 0, 1, 1], [], []>} : vector<8x128xbf16>, vector<128x384xbf16>, vector<8x384xf32> -> vector<8x384xf32>
    %424 = vector.broadcast %295 : vector<1x384xf32> to vector<8x384xf32>
    %425 = arith.addf %423, %424 : vector<8x384xf32>
    %426 = vector.extract_strided_slice %421 {offsets = [0, 0], sizes = [8, 128], strides = [1, 1]} : vector<8x384xf32> to vector<8x128xf32>
    %427 = vector.extract_strided_slice %425 {offsets = [0, 0], sizes = [8, 128], strides = [1, 1]} : vector<8x384xf32> to vector<8x128xf32>
    %428 = arith.addf %426, %427 : vector<8x128xf32>
    %429 = arith.negf %428 : vector<8x128xf32>
    %430 = math.exp %429 : vector<8x128xf32>
    %cst_97 = arith.constant 1.000000e+00 : f32
    %431 = vector.broadcast %cst_97 : f32 to vector<8x128xf32>
    %432 = arith.addf %431, %430 : vector<8x128xf32>
    %433 = arith.divf %431, %432 : vector<8x128xf32>
    %434 = vector.extract_strided_slice %421 {offsets = [0, 128], sizes = [8, 128], strides = [1, 1]} : vector<8x384xf32> to vector<8x128xf32>
    %435 = vector.extract_strided_slice %425 {offsets = [0, 128], sizes = [8, 128], strides = [1, 1]} : vector<8x384xf32> to vector<8x128xf32>
    %436 = arith.addf %434, %435 : vector<8x128xf32>
    %437 = arith.negf %436 : vector<8x128xf32>
    %438 = math.exp %437 : vector<8x128xf32>
    %cst_98 = arith.constant 1.000000e+00 : f32
    %439 = vector.broadcast %cst_98 : f32 to vector<8x128xf32>
    %440 = arith.addf %439, %438 : vector<8x128xf32>
    %441 = arith.divf %439, %440 : vector<8x128xf32>
    %442 = vector.extract_strided_slice %421 {offsets = [0, 256], sizes = [8, 128], strides = [1, 1]} : vector<8x384xf32> to vector<8x128xf32>
    %443 = vector.extract_strided_slice %425 {offsets = [0, 256], sizes = [8, 128], strides = [1, 1]} : vector<8x384xf32> to vector<8x128xf32>
    %444 = arith.mulf %433, %443 : vector<8x128xf32>
    %445 = arith.addf %442, %444 : vector<8x128xf32>
    %446 = math.tanh %445 : vector<8x128xf32>
    %cst_99 = arith.constant 1.000000e+00 : f32
    %447 = vector.broadcast %cst_99 : f32 to vector<8x128xf32>
    %448 = arith.subf %447, %441 : vector<8x128xf32>
    %449 = arith.mulf %448, %446 : vector<8x128xf32>
    %450 = arith.mulf %441, %364 : vector<8x128xf32>
    %451 = arith.addf %449, %450 : vector<8x128xf32>
    %452 = arith.truncf %451 : vector<8x128xf32> to vector<8x128xbf16>
    %cst_100 = arith.constant dense<0.000000e+00> : vector<8x128xf32>
    %453 = tpu.matmul %452, %296, %cst_100 {dimension_numbers = #tpu.dot_dimension_numbers<[1], [0], [0], [1], [0, 0, 1, 1], [], []>} : vector<8x128xbf16>, vector<128x128xbf16>, vector<8x128xf32> -> vector<8x128xf32>
    %454 = vector.broadcast %297 : vector<1x128xf32> to vector<8x128xf32>
    %455 = arith.addf %453, %454 : vector<8x128xf32>
    %cst_101 = arith.constant dense<0xFF800000> : vector<8xf32>
    %456 = vector.multi_reduction <maximumf>, %455, %cst_101 [1] : vector<8x128xf32> to vector<8xf32>
    %457 = vector.shape_cast %456 : vector<8xf32> to vector<8x1xf32>
    %458 = vector.broadcast %457 : vector<8x1xf32> to vector<8x128xf32>
    %459 = arith.subf %455, %458 : vector<8x128xf32>
    %460 = math.exp %459 : vector<8x128xf32>
    %cst_102 = arith.constant dense<0.000000e+00> : vector<8xf32>
    %461 = vector.multi_reduction <add>, %460, %cst_102 [1] : vector<8x128xf32> to vector<8xf32>
    %462 = vector.shape_cast %461 : vector<8xf32> to vector<8x1xf32>
    %463 = math.log %462 : vector<8x1xf32>
    %464 = arith.addf %463, %457 : vector<8x1xf32>
    %465 = vector.broadcast %464 : vector<8x1xf32> to vector<8x128xf32>
    %466 = arith.subf %455, %465 : vector<8x128xf32>
    %cst_103 = arith.constant dense<0xFF800000> : vector<8xf32>
    %467 = vector.multi_reduction <maximumf>, %466, %cst_103 [1] : vector<8x128xf32> to vector<8xf32>
    %468 = vector.shape_cast %467 : vector<8xf32> to vector<8x1xf32>
    %469 = vector.broadcast %468 : vector<8x1xf32> to vector<8x128xf32>
    %470 = arith.cmpf oeq, %466, %469 : vector<8x128xf32>
    %c128_i32_104 = arith.constant 128 : i32
    %471 = vector.broadcast %c128_i32_104 : i32 to vector<8x128xi32>
    %472 = arith.select %470, %298, %471 : vector<8x128xi1>, vector<8x128xi32>
    %cst_105 = arith.constant dense<2147483647> : vector<8xi32>
    %473 = vector.multi_reduction <minsi>, %472, %cst_105 [1] : vector<8x128xi32> to vector<8xi32>
    %474 = vector.shape_cast %473 : vector<8xi32> to vector<8x1xi32>
    %475 = vector.broadcast %474 : vector<8x1xi32> to vector<8x128xi32>
    %476 = arith.cmpi eq, %298, %475 : vector<8x128xi32>
    %477 = arith.extui %476 : vector<8x128xi1> to vector<8x128xi32>
    %478 = arith.sitofp %477 : vector<8x128xi32> to vector<8x128xf32>
    %479 = arith.truncf %478 : vector<8x128xf32> to vector<8x128xbf16>
    %cst_106 = arith.constant dense<0.000000e+00> : vector<8x128xf32>
    %480 = tpu.matmul %479, %289, %cst_106 {dimension_numbers = #tpu.dot_dimension_numbers<[1], [0], [0], [1], [0, 0, 1, 1], [], []>} : vector<8x128xbf16>, vector<128x128xbf16>, vector<8x128xf32> -> vector<8x128xf32>
    %481 = arith.truncf %451 : vector<8x128xf32> to vector<8x128xbf16>
    %cst_107 = arith.constant dense<0.000000e+00> : vector<8x128xf32>
    %482 = tpu.matmul %481, %290, %cst_107 {dimension_numbers = #tpu.dot_dimension_numbers<[1], [0], [0], [1], [0, 0, 1, 1], [], []>} : vector<8x128xbf16>, vector<128x128xbf16>, vector<8x128xf32> -> vector<8x128xf32>
    %483 = vector.shape_cast %482 : vector<8x128xf32> to vector<1x8x128xf32>
    %484 = vector.broadcast %483 : vector<1x8x128xf32> to vector<8x8x128xf32>
    %485 = arith.addf %288, %484 : vector<8x8x128xf32>
    %486 = math.tanh %485 : vector<8x8x128xf32>
    %487 = vector.shape_cast %486 : vector<8x8x128xf32> to vector<64x128xf32>
    %488 = arith.truncf %487 : vector<64x128xf32> to vector<64x128xbf16>
    %cst_108 = arith.constant dense<0.000000e+00> : vector<64x1xf32>
    %489 = tpu.matmul %488, %291, %cst_108 {dimension_numbers = #tpu.dot_dimension_numbers<[1], [0], [0], [1], [0, 0, 1, 1], [], []>} : vector<64x128xbf16>, vector<128x1xbf16>, vector<64x1xf32> -> vector<64x1xf32>
    %490 = vector.shape_cast %489 : vector<64x1xf32> to vector<8x8x1xf32>
    %cst_109 = arith.constant dense<0xFF800000> : vector<8x1xf32>
    %491 = vector.multi_reduction <maximumf>, %490, %cst_109 [0] : vector<8x8x1xf32> to vector<8x1xf32>
    %492 = vector.shape_cast %491 : vector<8x1xf32> to vector<1x8x1xf32>
    %493 = vector.broadcast %492 : vector<1x8x1xf32> to vector<8x8x1xf32>
    %494 = arith.subf %490, %493 : vector<8x8x1xf32>
    %495 = math.exp %494 : vector<8x8x1xf32>
    %cst_110 = arith.constant dense<0.000000e+00> : vector<8x1xf32>
    %496 = vector.multi_reduction <add>, %495, %cst_110 [0] : vector<8x8x1xf32> to vector<8x1xf32>
    %497 = vector.shape_cast %496 : vector<8x1xf32> to vector<1x8x1xf32>
    %498 = tpu.reciprocal %497 {approx = true} : vector<1x8x1xf32> -> vector<1x8x1xf32>
    %499 = vector.broadcast %498 : vector<1x8x1xf32> to vector<8x8x1xf32>
    %500 = arith.mulf %495, %499 : vector<8x8x1xf32>
    %501 = vector.broadcast %500 : vector<8x8x1xf32> to vector<8x8x128xf32>
    %502 = arith.mulf %501, %280 : vector<8x8x128xf32>
    %cst_111 = arith.constant dense<0.000000e+00> : vector<8x128xf32>
    %503 = vector.multi_reduction <add>, %502, %cst_111 [0] : vector<8x8x128xf32> to vector<8x128xf32>
    %504 = tpu.concatenate %503, %480 in 1 : vector<8x128xf32>, vector<8x128xf32> -> vector<8x256xf32>
    %505 = arith.truncf %504 : vector<8x256xf32> to vector<8x256xbf16>
    %cst_112 = arith.constant dense<0.000000e+00> : vector<8x384xf32>
    %506 = tpu.matmul %505, %292, %cst_112 {dimension_numbers = #tpu.dot_dimension_numbers<[1], [0], [0], [1], [0, 0, 1, 1], [], []>} : vector<8x256xbf16>, vector<256x384xbf16>, vector<8x384xf32> -> vector<8x384xf32>
    %507 = vector.broadcast %294 : vector<1x384xf32> to vector<8x384xf32>
    %508 = arith.addf %506, %507 : vector<8x384xf32>
    %509 = arith.truncf %451 : vector<8x128xf32> to vector<8x128xbf16>
    %cst_113 = arith.constant dense<0.000000e+00> : vector<8x384xf32>
    %510 = tpu.matmul %509, %293, %cst_113 {dimension_numbers = #tpu.dot_dimension_numbers<[1], [0], [0], [1], [0, 0, 1, 1], [], []>} : vector<8x128xbf16>, vector<128x384xbf16>, vector<8x384xf32> -> vector<8x384xf32>
    %511 = vector.broadcast %295 : vector<1x384xf32> to vector<8x384xf32>
    %512 = arith.addf %510, %511 : vector<8x384xf32>
    %513 = vector.extract_strided_slice %508 {offsets = [0, 0], sizes = [8, 128], strides = [1, 1]} : vector<8x384xf32> to vector<8x128xf32>
    %514 = vector.extract_strided_slice %512 {offsets = [0, 0], sizes = [8, 128], strides = [1, 1]} : vector<8x384xf32> to vector<8x128xf32>
    %515 = arith.addf %513, %514 : vector<8x128xf32>
    %516 = arith.negf %515 : vector<8x128xf32>
    %517 = math.exp %516 : vector<8x128xf32>
    %cst_114 = arith.constant 1.000000e+00 : f32
    %518 = vector.broadcast %cst_114 : f32 to vector<8x128xf32>
    %519 = arith.addf %518, %517 : vector<8x128xf32>
    %520 = arith.divf %518, %519 : vector<8x128xf32>
    %521 = vector.extract_strided_slice %508 {offsets = [0, 128], sizes = [8, 128], strides = [1, 1]} : vector<8x384xf32> to vector<8x128xf32>
    %522 = vector.extract_strided_slice %512 {offsets = [0, 128], sizes = [8, 128], strides = [1, 1]} : vector<8x384xf32> to vector<8x128xf32>
    %523 = arith.addf %521, %522 : vector<8x128xf32>
    %524 = arith.negf %523 : vector<8x128xf32>
    %525 = math.exp %524 : vector<8x128xf32>
    %cst_115 = arith.constant 1.000000e+00 : f32
    %526 = vector.broadcast %cst_115 : f32 to vector<8x128xf32>
    %527 = arith.addf %526, %525 : vector<8x128xf32>
    %528 = arith.divf %526, %527 : vector<8x128xf32>
    %529 = vector.extract_strided_slice %508 {offsets = [0, 256], sizes = [8, 128], strides = [1, 1]} : vector<8x384xf32> to vector<8x128xf32>
    %530 = vector.extract_strided_slice %512 {offsets = [0, 256], sizes = [8, 128], strides = [1, 1]} : vector<8x384xf32> to vector<8x128xf32>
    %531 = arith.mulf %520, %530 : vector<8x128xf32>
    %532 = arith.addf %529, %531 : vector<8x128xf32>
    %533 = math.tanh %532 : vector<8x128xf32>
    %cst_116 = arith.constant 1.000000e+00 : f32
    %534 = vector.broadcast %cst_116 : f32 to vector<8x128xf32>
    %535 = arith.subf %534, %528 : vector<8x128xf32>
    %536 = arith.mulf %535, %533 : vector<8x128xf32>
    %537 = arith.mulf %528, %451 : vector<8x128xf32>
    %538 = arith.addf %536, %537 : vector<8x128xf32>
    %539 = arith.truncf %538 : vector<8x128xf32> to vector<8x128xbf16>
    %cst_117 = arith.constant dense<0.000000e+00> : vector<8x128xf32>
    %540 = tpu.matmul %539, %296, %cst_117 {dimension_numbers = #tpu.dot_dimension_numbers<[1], [0], [0], [1], [0, 0, 1, 1], [], []>} : vector<8x128xbf16>, vector<128x128xbf16>, vector<8x128xf32> -> vector<8x128xf32>
    %541 = vector.broadcast %297 : vector<1x128xf32> to vector<8x128xf32>
    %542 = arith.addf %540, %541 : vector<8x128xf32>
    %cst_118 = arith.constant dense<0xFF800000> : vector<8xf32>
    %543 = vector.multi_reduction <maximumf>, %542, %cst_118 [1] : vector<8x128xf32> to vector<8xf32>
    %544 = vector.shape_cast %543 : vector<8xf32> to vector<8x1xf32>
    %545 = vector.broadcast %544 : vector<8x1xf32> to vector<8x128xf32>
    %546 = arith.subf %542, %545 : vector<8x128xf32>
    %547 = math.exp %546 : vector<8x128xf32>
    %cst_119 = arith.constant dense<0.000000e+00> : vector<8xf32>
    %548 = vector.multi_reduction <add>, %547, %cst_119 [1] : vector<8x128xf32> to vector<8xf32>
    %549 = vector.shape_cast %548 : vector<8xf32> to vector<8x1xf32>
    %550 = math.log %549 : vector<8x1xf32>
    %551 = arith.addf %550, %544 : vector<8x1xf32>
    %552 = vector.broadcast %551 : vector<8x1xf32> to vector<8x128xf32>
    %553 = arith.subf %542, %552 : vector<8x128xf32>
    %cst_120 = arith.constant dense<0xFF800000> : vector<8xf32>
    %554 = vector.multi_reduction <maximumf>, %553, %cst_120 [1] : vector<8x128xf32> to vector<8xf32>
    %555 = vector.shape_cast %554 : vector<8xf32> to vector<8x1xf32>
    %556 = vector.broadcast %555 : vector<8x1xf32> to vector<8x128xf32>
    %557 = arith.cmpf oeq, %553, %556 : vector<8x128xf32>
    %c128_i32_121 = arith.constant 128 : i32
    %558 = vector.broadcast %c128_i32_121 : i32 to vector<8x128xi32>
    %559 = arith.select %557, %298, %558 : vector<8x128xi1>, vector<8x128xi32>
    %cst_122 = arith.constant dense<2147483647> : vector<8xi32>
    %560 = vector.multi_reduction <minsi>, %559, %cst_122 [1] : vector<8x128xi32> to vector<8xi32>
    %561 = vector.shape_cast %560 : vector<8xi32> to vector<8x1xi32>
    %562 = vector.broadcast %561 : vector<8x1xi32> to vector<8x128xi32>
    %563 = arith.cmpi eq, %298, %562 : vector<8x128xi32>
    %564 = arith.extui %563 : vector<8x128xi1> to vector<8x128xi32>
    %565 = arith.sitofp %564 : vector<8x128xi32> to vector<8x128xf32>
    %566 = arith.truncf %565 : vector<8x128xf32> to vector<8x128xbf16>
    %cst_123 = arith.constant dense<0.000000e+00> : vector<8x128xf32>
    %567 = tpu.matmul %566, %289, %cst_123 {dimension_numbers = #tpu.dot_dimension_numbers<[1], [0], [0], [1], [0, 0, 1, 1], [], []>} : vector<8x128xbf16>, vector<128x128xbf16>, vector<8x128xf32> -> vector<8x128xf32>
    %568 = arith.truncf %538 : vector<8x128xf32> to vector<8x128xbf16>
    %cst_124 = arith.constant dense<0.000000e+00> : vector<8x128xf32>
    %569 = tpu.matmul %568, %290, %cst_124 {dimension_numbers = #tpu.dot_dimension_numbers<[1], [0], [0], [1], [0, 0, 1, 1], [], []>} : vector<8x128xbf16>, vector<128x128xbf16>, vector<8x128xf32> -> vector<8x128xf32>
    %570 = vector.shape_cast %569 : vector<8x128xf32> to vector<1x8x128xf32>
    %571 = vector.broadcast %570 : vector<1x8x128xf32> to vector<8x8x128xf32>
    %572 = arith.addf %288, %571 : vector<8x8x128xf32>
    %573 = math.tanh %572 : vector<8x8x128xf32>
    %574 = vector.shape_cast %573 : vector<8x8x128xf32> to vector<64x128xf32>
    %575 = arith.truncf %574 : vector<64x128xf32> to vector<64x128xbf16>
    %cst_125 = arith.constant dense<0.000000e+00> : vector<64x1xf32>
    %576 = tpu.matmul %575, %291, %cst_125 {dimension_numbers = #tpu.dot_dimension_numbers<[1], [0], [0], [1], [0, 0, 1, 1], [], []>} : vector<64x128xbf16>, vector<128x1xbf16>, vector<64x1xf32> -> vector<64x1xf32>
    %577 = vector.shape_cast %576 : vector<64x1xf32> to vector<8x8x1xf32>
    %cst_126 = arith.constant dense<0xFF800000> : vector<8x1xf32>
    %578 = vector.multi_reduction <maximumf>, %577, %cst_126 [0] : vector<8x8x1xf32> to vector<8x1xf32>
    %579 = vector.shape_cast %578 : vector<8x1xf32> to vector<1x8x1xf32>
    %580 = vector.broadcast %579 : vector<1x8x1xf32> to vector<8x8x1xf32>
    %581 = arith.subf %577, %580 : vector<8x8x1xf32>
    %582 = math.exp %581 : vector<8x8x1xf32>
    %cst_127 = arith.constant dense<0.000000e+00> : vector<8x1xf32>
    %583 = vector.multi_reduction <add>, %582, %cst_127 [0] : vector<8x8x1xf32> to vector<8x1xf32>
    %584 = vector.shape_cast %583 : vector<8x1xf32> to vector<1x8x1xf32>
    %585 = tpu.reciprocal %584 {approx = true} : vector<1x8x1xf32> -> vector<1x8x1xf32>
    %586 = vector.broadcast %585 : vector<1x8x1xf32> to vector<8x8x1xf32>
    %587 = arith.mulf %582, %586 : vector<8x8x1xf32>
    %588 = vector.broadcast %587 : vector<8x8x1xf32> to vector<8x8x128xf32>
    %589 = arith.mulf %588, %280 : vector<8x8x128xf32>
    %cst_128 = arith.constant dense<0.000000e+00> : vector<8x128xf32>
    %590 = vector.multi_reduction <add>, %589, %cst_128 [0] : vector<8x8x128xf32> to vector<8x128xf32>
    %591 = tpu.concatenate %590, %567 in 1 : vector<8x128xf32>, vector<8x128xf32> -> vector<8x256xf32>
    %592 = arith.truncf %591 : vector<8x256xf32> to vector<8x256xbf16>
    %cst_129 = arith.constant dense<0.000000e+00> : vector<8x384xf32>
    %593 = tpu.matmul %592, %292, %cst_129 {dimension_numbers = #tpu.dot_dimension_numbers<[1], [0], [0], [1], [0, 0, 1, 1], [], []>} : vector<8x256xbf16>, vector<256x384xbf16>, vector<8x384xf32> -> vector<8x384xf32>
    %594 = vector.broadcast %294 : vector<1x384xf32> to vector<8x384xf32>
    %595 = arith.addf %593, %594 : vector<8x384xf32>
    %596 = arith.truncf %538 : vector<8x128xf32> to vector<8x128xbf16>
    %cst_130 = arith.constant dense<0.000000e+00> : vector<8x384xf32>
    %597 = tpu.matmul %596, %293, %cst_130 {dimension_numbers = #tpu.dot_dimension_numbers<[1], [0], [0], [1], [0, 0, 1, 1], [], []>} : vector<8x128xbf16>, vector<128x384xbf16>, vector<8x384xf32> -> vector<8x384xf32>
    %598 = vector.broadcast %295 : vector<1x384xf32> to vector<8x384xf32>
    %599 = arith.addf %597, %598 : vector<8x384xf32>
    %600 = vector.extract_strided_slice %595 {offsets = [0, 0], sizes = [8, 128], strides = [1, 1]} : vector<8x384xf32> to vector<8x128xf32>
    %601 = vector.extract_strided_slice %599 {offsets = [0, 0], sizes = [8, 128], strides = [1, 1]} : vector<8x384xf32> to vector<8x128xf32>
    %602 = arith.addf %600, %601 : vector<8x128xf32>
    %603 = arith.negf %602 : vector<8x128xf32>
    %604 = math.exp %603 : vector<8x128xf32>
    %cst_131 = arith.constant 1.000000e+00 : f32
    %605 = vector.broadcast %cst_131 : f32 to vector<8x128xf32>
    %606 = arith.addf %605, %604 : vector<8x128xf32>
    %607 = arith.divf %605, %606 : vector<8x128xf32>
    %608 = vector.extract_strided_slice %595 {offsets = [0, 128], sizes = [8, 128], strides = [1, 1]} : vector<8x384xf32> to vector<8x128xf32>
    %609 = vector.extract_strided_slice %599 {offsets = [0, 128], sizes = [8, 128], strides = [1, 1]} : vector<8x384xf32> to vector<8x128xf32>
    %610 = arith.addf %608, %609 : vector<8x128xf32>
    %611 = arith.negf %610 : vector<8x128xf32>
    %612 = math.exp %611 : vector<8x128xf32>
    %cst_132 = arith.constant 1.000000e+00 : f32
    %613 = vector.broadcast %cst_132 : f32 to vector<8x128xf32>
    %614 = arith.addf %613, %612 : vector<8x128xf32>
    %615 = arith.divf %613, %614 : vector<8x128xf32>
    %616 = vector.extract_strided_slice %595 {offsets = [0, 256], sizes = [8, 128], strides = [1, 1]} : vector<8x384xf32> to vector<8x128xf32>
    %617 = vector.extract_strided_slice %599 {offsets = [0, 256], sizes = [8, 128], strides = [1, 1]} : vector<8x384xf32> to vector<8x128xf32>
    %618 = arith.mulf %607, %617 : vector<8x128xf32>
    %619 = arith.addf %616, %618 : vector<8x128xf32>
    %620 = math.tanh %619 : vector<8x128xf32>
    %cst_133 = arith.constant 1.000000e+00 : f32
    %621 = vector.broadcast %cst_133 : f32 to vector<8x128xf32>
    %622 = arith.subf %621, %615 : vector<8x128xf32>
    %623 = arith.mulf %622, %620 : vector<8x128xf32>
    %624 = arith.mulf %615, %538 : vector<8x128xf32>
    %625 = arith.addf %623, %624 : vector<8x128xf32>
    %626 = arith.truncf %625 : vector<8x128xf32> to vector<8x128xbf16>
    %cst_134 = arith.constant dense<0.000000e+00> : vector<8x128xf32>
    %627 = tpu.matmul %626, %296, %cst_134 {dimension_numbers = #tpu.dot_dimension_numbers<[1], [0], [0], [1], [0, 0, 1, 1], [], []>} : vector<8x128xbf16>, vector<128x128xbf16>, vector<8x128xf32> -> vector<8x128xf32>
    %628 = vector.broadcast %297 : vector<1x128xf32> to vector<8x128xf32>
    %629 = arith.addf %627, %628 : vector<8x128xf32>
    %cst_135 = arith.constant dense<0xFF800000> : vector<8xf32>
    %630 = vector.multi_reduction <maximumf>, %629, %cst_135 [1] : vector<8x128xf32> to vector<8xf32>
    %631 = vector.shape_cast %630 : vector<8xf32> to vector<8x1xf32>
    %632 = vector.broadcast %631 : vector<8x1xf32> to vector<8x128xf32>
    %633 = arith.subf %629, %632 : vector<8x128xf32>
    %634 = math.exp %633 : vector<8x128xf32>
    %cst_136 = arith.constant dense<0.000000e+00> : vector<8xf32>
    %635 = vector.multi_reduction <add>, %634, %cst_136 [1] : vector<8x128xf32> to vector<8xf32>
    %636 = vector.shape_cast %635 : vector<8xf32> to vector<8x1xf32>
    %637 = math.log %636 : vector<8x1xf32>
    %638 = arith.addf %637, %631 : vector<8x1xf32>
    %639 = vector.broadcast %638 : vector<8x1xf32> to vector<8x128xf32>
    %640 = arith.subf %629, %639 : vector<8x128xf32>
    %cst_137 = arith.constant dense<0xFF800000> : vector<8xf32>
    %641 = vector.multi_reduction <maximumf>, %640, %cst_137 [1] : vector<8x128xf32> to vector<8xf32>
    %642 = vector.shape_cast %641 : vector<8xf32> to vector<8x1xf32>
    %643 = vector.broadcast %642 : vector<8x1xf32> to vector<8x128xf32>
    %644 = arith.cmpf oeq, %640, %643 : vector<8x128xf32>
    %c128_i32_138 = arith.constant 128 : i32
    %645 = vector.broadcast %c128_i32_138 : i32 to vector<8x128xi32>
    %646 = arith.select %644, %298, %645 : vector<8x128xi1>, vector<8x128xi32>
    %cst_139 = arith.constant dense<2147483647> : vector<8xi32>
    %647 = vector.multi_reduction <minsi>, %646, %cst_139 [1] : vector<8x128xi32> to vector<8xi32>
    %648 = vector.shape_cast %647 : vector<8xi32> to vector<8x1xi32>
    %649 = vector.broadcast %648 : vector<8x1xi32> to vector<8x128xi32>
    %650 = arith.cmpi eq, %298, %649 : vector<8x128xi32>
    %651 = arith.extui %650 : vector<8x128xi1> to vector<8x128xi32>
    %652 = arith.sitofp %651 : vector<8x128xi32> to vector<8x128xf32>
    %653 = arith.truncf %652 : vector<8x128xf32> to vector<8x128xbf16>
    %cst_140 = arith.constant dense<0.000000e+00> : vector<8x128xf32>
    %654 = tpu.matmul %653, %289, %cst_140 {dimension_numbers = #tpu.dot_dimension_numbers<[1], [0], [0], [1], [0, 0, 1, 1], [], []>} : vector<8x128xbf16>, vector<128x128xbf16>, vector<8x128xf32> -> vector<8x128xf32>
    %655 = arith.truncf %625 : vector<8x128xf32> to vector<8x128xbf16>
    %cst_141 = arith.constant dense<0.000000e+00> : vector<8x128xf32>
    %656 = tpu.matmul %655, %290, %cst_141 {dimension_numbers = #tpu.dot_dimension_numbers<[1], [0], [0], [1], [0, 0, 1, 1], [], []>} : vector<8x128xbf16>, vector<128x128xbf16>, vector<8x128xf32> -> vector<8x128xf32>
    %657 = vector.shape_cast %656 : vector<8x128xf32> to vector<1x8x128xf32>
    %658 = vector.broadcast %657 : vector<1x8x128xf32> to vector<8x8x128xf32>
    %659 = arith.addf %288, %658 : vector<8x8x128xf32>
    %660 = math.tanh %659 : vector<8x8x128xf32>
    %661 = vector.shape_cast %660 : vector<8x8x128xf32> to vector<64x128xf32>
    %662 = arith.truncf %661 : vector<64x128xf32> to vector<64x128xbf16>
    %cst_142 = arith.constant dense<0.000000e+00> : vector<64x1xf32>
    %663 = tpu.matmul %662, %291, %cst_142 {dimension_numbers = #tpu.dot_dimension_numbers<[1], [0], [0], [1], [0, 0, 1, 1], [], []>} : vector<64x128xbf16>, vector<128x1xbf16>, vector<64x1xf32> -> vector<64x1xf32>
    %664 = vector.shape_cast %663 : vector<64x1xf32> to vector<8x8x1xf32>
    %cst_143 = arith.constant dense<0xFF800000> : vector<8x1xf32>
    %665 = vector.multi_reduction <maximumf>, %664, %cst_143 [0] : vector<8x8x1xf32> to vector<8x1xf32>
    %666 = vector.shape_cast %665 : vector<8x1xf32> to vector<1x8x1xf32>
    %667 = vector.broadcast %666 : vector<1x8x1xf32> to vector<8x8x1xf32>
    %668 = arith.subf %664, %667 : vector<8x8x1xf32>
    %669 = math.exp %668 : vector<8x8x1xf32>
    %cst_144 = arith.constant dense<0.000000e+00> : vector<8x1xf32>
    %670 = vector.multi_reduction <add>, %669, %cst_144 [0] : vector<8x8x1xf32> to vector<8x1xf32>
    %671 = vector.shape_cast %670 : vector<8x1xf32> to vector<1x8x1xf32>
    %672 = tpu.reciprocal %671 {approx = true} : vector<1x8x1xf32> -> vector<1x8x1xf32>
    %673 = vector.broadcast %672 : vector<1x8x1xf32> to vector<8x8x1xf32>
    %674 = arith.mulf %669, %673 : vector<8x8x1xf32>
    %675 = vector.broadcast %674 : vector<8x8x1xf32> to vector<8x8x128xf32>
    %676 = arith.mulf %675, %280 : vector<8x8x128xf32>
    %cst_145 = arith.constant dense<0.000000e+00> : vector<8x128xf32>
    %677 = vector.multi_reduction <add>, %676, %cst_145 [0] : vector<8x8x128xf32> to vector<8x128xf32>
    %678 = tpu.concatenate %677, %654 in 1 : vector<8x128xf32>, vector<8x128xf32> -> vector<8x256xf32>
    %679 = arith.truncf %678 : vector<8x256xf32> to vector<8x256xbf16>
    %cst_146 = arith.constant dense<0.000000e+00> : vector<8x384xf32>
    %680 = tpu.matmul %679, %292, %cst_146 {dimension_numbers = #tpu.dot_dimension_numbers<[1], [0], [0], [1], [0, 0, 1, 1], [], []>} : vector<8x256xbf16>, vector<256x384xbf16>, vector<8x384xf32> -> vector<8x384xf32>
    %681 = vector.broadcast %294 : vector<1x384xf32> to vector<8x384xf32>
    %682 = arith.addf %680, %681 : vector<8x384xf32>
    %683 = arith.truncf %625 : vector<8x128xf32> to vector<8x128xbf16>
    %cst_147 = arith.constant dense<0.000000e+00> : vector<8x384xf32>
    %684 = tpu.matmul %683, %293, %cst_147 {dimension_numbers = #tpu.dot_dimension_numbers<[1], [0], [0], [1], [0, 0, 1, 1], [], []>} : vector<8x128xbf16>, vector<128x384xbf16>, vector<8x384xf32> -> vector<8x384xf32>
    %685 = vector.broadcast %295 : vector<1x384xf32> to vector<8x384xf32>
    %686 = arith.addf %684, %685 : vector<8x384xf32>
    %687 = vector.extract_strided_slice %682 {offsets = [0, 0], sizes = [8, 128], strides = [1, 1]} : vector<8x384xf32> to vector<8x128xf32>
    %688 = vector.extract_strided_slice %686 {offsets = [0, 0], sizes = [8, 128], strides = [1, 1]} : vector<8x384xf32> to vector<8x128xf32>
    %689 = arith.addf %687, %688 : vector<8x128xf32>
    %690 = arith.negf %689 : vector<8x128xf32>
    %691 = math.exp %690 : vector<8x128xf32>
    %cst_148 = arith.constant 1.000000e+00 : f32
    %692 = vector.broadcast %cst_148 : f32 to vector<8x128xf32>
    %693 = arith.addf %692, %691 : vector<8x128xf32>
    %694 = arith.divf %692, %693 : vector<8x128xf32>
    %695 = vector.extract_strided_slice %682 {offsets = [0, 128], sizes = [8, 128], strides = [1, 1]} : vector<8x384xf32> to vector<8x128xf32>
    %696 = vector.extract_strided_slice %686 {offsets = [0, 128], sizes = [8, 128], strides = [1, 1]} : vector<8x384xf32> to vector<8x128xf32>
    %697 = arith.addf %695, %696 : vector<8x128xf32>
    %698 = arith.negf %697 : vector<8x128xf32>
    %699 = math.exp %698 : vector<8x128xf32>
    %cst_149 = arith.constant 1.000000e+00 : f32
    %700 = vector.broadcast %cst_149 : f32 to vector<8x128xf32>
    %701 = arith.addf %700, %699 : vector<8x128xf32>
    %702 = arith.divf %700, %701 : vector<8x128xf32>
    %703 = vector.extract_strided_slice %682 {offsets = [0, 256], sizes = [8, 128], strides = [1, 1]} : vector<8x384xf32> to vector<8x128xf32>
    %704 = vector.extract_strided_slice %686 {offsets = [0, 256], sizes = [8, 128], strides = [1, 1]} : vector<8x384xf32> to vector<8x128xf32>
    %705 = arith.mulf %694, %704 : vector<8x128xf32>
    %706 = arith.addf %703, %705 : vector<8x128xf32>
    %707 = math.tanh %706 : vector<8x128xf32>
    %cst_150 = arith.constant 1.000000e+00 : f32
    %708 = vector.broadcast %cst_150 : f32 to vector<8x128xf32>
    %709 = arith.subf %708, %702 : vector<8x128xf32>
    %710 = arith.mulf %709, %707 : vector<8x128xf32>
    %711 = arith.mulf %702, %625 : vector<8x128xf32>
    %712 = arith.addf %710, %711 : vector<8x128xf32>
    %713 = arith.truncf %712 : vector<8x128xf32> to vector<8x128xbf16>
    %cst_151 = arith.constant dense<0.000000e+00> : vector<8x128xf32>
    %714 = tpu.matmul %713, %296, %cst_151 {dimension_numbers = #tpu.dot_dimension_numbers<[1], [0], [0], [1], [0, 0, 1, 1], [], []>} : vector<8x128xbf16>, vector<128x128xbf16>, vector<8x128xf32> -> vector<8x128xf32>
    %715 = vector.broadcast %297 : vector<1x128xf32> to vector<8x128xf32>
    %716 = arith.addf %714, %715 : vector<8x128xf32>
    %cst_152 = arith.constant dense<0xFF800000> : vector<8xf32>
    %717 = vector.multi_reduction <maximumf>, %716, %cst_152 [1] : vector<8x128xf32> to vector<8xf32>
    %718 = vector.shape_cast %717 : vector<8xf32> to vector<8x1xf32>
    %719 = vector.broadcast %718 : vector<8x1xf32> to vector<8x128xf32>
    %720 = arith.subf %716, %719 : vector<8x128xf32>
    %721 = math.exp %720 : vector<8x128xf32>
    %cst_153 = arith.constant dense<0.000000e+00> : vector<8xf32>
    %722 = vector.multi_reduction <add>, %721, %cst_153 [1] : vector<8x128xf32> to vector<8xf32>
    %723 = vector.shape_cast %722 : vector<8xf32> to vector<8x1xf32>
    %724 = math.log %723 : vector<8x1xf32>
    %725 = arith.addf %724, %718 : vector<8x1xf32>
    %726 = vector.broadcast %725 : vector<8x1xf32> to vector<8x128xf32>
    %727 = arith.subf %716, %726 : vector<8x128xf32>
    %728 = vector.shape_cast %379 : vector<8x128xf32> to vector<1x8x128xf32>
    %729 = vector.shape_cast %466 : vector<8x128xf32> to vector<1x8x128xf32>
    %730 = vector.shape_cast %553 : vector<8x128xf32> to vector<1x8x128xf32>
    %731 = vector.shape_cast %640 : vector<8x128xf32> to vector<1x8x128xf32>
    %732 = vector.shape_cast %727 : vector<8x128xf32> to vector<1x8x128xf32>
    %733 = tpu.concatenate %728, %729, %730, %731, %732 in 0 : vector<1x8x128xf32>, vector<1x8x128xf32>, vector<1x8x128xf32>, vector<1x8x128xf32>, vector<1x8x128xf32> -> vector<5x8x128xf32>
    %c0_154 = arith.constant 0 : index
    %c0_155 = arith.constant 0 : index
    %c0_156 = arith.constant 0 : index
    %734 = vector.load %arg19[%c0_154, %c0_155, %c0_156] : memref<5x8x128xf32, #tpu.memory_space<vmem>>, vector<5x8x128xf32>
    tpu.vector_store %arg19[%c0_154, %c0_155, %c0_156], %733 {strides = array<i32>} : memref<5x8x128xf32, #tpu.memory_space<vmem>>, vector<5x8x128xf32>,
    return
  }
}

</mosaic_0001>

<bundles_post_ra>
// kernel: tpu_custom_call.1
= control target key start
LH: loop header
LB: loop body
LE: loop exit
PB: predicated region body
PF: predicated region fallthrough
CT: control target
= control target key end

     0   :  { %s10084_s0 = inlined_call_operand.hbm [shape: bf16[64,64], index: 0, kind: input, shape index: {}]   ;;  %s10085_s1 = inlined_call_operand.vmem [shape: s32[5,8,1], index: 1, kind: input, shape index: {}]   ;;  %s10086_s2 = inlined_call_operand.hbm [shape: bf16[64,128], index: 2, kind: input, shape index: {}]   ;;  %s10087_s3 = inlined_call_operand.hbm [shape: f32[1,128], index: 3, kind: input, shape index: {}]   ;;  %s10088_s4 = inlined_call_operand.hbm [shape: bf16[128,384], index: 4, kind: input, shape index: {}]   ;;  %s10089_s5 = inlined_call_operand.hbm [shape: bf16[128,384], index: 5, kind: input, shape index: {}]   ;;  %s10090_s6 = inlined_call_operand.hbm [shape: f32[1,384], index: 6, kind: input, shape index: {}]   ;;  %s10091_s7 = inlined_call_operand.hbm [shape: f32[1,384], index: 7, kind: input, shape index: {}]   ;;  %s10092_s8 = inlined_call_operand.vmem [shape: bf16[128,128], index: 8, kind: input, shape index: {}]   ;;  %s10093_s9 = inlined_call_operand.hbm [shape: f32[1,128], index: 9, kind: input, shape index: {}]   ;;  %s10094_s10 = inlined_call_operand.vmem [shape: bf16[128,128], index: 10, kind: input, shape index: {}]   ;;  %s10095_s11 = inlined_call_operand.vmem [shape: bf16[128,1], index: 11, kind: input, shape index: {}]   ;;  %s10096_s12 = inlined_call_operand.hbm [shape: bf16[128,128], index: 12, kind: input, shape index: {}]   ;;  %s10097_s13 = inlined_call_operand.hbm [shape: bf16[256,384], index: 13, kind: input, shape index: {}]   ;;  %s10098_s14 = inlined_call_operand.hbm [shape: bf16[128,384], index: 14, kind: input, shape index: {}]   ;;  %s10099_s15 = inlined_call_operand.vmem [shape: f32[1,384], index: 15, kind: input, shape index: {}]   ;;  %s10100_s16 = inlined_call_operand.vmem [shape: f32[1,384], index: 16, kind: input, shape index: {}]   ;;  %s10101_s17 = inlined_call_operand.hbm [shape: bf16[128,128], index: 17, kind: input, shape index: {}]   ;;  %s10102_s18 = inlined_call_operand.vmem [shape: f32[1,128], index: 18, kind: input, shape index: {}]   ;;  %s10103_s19 = inlined_call_operand.hbm [shape: f32[5,8,128], index: 19, kind: output, shape index: {}]  }
   0x1   :  { %10300 = sst [smem:[#allocation111_spill]] %s10084_s0 }
   0x2   :  { %10301 = sst [smem:[#allocation112_spill]] %s10085_s1 }
   0x3   :  { %10302 = sst [smem:[#allocation113_spill]] %s10086_s2 }
   0x4   :  { %10303 = sst [smem:[#allocation114_spill]] %s10087_s3 }
   0x5   :  { %24 = vsyncpa [#allocation3], 0 }
   0x6   :  { %25 = vsyncpa [#allocation6], 0 }
   0x7   :  { %26 = vsyncpa [#allocation9], 0 }
   0x8   :  { %27 = vsyncpa [#allocation12], 0 }
   0x9   :  { %28 = vsyncpa [#allocation15], 0 }
   0xa   :  { %29 = vsyncpa [#allocation18], 0 }
   0xb   :  { %30 = vsyncpa [#allocation21], 0 }
   0xc   :  { %31 = vsyncpa [#allocation4], 0  ;;  %s7806_s0 = smov [#allocation5]   ;;  %s7807_s20 = smov [#allocation8]  }
   0xd   :  { %s51_s30 = sshll.u32 %s7806_s0, 4  ;;  %s73_s21 = sshll.u32 %s7807_s20, 4  ;;  %s52_s30 = int_to_ptr.vmem [resolvable:$true] %s51_s30  ;;  %s74_s21 = int_to_ptr.vmem [resolvable:$true] %s73_s21 }
   0xe   :  { %s7538_s1 = scalar_lea.vmem %s52_s30, 512  ;;  %p7543_p1 = scmp.lt.s32.totalorder %s52_s30, %s52_s30 }
   0xf   :  { %p7539_p0 = scmp.ne.s32.totalorder %s52_s30, %s7538_s1  ;;  %p7544_p2 = scmp.lt.s32.totalorder %s7538_s1, %s7538_s1 }
  0x11   :  { %p7545_p3 = por %p7544_p2, %p7543_p1 }
  0x13   :  { %p7546_p4 = pnand %p7545_p3, %p7539_p0 }
  0x15   :  { %7549 = shalt.err (!%p7546_p4)
}
  0x16   :  { %s7808_s22 = smov 64   ;;  %s7809_s2 = smov 4  }
  0x17   :  { %s10304_s25 = sld [smem:[#allocation113_spill]]  ;;  %s7558_s3 = scalar_lea.vmem %s74_s21, 3072 }
  0x18   :  { %p7559_p5 = scmp.ne.s32.totalorder %s74_s21, %s7558_s3  ;;  %p7563_p6 = scmp.lt.s32.totalorder %s74_s21, %s74_s21 }
  0x19   :  { %p7564_p7 = scmp.lt.s32.totalorder %s7558_s3, %s7558_s3 }
  0x1b   :  { %p7565_p8 = por %p7564_p7, %p7563_p6 }
  0x1d   :  { %57 = dma.hbm_to_vmem [thread:$0]  %s10304_s25, 512, %s52_s30, [#allocation6], %s7808_s22, %s7808_s22, %s7809_s2  }
  0x1e   :  { %p7566_p9 = pnand %p7565_p8, %p7559_p5 }
  0x20   :  { %7569 = shalt.err (!%p7566_p9)
}
  0x21   :  { %s7810_s26 = smov 192   ;;  %s7811_s27 = smov 12  }
  0x22   :  { %79 = dma.hbm_to_vmem [thread:$0]  %s10088_s4, 3072, %s74_s21, [#allocation9], %s7810_s26, %s7810_s26, %s7811_s27  }
  0x23   :  { %s7812_s0 = smov [#allocation11]   ;;  %s7813_s1 = smov [#allocation14]  }
  0x24   :  { %s98_s20 = sshll.u32 %s7812_s0, 4  ;;  %s120_s30 = sshll.u32 %s7813_s1, 4  ;;  %s99_s20 = int_to_ptr.vmem [resolvable:$true] %s98_s20  ;;  %s121_s30 = int_to_ptr.vmem [resolvable:$true] %s120_s30 }
  0x25   :  { %s7578_s23 = scalar_lea.vmem %s99_s20, 48  ;;  %s7582_s24 = scalar_lea.vmem %s99_s20, 64 }
  0x26   :  { %p7579_p10 = scmp.ne.s32.totalorder %s99_s20, %s7578_s23  ;;  %p7583_p11 = scmp.lt.s32.totalorder %s99_s20, %s99_s20 }
  0x27   :  { %p7584_p12 = scmp.lt.s32.totalorder %s7582_s24, %s7578_s23 }
  0x29   :  { %p7585_p13 = por %p7584_p12, %p7583_p11 }
  0x2b   :  { %p7586_p0 = pnand %p7585_p13, %p7579_p10 }
  0x2d   :  { %7589 = shalt.err (!%p7586_p0)
}
  0x2e   :  { %101 = dma.hbm_to_vmem [thread:$0]  %s10090_s6, 48, %s99_s20, [#allocation12]  }
  0x2f   :  { %s7598_s28 = scalar_lea.vmem %s121_s30, 16  ;;  %s7602_s4 = scalar_lea.vmem %s121_s30, 32 }
  0x30   :  { %p7599_p1 = scmp.ne.s32.totalorder %s121_s30, %s7598_s28  ;;  %p7603_p2 = scmp.lt.s32.totalorder %s121_s30, %s121_s30 }
  0x31   :  { %p7604_p3 = scmp.lt.s32.totalorder %s7602_s4, %s7598_s28 }
  0x33   :  { %p7605_p4 = por %p7604_p3, %p7603_p2 }
  0x35   :  { %p7606_p5 = pnand %p7605_p4, %p7599_p1 }
  0x37   :  { %7609 = shalt.err (!%p7606_p5)
}
  0x38   :  { %123 = dma.hbm_to_vmem [thread:$0]  %s10093_s9, 16, %s121_s30, [#allocation15]  }
  0x39   :  { %s7814_s0 = smov [#allocation17]   ;;  %s7815_s23 = smov [#allocation2]  }
  0x3a   :  { %s145_s1 = sshll.u32 %s7814_s0, 4  ;;  %s37_s24 = sshll.u32 %s7815_s23, 4  ;;  %s146_s1 = int_to_ptr.vmem [resolvable:$true] %s145_s1  ;;  %s38_s24 = int_to_ptr.vmem [resolvable:$true] %s37_s24 }
  0x3b   :  { %s7618_s25 = scalar_lea.vmem %s146_s1, 6144  ;;  %p7623_p7 = scmp.lt.s32.totalorder %s146_s1, %s146_s1 }
  0x3c   :  { %p7619_p6 = scmp.ne.s32.totalorder %s146_s1, %s7618_s25  ;;  %p7624_p8 = scmp.lt.s32.totalorder %s7618_s25, %s7618_s25 }
  0x3e   :  { %p7625_p9 = por %p7624_p8, %p7623_p7 }
  0x40   :  { %p7626_p10 = pnand %p7625_p9, %p7619_p6 }
  0x42   :  { %7629 = shalt.err (!%p7626_p10)
}
  0x43   :  { %151 = dma.hbm_to_vmem [thread:$0]  %s10097_s13, 6144, %s146_s1, [#allocation18], %s7810_s26, %s7810_s26, %s7811_s27  }
  0x44   :  { %s7638_s9 = scalar_lea.vmem %s38_s24, 512  ;;  %p7643_p12 = scmp.lt.s32.totalorder %s38_s24, %s38_s24 }
  0x45   :  { %p7639_p11 = scmp.ne.s32.totalorder %s38_s24, %s7638_s9  ;;  %p7644_p13 = scmp.lt.s32.totalorder %s7638_s9, %s7638_s9 }
  0x47   :  { %p7645_p0 = por %p7644_p13, %p7643_p12 }
  0x49   :  { %p7646_p1 = pnand %p7645_p0, %p7639_p11 }
  0x4b   :  { %7649 = shalt.err (!%p7646_p1)
}
  0x4c   :  { %s10305_s28 = sld [smem:[#allocation111_spill]]  ;;  %s7816_s4 = smov [#allocation7]  }
  0x4d   :  { %s64_s21 = sshll.u32 %s7816_s4, 4  ;;  %s7817_s29 = smov [#allocation10]   ;;  %s65_s21 = int_to_ptr.vmem [resolvable:$true] %s64_s21 }
  0x4e   :  { %s85_s0 = sshll.u32 %s7817_s29, 4  ;;  %s7658_s13 = scalar_lea.vmem %s65_s21, 16  ;;  %s86_s0 = int_to_ptr.vmem [resolvable:$true] %s85_s0 }
  0x4f   :  { %p7659_p2 = scmp.ne.s32.totalorder %s65_s21, %s7658_s13  ;;  %s7662_s1 = scalar_lea.vmem %s65_s21, 32 }
  0x50   :  { %p7663_p3 = scmp.lt.s32.totalorder %s65_s21, %s65_s21  ;;  %p7664_p4 = scmp.lt.s32.totalorder %s7662_s1, %s7658_s13 }
  0x52   :  { %43 = dma.hbm_to_vmem [thread:$0]  %s10305_s28, 512, %s38_s24, [#allocation3], %s7808_s22, %s7808_s22, %s7809_s2  }
  0x53   :  { %p7665_p5 = por %p7664_p4, %p7663_p3 }
  0x55   :  { %p7666_p6 = pnand %p7665_p5, %p7659_p2 }
  0x57   :  { %7669 = shalt.err (!%p7666_p6)
}
  0x58   :  { %s10306_s6 = sld [smem:[#allocation114_spill]]  ;;  %s7678_s20 = scalar_lea.vmem %s86_s0, 3072 }
  0x59   :  { %p7679_p7 = scmp.ne.s32.totalorder %s86_s0, %s7678_s20  ;;  %p7683_p8 = scmp.lt.s32.totalorder %s86_s0, %s86_s0 }
  0x5a   :  { %p7684_p9 = scmp.lt.s32.totalorder %s7678_s20, %s7678_s20 }
  0x5c   :  { %p7685_p10 = por %p7684_p9, %p7683_p8 }
  0x5e   :  { %67 = dma.hbm_to_vmem [thread:$0]  %s10306_s6, 16, %s65_s21, [#allocation6]  }
  0x5f   :  { %p7686_p11 = pnand %p7685_p10, %p7679_p7 }
  0x61   :  { %7689 = shalt.err (!%p7686_p11)
}
  0x62   :  { %91 = dma.hbm_to_vmem [thread:$0]  %s10089_s5, 3072, %s86_s0, [#allocation9], %s7810_s26, %s7810_s26, %s7811_s27  }
  0x63   :  { %s7818_s30 = smov [#allocation13]   ;;  %s7819_s28 = smov [#allocation16]  }
  0x64   :  { %s108_s3 = sshll.u32 %s7818_s30, 4  ;;  %s133_s4 = sshll.u32 %s7819_s28, 4  ;;  %s109_s3 = int_to_ptr.vmem [resolvable:$true] %s108_s3  ;;  %s134_s4 = int_to_ptr.vmem [resolvable:$true] %s133_s4 }
  0x65   :  { %s7698_s21 = scalar_lea.vmem %s109_s3, 48  ;;  %s7702_s29 = scalar_lea.vmem %s109_s3, 64 }
  0x66   :  { %p7699_p12 = scmp.ne.s32.totalorder %s109_s3, %s7698_s21  ;;  %p7703_p13 = scmp.lt.s32.totalorder %s109_s3, %s109_s3 }
  0x67   :  { %p7704_p0 = scmp.lt.s32.totalorder %s7702_s29, %s7698_s21 }
  0x69   :  { %p7705_p1 = por %p7704_p0, %p7703_p13 }
  0x6b   :  { %p7706_p2 = pnand %p7705_p1, %p7699_p12 }
  0x6d   :  { %7709 = shalt.err (!%p7706_p2)
}
  0x6e   :  { %111 = dma.hbm_to_vmem [thread:$0]  %s10091_s7, 48, %s109_s3, [#allocation12]  }
  0x6f   :  { %s7718_s23 = scalar_lea.vmem %s134_s4, 1024  ;;  %p7723_p4 = scmp.lt.s32.totalorder %s134_s4, %s134_s4 }
  0x70   :  { %p7719_p3 = scmp.ne.s32.totalorder %s134_s4, %s7718_s23  ;;  %p7724_p5 = scmp.lt.s32.totalorder %s7718_s23, %s7718_s23 }
  0x72   :  { %p7725_p6 = por %p7724_p5, %p7723_p4 }
  0x74   :  { %p7726_p7 = pnand %p7725_p6, %p7719_p3 }
  0x76   :  { %7729 = shalt.err (!%p7726_p7)
}
  0x77   :  { %139 = dma.hbm_to_vmem [thread:$0]  %s10096_s12, 1024, %s134_s4, [#allocation15], %s7808_s22, %s7808_s22, %s7809_s2  }
  0x78   :  { %s7820_s25 = smov [#allocation19]   ;;  %s7821_s20 = smov [#allocation20]  }
  0x79   :  { %s157_s6 = sshll.u32 %s7820_s25, 4  ;;  %s173_s24 = sshll.u32 %s7821_s20, 4  ;;  %s158_s6 = int_to_ptr.vmem [resolvable:$true] %s157_s6  ;;  %s174_s24 = int_to_ptr.vmem [resolvable:$true] %s173_s24 }
  0x7a   :  { %s7738_s7 = scalar_lea.vmem %s158_s6, 3072  ;;  %p7743_p9 = scmp.lt.s32.totalorder %s158_s6, %s158_s6 }
  0x7b   :  { %p7739_p8 = scmp.ne.s32.totalorder %s158_s6, %s7738_s7  ;;  %p7744_p10 = scmp.lt.s32.totalorder %s7738_s7, %s7738_s7 }
  0x7d   :  { %p7745_p11 = por %p7744_p10, %p7743_p9 }
  0x7f   :  { %p7746_p12 = pnand %p7745_p11, %p7739_p8 }
  0x81   :  { %7749 = shalt.err (!%p7746_p12)
}
  0x82   :  { %163 = dma.hbm_to_vmem [thread:$0]  %s10098_s14, 3072, %s158_s6, [#allocation18], %s7810_s26, %s7810_s26, %s7811_s27  }
  0x83   :  { %s7758_s12 = scalar_lea.vmem %s174_s24, 1024  ;;  %p7763_p0 = scmp.lt.s32.totalorder %s174_s24, %s174_s24 }
  0x84   :  { %p7759_p13 = scmp.ne.s32.totalorder %s174_s24, %s7758_s12  ;;  %p7764_p1 = scmp.lt.s32.totalorder %s7758_s12, %s7758_s12 }
  0x86   :  { %p7765_p2 = por %p7764_p1, %p7763_p0 }
  0x88   :  { %p7766_p3 = pnand %p7765_p2, %p7759_p13 }
  0x8a   :  { %7769 = shalt.err (!%p7766_p3)
}
  0x8b   :  { %179 = dma.hbm_to_vmem [thread:$0]  %s10101_s17, 1024, %s174_s24, [#allocation21], %s7808_s22, %s7808_s22, %s7809_s2  }
  0x8c   :  { %7790 = dma.done.wait [#allocation3], 512  }
  0x8d   :  { %7791 = vsyncadd [#allocation3], 4294966784 }
  0x8e   :  { %7792 = dma.done.wait [#allocation6], 528  }
  0x8f   :  { %7793 = vsyncadd [#allocation6], 4294966768 }
  0x90   :  { %7794 = dma.done.wait [#allocation9], 6144  }
  0x91   :  { %7795 = vsyncadd [#allocation9], 4294961152 }
  0x92   :  { %7796 = dma.done.wait [#allocation12], 96  }
  0x93   :  { %7797 = vsyncadd [#allocation12], 4294967200 }
  0x94   :  { %7798 = dma.done.wait [#allocation15], 1040  }
  0x95   :  { %7799 = vsyncadd [#allocation15], 4294966256 }
  0x96   :  { %7800 = dma.done.wait [#allocation18], 9216  }
  0x97   :  { %7801 = vsyncadd [#allocation18], 4294958080 }
  0x98   :  { %7802 = dma.done.wait [#allocation21], 1024  }
  0x99   :  { %7803 = vsyncadd [#allocation21], 4294966272  ;;  %v6767_v0 = vld [vmem:[#allocation5 + $0x18] sm:$0xff]   ;;  %v6768_v1 = vld [vmem:[#allocation5 + $0x10] sm:$0xff]   ;;  %vm286_vm0 = vcmask 523264   ;;  %v10105_v33 = vmov 0  }
  0x9a   :  { %5998 = vmatprep.subr.bf16.mxu0 %v6767_v0  ;;  %v6769_v2 = vld [vmem:[#allocation5 + $0x8] sm:$0xff]   ;;  %v6771_v3 = vld [vmem:[#allocation2] sm:$0xff]   ;;  %v6773_v12 = vld [vmem:[#allocation2 + $0x10] sm:$0xff]   ;;  %577 = vmatprep.mubr.bf16.mxu1 %v10105_v33  ;;  %v10107_v34 = vmov 0.0   ;;  %vm7824_vm1 = vmmov 0   ;;  %s10323_s13 = sld [smem:[#allocation112_spill]] }
  0x9b   :  { %5999 = vmatpush3.bf16.msra.mxu0 %v6767_v0  ;;  %6006 = vmatprep.mubr.msk.bf16.mxu0 %vm286_vm0, %v6771_v3  ;;  %v6770_v4 = vld [vmem:[#allocation5] sm:$0xff]   ;;  %v6775_v5 = vld [vmem:[#allocation8 + $0xac] ss:$12 sps:$4 sm:$0xff]   ;;  %v6777_v6 = vld [vmem:[#allocation8 + $0xa8] ss:$12 sps:$4 sm:$0xff]   ;;  %vm2306_vm4 = vcmask 7168  }
  0x9c   :  { %6000 = vmatprep.subr.bf16.mxu0 %v6768_v1  ;;  %545 = vmatprep.subr.bf16.mxu1 %v6775_v5  ;;  %v6779_v7 = vld [vmem:[#allocation8 + $0x94] ss:$12 sps:$4 sm:$0xff]   ;;  %v6781_v8 = vld [vmem:[#allocation8 + $0x90] ss:$12 sps:$4 sm:$0xff]   ;;  %v6772_v10 = vld [vmem:[#allocation2 + $0x8] sm:$0xff]   ;;  %s7826_s7 = smov [#allocation22]  }
  0x9d   :  { %546 = vmatpush1.bf16.msra.mxu1 %v6777_v6  ;;  %v6778_v9 = vld [vmem:[#allocation8 + $0xb0] ss:$12 sps:$4 sm:$0xff]   ;;  %v6782_v13 = vld [vmem:[#allocation8 + $0x98] ss:$12 sps:$4 sm:$0xff]   ;;  %v6786_v16 = vld [vmem:[#allocation8 + $0x80] ss:$12 sps:$4 sm:$0xff]   ;;  %6765 = vset.pattern.permute.xlu0 %v10105_v33 }
  0x9e   :  { %547 = vmatprep.subr.bf16.mxu1 %v6779_v7  ;;  %v6783_v11 = vld [vmem:[#allocation8 + $0x7c] ss:$12 sps:$4 sm:$0xff]   ;;  %v6785_v14 = vld [vmem:[#allocation8 + $0x78] ss:$12 sps:$4 sm:$0xff]   ;;  %v6789_v18 = vld [vmem:[#allocation8 + $0x60] ss:$12 sps:$4 sm:$0xff]   ;;  %6766 = vset.pattern.permute.xlu1 %v10105_v33 }
  0x9f   :  { %6001 = vmatpush3.bf16.msra.mxu0 %v6768_v1  ;;  %v6787_v15 = vld [vmem:[#allocation8 + $0x64] ss:$12 sps:$4 sm:$0xff]   ;;  %v6774_v17 = vld [vmem:[#allocation2 + $0x18] sm:$0xff]   ;;  %v6802_v28 = vld [vmem:[#allocation8 + $0x20] ss:$12 sps:$4 sm:$0xff]   ;;  %s5310_s9 = sshll.u32 %s7826_s7, 4  ;;  %s5311_s9 = int_to_ptr.vmem [resolvable:$true] %s5310_s9 }
  0xa0   :  { %6002 = vmatprep.subr.bf16.mxu0 %v6769_v2  ;;  %v6791_v19 = vld [vmem:[#allocation8 + $0x4c] ss:$12 sps:$4 sm:$0xff]   ;;  %v6790_v20 = vld [vmem:[#allocation8 + $0x68] ss:$12 sps:$4 sm:$0xff]   ;;  %v6794_v23 = vld [vmem:[#allocation8 + $0x50] ss:$12 sps:$4 sm:$0xff]   ;;  %p7775_p5 = scmp.lt.s32.totalorder %s5311_s9, %s5311_s9 }
  0xa1   :  { %548 = vmatpush1.bf16.msra.mxu1 %v6781_v8  ;;  %v6793_v21 = vld [vmem:[#allocation8 + $0x48] ss:$12 sps:$4 sm:$0xff]   ;;  %v6797_v24 = vld [vmem:[#allocation8 + $0x30] ss:$12 sps:$4 sm:$0xff]   ;;  %v6798_v25 = vld [vmem:[#allocation8 + $0x38] ss:$12 sps:$4 sm:$0xff]  }
  0xa2   :  { %549 = vmatprep.subr.bf16.mxu1 %v6783_v11  ;;  %v6795_v22 = vld [vmem:[#allocation8 + $0x34] ss:$12 sps:$4 sm:$0xff]   ;;  %v6799_v26 = vld [vmem:[#allocation8 + $0x1c] ss:$12 sps:$4 sm:$0xff]   ;;  %v6801_v27 = vld [vmem:[#allocation8 + $0x18] ss:$12 sps:$4 sm:$0xff]  }
  0xa3   :  { %6003 = vmatpush3.bf16.msra.mxu0 %v6769_v2  ;;  %v6803_v29 = vld [vmem:[#allocation8 + $0x4] ss:$12 sps:$4 sm:$0xff]   ;;  %v6805_v30 = vld [vmem:[#allocation8] ss:$12 sps:$4 sm:$0xff]   ;;  %v6806_v31 = vld [vmem:[#allocation8 + $0x8] ss:$12 sps:$4 sm:$0xff]  }
  0xa4   :  { %6004 = vmatprep.subr.bf16.mxu0 %v6770_v4  ;;  %v7993_v32 = vld [vmem:[#allocation10 + $0xac] ss:$12 sps:$4 sm:$0xff]   ;;  %v5328_v38 = vld [vmem:[#allocation7] ss:$0 sm:$0xff]  ;;  %v8000_v45 = vld [vmem:[#allocation10 + $0xa8] ss:$12 sps:$4 sm:$0xff]  }
  0xa5   :  { %550 = vmatpush1.bf16.msra.mxu1 %v6785_v14  ;;  %v8002_v47 = vld [vmem:[#allocation10 + $0x94] ss:$12 sps:$4 sm:$0xff]   ;;  %v8004_v50 = vld [vmem:[#allocation10 + $0xb0] ss:$12 sps:$4 sm:$0xff]   ;;  %v8014_v58 = vld [vmem:[#allocation10 + $0x98] ss:$12 sps:$4 sm:$0xff]  }
  0xa6   :  { %551 = vmatprep.subr.bf16.mxu1 %v6787_v15  ;;  %v8007_v53 = vld [vmem:[#allocation10 + $0x90] ss:$12 sps:$4 sm:$0xff]   ;;  %v8018_v61 = vld [vmem:[#allocation10 + $0x78] ss:$12 sps:$4 sm:$0xff]   ;;  %v8024_v0 = vld [vmem:[#allocation10 + $0x80] ss:$12 sps:$4 sm:$0xff]   ;;  %v10104_v15 = vlaneseq }
  0xa7   :  { %6005 = vmatpush3.bf16.msra.mxu0 %v6770_v4  ;;  %v8011_v56 = vld [vmem:[#allocation10 + $0x7c] ss:$12 sps:$4 sm:$0xff]   ;;  %v8021_v63 = vld [vmem:[#allocation10 + $0x64] ss:$12 sps:$4 sm:$0xff]   ;;  %v8027_v1 = vld [vmem:[#allocation10 + $0x60] ss:$12 sps:$4 sm:$0xff]  }
  0xa8   :  { %6014 = vmatprep.subr.bf16.mxu0 %v6778_v9  ;;  %v8031_v2 = vld [vmem:[#allocation10 + $0x4c] ss:$12 sps:$4 sm:$0xff]   ;;  %v8037_v3 = vld [vmem:[#allocation10 + $0x68] ss:$12 sps:$4 sm:$0xff]   ;;  %v8047_v6 = vld [vmem:[#allocation10 + $0x50] ss:$12 sps:$4 sm:$0xff]  }
  0xa9   :  { %552 = vmatpush1.bf16.msra.mxu1 %v6789_v18  ;;  %v8040_v4 = vld [vmem:[#allocation10 + $0x48] ss:$12 sps:$4 sm:$0xff]   ;;  %v8050_v7 = vld [vmem:[#allocation10 + $0x30] ss:$12 sps:$4 sm:$0xff]   ;;  %v400_v18 = vld [vmem:[#allocation11] sm:$0x7] }
  0xaa   :  { %6007 = vmatmul.mubr.msk.bf16.vlgmr.msra.gmra.mxu0 %vm286_vm0, %v6772_v10  ;;  %553 = vmatprep.subr.bf16.mxu1 %v6791_v19  ;;  %v8044_v5 = vld [vmem:[#allocation10 + $0x34] ss:$12 sps:$4 sm:$0xff]   ;;  %v8054_v8 = vld [vmem:[#allocation10 + $0x1c] ss:$12 sps:$4 sm:$0xff]   ;;  %v8061_v10 = vld [vmem:[#allocation10 + $0x18] ss:$12 sps:$4 sm:$0xff]  }
  0xab   :  { %6010 = vmatprep.mubr.msk.bf16.mxu0 %vm286_vm0, %v6773_v12  ;;  %6015 = vmatpush3.bf16.msra.mxu0 %v6778_v9  ;;  %v8058_v9 = vld [vmem:[#allocation10 + $0x38] ss:$12 sps:$4 sm:$0xff]   ;;  %v8068_v12 = vld [vmem:[#allocation10 + $0x20] ss:$12 sps:$4 sm:$0xff]   ;;  %v8077_v14 = vld [vmem:[#allocation10 + $0x8] ss:$12 sps:$4 sm:$0xff]  }
  0xac   :  { %6016 = vmatprep.subr.bf16.mxu0 %v6782_v13  ;;  %v8065_v11 = vld [vmem:[#allocation10 + $0x4] ss:$12 sps:$4 sm:$0xff]  }
  0xad   :  { %554 = vmatpush1.bf16.msra.mxu1 %v6793_v21 }
  0xae   :  { %555 = vmatprep.subr.bf16.mxu1 %v6795_v22 }
  0xaf   :  { %6017 = vmatpush3.bf16.msra.mxu0 %v6782_v13  ;;  %v8071_v13 = vld [vmem:[#allocation10] ss:$12 sps:$4 sm:$0xff]  }
  0xb0   :  { %6018 = vmatprep.subr.bf16.mxu0 %v6786_v16 }
  0xb1   :  { %556 = vmatpush1.bf16.msra.mxu1 %v6797_v24 }
  0xb2   :  { %6011 = vmatmul.mubr.msk.bf16.gmra.mxu0 %vm286_vm0, %v6774_v17  ;;  %557 = vmatprep.subr.bf16.mxu1 %v6799_v26 }
  0xb3   :  { %6019 = vmatpush3.bf16.msra.mxu0 %v6786_v16  ;;  %v403_v16 = vshrl.u32 %v10104_v15, 7 }
  0xb4   :  { %6020 = vmatprep.subr.bf16.mxu0 %v6790_v20 }
  0xb5   :  { %558 = vmatpush1.bf16.msra.mxu1 %v6801_v27  ;;  %v8122_v17 = vsub.s32 2, %v403_v16 }
  0xb6   :  { %559 = vmatprep.subr.bf16.mxu1 %v6803_v29 }
  0xb7   :  { %6021 = vmatpush3.bf16.msra.mxu0 %v6790_v20  ;;  %10307 = vst [vmem:[#allocation31_spill] sm:$0xff] %v8122_v17  ;;  %v8125_v19 = vrot.slane %v400_v18, %v8122_v17  ;;  %v8127_v20 = vsub.s32 0, %v403_v16 }
  0xb8   :  { %6022 = vmatprep.subr.bf16.mxu0 %v6794_v23 }
  0xb9   :  { %560 = vmatpush1.bf16.msra.mxu1 %v6805_v30  ;;  %10308 = vst [vmem:[#allocation32_spill] sm:$0xff] %v8127_v20 }
  0xba   :  { %860 = vmatprep.subr.bf16.mxu1 %v7993_v32 }
  0xbb   :  { %6023 = vmatpush3.bf16.msra.mxu0 %v6794_v23 }
  0xbc   :  { %6024 = vmatprep.subr.bf16.mxu0 %v6798_v25 }
  0xbf   :  { %6025 = vmatpush3.bf16.msra.mxu0 %v6798_v25  ;;  %v405_v25 = vrot.slane %v400_v18, %v8127_v20 }
  0xc0   :  { %6026 = vmatprep.subr.bf16.mxu0 %v6802_v28 }
  0xc3   :  { %6027 = vmatpush3.bf16.msra.mxu0 %v6802_v28  ;;  %v8135_v28 = vsub.s32 1, %v403_v16 }
  0xc4   :  { %6028 = vmatprep.subr.bf16.mxu0 %v6806_v31 }
  0xc5   :  { %10309 = vst [vmem:[#allocation33_spill] sm:$0xff] %v8135_v28 }
  0xc7   :  { %6029 = vmatpush3.bf16.msra.mxu0 %v6806_v31 }
  0xc8   :  { %6038 = vmatprep.subr.bf16.mxu0 %v10107_v34 }
 0x16a   :  { %v6008_v35 = vpop.f32.mrf.mxu0 }
 0x16b   :  { %v342_v43 = vadd.f32 %v6008_v35, %v5328_v38 }
 0x16c   :  { %v333_v36 = vpop.f32.mrf.mxu0 }
 0x16d   :  { %v334_v41 = vadd.f32 %v5328_v38, %v333_v36 }
 0x16e   :  { %v6009_v37 = vpop.f32.mrf.mxu0 }
 0x16f   :  { %v345_v39 = vadd.f32 %v6009_v37, %v5328_v38 }
 0x170   :  { %v336_v40 = vpop.f32.mrf.mxu0 }
 0x171   :  { %v337_v42 = vadd.f32 %v5328_v38, %v336_v40  ;;  %v365_v48 = vpack.c.bf16 %v345_v39, %v342_v43 }
 0x172   :  { %v6012_v44 = vpop.f32.mrf.mxu0 }
 0x173   :  { %v364_v46 = vpack.c.bf16 %v337_v42, %v334_v41  ;;  %v358_v51 = vadd.f32 %v6012_v44, %v5328_v38 }
 0x174   :  { %v349_v49 = vpop.f32.mrf.mxu0 }
 0x175   :  { %578 = vmatmul.mubr.bf16.vlgmr.msra.gmra.mxu1 %v364_v46  ;;  %6030 = vmatprep.mubr.bf16.mxu0 %v364_v46  ;;  %v350_v54 = vadd.f32 %v5328_v38, %v349_v49 }
 0x176   :  { %861 = vmatpush1.bf16.msra.mxu1 %v8000_v45  ;;  %v6013_v52 = vpop.f32.mrf.mxu0  ;;  %6031 = vmatmul.mubr.bf16.vlgmr.msra.gmra.mxu0 %v365_v48 }
 0x177   :  { %v361_v55 = vadd.f32 %v6013_v52, %v5328_v38  ;;  %862 = vmatprep.subr.bf16.mxu1 %v8002_v47  ;;  %587 = vmatprep.mubr.bf16.mxu1 %v10105_v33 }
 0x178   :  { %v352_v57 = vpop.f32.mrf.mxu0  ;;  %6039 = vmatpush3.bf16.msra.mxu0 %v8004_v50 }
 0x179   :  { %v353_v59 = vadd.f32 %v5328_v38, %v352_v57  ;;  %6040 = vmatprep.subr.bf16.mxu0 %v10107_v34  ;;  %v367_v60 = vpack.c.bf16 %v361_v55, %v358_v51  ;;  %v8147_v38 = vrot.slane %v400_v18, %v8135_v28 }
 0x17a   :  { %863 = vmatpush1.bf16.msra.mxu1 %v8007_v53 }
 0x17b   :  { %v366_v62 = vpack.c.bf16 %v353_v59, %v350_v54  ;;  %864 = vmatprep.subr.bf16.mxu1 %v8011_v56 }
 0x17c   :  { %6041 = vmatpush3.bf16.msra.mxu0 %v8014_v58 }
 0x17d   :  { %588 = vmatmul.mubr.bf16.gmra.mxu1 %v365_v48  ;;  %6034 = vmatprep.mubr.bf16.mxu0 %v366_v62 }
 0x17e   :  { %865 = vmatpush1.bf16.msra.mxu1 %v8018_v61  ;;  %6035 = vmatmul.mubr.bf16.gmra.mxu0 %v367_v60 }
 0x17f   :  { %866 = vmatprep.subr.bf16.mxu1 %v8021_v63  ;;  %597 = vmatprep.mubr.bf16.mxu1 %v10105_v33 }
 0x180   :  { %6042 = vmatprep.subr.bf16.mxu0 %v10107_v34  ;;  %6054 = vmatprep.mubr.msk.bf16.mxu0 %vm7824_vm1, %v10107_v34 }
 0x181   :  { %6043 = vmatpush3.bf16.msra.mxu0 %v8024_v0 }
 0x182   :  { %867 = vmatpush1.bf16.msra.mxu1 %v8027_v1  ;;  %6044 = vmatprep.subr.bf16.mxu0 %v10107_v34 }
 0x183   :  { %868 = vmatprep.subr.bf16.mxu1 %v8031_v2 }
 0x185   :  { %598 = vmatmul.mubr.bf16.gmra.mxu1 %v366_v62  ;;  %6045 = vmatpush3.bf16.msra.mxu0 %v8037_v3 }
 0x186   :  { %869 = vmatpush1.bf16.msra.mxu1 %v8040_v4  ;;  %607 = vmatprep.mubr.bf16.mxu1 %v10105_v33 }
 0x187   :  { %870 = vmatprep.subr.bf16.mxu1 %v8044_v5  ;;  %6046 = vmatprep.subr.bf16.mxu0 %v10107_v34 }
 0x189   :  { %6047 = vmatpush3.bf16.msra.mxu0 %v8047_v6 }
 0x18a   :  { %871 = vmatpush1.bf16.msra.mxu1 %v8050_v7  ;;  %6048 = vmatprep.subr.bf16.mxu0 %v10107_v34 }
 0x18b   :  { %872 = vmatprep.subr.bf16.mxu1 %v8054_v8 }
 0x18d   :  { %608 = vmatmul.mubr.bf16.gmra.mxu1 %v367_v60  ;;  %6049 = vmatpush3.bf16.msra.mxu0 %v8058_v9 }
 0x18e   :  { %873 = vmatpush1.bf16.msra.mxu1 %v8061_v10  ;;  %892 = vmatprep.mubr.bf16.mxu1 %v10105_v33 }
 0x18f   :  { %874 = vmatprep.subr.bf16.mxu1 %v8065_v11  ;;  %6050 = vmatprep.subr.bf16.mxu0 %v10107_v34 }
 0x191   :  { %6051 = vmatpush3.bf16.msra.mxu0 %v8068_v12 }
 0x192   :  { %875 = vmatpush1.bf16.msra.mxu1 %v8071_v13  ;;  %6052 = vmatprep.subr.bf16.mxu0 %v10107_v34 }
 0x193   :  { %963 = vmatprep.subr.bf16.mxu1 %v7993_v32 }
 0x195   :  { %893 = vmatmul.mubr.bf16.vlgmr.msra.gmra.mxu1 %v10105_v33  ;;  %6053 = vmatpush3.bf16.msra.mxu0 %v8077_v14 }
 0x196   :  { %6058 = vmatprep.subr.bf16.mxu0 %v10107_v34  ;;  %964 = vmatpush1.bf16.msra.mxu1 %v8000_v45 }
 0x197   :  { %965 = vmatprep.subr.bf16.mxu1 %v8002_v47  ;;  %995 = vmatprep.mubr.bf16.mxu1 %v10105_v33 }
 0x198   :  { %6055 = vmatmul.mubr.bf16.vlgmr.msra.gmra.mxu0 %v10105_v33 }
 0x199   :  { %6059 = vmatpush3.bf16.msra.mxu0 %v8004_v50  ;;  %6074 = vmatprep.mubr.msk.bf16.mxu0 %vm7824_vm1, %v10107_v34 }
 0x19a   :  { %6060 = vmatprep.subr.bf16.mxu0 %v10107_v34  ;;  %966 = vmatpush1.bf16.msra.mxu1 %v8007_v53 }
 0x19b   :  { %967 = vmatprep.subr.bf16.mxu1 %v8011_v56 }
 0x19d   :  { %6061 = vmatpush3.bf16.msra.mxu0 %v8014_v58 }
 0x19e   :  { %6062 = vmatprep.subr.bf16.mxu0 %v10107_v34  ;;  %968 = vmatpush1.bf16.msra.mxu1 %v8018_v61 }
 0x19f   :  { %969 = vmatprep.subr.bf16.mxu1 %v8021_v63 }
 0x1a1   :  { %6063 = vmatpush3.bf16.msra.mxu0 %v8024_v0 }
 0x1a2   :  { %6064 = vmatprep.subr.bf16.mxu0 %v10107_v34  ;;  %970 = vmatpush1.bf16.msra.mxu1 %v8027_v1 }
 0x1a3   :  { %971 = vmatprep.subr.bf16.mxu1 %v8031_v2 }
 0x1a5   :  { %6065 = vmatpush3.bf16.msra.mxu0 %v8037_v3 }
 0x1a6   :  { %6066 = vmatprep.subr.bf16.mxu0 %v10107_v34  ;;  %972 = vmatpush1.bf16.msra.mxu1 %v8040_v4 }
 0x1a7   :  { %973 = vmatprep.subr.bf16.mxu1 %v8044_v5 }
 0x1a9   :  { %6067 = vmatpush3.bf16.msra.mxu0 %v8047_v6 }
 0x1aa   :  { %6068 = vmatprep.subr.bf16.mxu0 %v10107_v34  ;;  %974 = vmatpush1.bf16.msra.mxu1 %v8050_v7 }
 0x1ab   :  { %975 = vmatprep.subr.bf16.mxu1 %v8054_v8 }
 0x1ad   :  { %6069 = vmatpush3.bf16.msra.mxu0 %v8058_v9 }
 0x1ae   :  { %6070 = vmatprep.subr.bf16.mxu0 %v10107_v34  ;;  %976 = vmatpush1.bf16.msra.mxu1 %v8061_v10 }
 0x1af   :  { %977 = vmatprep.subr.bf16.mxu1 %v8065_v11 }
 0x1b1   :  { %6071 = vmatpush3.bf16.msra.mxu0 %v8068_v12 }
 0x1b2   :  { %6072 = vmatprep.subr.bf16.mxu0 %v10107_v34  ;;  %978 = vmatpush1.bf16.msra.mxu1 %v8071_v13 }
 0x1b3   :  { %1066 = vmatprep.subr.bf16.mxu1 %v7993_v32 }
 0x1b5   :  { %6073 = vmatpush3.bf16.msra.mxu0 %v8077_v14 }
 0x1b6   :  { %6078 = vmatprep.subr.bf16.mxu0 %v10107_v34 }
 0x235   :  { %v579_v21 = vpop.f32.mrf.mxu1 }
 0x236   :  { %v6032_v22 = vpop.f32.mrf.mxu0 }
 0x237   :  { %v8130_v23 = vadd.f32 %v6032_v22, %v8125_v19  ;;  %v581_v24 = vpop.f32.mrf.mxu1 }
 0x238   :  { %v8133_v26 = vpop.f32.mrf.mxu0 }
 0x239   :  { %v583_v27 = vpop.f32.mrf.mxu1 }
 0x23a   :  { %v8137_v29 = vadd.f32 %v583_v27, %v405_v25  ;;  %v6033_v30 = vpop.f32.mrf.mxu0 }
 0x23b   :  { %v8140_v31 = vadd.f32 %v6033_v30, %v8125_v19  ;;  %v8142_v35 = vpop.f32.mrf.mxu1 }
 0x23c   :  { %v8144_v36 = vpop.f32.mrf.mxu0 }
 0x23d   :  { %v589_v37 = vpop.f32.mrf.mxu1 }
 0x23e   :  { %v8149_v39 = vadd.f32 %v589_v37, %v405_v25  ;;  %v6036_v40 = vpop.f32.mrf.mxu0  ;;  %v715_v37 = vld [vmem:[#allocation13] sm:$0x7] }
 0x23f   :  { %v8152_v41 = vadd.f32 %v6036_v40, %v8125_v19  ;;  %v591_v42 = vpop.f32.mrf.mxu1  ;;  %v8192_v15 = vrot.slane %v715_v37, %v8135_v28 }
 0x240   :  { %v8155_v43 = vadd.f32 %v591_v42, %v8147_v38  ;;  %v668_v44 = vpop.f32.mrf.mxu0 }
 0x241   :  { %10310 = vst [vmem:[#allocation34_spill] sm:$0xff] %v8152_v41  ;;  %v8158_v46 = vadd.f32 %v668_v44, %v8125_v19  ;;  %v593_v48 = vpop.f32.mrf.mxu1 }
 0x242   :  { %v8160_v49 = vadd.f32 %v593_v48, %v405_v25  ;;  %v6037_v51 = vpop.f32.mrf.mxu0  ;;  %v8184_v48 = vrot.slane %v715_v37, %v8127_v20 }
 0x243   :  { %v8163_v52 = vadd.f32 %v6037_v51, %v8125_v19  ;;  %v8165_v54 = vpop.f32.mrf.mxu1 }
 0x245   :  { %10311 = vst [vmem:[#allocation35_spill] sm:$0xff] %v8163_v52  ;;  %v599_v55 = vpop.f32.mrf.mxu1 }
 0x246   :  { %v8167_v57 = vadd.f32 %v599_v55, %v405_v25 }
 0x247   :  { %v601_v59 = vpop.f32.mrf.mxu1 }
 0x248   :  { %v8170_v60 = vadd.f32 %v601_v59, %v8147_v38  ;;  %v580_v59 = vadd.f32 %v579_v21, %v405_v25 }
 0x249   :  { %v603_v62 = vpop.f32.mrf.mxu1 }
 0x24a   :  { %v8172_v16 = vadd.f32 %v603_v62, %v405_v25  ;;  %v8188_v62 = vpop.f32.mrf.mxu0 }
 0x24b   :  { %v8174_v18 = vpop.f32.mrf.mxu1 }
 0x24d   :  { %v609_v22 = vpop.f32.mrf.mxu1 }
 0x24e   :  { %v8176_v27 = vadd.f32 %v609_v22, %v405_v25 }
 0x24f   :  { %v611_v30 = vpop.f32.mrf.mxu1 }
 0x250   :  { %10312 = vst [vmem:[#allocation36_spill] sm:$0xff] %v8176_v27  ;;  %v8179_v40 = vadd.f32 %v611_v30, %v8147_v38 }
 0x251   :  { %v613_v42 = vpop.f32.mrf.mxu1 }
 0x252   :  { %10313 = vst [vmem:[#allocation37_spill] sm:$0xff] %v8179_v40  ;;  %v8181_v44 = vadd.f32 %v613_v42, %v405_v25 }
 0x253   :  { %v8186_v51 = vpop.f32.mrf.mxu1 }
 0x254   :  { %10314 = vst [vmem:[#allocation38_spill] sm:$0xff] %v8181_v44  ;;  %10315 = vst [vmem:[#allocation39_spill] sm:$0xff] %v8186_v51  ;;  %v582_v51 = vadd.f32 %v581_v24, %v8147_v38  ;;  %v653_v24 = vadd.f32 %v8133_v26, %v8125_v19  ;;  %v10318_v26 = vmov 0  }
 0x255   :  { %v894_v55 = vpop.f32.mrf.mxu1 }
 0x256   :  { %v895_v22 = vadd.f32 %v894_v55, %v8184_v48 }
 0x257   :  { %v896_v33 = vpop.f32.mrf.mxu1 }
 0x258   :  { %v941_v30 = vadd.f32 %v895_v22, %v580_v59  ;;  %v935_v34 = vpop.f32.mrf.mxu0  ;;  %v897_v44 = vadd.f32 %v896_v33, %v8192_v15  ;;  %v8197_v59 = vrot.slane %v715_v37, %v8122_v17 }
 0x259   :  { %v898_v52 = vpop.f32.mrf.mxu1 }
 0x25a   :  { %v5389_v42 = vmul.f32 -1.442695, %v941_v30  ;;  %v6056_v20 = vpop.f32.mrf.mxu0  ;;  %v948_v25 = vadd.f32 %v897_v44, %v582_v51  ;;  %v936_v33 = vadd.f32 %v935_v34, %v8197_v59  ;;  %v10317_v34 = vmov 0.0  }
 0x25b   :  { %v899_v41 = vpop.f32.mrf.mxu1 }
 0x25c   :  { %6975 = vpow2.f32 %v5389_v42  ;;  %v938_v21 = vpop.f32.mrf.mxu0  ;;  %v5390_v27 = vmul.f32 -1.442695, %v948_v25 }
 0x25e   :  { %v6057_v40 = vpop.f32.mrf.mxu0  ;;  %6977 = vpow2.f32 %v5390_v27 }
 0x269   :  { %v6976_v55 = vpop.eup %6975 }
 0x26a   :  { %v945_v28 = vadd.f32 1.0, %v6976_v55 }
 0x26b   :  { %v6978_v52 = vpop.eup %6977 }
 0x26c   :  { %6979 = vrcp.f32 %v945_v28  ;;  %v952_v22 = vadd.f32 1.0, %v6978_v52 }
 0x26e   :  { %6981 = vrcp.f32 %v952_v22 }
 0x279   :  { %v6980_v20 = vpop.eup %6979 }
 0x27a   :  { %v955_v41 = vmul.f32 %v6980_v20, %v936_v33 }
 0x27b   :  { %v6982_v40 = vpop.eup %6981 }
 0x27c   :  { %v956_v44 = vadd.f32 %v955_v41, %v653_v24  ;;  %v958_v27 = vsub.f32 1.0, %v6982_v40  ;;  %v960_v30 = vmul.f32 0.0, %v6982_v40 }
 0x27e   :  { %6983 = vtanh.f32 %v956_v44 }
 0x28b   :  { %v6984_v51 = vpop.eup %6983 }
 0x28c   :  { %v959_v28 = vmul.f32 %v6984_v51, %v958_v27  ;;  %v586_v51 = vadd.f32 %v8142_v35, %v8147_v38 }
 0x28e   :  { %v8202_v42 = vadd.f32 %v960_v30, %v959_v28 }
 0x290   :  { %10316 = vst [vmem:[#allocation40_spill] sm:$0xff] %v8202_v42  ;;  %v962_v37 = vpack.c.bf16 %v8202_v42, %v8202_v42 }
 0x292   :  { %996 = vmatmul.mubr.bf16.vlgmr.msra.gmra.mxu1 %v962_v37  ;;  %6075 = vmatmul.mubr.bf16.vlgmr.msra.gmra.mxu0 %v962_v37 }
 0x293   :  { %1067 = vmatpush1.bf16.msra.mxu1 %v8000_v45  ;;  %6079 = vmatpush3.bf16.msra.mxu0 %v8004_v50 }
 0x294   :  { %1068 = vmatprep.subr.bf16.mxu1 %v8002_v47  ;;  %6080 = vmatprep.subr.bf16.mxu0 %v10317_v34 }
 0x295   :  { %1098 = vmatprep.mubr.bf16.mxu1 %v10318_v26  ;;  %6094 = vmatprep.mubr.msk.bf16.mxu0 %vm7824_vm1, %v10317_v34 }
 0x297   :  { %1069 = vmatpush1.bf16.msra.mxu1 %v8007_v53  ;;  %6081 = vmatpush3.bf16.msra.mxu0 %v8014_v58 }
 0x298   :  { %1070 = vmatprep.subr.bf16.mxu1 %v8011_v56  ;;  %6082 = vmatprep.subr.bf16.mxu0 %v10317_v34 }
 0x29b   :  { %1071 = vmatpush1.bf16.msra.mxu1 %v8018_v61  ;;  %6083 = vmatpush3.bf16.msra.mxu0 %v8024_v0 }
 0x29c   :  { %1072 = vmatprep.subr.bf16.mxu1 %v8021_v63  ;;  %6084 = vmatprep.subr.bf16.mxu0 %v10317_v34 }
 0x29f   :  { %1073 = vmatpush1.bf16.msra.mxu1 %v8027_v1  ;;  %6085 = vmatpush3.bf16.msra.mxu0 %v8037_v3 }
 0x2a0   :  { %1074 = vmatprep.subr.bf16.mxu1 %v8031_v2  ;;  %6086 = vmatprep.subr.bf16.mxu0 %v10317_v34 }
 0x2a3   :  { %1075 = vmatpush1.bf16.msra.mxu1 %v8040_v4  ;;  %6087 = vmatpush3.bf16.msra.mxu0 %v8047_v6 }
 0x2a4   :  { %1076 = vmatprep.subr.bf16.mxu1 %v8044_v5  ;;  %6088 = vmatprep.subr.bf16.mxu0 %v10317_v34 }
 0x2a7   :  { %1077 = vmatpush1.bf16.msra.mxu1 %v8050_v7  ;;  %6089 = vmatpush3.bf16.msra.mxu0 %v8058_v9 }
 0x2a8   :  { %1078 = vmatprep.subr.bf16.mxu1 %v8054_v8  ;;  %6090 = vmatprep.subr.bf16.mxu0 %v10317_v34 }
 0x2ab   :  { %1079 = vmatpush1.bf16.msra.mxu1 %v8061_v10  ;;  %6091 = vmatpush3.bf16.msra.mxu0 %v8068_v12 }
 0x2ac   :  { %1080 = vmatprep.subr.bf16.mxu1 %v8065_v11  ;;  %6092 = vmatprep.subr.bf16.mxu0 %v10317_v34 }
 0x2af   :  { %1081 = vmatpush1.bf16.msra.mxu1 %v8071_v13  ;;  %6093 = vmatpush3.bf16.msra.mxu0 %v8077_v14 }
 0x2b0   :  { %1169 = vmatprep.subr.bf16.mxu1 %v7993_v32  ;;  %6098 = vmatprep.subr.bf16.mxu0 %v10317_v34 }
 0x352   :  { %v997_v21 = vpop.f32.mrf.mxu1  ;;  %v1038_v25 = vpop.f32.mrf.mxu0 }
 0x353   :  { %v998_v55 = vadd.f32 %v997_v21, %v8184_v48 }
 0x354   :  { %v999_v52 = vpop.f32.mrf.mxu1  ;;  %v6076_v22 = vpop.f32.mrf.mxu0 }
 0x355   :  { %v1044_v33 = vadd.f32 %v998_v55, %v8137_v29  ;;  %v1000_v44 = vadd.f32 %v999_v52, %v8192_v15  ;;  %v1039_v29 = vadd.f32 %v1038_v25, %v8197_v59  ;;  %v656_v52 = vadd.f32 %v8144_v36, %v8125_v19 }
 0x356   :  { %v1001_v20 = vpop.f32.mrf.mxu1  ;;  %v1041_v24 = vpop.f32.mrf.mxu0 }
 0x357   :  { %v5391_v41 = vmul.f32 -1.442695, %v1044_v33  ;;  %v1051_v30 = vadd.f32 %v1000_v44, %v586_v51 }
 0x358   :  { %v1002_v40 = vpop.f32.mrf.mxu1  ;;  %v6077_v27 = vpop.f32.mrf.mxu0 }
 0x359   :  { %6985 = vpow2.f32 %v5391_v41  ;;  %v5392_v28 = vmul.f32 -1.442695, %v1051_v30 }
 0x35b   :  { %6987 = vpow2.f32 %v5392_v28 }
 0x366   :  { %v6986_v37 = vpop.eup %6985 }
 0x367   :  { %v1048_v21 = vadd.f32 1.0, %v6986_v37 }
 0x368   :  { %v6988_v22 = vpop.eup %6987 }
 0x369   :  { %6989 = vrcp.f32 %v1048_v21  ;;  %v1055_v17 = vadd.f32 1.0, %v6988_v22 }
 0x36b   :  { %6991 = vrcp.f32 %v1055_v17 }
 0x376   :  { %v6990_v55 = vpop.eup %6989 }
 0x377   :  { %v1058_v33 = vmul.f32 %v6990_v55, %v1039_v29 }
 0x378   :  { %v6992_v35 = vpop.eup %6991 }
 0x379   :  { %v1059_v20 = vadd.f32 %v1058_v33, %v656_v52  ;;  %v1061_v24 = vsub.f32 1.0, %v6992_v35  ;;  %v1063_v40 = vmul.f32 %v6992_v35, %v8202_v42 }
 0x37b   :  { %6993 = vtanh.f32 %v1059_v20 }
 0x388   :  { %v6994_v41 = vpop.eup %6993 }
 0x389   :  { %v1062_v44 = vmul.f32 %v6994_v41, %v1061_v24 }
 0x38b   :  { %v8250_v27 = vadd.f32 %v1063_v40, %v1062_v44 }
 0x38d   :  { %10319 = vst [vmem:[#allocation41_spill] sm:$0xff] %v8250_v27  ;;  %v1065_v51 = vpack.c.bf16 %v8250_v27, %v8250_v27 }
 0x38f   :  { %1099 = vmatmul.mubr.bf16.vlgmr.msra.gmra.mxu1 %v1065_v51  ;;  %6095 = vmatmul.mubr.bf16.vlgmr.msra.gmra.mxu0 %v1065_v51 }
 0x390   :  { %1170 = vmatpush1.bf16.msra.mxu1 %v8000_v45  ;;  %6099 = vmatpush3.bf16.msra.mxu0 %v8004_v50 }
 0x391   :  { %1171 = vmatprep.subr.bf16.mxu1 %v8002_v47  ;;  %6100 = vmatprep.subr.bf16.mxu0 %v10317_v34 }
 0x392   :  { %1201 = vmatprep.mubr.bf16.mxu1 %v10318_v26  ;;  %6114 = vmatprep.mubr.msk.bf16.mxu0 %vm7824_vm1, %v10317_v34 }
 0x394   :  { %1172 = vmatpush1.bf16.msra.mxu1 %v8007_v53  ;;  %6101 = vmatpush3.bf16.msra.mxu0 %v8014_v58 }
 0x395   :  { %1173 = vmatprep.subr.bf16.mxu1 %v8011_v56  ;;  %6102 = vmatprep.subr.bf16.mxu0 %v10317_v34 }
 0x398   :  { %1174 = vmatpush1.bf16.msra.mxu1 %v8018_v61  ;;  %6103 = vmatpush3.bf16.msra.mxu0 %v8024_v0 }
 0x399   :  { %1175 = vmatprep.subr.bf16.mxu1 %v8021_v63  ;;  %6104 = vmatprep.subr.bf16.mxu0 %v10317_v34 }
 0x39c   :  { %1176 = vmatpush1.bf16.msra.mxu1 %v8027_v1  ;;  %6105 = vmatpush3.bf16.msra.mxu0 %v8037_v3 }
 0x39d   :  { %1177 = vmatprep.subr.bf16.mxu1 %v8031_v2  ;;  %6106 = vmatprep.subr.bf16.mxu0 %v10317_v34 }
 0x3a0   :  { %1178 = vmatpush1.bf16.msra.mxu1 %v8040_v4  ;;  %6107 = vmatpush3.bf16.msra.mxu0 %v8047_v6 }
 0x3a1   :  { %1179 = vmatprep.subr.bf16.mxu1 %v8044_v5  ;;  %6108 = vmatprep.subr.bf16.mxu0 %v10317_v34 }
 0x3a4   :  { %1180 = vmatpush1.bf16.msra.mxu1 %v8050_v7  ;;  %6109 = vmatpush3.bf16.msra.mxu0 %v8058_v9 }
 0x3a5   :  { %1181 = vmatprep.subr.bf16.mxu1 %v8054_v8  ;;  %6110 = vmatprep.subr.bf16.mxu0 %v10317_v34 }
 0x3a8   :  { %1182 = vmatpush1.bf16.msra.mxu1 %v8061_v10  ;;  %6111 = vmatpush3.bf16.msra.mxu0 %v8068_v12 }
 0x3a9   :  { %1183 = vmatprep.subr.bf16.mxu1 %v8065_v11  ;;  %6112 = vmatprep.subr.bf16.mxu0 %v10317_v34 }
 0x3ac   :  { %1184 = vmatpush1.bf16.msra.mxu1 %v8071_v13  ;;  %6113 = vmatpush3.bf16.msra.mxu0 %v8077_v14 }
 0x3ad   :  { %1272 = vmatprep.subr.bf16.mxu1 %v7993_v32  ;;  %6118 = vmatprep.subr.bf16.mxu0 %v10317_v34 }
 0x44f   :  { %v1100_v17 = vpop.f32.mrf.mxu1  ;;  %v1141_v36 = vpop.f32.mrf.mxu0 }
 0x450   :  { %v1101_v25 = vadd.f32 %v1100_v17, %v8184_v48  ;;  %v1142_v51 = vadd.f32 %v1141_v36, %v8197_v59 }
 0x451   :  { %v1102_v30 = vpop.f32.mrf.mxu1  ;;  %v6096_v28 = vpop.f32.mrf.mxu0 }
 0x452   :  { %v1147_v37 = vadd.f32 %v1101_v25, %v8149_v39  ;;  %v1103_v55 = vadd.f32 %v1102_v30, %v8192_v15 }
 0x453   :  { %v1104_v21 = vpop.f32.mrf.mxu1  ;;  %v1144_v22 = vpop.f32.mrf.mxu0 }
 0x454   :  { %v5393_v29 = vmul.f32 -1.442695, %v1147_v37  ;;  %v1154_v20 = vadd.f32 %v1103_v55, %v8155_v43 }
 0x455   :  { %v1105_v52 = vpop.f32.mrf.mxu1  ;;  %v6097_v33 = vpop.f32.mrf.mxu0 }
 0x456   :  { %6995 = vpow2.f32 %v5393_v29  ;;  %v5394_v35 = vmul.f32 -1.442695, %v1154_v20 }
 0x458   :  { %6997 = vpow2.f32 %v5394_v35 }
 0x463   :  { %v6996_v24 = vpop.eup %6995 }
 0x464   :  { %v1151_v41 = vadd.f32 1.0, %v6996_v24 }
 0x465   :  { %v6998_v44 = vpop.eup %6997 }
 0x466   :  { %6999 = vrcp.f32 %v1151_v41  ;;  %v1158_v40 = vadd.f32 1.0, %v6998_v44 }
 0x468   :  { %7001 = vrcp.f32 %v1158_v40 }
 0x473   :  { %v7000_v39 = vpop.eup %6999 }
 0x474   :  { %v1161_v17 = vmul.f32 %v7000_v39, %v1142_v51  ;;  %v596_v39 = vadd.f32 %v8165_v54, %v8147_v38 }
 0x475   :  { %v7002_v30 = vpop.eup %7001 }
 0x476   :  { %v1162_v25 = vadd.f32 %v1161_v17, %v8130_v23  ;;  %v1164_v28 = vsub.f32 1.0, %v7002_v30  ;;  %v1166_v43 = vmul.f32 %v7002_v30, %v8250_v27 }
 0x478   :  { %7003 = vtanh.f32 %v1162_v25 }
 0x485   :  { %v7004_v37 = vpop.eup %7003 }
 0x486   :  { %v1165_v21 = vmul.f32 %v7004_v37, %v1164_v28 }
 0x488   :  { %v8296_v22 = vadd.f32 %v1166_v43, %v1165_v21 }
 0x48a   :  { %v1168_v29 = vpack.c.bf16 %v8296_v22, %v8296_v22 }
 0x48c   :  { %1202 = vmatmul.mubr.bf16.vlgmr.msra.gmra.mxu1 %v1168_v29  ;;  %6115 = vmatmul.mubr.bf16.vlgmr.msra.gmra.mxu0 %v1168_v29 }
 0x48d   :  { %1273 = vmatpush1.bf16.msra.mxu1 %v8000_v45  ;;  %6119 = vmatpush3.bf16.msra.mxu0 %v8004_v50 }
 0x48e   :  { %1274 = vmatprep.subr.bf16.mxu1 %v8002_v47  ;;  %6120 = vmatprep.subr.bf16.mxu0 %v10317_v34 }
 0x48f   :  { %1304 = vmatprep.mubr.bf16.mxu1 %v10318_v26  ;;  %6134 = vmatprep.mubr.msk.bf16.mxu0 %vm7824_vm1, %v10317_v34 }
 0x491   :  { %1275 = vmatpush1.bf16.msra.mxu1 %v8007_v53  ;;  %6121 = vmatpush3.bf16.msra.mxu0 %v8014_v58 }
 0x492   :  { %1276 = vmatprep.subr.bf16.mxu1 %v8011_v56  ;;  %6122 = vmatprep.subr.bf16.mxu0 %v10317_v34 }
 0x495   :  { %1277 = vmatpush1.bf16.msra.mxu1 %v8018_v61  ;;  %6123 = vmatpush3.bf16.msra.mxu0 %v8024_v0 }
 0x496   :  { %1278 = vmatprep.subr.bf16.mxu1 %v8021_v63  ;;  %6124 = vmatprep.subr.bf16.mxu0 %v10317_v34 }
 0x499   :  { %1279 = vmatpush1.bf16.msra.mxu1 %v8027_v1  ;;  %6125 = vmatpush3.bf16.msra.mxu0 %v8037_v3 }
 0x49a   :  { %1280 = vmatprep.subr.bf16.mxu1 %v8031_v2  ;;  %6126 = vmatprep.subr.bf16.mxu0 %v10317_v34 }
 0x49d   :  { %1281 = vmatpush1.bf16.msra.mxu1 %v8040_v4  ;;  %6127 = vmatpush3.bf16.msra.mxu0 %v8047_v6 }
 0x49e   :  { %1282 = vmatprep.subr.bf16.mxu1 %v8044_v5  ;;  %6128 = vmatprep.subr.bf16.mxu0 %v10317_v34 }
 0x4a1   :  { %1283 = vmatpush1.bf16.msra.mxu1 %v8050_v7  ;;  %6129 = vmatpush3.bf16.msra.mxu0 %v8058_v9 }
 0x4a2   :  { %1284 = vmatprep.subr.bf16.mxu1 %v8054_v8  ;;  %6130 = vmatprep.subr.bf16.mxu0 %v10317_v34 }
 0x4a5   :  { %1285 = vmatpush1.bf16.msra.mxu1 %v8061_v10  ;;  %6131 = vmatpush3.bf16.msra.mxu0 %v8068_v12 }
 0x4a6   :  { %1286 = vmatprep.subr.bf16.mxu1 %v8065_v11  ;;  %6132 = vmatprep.subr.bf16.mxu0 %v10317_v34 }
 0x4a9   :  { %1287 = vmatpush1.bf16.msra.mxu1 %v8071_v13  ;;  %6133 = vmatpush3.bf16.msra.mxu0 %v8077_v14 }
 0x4aa   :  { %1375 = vmatprep.subr.bf16.mxu1 %v7993_v32  ;;  %6138 = vmatprep.subr.bf16.mxu0 %v10317_v34 }
 0x54c   :  { %v1203_v23 = vpop.f32.mrf.mxu1  ;;  %v1244_v36 = vpop.f32.mrf.mxu0 }
 0x54d   :  { %v1204_v55 = vadd.f32 %v1203_v23, %v8184_v48 }
 0x54e   :  { %v1205_v52 = vpop.f32.mrf.mxu1  ;;  %v6116_v33 = vpop.f32.mrf.mxu0 }
 0x54f   :  { %v1250_v20 = vadd.f32 %v1204_v55, %v8160_v49  ;;  %v1206_v44 = vadd.f32 %v1205_v52, %v8192_v15  ;;  %v1245_v49 = vadd.f32 %v1244_v36, %v8197_v59 }
 0x550   :  { %v1207_v35 = vpop.f32.mrf.mxu1  ;;  %v1247_v24 = vpop.f32.mrf.mxu0 }
 0x551   :  { %v5395_v41 = vmul.f32 -1.442695, %v1250_v20  ;;  %v1257_v17 = vadd.f32 %v1206_v44, %v596_v39 }
 0x552   :  { %v1208_v40 = vpop.f32.mrf.mxu1  ;;  %v6117_v51 = vpop.f32.mrf.mxu0 }
 0x553   :  { %7005 = vpow2.f32 %v5395_v41  ;;  %v5396_v25 = vmul.f32 -1.442695, %v1257_v17 }
 0x555   :  { %7007 = vpow2.f32 %v5396_v25 }
 0x560   :  { %v7006_v30 = vpop.eup %7005 }
 0x561   :  { %v1254_v28 = vadd.f32 1.0, %v7006_v30 }
 0x562   :  { %v7008_v37 = vpop.eup %7007 }
 0x563   :  { %7009 = vrcp.f32 %v1254_v28  ;;  %v1261_v21 = vadd.f32 1.0, %v7008_v37 }
 0x565   :  { %7011 = vrcp.f32 %v1261_v21 }
 0x570   :  { %v7010_v43 = vpop.eup %7009 }
 0x571   :  { %v1264_v29 = vmul.f32 %v7010_v43, %v1245_v49 }
 0x572   :  { %v7012_v55 = vpop.eup %7011 }
 0x573   :  { %v1265_v23 = vadd.f32 %v1264_v29, %v8140_v31  ;;  %v1267_v52 = vsub.f32 1.0, %v7012_v55  ;;  %v1269_v20 = vmul.f32 %v7012_v55, %v8296_v22 }
 0x575   :  { %7013 = vtanh.f32 %v1265_v23 }
 0x582   :  { %v7014_v54 = vpop.eup %7013 }
 0x583   :  { %v1268_v33 = vmul.f32 %v7014_v54, %v1267_v52 }
 0x585   :  { %v8343_v35 = vadd.f32 %v1269_v20, %v1268_v33 }
 0x587   :  { %v1271_v24 = vpack.c.bf16 %v8343_v35, %v8343_v35 }
 0x589   :  { %1305 = vmatmul.mubr.bf16.vlgmr.msra.gmra.mxu1 %v1271_v24  ;;  %6135 = vmatmul.mubr.bf16.vlgmr.msra.gmra.mxu0 %v1271_v24 }
 0x58a   :  { %1376 = vmatpush1.bf16.msra.mxu1 %v8000_v45  ;;  %6139 = vmatpush3.bf16.msra.mxu0 %v8004_v50 }
 0x58b   :  { %1377 = vmatprep.subr.bf16.mxu1 %v8002_v47  ;;  %6140 = vmatprep.subr.bf16.mxu0 %v10317_v34 }
 0x58c   :  { %1407 = vmatprep.mubr.bf16.mxu1 %v10318_v26  ;;  %6154 = vmatprep.mubr.msk.bf16.mxu0 %vm7824_vm1, %v10317_v34 }
 0x58e   :  { %1378 = vmatpush1.bf16.msra.mxu1 %v8007_v53  ;;  %6141 = vmatpush3.bf16.msra.mxu0 %v8014_v58 }
 0x58f   :  { %1379 = vmatprep.subr.bf16.mxu1 %v8011_v56  ;;  %6142 = vmatprep.subr.bf16.mxu0 %v10317_v34 }
 0x592   :  { %1380 = vmatpush1.bf16.msra.mxu1 %v8018_v61  ;;  %6143 = vmatpush3.bf16.msra.mxu0 %v8024_v0 }
 0x593   :  { %1381 = vmatprep.subr.bf16.mxu1 %v8021_v63  ;;  %6144 = vmatprep.subr.bf16.mxu0 %v10317_v34 }
 0x596   :  { %1382 = vmatpush1.bf16.msra.mxu1 %v8027_v1  ;;  %6145 = vmatpush3.bf16.msra.mxu0 %v8037_v3 }
 0x597   :  { %1383 = vmatprep.subr.bf16.mxu1 %v8031_v2  ;;  %6146 = vmatprep.subr.bf16.mxu0 %v10317_v34 }
 0x59a   :  { %1384 = vmatpush1.bf16.msra.mxu1 %v8040_v4  ;;  %6147 = vmatpush3.bf16.msra.mxu0 %v8047_v6 }
 0x59b   :  { %1385 = vmatprep.subr.bf16.mxu1 %v8044_v5  ;;  %6148 = vmatprep.subr.bf16.mxu0 %v10317_v34 }
 0x59e   :  { %1386 = vmatpush1.bf16.msra.mxu1 %v8050_v7  ;;  %6149 = vmatpush3.bf16.msra.mxu0 %v8058_v9 }
 0x59f   :  { %1387 = vmatprep.subr.bf16.mxu1 %v8054_v8  ;;  %6150 = vmatprep.subr.bf16.mxu0 %v10317_v34 }
 0x5a2   :  { %1388 = vmatpush1.bf16.msra.mxu1 %v8061_v10  ;;  %6151 = vmatpush3.bf16.msra.mxu0 %v8068_v12 }
 0x5a3   :  { %1389 = vmatprep.subr.bf16.mxu1 %v8065_v11  ;;  %6152 = vmatprep.subr.bf16.mxu0 %v10317_v34 }
 0x5a6   :  { %1390 = vmatpush1.bf16.msra.mxu1 %v8071_v13  ;;  %6153 = vmatpush3.bf16.msra.mxu0 %v8077_v14 }
 0x5a7   :  { %1478 = vmatprep.subr.bf16.mxu1 %v7993_v32  ;;  %6158 = vmatprep.subr.bf16.mxu0 %v10317_v34 }
 0x649   :  { %v1306_v31 = vpop.f32.mrf.mxu1  ;;  %v1347_v36 = vpop.f32.mrf.mxu0 }
 0x64a   :  { %v1307_v41 = vadd.f32 %v1306_v31, %v8184_v48  ;;  %v1348_v55 = vadd.f32 %v1347_v36, %v8197_v59 }
 0x64b   :  { %v1308_v44 = vpop.f32.mrf.mxu1  ;;  %v6136_v40 = vpop.f32.mrf.mxu0 }
 0x64c   :  { %v1353_v51 = vadd.f32 %v1307_v41, %v8167_v57  ;;  %v1309_v30 = vadd.f32 %v1308_v44, %v8192_v15 }
 0x64d   :  { %v1310_v39 = vpop.f32.mrf.mxu1  ;;  %v1350_v17 = vpop.f32.mrf.mxu0 }
 0x64e   :  { %v5397_v25 = vmul.f32 -1.442695, %v1353_v51  ;;  %v1360_v32 = vadd.f32 %v1309_v30, %v8170_v60  ;;  %v7296_v30 = vld [vmem:[#allocation10 + $0xa8] ss:$12 sps:$4 sm:$0xff]  }
 0x64f   :  { %v1311_v28 = vpop.f32.mrf.mxu1  ;;  %v6137_v37 = vpop.f32.mrf.mxu0 }
 0x650   :  { %7015 = vpow2.f32 %v5397_v25  ;;  %v5398_v21 = vmul.f32 -1.442695, %v1360_v32  ;;  %v7299_v28 = vld [vmem:[#allocation10 + $0x90] ss:$12 sps:$4 sm:$0xff]   ;;  %v7300_v37 = vld [vmem:[#allocation10 + $0x98] ss:$12 sps:$4 sm:$0xff]  }
 0x651   :  { %v7301_v32 = vld [vmem:[#allocation10 + $0x7c] ss:$12 sps:$4 sm:$0xff]  }
 0x652   :  { %7017 = vpow2.f32 %v5398_v21  ;;  %v7302_v21 = vld [vmem:[#allocation10 + $0x78] ss:$12 sps:$4 sm:$0xff]  }
 0x65d   :  { %v7016_v49 = vpop.eup %7015 }
 0x65e   :  { %v1357_v43 = vadd.f32 1.0, %v7016_v49  ;;  %v7303_v49 = vld [vmem:[#allocation10 + $0x80] ss:$12 sps:$4 sm:$0xff]  }
 0x65f   :  { %v7018_v29 = vpop.eup %7017 }
 0x660   :  { %7019 = vrcp.f32 %v1357_v43  ;;  %v1364_v23 = vadd.f32 1.0, %v7018_v29  ;;  %v7304_v43 = vld [vmem:[#allocation10 + $0x64] ss:$12 sps:$4 sm:$0xff]   ;;  %v7305_v29 = vld [vmem:[#allocation10 + $0x60] ss:$12 sps:$4 sm:$0xff]  }
 0x662   :  { %7021 = vrcp.f32 %v1364_v23  ;;  %v7306_v23 = vld [vmem:[#allocation10 + $0x68] ss:$12 sps:$4 sm:$0xff]  }
 0x66d   :  { %v7020_v57 = vpop.eup %7019 }
 0x66e   :  { %v1367_v52 = vmul.f32 %v7020_v57, %v1348_v55  ;;  %v7307_v55 = vld [vmem:[#allocation10 + $0x4c] ss:$12 sps:$4 sm:$0xff]   ;;  %v7308_v57 = vld [vmem:[#allocation10 + $0x48] ss:$12 sps:$4 sm:$0xff]  }
 0x66f   :  { %v7022_v33 = vpop.eup %7021 }
 0x670   :  { %v1368_v54 = vadd.f32 %v1367_v52, %v8158_v46  ;;  %v1370_v20 = vsub.f32 1.0, %v7022_v33  ;;  %v1372_v60 = vmul.f32 %v7022_v33, %v8343_v35  ;;  %v7309_v52 = vld [vmem:[#allocation10 + $0x50] ss:$12 sps:$4 sm:$0xff]  }
 0x671   :  { %v7311_v33 = vld [vmem:[#allocation10 + $0x30] ss:$12 sps:$4 sm:$0xff]  }
 0x672   :  { %7023 = vtanh.f32 %v1368_v54  ;;  %v7310_v54 = vld [vmem:[#allocation10 + $0x34] ss:$12 sps:$4 sm:$0xff]  }
 0x67f   :  { %v7024_v24 = vpop.eup %7023 }
 0x680   :  { %v1371_v31 = vmul.f32 %v7024_v24, %v1370_v20  ;;  %v7312_v20 = vld [vmem:[#allocation10 + $0x38] ss:$12 sps:$4 sm:$0xff]   ;;  %v7313_v24 = vld [vmem:[#allocation10 + $0x1c] ss:$12 sps:$4 sm:$0xff]  }
 0x682   :  { %v8389_v41 = vadd.f32 %v1372_v60, %v1371_v31  ;;  %v7314_v31 = vld [vmem:[#allocation10 + $0x18] ss:$12 sps:$4 sm:$0xff]   ;;  %v7315_v60 = vld [vmem:[#allocation10 + $0x20] ss:$12 sps:$4 sm:$0xff]  }
 0x684   :  { %v1374_v44 = vpack.c.bf16 %v8389_v41, %v8389_v41 }
 0x686   :  { %1408 = vmatmul.mubr.bf16.vlgmr.msra.gmra.mxu1 %v1374_v44  ;;  %6155 = vmatmul.mubr.bf16.vlgmr.msra.gmra.mxu0 %v1374_v44  ;;  %v7316_v44 = vld [vmem:[#allocation10 + $0x4] ss:$12 sps:$4 sm:$0xff]  }
 0x687   :  { %1479 = vmatpush1.bf16.msra.mxu1 %v8000_v45  ;;  %6159 = vmatpush3.bf16.msra.mxu0 %v8004_v50  ;;  %v7295_v45 = vld [vmem:[#allocation10 + $0xac] ss:$12 sps:$4 sm:$0xff]  }
 0x688   :  { %1480 = vmatprep.subr.bf16.mxu1 %v8002_v47  ;;  %6160 = vmatprep.subr.bf16.mxu0 %v10317_v34 }
 0x689   :  { %1510 = vmatprep.mubr.bf16.mxu1 %v10318_v26  ;;  %6174 = vmatprep.mubr.msk.bf16.mxu0 %vm7824_vm1, %v10317_v34 }
 0x68b   :  { %1481 = vmatpush1.bf16.msra.mxu1 %v8007_v53  ;;  %6161 = vmatpush3.bf16.msra.mxu0 %v8014_v58 }
 0x68c   :  { %1482 = vmatprep.subr.bf16.mxu1 %v8011_v56  ;;  %6162 = vmatprep.subr.bf16.mxu0 %v10317_v34 }
 0x68f   :  { %1483 = vmatpush1.bf16.msra.mxu1 %v8018_v61  ;;  %6163 = vmatpush3.bf16.msra.mxu0 %v8024_v0 }
 0x690   :  { %1484 = vmatprep.subr.bf16.mxu1 %v8021_v63  ;;  %6164 = vmatprep.subr.bf16.mxu0 %v10317_v34 }
 0x693   :  { %1485 = vmatpush1.bf16.msra.mxu1 %v8027_v1  ;;  %6165 = vmatpush3.bf16.msra.mxu0 %v8037_v3 }
 0x694   :  { %1486 = vmatprep.subr.bf16.mxu1 %v8031_v2  ;;  %6166 = vmatprep.subr.bf16.mxu0 %v10317_v34 }
 0x697   :  { %1487 = vmatpush1.bf16.msra.mxu1 %v8040_v4  ;;  %6167 = vmatpush3.bf16.msra.mxu0 %v8047_v6 }
 0x698   :  { %1488 = vmatprep.subr.bf16.mxu1 %v8044_v5  ;;  %6168 = vmatprep.subr.bf16.mxu0 %v10317_v34  ;;  %v606_v5 = vadd.f32 %v8174_v18, %v8147_v38 }
 0x69b   :  { %1489 = vmatpush1.bf16.msra.mxu1 %v8050_v7  ;;  %6169 = vmatpush3.bf16.msra.mxu0 %v8058_v9 }
 0x69c   :  { %1490 = vmatprep.subr.bf16.mxu1 %v8054_v8  ;;  %6170 = vmatprep.subr.bf16.mxu0 %v10317_v34 }
 0x69f   :  { %1491 = vmatpush1.bf16.msra.mxu1 %v8061_v10  ;;  %6171 = vmatpush3.bf16.msra.mxu0 %v8068_v12 }
 0x6a0   :  { %1492 = vmatprep.subr.bf16.mxu1 %v8065_v11  ;;  %6172 = vmatprep.subr.bf16.mxu0 %v10317_v34 }
 0x6a3   :  { %1493 = vmatpush1.bf16.msra.mxu1 %v8071_v13  ;;  %6173 = vmatpush3.bf16.msra.mxu0 %v8077_v14  ;;  %v672_v14 = vadd.f32 %v8188_v62, %v8125_v19  ;;  %v7297_v19 = vld [vmem:[#allocation10 + $0xb0] ss:$12 sps:$4 sm:$0xff]   ;;  %v7298_v62 = vld [vmem:[#allocation10 + $0x94] ss:$12 sps:$4 sm:$0xff]  }
 0x6a4   :  { %1581 = vmatprep.subr.bf16.mxu1 %v7295_v45  ;;  %6178 = vmatprep.subr.bf16.mxu0 %v10317_v34  ;;  %v7317_v45 = vld [vmem:[#allocation10] ss:$12 sps:$4 sm:$0xff]  }
 0x746   :  { %v1409_v47 = vpop.f32.mrf.mxu1  ;;  %v1450_v50 = vpop.f32.mrf.mxu0 }
 0x747   :  { %v1410_v53 = vadd.f32 %v1409_v47, %v8184_v48  ;;  %v1451_v12 = vadd.f32 %v1450_v50, %v8197_v59  ;;  %v7318_v47 = vld [vmem:[#allocation10 + $0x8] ss:$12 sps:$4 sm:$0xff]  }
 0x748   :  { %v1411_v56 = vpop.f32.mrf.mxu1  ;;  %v6156_v58 = vpop.f32.mrf.mxu0  ;;  %v6839_v50 = vld [vmem:[%s10092_s8 + $0x38] sm:$0xff]  }
 0x749   :  { %v1456_v61 = vadd.f32 %v1410_v53, %v8172_v16  ;;  %v1412_v2 = vadd.f32 %v1411_v56, %v8192_v15 }
 0x74a   :  { %v1413_v63 = vpop.f32.mrf.mxu1  ;;  %v1453_v0 = vpop.f32.mrf.mxu0 }
 0x74b   :  { %v5399_v1 = vmul.f32 -1.442695, %v1456_v61  ;;  %v1463_v6 = vadd.f32 %v1412_v2, %v606_v5  ;;  %v10320_v0 = vld [vmem:[#allocation36_spill] sm:$0xff] }
 0x74c   :  { %v1414_v3 = vpop.f32.mrf.mxu1  ;;  %v6157_v4 = vpop.f32.mrf.mxu0 }
 0x74d   :  { %7025 = vpow2.f32 %v5399_v1  ;;  %v5400_v7 = vmul.f32 -1.442695, %v1463_v6 }
 0x74f   :  { %7027 = vpow2.f32 %v5400_v7 }
 0x75a   :  { %v7026_v8 = vpop.eup %7025 }
 0x75b   :  { %v1460_v9 = vadd.f32 1.0, %v7026_v8  ;;  %v10321_v8 = vld [vmem:[#allocation37_spill] sm:$0xff] }
 0x75c   :  { %v7028_v10 = vpop.eup %7027 }
 0x75d   :  { %7029 = vrcp.f32 %v1460_v9  ;;  %v1467_v11 = vadd.f32 1.0, %v7028_v10 }
 0x75f   :  { %7031 = vrcp.f32 %v1467_v11 }
 0x76a   :  { %v7030_v13 = vpop.eup %7029 }
 0x76b   :  { %v1470_v46 = vmul.f32 %v7030_v13, %v1451_v12 }
 0x76c   :  { %v7032_v18 = vpop.eup %7031 }
 0x76d   :  { %v1471_v16 = vadd.f32 %v1470_v46, %v672_v14  ;;  %v1473_v36 = vsub.f32 1.0, %v7032_v18  ;;  %v1475_v39 = vmul.f32 %v7032_v18, %v8389_v41 }
 0x76f   :  { %7033 = vtanh.f32 %v1471_v16 }
 0x77c   :  { %v7034_v40 = vpop.eup %7033 }
 0x77d   :  { %v1474_v51 = vmul.f32 %v7034_v40, %v1473_v36  ;;  %v10322_v36 = vld [vmem:[#allocation34_spill] sm:$0xff] }
 0x77f   :  { %v8436_v17 = vadd.f32 %v1475_v39, %v1474_v51 }
 0x781   :  { %v1477_v25 = vpack.c.bf16 %v8436_v17, %v8436_v17 }
 0x783   :  { %1511 = vmatmul.mubr.bf16.vlgmr.msra.gmra.mxu1 %v1477_v25  ;;  %6175 = vmatmul.mubr.bf16.vlgmr.msra.gmra.mxu0 %v1477_v25 }
 0x784   :  { %1582 = vmatpush1.bf16.msra.mxu1 %v7296_v30  ;;  %6179 = vmatpush3.bf16.msra.mxu0 %v7297_v19 }
 0x785   :  { %1583 = vmatprep.subr.bf16.mxu1 %v7298_v62  ;;  %6180 = vmatprep.subr.bf16.mxu0 %v10317_v34 }
 0x786   :  { %1613 = vmatprep.mubr.bf16.mxu1 %v10318_v26  ;;  %6194 = vmatprep.mubr.msk.bf16.mxu0 %vm7824_vm1, %v10317_v34 }
 0x788   :  { %1584 = vmatpush1.bf16.msra.mxu1 %v7299_v28  ;;  %6181 = vmatpush3.bf16.msra.mxu0 %v7300_v37  ;;  %v6840_v37 = vld [vmem:[%s10092_s8 + $0x30] sm:$0xff]  }
 0x789   :  { %1585 = vmatprep.subr.bf16.mxu1 %v7301_v32  ;;  %6182 = vmatprep.subr.bf16.mxu0 %v10317_v34  ;;  %v1683_v32 = vpack.c.bf16 %v8250_v27, %v8202_v42 }
 0x78c   :  { %1586 = vmatpush1.bf16.msra.mxu1 %v7302_v21  ;;  %6183 = vmatpush3.bf16.msra.mxu0 %v7303_v49  ;;  %v6841_v21 = vld [vmem:[%s10092_s8 + $0x28] sm:$0xff]   ;;  %v6842_v49 = vld [vmem:[%s10092_s8 + $0x20] sm:$0xff]  }
 0x78d   :  { %1587 = vmatprep.subr.bf16.mxu1 %v7304_v43  ;;  %6184 = vmatprep.subr.bf16.mxu0 %v10317_v34  ;;  %v6843_v43 = vld [vmem:[%s10092_s8 + $0x18] sm:$0xff]  }
 0x790   :  { %1588 = vmatpush1.bf16.msra.mxu1 %v7305_v29  ;;  %6185 = vmatpush3.bf16.msra.mxu0 %v7306_v23  ;;  %v6844_v29 = vld [vmem:[%s10092_s8 + $0x10] sm:$0xff]   ;;  %v6845_v23 = vld [vmem:[%s10092_s8 + $0x8] sm:$0xff]  }
 0x791   :  { %1589 = vmatprep.subr.bf16.mxu1 %v7307_v55  ;;  %6186 = vmatprep.subr.bf16.mxu0 %v10317_v34  ;;  %v6846_v55 = vld [vmem:[%s10092_s8] sm:$0xff]  }
 0x794   :  { %1590 = vmatpush1.bf16.msra.mxu1 %v7308_v57  ;;  %6187 = vmatpush3.bf16.msra.mxu0 %v7309_v52  ;;  %v1684_v57 = vpack.c.bf16 %v8343_v35, %v8296_v22  ;;  %v1685_v52 = vpack.c.bf16 %v8436_v17, %v8389_v41 }
 0x795   :  { %1591 = vmatprep.subr.bf16.mxu1 %v7310_v54  ;;  %6188 = vmatprep.subr.bf16.mxu0 %v10317_v34  ;;  %v6847_v54 = vld [vmem:[%s10094_s10 + $0x38] sm:$0xff]  }
 0x798   :  { %1592 = vmatpush1.bf16.msra.mxu1 %v7311_v33  ;;  %6189 = vmatpush3.bf16.msra.mxu0 %v7312_v20  ;;  %v6848_v33 = vld [vmem:[%s10094_s10 + $0x30] sm:$0xff]   ;;  %v6849_v20 = vld [vmem:[%s10094_s10 + $0x28] sm:$0xff]  }
 0x799   :  { %1593 = vmatprep.subr.bf16.mxu1 %v7313_v24  ;;  %6190 = vmatprep.subr.bf16.mxu0 %v10317_v34  ;;  %v6850_v24 = vld [vmem:[%s10094_s10 + $0x20] sm:$0xff]  }
 0x79c   :  { %1594 = vmatpush1.bf16.msra.mxu1 %v7314_v31  ;;  %6191 = vmatpush3.bf16.msra.mxu0 %v7315_v60  ;;  %v6851_v31 = vld [vmem:[%s10094_s10 + $0x18] sm:$0xff]   ;;  %v6852_v60 = vld [vmem:[%s10094_s10 + $0x10] sm:$0xff]  }
 0x79d   :  { %1595 = vmatprep.subr.bf16.mxu1 %v7316_v44  ;;  %6192 = vmatprep.subr.bf16.mxu0 %v10317_v34  ;;  %v6853_v44 = vld [vmem:[%s10094_s10 + $0x8] sm:$0xff]  }
 0x7a0   :  { %1596 = vmatpush1.bf16.msra.mxu1 %v7317_v45  ;;  %6193 = vmatpush3.bf16.msra.mxu0 %v7318_v47  ;;  %v6854_v45 = vld [vmem:[%s10094_s10] sm:$0xff]  }
 0x7a1   :  { %6222 = vmatprep.subr.bf16.mxu0 %v10317_v34  ;;  %6198 = vmatprep.subr.bf16.mxu1 %v6839_v50  ;;  %v1988_v47 = vld [vmem:[%s10323_s13] sm:$0xff] }
 0x7a2   :  { %1990 = vperm.xlu0 %6765, %v1988_v47  }
 0x843   :  { %v1512_v53 = vpop.f32.mrf.mxu1  ;;  %v1553_v56 = vpop.f32.mrf.mxu0 }
 0x844   :  { %v1513_v58 = vadd.f32 %v1512_v53, %v8184_v48  ;;  %v1554_v46 = vadd.f32 %v1553_v56, %v8197_v59  ;;  %v8532_v53 = vld [vmem:[#allocation16 + $0x30] sm:$0xff]   ;;  %v8536_v56 = vld [vmem:[#allocation16 + $0x28] sm:$0xff]  }
 0x845   :  { %v1514_v61 = vpop.f32.mrf.mxu1  ;;  %v6176_v63 = vpop.f32.mrf.mxu0 }
 0x846   :  { %v1559_v1 = vadd.f32 %v1513_v58, %v10320_v0  ;;  %v1515_v5 = vadd.f32 %v1514_v61, %v8192_v15  ;;  %v8540_v58 = vld [vmem:[#allocation16 + $0x20] sm:$0xff]   ;;  %v8544_v61 = vld [vmem:[#allocation16 + $0x18] sm:$0xff]   ;;  %v8548_v63 = vld [vmem:[#allocation16 + $0x10] sm:$0xff]  }
 0x847   :  { %v1516_v2 = vpop.f32.mrf.mxu1  ;;  %v1556_v3 = vpop.f32.mrf.mxu0  ;;  %v8552_v0 = vld [vmem:[#allocation16 + $0x8] sm:$0xff]  }
 0x848   :  { %v5401_v4 = vmul.f32 -1.442695, %v1559_v1  ;;  %v1566_v9 = vadd.f32 %v1515_v5, %v10321_v8  ;;  %v8556_v1 = vld [vmem:[#allocation16] sm:$0xff]   ;;  %v8562_v2 = vld [vmem:[%s10095_s11 + $0x38] sm:$0xff]  }
 0x849   :  { %v1517_v6 = vpop.f32.mrf.mxu1  ;;  %v6177_v7 = vpop.f32.mrf.mxu0  ;;  %v10324_v8 = vld [vmem:[#allocation38_spill] sm:$0xff] }
 0x84a   :  { %7035 = vpow2.f32 %v5401_v4  ;;  %v5402_v10 = vmul.f32 -1.442695, %v1566_v9 }
 0x84c   :  { %7037 = vpow2.f32 %v5402_v10 }
 0x857   :  { %v7036_v11 = vpop.eup %7035 }
 0x858   :  { %v1563_v12 = vadd.f32 1.0, %v7036_v11 }
 0x859   :  { %v7038_v13 = vpop.eup %7037 }
 0x85a   :  { %7039 = vrcp.f32 %v1563_v12  ;;  %v1570_v14 = vadd.f32 1.0, %v7038_v13 }
 0x85c   :  { %7041 = vrcp.f32 %v1570_v14 }
 0x867   :  { %v7040_v16 = vpop.eup %7039 }
 0x868   :  { %v1573_v18 = vmul.f32 %v7040_v16, %v1554_v46  ;;  %v10325_v16 = vld [vmem:[#allocation39_spill] sm:$0xff] }
 0x869   :  { %v7042_v51 = vpop.eup %7041 }
 0x86a   :  { %v1574_v40 = vadd.f32 %v1573_v18, %v10322_v36  ;;  %v1576_v39 = vsub.f32 1.0, %v7042_v51  ;;  %v1578_v19 = vmul.f32 %v7042_v51, %v8436_v17  ;;  %v616_v18 = vadd.f32 %v10325_v16, %v8147_v38 }
 0x86c   :  { %7043 = vtanh.f32 %v1574_v40 }
 0x879   :  { %v7044_v25 = vpop.eup %7043 }
 0x87a   :  { %v1577_v30 = vmul.f32 %v7044_v25, %v1576_v39 }
 0x87c   :  { %v8461_v62 = vadd.f32 %v1578_v19, %v1577_v30 }
 0x87e   :  { %v1580_v28 = vpack.c.bf16 %v8461_v62, %v8461_v62 }
 0x880   :  { %1614 = vmatmul.mubr.bf16.vlgmr.msra.gmra.mxu1 %v1580_v28  ;;  %6195 = vmatmul.mubr.bf16.vlgmr.msra.gmra.mxu0 %v1580_v28 }
 0x881   :  { %6199 = vmatpush3.bf16.msra.mxu1 %v6839_v50  ;;  %6214 = vmatprep.mubr.bf16.mxu1 %v1683_v32  ;;  %v8529_v50 = vld [vmem:[#allocation16 + $0x38] sm:$0xff]  }
 0x882   :  { %6200 = vmatprep.subr.bf16.mxu1 %v6840_v37  ;;  %6238 = vmatprep.mubr.msk.bf16.mxu0 %vm7824_vm1, %v10317_v34 }
 0x883   :  { %6223 = vmatpush3.bf16.msra.mxu0 %v8529_v50 }
 0x884   :  { %6224 = vmatprep.subr.bf16.mxu0 %v10317_v34 }
 0x885   :  { %6201 = vmatpush3.bf16.msra.mxu1 %v6840_v37 }
 0x886   :  { %6202 = vmatprep.subr.bf16.mxu1 %v6841_v21 }
 0x887   :  { %6225 = vmatpush3.bf16.msra.mxu0 %v8532_v53 }
 0x888   :  { %6226 = vmatprep.subr.bf16.mxu0 %v10317_v34 }
 0x889   :  { %6203 = vmatpush3.bf16.msra.mxu1 %v6841_v21 }
 0x88a   :  { %6204 = vmatprep.subr.bf16.mxu1 %v6842_v49 }
 0x88b   :  { %6227 = vmatpush3.bf16.msra.mxu0 %v8536_v56 }
 0x88c   :  { %6228 = vmatprep.subr.bf16.mxu0 %v10317_v34 }
 0x88d   :  { %6205 = vmatpush3.bf16.msra.mxu1 %v6842_v49 }
 0x88e   :  { %6206 = vmatprep.subr.bf16.mxu1 %v6843_v43 }
 0x88f   :  { %6229 = vmatpush3.bf16.msra.mxu0 %v8540_v58 }
 0x890   :  { %6230 = vmatprep.subr.bf16.mxu0 %v10317_v34 }
 0x891   :  { %6207 = vmatpush3.bf16.msra.mxu1 %v6843_v43 }
 0x892   :  { %6208 = vmatprep.subr.bf16.mxu1 %v6844_v29 }
 0x893   :  { %6231 = vmatpush3.bf16.msra.mxu0 %v8544_v61 }
 0x894   :  { %6232 = vmatprep.subr.bf16.mxu0 %v10317_v34 }
 0x895   :  { %6209 = vmatpush3.bf16.msra.mxu1 %v6844_v29 }
 0x896   :  { %6210 = vmatprep.subr.bf16.mxu1 %v6845_v23 }
 0x897   :  { %6233 = vmatpush3.bf16.msra.mxu0 %v8548_v63 }
 0x898   :  { %6234 = vmatprep.subr.bf16.mxu0 %v10317_v34 }
 0x899   :  { %6211 = vmatpush3.bf16.msra.mxu1 %v6845_v23 }
 0x89a   :  { %6212 = vmatprep.subr.bf16.mxu1 %v6846_v55 }
 0x89b   :  { %6235 = vmatpush3.bf16.msra.mxu0 %v8552_v0 }
 0x89c   :  { %6236 = vmatprep.subr.bf16.mxu0 %v10317_v34 }
 0x89d   :  { %6213 = vmatpush3.bf16.msra.mxu1 %v6846_v55 }
 0x89e   :  { %6242 = vmatprep.subr.bf16.mxu1 %v10317_v34 }
 0x89f   :  { %6237 = vmatpush3.bf16.msra.mxu0 %v8556_v1 }
 0x8a0   :  { %6215 = vmatmul.mubr.bf16.vlgmr.msra.gmra.mxu1 %v1684_v57  ;;  %6262 = vmatprep.subr.bf16.mxu0 %v8562_v2  ;;  %v1991_v57 = vpop.permute.xlu0 %1990 }
 0x8a1   :  { %6218 = vmatprep.mubr.bf16.mxu1 %v1685_v52  ;;  %6243 = vmatpush3.bf16.msra.mxu1 %v6847_v54  ;;  %v10115_v54 = vmov 1.0|1.0  }
 0x8a2   :  { %6244 = vmatprep.subr.bf16.mxu1 %v10317_v34 }
 0x8a5   :  { %6245 = vmatpush3.bf16.msra.mxu1 %v6848_v33  ;;  %v6864_v33 = vld [vmem:[%s10095_s11 + $0x30] sm:$0xff]  }
 0x8a6   :  { %6246 = vmatprep.subr.bf16.mxu1 %v10317_v34 }
 0x8a9   :  { %6247 = vmatpush3.bf16.msra.mxu1 %v6849_v20  ;;  %v6865_v20 = vld [vmem:[%s10095_s11 + $0x28] sm:$0xff]  }
 0x8aa   :  { %6248 = vmatprep.subr.bf16.mxu1 %v10317_v34 }
 0x8ad   :  { %6249 = vmatpush3.bf16.msra.mxu1 %v6850_v24  ;;  %v6866_v24 = vld [vmem:[%s10095_s11 + $0x20] sm:$0xff]  }
 0x8ae   :  { %6250 = vmatprep.subr.bf16.mxu1 %v10317_v34 }
 0x8b1   :  { %6251 = vmatpush3.bf16.msra.mxu1 %v6851_v31  ;;  %v6867_v31 = vld [vmem:[%s10095_s11 + $0x18] sm:$0xff]  }
 0x8b2   :  { %6252 = vmatprep.subr.bf16.mxu1 %v10317_v34 }
 0x8b5   :  { %6253 = vmatpush3.bf16.msra.mxu1 %v6852_v60  ;;  %v6868_v60 = vld [vmem:[%s10095_s11 + $0x10] sm:$0xff]  }
 0x8b6   :  { %6254 = vmatprep.subr.bf16.mxu1 %v10317_v34 }
 0x8b9   :  { %6255 = vmatpush3.bf16.msra.mxu1 %v6853_v44  ;;  %v6869_v44 = vld [vmem:[%s10095_s11 + $0x8] sm:$0xff]  }
 0x8ba   :  { %6256 = vmatprep.subr.bf16.mxu1 %v10317_v34 }
 0x8bd   :  { %6257 = vmatpush3.bf16.msra.mxu1 %v6854_v45  ;;  %v6870_v45 = vld [vmem:[%s10095_s11] sm:$0xff]  }
 0x940   :  { %v1615_v3 = vpop.f32.mrf.mxu1  ;;  %v1656_v4 = vpop.f32.mrf.mxu0 }
 0x941   :  { %v1616_v5 = vadd.f32 %v1615_v3, %v8184_v48  ;;  %v1657_v30 = vadd.f32 %v1656_v4, %v8197_v59  ;;  %v10327_v59 = vlaneseq }
 0x942   :  { %v1617_v6 = vpop.f32.mrf.mxu1  ;;  %v6196_v7 = vpop.f32.mrf.mxu0 }
 0x943   :  { %v1662_v9 = vadd.f32 %v1616_v5, %v10324_v8  ;;  %v1618_v13 = vadd.f32 %v1617_v6, %v8192_v15  ;;  %v10326_v15 = vld [vmem:[#allocation35_spill] sm:$0xff]  ;;  %v8581_v55 = vand.u32 127, %v10327_v59  ;;  %v5405_v8 = vld [vmem:[#allocation14] ss:$0 sm:$0xff] }
 0x944   :  { %v1619_v10 = vpop.f32.mrf.mxu1  ;;  %v1659_v11 = vpop.f32.mrf.mxu0 }
 0x945   :  { %v5403_v12 = vmul.f32 -1.442695, %v1662_v9  ;;  %v1669_v36 = vadd.f32 %v1618_v13, %v616_v18  ;;  %10328 = vst [vmem:[#allocation36_spill] sm:$0xff] %v8581_v55  ;;  %vm1992_vm2 = vcmp.eq.s32.totalorder %v8581_v55, %v1991_v57 }
 0x946   :  { %v1620_v14 = vpop.f32.mrf.mxu1  ;;  %v6197_v46 = vpop.f32.mrf.mxu0  ;;  %vm5423_vm3 = vmpackc.low %vm1992_vm2, %vm1992_vm2 }
 0x947   :  { %7045 = vpow2.f32 %v5403_v12  ;;  %v5404_v40 = vmul.f32 -1.442695, %v1669_v36  ;;  %6239 = vmatmul.mubr.msk.bf16.vlgmr.msra.gmra.mxu0 %vm5423_vm3, %v10115_v54 }
 0x948   :  { %6263 = vmatpush3.bf16.msra.mxu0 %v8562_v2 }
 0x949   :  { %7047 = vpow2.f32 %v5404_v40  ;;  %6264 = vmatprep.subr.bf16.mxu0 %v6864_v33 }
 0x94c   :  { %6265 = vmatpush3.bf16.msra.mxu0 %v6864_v33 }
 0x94d   :  { %6266 = vmatprep.subr.bf16.mxu0 %v6865_v20 }
 0x950   :  { %6267 = vmatpush3.bf16.msra.mxu0 %v6865_v20 }
 0x951   :  { %6268 = vmatprep.subr.bf16.mxu0 %v6866_v24 }
 0x954   :  { %v7046_v51 = vpop.eup %7045  ;;  %6269 = vmatpush3.bf16.msra.mxu0 %v6866_v24 }
 0x955   :  { %v1666_v48 = vadd.f32 1.0, %v7046_v51  ;;  %6270 = vmatprep.subr.bf16.mxu0 %v6867_v31 }
 0x956   :  { %v7048_v39 = vpop.eup %7047 }
 0x957   :  { %7049 = vrcp.f32 %v1666_v48  ;;  %v1673_v25 = vadd.f32 1.0, %v7048_v39 }
 0x958   :  { %6271 = vmatpush3.bf16.msra.mxu0 %v6867_v31 }
 0x959   :  { %7051 = vrcp.f32 %v1673_v25  ;;  %6272 = vmatprep.subr.bf16.mxu0 %v6868_v60 }
 0x95c   :  { %6273 = vmatpush3.bf16.msra.mxu0 %v6868_v60 }
 0x95d   :  { %6274 = vmatprep.subr.bf16.mxu0 %v6869_v44 }
 0x960   :  { %6275 = vmatpush3.bf16.msra.mxu0 %v6869_v44  ;;  %v6216_v47 = vpop.f32.mrf.mxu1 }
 0x961   :  { %6276 = vmatprep.subr.bf16.mxu0 %v6870_v45  ;;  %v8612_v11 = vadd.f32 %v6216_v47, %v5405_v8 }
 0x962   :  { %v1792_v3 = vpop.f32.mrf.mxu1 }
 0x963   :  { %10329 = vst [vmem:[#allocation37_spill] sm:$0xff] %v8612_v11  ;;  %v8614_v12 = vadd.f32 %v5405_v8, %v1792_v3 }
 0x964   :  { %v7050_v19 = vpop.eup %7049  ;;  %6277 = vmatpush3.bf16.msra.mxu0 %v6870_v45  ;;  %v6217_v4 = vpop.f32.mrf.mxu1 }
 0x965   :  { %v1676_v28 = vmul.f32 %v7050_v19, %v1657_v30  ;;  %10330 = vst [vmem:[#allocation34_spill] sm:$0xff] %v8614_v12  ;;  %v8616_v13 = vadd.f32 %v6217_v4, %v5405_v8 }
 0x966   :  { %v7052_v32 = vpop.eup %7051  ;;  %v1795_v5 = vpop.f32.mrf.mxu1 }
 0x967   :  { %v1677_v37 = vadd.f32 %v1676_v28, %v10326_v15  ;;  %v1679_v21 = vsub.f32 1.0, %v7052_v32  ;;  %v1681_v43 = vmul.f32 %v7052_v32, %v8461_v62  ;;  %10331 = vst [vmem:[#allocation38_spill] sm:$0xff] %v8616_v13  ;;  %v8618_v46 = vadd.f32 %v5405_v8, %v1795_v5 }
 0x969   :  { %7053 = vtanh.f32 %v1677_v37  ;;  %10332 = vst [vmem:[#allocation39_spill] sm:$0xff] %v8618_v46 }
 0x976   :  { %v7054_v38 = vpop.eup %7053 }
 0x977   :  { %v1680_v49 = vmul.f32 %v7054_v38, %v1679_v21 }
 0x979   :  { %v8574_v29 = vadd.f32 %v1681_v43, %v1680_v49 }
 0x97b   :  { %v1686_v23 = vpack.c.bf16 %v8574_v29, %v8461_v62  ;;  %v8586_v52 = vpack.c.bf16 %v8574_v29, %v8574_v29 }
 0x97d   :  { %6219 = vmatmul.mubr.bf16.gmra.mxu1 %v1686_v23 }
 0x97e   :  { %6258 = vmatprep.mubr.msk.bf16.mxu1 %vm7824_vm1, %v10317_v34 }
 0x985   :  { %6259 = vmatmul.mubr.bf16.vlgmr.msra.gmra.mxu1 %v8586_v52 }
 0xa07   :  { %v2078_v14 = vpop.f32.mrf.mxu0 }
 0xa08   :  { %v2426_v36 = vpack.c.bf16 %v2078_v14, %v2078_v14  ;;  %v8649_v14 = vld [vmem:[#allocation17 + $0x170] ss:$12 sps:$4 sm:$0xff]  }
 0xa09   :  { %v6240_v25 = vpop.f32.mrf.mxu0  ;;  %10337 = vst [vmem:[#allocation45_spill] sm:$0xff] %v8649_v14  ;;  %5678 = vmatprep.subr.bf16.mxu0 %v8649_v14 }
 0xa0a   :  { %2731 = vmatprep.mubr.bf16.mxu1 %v2426_v36  ;;  %v8666_v25 = vld [vmem:[#allocation17 + $0x140] ss:$12 sps:$4 sm:$0xff]  }
 0xa0b   :  { %v2081_v15 = vpop.f32.mrf.mxu0  ;;  %10341 = vst [vmem:[#allocation49_spill] sm:$0xff] %v8666_v25 }
 0xa0c   :  { %v8678_v15 = vld [vmem:[#allocation17 + $0x128] ss:$12 sps:$4 sm:$0xff]  }
 0xa0d   :  { %v6241_v21 = vpop.f32.mrf.mxu0  ;;  %10343 = vst [vmem:[#allocation51_spill] sm:$0xff] %v8678_v15 }
 0xa0e   :  { %v8689_v21 = vld [vmem:[#allocation17 + $0x30] ss:$12 sps:$4 sm:$0xff]  }
 0xa0f   :  { %10344 = vst [vmem:[#allocation52_spill] sm:$0xff] %v8689_v21 }
 0xa3d   :  { %v6220_v6 = vpop.f32.mrf.mxu1 }
 0xa3e   :  { %v8630_v38 = vadd.f32 %v6220_v6, %v5405_v8  ;;  %v8636_v6 = vld [vmem:[#allocation17 + $0xac] ss:$12 sps:$4 sm:$0xff]  }
 0xa3f   :  { %v1808_v7 = vpop.f32.mrf.mxu1  ;;  %2699 = vmatprep.subr.bf16.mxu1 %v8636_v6 }
 0xa40   :  { %v8622_v40 = vadd.f32 %v5405_v8, %v1808_v7  ;;  %10335 = vst [vmem:[#allocation43_spill] sm:$0xff] %v8630_v38  ;;  %v8638_v7 = vld [vmem:[#allocation17 + $0xa8] ss:$12 sps:$4 sm:$0xff]  }
 0xa41   :  { %v6221_v9 = vpop.f32.mrf.mxu1  ;;  %2700 = vmatpush1.bf16.msra.mxu1 %v8638_v7 }
 0xa42   :  { %10334 = vst [vmem:[#allocation42_spill] sm:$0xff] %v8622_v40  ;;  %v8632_v43 = vadd.f32 %v6221_v9, %v5405_v8  ;;  %v8644_v9 = vld [vmem:[#allocation17 + $0x90] ss:$12 sps:$4 sm:$0xff]  }
 0xa43   :  { %v1811_v10 = vpop.f32.mrf.mxu1 }
 0xa44   :  { %v8620_v16 = vadd.f32 %v5405_v8, %v1811_v10  ;;  %10336 = vst [vmem:[#allocation44_spill] sm:$0xff] %v8632_v43  ;;  %v8640_v8 = vld [vmem:[#allocation17 + $0x94] ss:$12 sps:$4 sm:$0xff]   ;;  %v8647_v10 = vld [vmem:[#allocation17 + $0x7c] ss:$12 sps:$4 sm:$0xff]  }
 0xa45   :  { %v2167_v18 = vpop.f32.mrf.mxu1  ;;  %2701 = vmatprep.subr.bf16.mxu1 %v8640_v8 }
 0xa46   :  { %10333 = vst [vmem:[#allocation35_spill] sm:$0xff] %v8620_v16  ;;  %v2175_v51 = vadd.f32 %v2167_v18, %v8612_v11  ;;  %v2176_v48 = vadd.f32 %v2167_v18, %v8616_v13  ;;  %v2173_v39 = vadd.f32 %v2167_v18, %v8614_v12  ;;  %v2174_v19 = vadd.f32 %v2167_v18, %v8618_v46 }
 0xa47   :  { %v6260_v30 = vpop.f32.mrf.mxu1  ;;  %v2177_v28 = vadd.f32 %v2167_v18, %v8622_v40  ;;  %v2178_v32 = vadd.f32 %v2167_v18, %v8620_v16  ;;  %v2179_v23 = vadd.f32 %v2167_v18, %v8630_v38  ;;  %v2180_v59 = vadd.f32 %v2167_v18, %v8632_v43  ;;  %v8651_v18 = vld [vmem:[#allocation17 + $0xb0] ss:$12 sps:$4 sm:$0xff]   ;;  %2702 = vmatpush1.bf16.msra.mxu1 %v8644_v9 }
 0xa48   :  { %7055 = vtanh.f32 %v2175_v51  ;;  %10338 = vst [vmem:[#allocation46_spill] sm:$0xff] %v8651_v18  ;;  %v8657_v51 = vld [vmem:[#allocation17 + $0x158] ss:$12 sps:$4 sm:$0xff]   ;;  %2703 = vmatprep.subr.bf16.mxu1 %v8647_v10  ;;  %v8669_v30 = vld [vmem:[#allocation17 + $0x60] ss:$12 sps:$4 sm:$0xff]  }
 0xa49   :  { %7057 = vtanh.f32 %v2176_v48  ;;  %v2170_v37 = vpop.f32.mrf.mxu1  ;;  %10339 = vst [vmem:[#allocation47_spill] sm:$0xff] %v8657_v51  ;;  %v8660_v48 = vld [vmem:[#allocation17 + $0x64] ss:$12 sps:$4 sm:$0xff]  }
 0xa4a   :  { %7059 = vtanh.f32 %v2173_v39  ;;  %v8663_v39 = vld [vmem:[#allocation17 + $0x98] ss:$12 sps:$4 sm:$0xff]   ;;  %v8681_v37 = vld [vmem:[#allocation17 + $0x48] ss:$12 sps:$4 sm:$0xff]  }
 0xa4b   :  { %v6261_v49 = vpop.f32.mrf.mxu1  ;;  %7061 = vtanh.f32 %v2174_v19  ;;  %10340 = vst [vmem:[#allocation48_spill] sm:$0xff] %v8663_v39  ;;  %v8672_v19 = vld [vmem:[#allocation17 + $0x4c] ss:$12 sps:$4 sm:$0xff]  }
 0xa4c   :  { %7063 = vtanh.f32 %v2177_v28  ;;  %v8675_v28 = vld [vmem:[#allocation17 + $0x80] ss:$12 sps:$4 sm:$0xff]   ;;  %v8692_v49 = vld [vmem:[#allocation17 + $0x1c] ss:$12 sps:$4 sm:$0xff]  }
 0xa4d   :  { %7065 = vtanh.f32 %v2178_v32  ;;  %10342 = vst [vmem:[#allocation50_spill] sm:$0xff] %v8675_v28  ;;  %v8684_v32 = vld [vmem:[#allocation17 + $0x34] ss:$12 sps:$4 sm:$0xff]   ;;  %10345 = vst [vmem:[#allocation53_spill] sm:$0xff] %v8692_v49 }
 0xa4e   :  { %7067 = vtanh.f32 %v2179_v23  ;;  %v8695_v23 = vld [vmem:[#allocation17 + $0x18] ss:$12 sps:$4 sm:$0xff]  }
 0xa4f   :  { %7069 = vtanh.f32 %v2180_v59  ;;  %10346 = vst [vmem:[#allocation54_spill] sm:$0xff] %v8695_v23  ;;  %v8698_v59 = vld [vmem:[#allocation17 + $0x4] ss:$12 sps:$4 sm:$0xff]  }
 0xa50   :  { %10347 = vst [vmem:[#allocation55_spill] sm:$0xff] %v8698_v59 }
 0xa55   :  { %v7056_v57 = vpop.eup %7055 }
 0xa56   :  { %v7058_v33 = vpop.eup %7057 }
 0xa57   :  { %v7060_v20 = vpop.eup %7059  ;;  %v2190_v31 = vpack.c.bf16 %v7058_v33, %v7056_v57  ;;  %v8701_v57 = vld [vmem:[#allocation17] ss:$12 sps:$4 sm:$0xff]  }
 0xa58   :  { %v7062_v24 = vpop.eup %7061  ;;  %10348 = vst [vmem:[#allocation56_spill] sm:$0xff] %v8701_v57  ;;  %v8704_v33 = vld [vmem:[#allocation17 + $0x16c] ss:$12 sps:$4 sm:$0xff]  }
 0xa59   :  { %v7064_v60 = vpop.eup %7063  ;;  %v2189_v44 = vpack.c.bf16 %v7062_v24, %v7060_v20  ;;  %10349 = vst [vmem:[#allocation57_spill] sm:$0xff] %v8704_v33  ;;  %v8707_v20 = vld [vmem:[#allocation17 + $0x168] ss:$12 sps:$4 sm:$0xff]  }
 0xa5a   :  { %v7066_v45 = vpop.eup %7065  ;;  %10350 = vst [vmem:[#allocation58_spill] sm:$0xff] %v8707_v20  ;;  %v8710_v24 = vld [vmem:[#allocation17 + $0x154] ss:$12 sps:$4 sm:$0xff]  }
 0xa5b   :  { %6278 = vmatprep.mubr.bf16.mxu0 %v2189_v44  ;;  %v2191_v47 = vpack.c.bf16 %v7066_v45, %v7064_v60  ;;  %v7068_v3 = vpop.eup %7067  ;;  %10351 = vst [vmem:[#allocation59_spill] sm:$0xff] %v8710_v24  ;;  %v8716_v60 = vld [vmem:[#allocation17 + $0x13c] ss:$12 sps:$4 sm:$0xff]   ;;  %v8719_v45 = vld [vmem:[#allocation17 + $0x138] ss:$12 sps:$4 sm:$0xff]  }
 0xa5c   :  { %6279 = vmatmul.mubr.bf16.vlgmr.msra.gmra.mxu0 %v2190_v31  ;;  %v7070_v4 = vpop.eup %7069  ;;  %v8713_v31 = vld [vmem:[#allocation17 + $0x150] ss:$12 sps:$4 sm:$0xff]   ;;  %10353 = vst [vmem:[#allocation61_spill] sm:$0xff] %v8716_v60  ;;  %10354 = vst [vmem:[#allocation62_spill] sm:$0xff] %v8719_v45 }
 0xa5d   :  { %6282 = vmatprep.mubr.bf16.mxu0 %v2191_v47  ;;  %v2192_v5 = vpack.c.bf16 %v7070_v4, %v7068_v3  ;;  %5679 = vmatpush3.bf16.msra.mxu0 %v8651_v18  ;;  %10352 = vst [vmem:[#allocation60_spill] sm:$0xff] %v8713_v31  ;;  %v8722_v3 = vld [vmem:[#allocation17 + $0x124] ss:$12 sps:$4 sm:$0xff]  }
 0xa5e   :  { %5680 = vmatprep.subr.bf16.mxu0 %v8657_v51  ;;  %10355 = vst [vmem:[#allocation63_spill] sm:$0xff] %v8722_v3 }
 0xa61   :  { %5681 = vmatpush3.bf16.msra.mxu0 %v8663_v39 }
 0xa62   :  { %5682 = vmatprep.subr.bf16.mxu0 %v8666_v25 }
 0xa64   :  { %6283 = vmatmul.mubr.bf16.gmra.mxu0 %v2192_v5 }
 0xa65   :  { %2772 = vmatprep.mubr.bf16.mxu0 %v2426_v36  ;;  %v8654_v36 = vld [vmem:[#allocation17 + $0x78] ss:$12 sps:$4 sm:$0xff]   ;;  %5683 = vmatpush3.bf16.msra.mxu0 %v8675_v28 }
 0xa66   :  { %2704 = vmatpush1.bf16.msra.mxu1 %v8654_v36  ;;  %5684 = vmatprep.subr.bf16.mxu0 %v8678_v15 }
 0xa67   :  { %2705 = vmatprep.subr.bf16.mxu1 %v8660_v48 }
 0xa6a   :  { %2706 = vmatpush1.bf16.msra.mxu1 %v8669_v30 }
 0xa6b   :  { %2707 = vmatprep.subr.bf16.mxu1 %v8672_v19 }
 0xa6e   :  { %2708 = vmatpush1.bf16.msra.mxu1 %v8681_v37 }
 0xa6f   :  { %2709 = vmatprep.subr.bf16.mxu1 %v8684_v32 }
 0xa72   :  { %2710 = vmatpush1.bf16.msra.mxu1 %v8689_v21 }
 0xa73   :  { %2711 = vmatprep.subr.bf16.mxu1 %v8692_v49 }
 0xa76   :  { %2712 = vmatpush1.bf16.msra.mxu1 %v8695_v23 }
 0xa77   :  { %2713 = vmatprep.subr.bf16.mxu1 %v8698_v59 }
 0xa7a   :  { %2714 = vmatpush1.bf16.msra.mxu1 %v8701_v57 }
 0xa7b   :  { %2715 = vmatprep.subr.bf16.mxu1 %v8704_v33 }
 0xa7e   :  { %2716 = vmatpush2.bf16.msra.mxu1 %v8707_v20 }
 0xa7f   :  { %2717 = vmatprep.subr.bf16.mxu1 %v8710_v24 }
 0xa82   :  { %2718 = vmatpush2.bf16.msra.mxu1 %v8713_v31 }
 0xa83   :  { %2719 = vmatprep.subr.bf16.mxu1 %v8716_v60 }
 0xa86   :  { %2720 = vmatpush2.bf16.msra.mxu1 %v8719_v45 }
 0xa87   :  { %2721 = vmatprep.subr.bf16.mxu1 %v8722_v3 }
 0xb1c   :  { %v6280_v44 = vpop.f32.mrf.mxu0 }
 0xb1d   :  { %v2309_v38 = vsel %vm2306_vm4, %v6280_v44, -inf }
 0xb1e   :  { %v2275_v47 = vpop.f32.mrf.mxu0 }
 0xb1f   :  { %v2307_v16 = vsel %vm2306_vm4, %v2275_v47, -inf }
 0xb20   :  { %v6281_v4 = vpop.f32.mrf.mxu0 }
 0xb21   :  { %v2310_v25 = vsel %vm2306_vm4, %v6281_v4, -inf }
 0xb22   :  { %v2278_v5 = vpop.f32.mrf.mxu0 }
 0xb23   :  { %v2308_v40 = vsel %vm2306_vm4, %v2278_v5, -inf }
 0xb24   :  { %v6284_v54 = vpop.f32.mrf.mxu0 }
 0xb25   :  { %v2315_v39 = vsel %vm2306_vm4, %v6284_v54, -inf }
 0xb26   :  { %v2291_v15 = vpop.f32.mrf.mxu0  ;;  %v2316_v11 = vmax.f32 %v2309_v38, %v2315_v39 }
 0xb27   :  { %v2311_v51 = vsel %vm2306_vm4, %v2291_v15, -inf }
 0xb28   :  { %v6285_v28 = vpop.f32.mrf.mxu0  ;;  %v2312_v46 = vmax.f32 %v2307_v16, %v2311_v51 }
 0xb29   :  { %v2317_v18 = vsel %vm2306_vm4, %v6285_v28, -inf }
 0xb2a   :  { %v2318_v14 = vmax.f32 %v2310_v25, %v2317_v18  ;;  %v2294_v43 = vpop.f32.mrf.mxu0 }
 0xb2b   :  { %v2313_v13 = vsel %vm2306_vm4, %v2294_v43, -inf }
 0xb2c   :  { %v2314_v12 = vmax.f32 %v2308_v40, %v2313_v13  ;;  %v2320_v55 = vmax.f32 %v2316_v11, %v2318_v14 }
 0xb2e   :  { %v2319_v3 = vmax.f32 %v2312_v46, %v2314_v12 }
 0xb30   :  { %v2321_v45 = vmax.f32 %v2319_v3, %v2320_v55  ;;  %v8744_v3 = vld [vmem:[#allocation17 + $0x68] ss:$12 sps:$4 sm:$0xff]  }
 0xb31   :  { %5685 = vmatpush3.bf16.msra.mxu0 %v8744_v3 }
 0xb32   :  { %v2322_v60 = vsub.f32 %v2275_v47, %v2321_v45  ;;  %v2324_v31 = vsub.f32 %v6280_v44, %v2321_v45  ;;  %v2323_v20 = vsub.f32 %v2278_v5, %v2321_v45  ;;  %v2325_v18 = vsub.f32 %v6281_v4, %v2321_v45  ;;  %v8742_v47 = vld [vmem:[#allocation17 + $0x120] ss:$12 sps:$4 sm:$0xff]  }
 0xb33   :  { %v2326_v33 = vsub.f32 %v2291_v15, %v2321_v45  ;;  %v2327_v59 = vsub.f32 %v2294_v43, %v2321_v45  ;;  %v2328_v49 = vsub.f32 %v6284_v54, %v2321_v45  ;;  %v2329_v16 = vsub.f32 %v6285_v28, %v2321_v45  ;;  %2722 = vmatpush2.bf16.msra.mxu1 %v8742_v47 }
 0xb34   :  { %v2330_v24 = vmul.f32 1.442695, %v2322_v60  ;;  %v2334_v25 = vmul.f32 1.442695, %v2324_v31  ;;  %v2332_v57 = vmul.f32 1.442695, %v2323_v20 }
 0xb35   :  { %v2336_v23 = vmul.f32 1.442695, %v2325_v18  ;;  %v2338_v21 = vmul.f32 1.442695, %v2326_v33  ;;  %v2340_v11 = vmul.f32 1.442695, %v2327_v59 }
 0xb36   :  { %7071 = vpow2.f32 %v2330_v24  ;;  %v2342_v55 = vmul.f32 1.442695, %v2328_v49  ;;  %v2344_v12 = vmul.f32 1.442695, %v2329_v16  ;;  %v8750_v16 = vld [vmem:[#allocation17 + $0x110] ss:$12 sps:$4 sm:$0xff]  }
 0xb37   :  { %7073 = vpow2.f32 %v2334_v25  ;;  %v8748_v25 = vld [vmem:[#allocation17 + $0x10c] ss:$12 sps:$4 sm:$0xff]   ;;  %5686 = vmatprep.subr.bf16.mxu0 %v8750_v16 }
 0xb38   :  { %7075 = vpow2.f32 %v2332_v57  ;;  %2723 = vmatprep.subr.bf16.mxu1 %v8748_v25 }
 0xb39   :  { %7077 = vpow2.f32 %v2336_v23 }
 0xb3a   :  { %7079 = vpow2.f32 %v2338_v21 }
 0xb3b   :  { %7081 = vpow2.f32 %v2340_v11  ;;  %v8752_v11 = vld [vmem:[#allocation17 + $0x108] ss:$12 sps:$4 sm:$0xff]  }
 0xb3c   :  { %7083 = vpow2.f32 %v2342_v55  ;;  %v8754_v55 = vld [vmem:[#allocation17 + $0x50] ss:$12 sps:$4 sm:$0xff]   ;;  %2724 = vmatpush2.bf16.msra.mxu1 %v8752_v11 }
 0xb3d   :  { %7085 = vpow2.f32 %v2344_v12  ;;  %5687 = vmatpush3.bf16.msra.mxu0 %v8754_v55 }
 0xb43   :  { %v7072_v13 = vpop.eup %7071 }
 0xb44   :  { %v7074_v46 = vpop.eup %7073  ;;  %v2346_v40 = vsel %vm2306_vm4, %v7072_v13, 0.0 }
 0xb45   :  { %v7076_v38 = vpop.eup %7075  ;;  %v2349_v51 = vsel %vm2306_vm4, %v7074_v46, 0.0 }
 0xb46   :  { %v2347_v43 = vsel %vm2306_vm4, %v7076_v38, 0.0  ;;  %v7078_v14 = vpop.eup %7077 }
 0xb47   :  { %v2348_v54 = vadd.f32 %v2347_v43, %v2346_v40  ;;  %v7080_v39 = vpop.eup %7079  ;;  %v2351_v15 = vsel %vm2306_vm4, %v7078_v14, 0.0  ;;  %v8764_v43 = vld [vmem:[#allocation17 + $0xf0] ss:$12 sps:$4 sm:$0xff]  }
 0xb48   :  { %v7082_v21 = vpop.eup %7081  ;;  %v2353_v23 = vsel %vm2306_vm4, %v7080_v39, 0.0 }
 0xb49   :  { %v2350_v28 = vadd.f32 %v2349_v51, %v2348_v54  ;;  %v7084_v59 = vpop.eup %7083  ;;  %v2355_v33 = vsel %vm2306_vm4, %v7082_v21, 0.0  ;;  %v8766_v54 = vld [vmem:[#allocation17 + $0x38] ss:$12 sps:$4 sm:$0xff]   ;;  %v8772_v51 = vld [vmem:[#allocation17 + $0xdc] ss:$12 sps:$4 sm:$0xff]  }
 0xb4a   :  { %v7086_v20 = vpop.eup %7085  ;;  %v2357_v31 = vsel %vm2306_vm4, %v7084_v59, 0.0 }
 0xb4b   :  { %v2352_v49 = vadd.f32 %v2351_v15, %v2350_v28  ;;  %v2359_v44 = vsel %vm2306_vm4, %v7086_v20, 0.0  ;;  %v8774_v28 = vld [vmem:[#allocation17 + $0xe0] ss:$12 sps:$4 sm:$0xff]   ;;  %v8776_v15 = vld [vmem:[#allocation17 + $0xd8] ss:$12 sps:$4 sm:$0xff]  }
 0xb4d   :  { %v2354_v57 = vadd.f32 %v2353_v23, %v2352_v49  ;;  %v8778_v49 = vld [vmem:[#allocation17 + $0x20] ss:$12 sps:$4 sm:$0xff]   ;;  %v8784_v23 = vld [vmem:[#allocation17 + $0xc4] ss:$12 sps:$4 sm:$0xff]  }
 0xb4f   :  { %v2356_v24 = vadd.f32 %v2355_v33, %v2354_v57  ;;  %v8786_v57 = vld [vmem:[#allocation17 + $0xc8] ss:$12 sps:$4 sm:$0xff]   ;;  %v8788_v33 = vld [vmem:[#allocation17 + $0xc0] ss:$12 sps:$4 sm:$0xff]  }
 0xb50   :  { %10356 = vst [vmem:[#allocation64_spill] sm:$0xff] %v8786_v57 }
 0xb51   :  { %v2358_v60 = vadd.f32 %v2357_v31, %v2356_v24  ;;  %v8790_v24 = vld [vmem:[#allocation17 + $0x8] ss:$12 sps:$4 sm:$0xff]  }
 0xb52   :  { %10357 = vst [vmem:[#allocation65_spill] sm:$0xff] %v8790_v24 }
 0xb53   :  { %v2360_v45 = vadd.f32 %v2359_v44, %v2358_v60 }
 0xb55   :  { %7087 = vrcp.f32 %v2360_v45 }
 0xb62   :  { %v7088_v4 = vpop.eup %7087 }
 0xb63   :  { %v2363_v5 = vmul.f32 %v7088_v4, %v7076_v38  ;;  %v2362_v18 = vmul.f32 %v7088_v4, %v7072_v13  ;;  %v2364_v12 = vmul.f32 %v7088_v4, %v7074_v46  ;;  %v2365_v40 = vmul.f32 %v7088_v4, %v7078_v14  ;;  %v8760_v13 = vld [vmem:[#allocation17 + $0xf4] ss:$12 sps:$4 sm:$0xff]   ;;  %v8762_v38 = vld [vmem:[#allocation17 + $0xf8] ss:$12 sps:$4 sm:$0xff]  }
 0xb64   :  { %2725 = vmatprep.subr.bf16.mxu1 %v8760_v13  ;;  %5688 = vmatprep.subr.bf16.mxu0 %v8762_v38  ;;  %v2366_v46 = vmul.f32 %v7088_v4, %v7080_v39  ;;  %v2367_v14 = vmul.f32 %v7088_v4, %v7082_v21  ;;  %v2368_v39 = vmul.f32 %v7088_v4, %v7084_v59  ;;  %v8796_v59 = vld [vmem:[#allocation19 + $0xac] ss:$12 sps:$4 sm:$0xff]  }
 0xb65   :  { %2377 = vperm.xlu1 %6766, %v2363_v5   ;;  %2372 = vperm.xlu0 %6765, %v2362_v18   ;;  %v2369_v21 = vmul.f32 %v7088_v4, %v7086_v20  ;;  %10358 = vst [vmem:[#allocation66_spill] sm:$0xff] %v8796_v59 }
 0xb66   :  { %2726 = vmatpush2.bf16.msra.mxu1 %v8764_v43  ;;  %5689 = vmatpush3.bf16.msra.mxu0 %v8766_v54 }
 0xb67   :  { %2727 = vmatprep.subr.bf16.mxu1 %v8772_v51  ;;  %5690 = vmatprep.subr.bf16.mxu0 %v8774_v28 }
 0xb69   :  { %2382 = vperm.xlu1 %6766, %v2364_v12   ;;  %2387 = vperm.xlu0 %6765, %v2365_v40  }
 0xb6a   :  { %2728 = vmatpush2.bf16.msra.mxu1 %v8776_v15  ;;  %5691 = vmatpush3.bf16.msra.mxu0 %v8778_v49 }
 0xb6b   :  { %2729 = vmatprep.subr.bf16.mxu1 %v8784_v23  ;;  %5692 = vmatprep.subr.bf16.mxu0 %v8786_v57 }
 0xb6d   :  { %2392 = vperm.xlu1 %6766, %v2366_v46   ;;  %2397 = vperm.xlu0 %6765, %v2367_v14  }
 0xb6e   :  { %2730 = vmatpush2.bf16.msra.mxu1 %v8788_v33  ;;  %5693 = vmatpush3.bf16.msra.mxu0 %v8790_v24 }
 0xb6f   :  { %6286 = vmatprep.subr.bf16.mxu1 %v10317_v34  ;;  %2924 = vmatprep.subr.bf16.mxu0 %v8796_v59 }
 0xb71   :  { %2402 = vperm.xlu1 %6766, %v2368_v39   ;;  %2407 = vperm.xlu0 %6765, %v2369_v21  }
 0xbe0   :  { %v2378_v20 = vpop.permute.xlu1 %2377  ;;  %v2373_v31 = vpop.permute.xlu0 %2372 }
 0xbe1   :  { %v2411_v60 = vmul.f32 %v2378_v20, %v8250_v27  ;;  %v2410_v44 = vmul.f32 %v2373_v31, %v8202_v42 }
 0xbe3   :  { %v2418_v5 = vadd.f32 %v2411_v60, %v2410_v44 }
 0xbe4   :  { %v2383_v45 = vpop.permute.xlu1 %2382  ;;  %v2388_v4 = vpop.permute.xlu0 %2387 }
 0xbe5   :  { %v2412_v18 = vmul.f32 %v2383_v45, %v8296_v22  ;;  %v2413_v40 = vmul.f32 %v2388_v4, %v8343_v35  ;;  %v8808_v45 = vld [vmem:[#allocation19 + $0xa8] ss:$12 sps:$4 sm:$0xff]   ;;  %v8810_v4 = vld [vmem:[#allocation19 + $0xb0] ss:$12 sps:$4 sm:$0xff]  }
 0xbe7   :  { %v2419_v12 = vadd.f32 %v2418_v5, %v2412_v18  ;;  %v8812_v18 = vld [vmem:[#allocation19 + $0x94] ss:$12 sps:$4 sm:$0xff]  }
 0xbe8   :  { %v2393_v46 = vpop.permute.xlu1 %2392  ;;  %v2398_v14 = vpop.permute.xlu0 %2397 }
 0xbe9   :  { %v2420_v39 = vadd.f32 %v2419_v12, %v2413_v40  ;;  %v2414_v21 = vmul.f32 %v2393_v46, %v8389_v41  ;;  %v2415_v24 = vmul.f32 %v2398_v14, %v8436_v17  ;;  %v8835_v12 = vld [vmem:[#allocation19 + $0x64] ss:$12 sps:$4 sm:$0xff]   ;;  %v8839_v40 = vld [vmem:[#allocation19 + $0x60] ss:$12 sps:$4 sm:$0xff]   ;;  %v8841_v46 = vld [vmem:[#allocation19 + $0x68] ss:$12 sps:$4 sm:$0xff]  }
 0xbea   :  { %10363 = vst [vmem:[#allocation71_spill] sm:$0xff] %v8835_v12  ;;  %10364 = vst [vmem:[#allocation72_spill] sm:$0xff] %v8839_v40  ;;  %v8845_v14 = vld [vmem:[#allocation19 + $0x4c] ss:$12 sps:$4 sm:$0xff]  }
 0xbeb   :  { %v2421_v59 = vadd.f32 %v2420_v39, %v2414_v21  ;;  %10365 = vst [vmem:[#allocation73_spill] sm:$0xff] %v8841_v46  ;;  %10366 = vst [vmem:[#allocation74_spill] sm:$0xff] %v8845_v14  ;;  %v8849_v39 = vld [vmem:[#allocation19 + $0x48] ss:$12 sps:$4 sm:$0xff]   ;;  %v8851_v21 = vld [vmem:[#allocation19 + $0x50] ss:$12 sps:$4 sm:$0xff]  }
 0xbec   :  { %v2403_v57 = vpop.permute.xlu1 %2402  ;;  %v2408_v20 = vpop.permute.xlu0 %2407  ;;  %10367 = vst [vmem:[#allocation75_spill] sm:$0xff] %v8849_v39  ;;  %10368 = vst [vmem:[#allocation76_spill] sm:$0xff] %v8851_v21 }
 0xbed   :  { %v2422_v27 = vadd.f32 %v2421_v59, %v2415_v24  ;;  %v2416_v31 = vmul.f32 %v2403_v57, %v8461_v62  ;;  %v2417_v60 = vmul.f32 %v2408_v20, %v8574_v29  ;;  %v8816_v24 = vld [vmem:[#allocation19 + $0x90] ss:$12 sps:$4 sm:$0xff]   ;;  %v8818_v57 = vld [vmem:[#allocation19 + $0x98] ss:$12 sps:$4 sm:$0xff]   ;;  %v8831_v59 = vld [vmem:[#allocation19 + $0x80] ss:$12 sps:$4 sm:$0xff]  }
 0xbee   :  { %10359 = vst [vmem:[#allocation67_spill] sm:$0xff] %v8818_v57  ;;  %10362 = vst [vmem:[#allocation70_spill] sm:$0xff] %v8831_v59  ;;  %v8855_v20 = vld [vmem:[#allocation19 + $0x34] ss:$12 sps:$4 sm:$0xff]  }
 0xbef   :  { %v2423_v42 = vadd.f32 %v2422_v27, %v2416_v31  ;;  %v8829_v27 = vld [vmem:[#allocation19 + $0x78] ss:$12 sps:$4 sm:$0xff]   ;;  %10369 = vst [vmem:[#allocation77_spill] sm:$0xff] %v8855_v20  ;;  %v8859_v31 = vld [vmem:[#allocation19 + $0x30] ss:$12 sps:$4 sm:$0xff]  }
 0xbf0   :  { %10361 = vst [vmem:[#allocation69_spill] sm:$0xff] %v8829_v27  ;;  %10370 = vst [vmem:[#allocation78_spill] sm:$0xff] %v8859_v31 }
 0xbf1   :  { %v2424_v44 = vadd.f32 %v2423_v42, %v2417_v60  ;;  %v8822_v42 = vld [vmem:[#allocation19 + $0x7c] ss:$12 sps:$4 sm:$0xff]   ;;  %v8861_v60 = vld [vmem:[#allocation19 + $0x38] ss:$12 sps:$4 sm:$0xff]  }
 0xbf2   :  { %10360 = vst [vmem:[#allocation68_spill] sm:$0xff] %v8822_v42  ;;  %10371 = vst [vmem:[#allocation79_spill] sm:$0xff] %v8861_v60 }
 0xbf3   :  { %v2425_v5 = vpack.c.bf16 %v2424_v44, %v2424_v44  ;;  %v8865_v44 = vld [vmem:[#allocation19 + $0x1c] ss:$12 sps:$4 sm:$0xff]  }
 0xbf4   :  { %10372 = vst [vmem:[#allocation80_spill] sm:$0xff] %v8865_v44 }
 0xbf5   :  { %2732 = vmatmul.mubr.bf16.vlgmr.msra.gmra.mxu1 %v2425_v5  ;;  %2773 = vmatmul.mubr.bf16.vlgmr.msra.gmra.mxu0 %v2425_v5  ;;  %v8869_v5 = vld [vmem:[#allocation19 + $0x18] ss:$12 sps:$4 sm:$0xff]  }
 0xbf6   :  { %2925 = vmatpush1.bf16.msra.mxu0 %v8808_v45  ;;  %6287 = vmatpush3.bf16.msra.mxu1 %v8810_v4  ;;  %10373 = vst [vmem:[#allocation81_spill] sm:$0xff] %v8869_v5 }
 0xbf7   :  { %2926 = vmatprep.subr.bf16.mxu0 %v8812_v18  ;;  %6288 = vmatprep.subr.bf16.mxu1 %v10317_v34 }
 0xbf8   :  { %2956 = vmatprep.mubr.bf16.mxu0 %v10318_v26  ;;  %6302 = vmatprep.mubr.msk.bf16.mxu1 %vm7824_vm1, %v10317_v34 }
 0xbfa   :  { %2927 = vmatpush1.bf16.msra.mxu0 %v8816_v24  ;;  %6289 = vmatpush3.bf16.msra.mxu1 %v8818_v57 }
 0xbfb   :  { %2928 = vmatprep.subr.bf16.mxu0 %v8822_v42  ;;  %6290 = vmatprep.subr.bf16.mxu1 %v10317_v34 }
 0xbfe   :  { %2929 = vmatpush1.bf16.msra.mxu0 %v8829_v27  ;;  %6291 = vmatpush3.bf16.msra.mxu1 %v8831_v59 }
 0xbff   :  { %2930 = vmatprep.subr.bf16.mxu0 %v8835_v12  ;;  %6292 = vmatprep.subr.bf16.mxu1 %v10317_v34 }
 0xc02   :  { %2931 = vmatpush1.bf16.msra.mxu0 %v8839_v40  ;;  %6293 = vmatpush3.bf16.msra.mxu1 %v8841_v46 }
 0xc03   :  { %2932 = vmatprep.subr.bf16.mxu0 %v8845_v14  ;;  %6294 = vmatprep.subr.bf16.mxu1 %v10317_v34  ;;  %v8871_v14 = vld [vmem:[#allocation19 + $0x20] ss:$12 sps:$4 sm:$0xff]  }
 0xc04   :  { %10374 = vst [vmem:[#allocation82_spill] sm:$0xff] %v8871_v14 }
 0xc06   :  { %2933 = vmatpush1.bf16.msra.mxu0 %v8849_v39  ;;  %6295 = vmatpush3.bf16.msra.mxu1 %v8851_v21  ;;  %v8875_v21 = vld [vmem:[#allocation19 + $0x4] ss:$12 sps:$4 sm:$0xff]   ;;  %v8881_v39 = vld [vmem:[#allocation19 + $0x8] ss:$12 sps:$4 sm:$0xff]  }
 0xc07   :  { %2934 = vmatprep.subr.bf16.mxu0 %v8855_v20  ;;  %6296 = vmatprep.subr.bf16.mxu1 %v10317_v34  ;;  %10375 = vst [vmem:[#allocation83_spill] sm:$0xff] %v8875_v21  ;;  %v8879_v20 = vld [vmem:[#allocation19] ss:$12 sps:$4 sm:$0xff]   ;;  %10377 = vst [vmem:[#allocation85_spill] sm:$0xff] %v8881_v39 }
 0xc08   :  { %10376 = vst [vmem:[#allocation84_spill] sm:$0xff] %v8879_v20 }
 0xc0a   :  { %2935 = vmatpush1.bf16.msra.mxu0 %v8859_v31  ;;  %6297 = vmatpush3.bf16.msra.mxu1 %v8861_v60 }
 0xc0b   :  { %2936 = vmatprep.subr.bf16.mxu0 %v8865_v44  ;;  %6298 = vmatprep.subr.bf16.mxu1 %v10317_v34 }
 0xc0e   :  { %2937 = vmatpush1.bf16.msra.mxu0 %v8869_v5  ;;  %6299 = vmatpush3.bf16.msra.mxu1 %v8871_v14 }
 0xc0f   :  { %2938 = vmatprep.subr.bf16.mxu0 %v8875_v21  ;;  %6300 = vmatprep.subr.bf16.mxu1 %v10317_v34 }
 0xc12   :  { %2939 = vmatpush1.bf16.msra.mxu0 %v8879_v20  ;;  %6301 = vmatpush3.bf16.msra.mxu1 %v8881_v39  ;;  %v1968_v20 = vld [vmem:[%s10100_s16] sm:$0x7] }
 0xc13   :  { %6306 = vmatprep.subr.bf16.mxu0 %v10317_v34  ;;  %6326 = vmatprep.subr.bf16.mxu1 %v10317_v34 }
 0xc15   :  { %2957 = vmatmul.mubr.bf16.vlgmr.msra.gmra.mxu0 %v8586_v52  ;;  %6303 = vmatmul.mubr.bf16.vlgmr.msra.gmra.mxu1 %v8586_v52 }
 0xc16   :  { %6322 = vmatprep.mubr.msk.bf16.mxu0 %vm7824_vm1, %v10317_v34  ;;  %6327 = vmatpush3.bf16.msra.mxu1 %v8529_v50  ;;  %v8911_v50 = vld [vmem:[#allocation20 + $0x38] sm:$0xff]  }
 0xc17   :  { %6328 = vmatprep.subr.bf16.mxu1 %v10317_v34  ;;  %6342 = vmatprep.mubr.msk.bf16.mxu1 %vm7824_vm1, %v10317_v34  ;;  %10378 = vst [vmem:[#allocation86_spill] sm:$0xff] %v8911_v50 }
 0xc18   :  { %6307 = vmatpush3.bf16.msra.mxu0 %v8911_v50 }
 0xc19   :  { %6308 = vmatprep.subr.bf16.mxu0 %v10317_v34 }
 0xc1a   :  { %6329 = vmatpush3.bf16.msra.mxu1 %v8532_v53  ;;  %v8915_v53 = vld [vmem:[#allocation20 + $0x30] sm:$0xff]  }
 0xc1b   :  { %6330 = vmatprep.subr.bf16.mxu1 %v10317_v34  ;;  %10379 = vst [vmem:[#allocation87_spill] sm:$0xff] %v8915_v53 }
 0xc1c   :  { %6309 = vmatpush3.bf16.msra.mxu0 %v8915_v53 }
 0xc1d   :  { %6310 = vmatprep.subr.bf16.mxu0 %v10317_v34 }
 0xc1e   :  { %6331 = vmatpush3.bf16.msra.mxu1 %v8536_v56  ;;  %v8919_v56 = vld [vmem:[#allocation20 + $0x28] sm:$0xff]  }
 0xc1f   :  { %6332 = vmatprep.subr.bf16.mxu1 %v10317_v34  ;;  %10380 = vst [vmem:[#allocation88_spill] sm:$0xff] %v8919_v56 }
 0xc20   :  { %6311 = vmatpush3.bf16.msra.mxu0 %v8919_v56 }
 0xc21   :  { %6312 = vmatprep.subr.bf16.mxu0 %v10317_v34 }
 0xc22   :  { %6333 = vmatpush3.bf16.msra.mxu1 %v8540_v58  ;;  %v8923_v58 = vld [vmem:[#allocation20 + $0x20] sm:$0xff]  }
 0xc23   :  { %6334 = vmatprep.subr.bf16.mxu1 %v10317_v34  ;;  %10381 = vst [vmem:[#allocation89_spill] sm:$0xff] %v8923_v58 }
 0xc24   :  { %6313 = vmatpush3.bf16.msra.mxu0 %v8923_v58 }
 0xc25   :  { %6314 = vmatprep.subr.bf16.mxu0 %v10317_v34 }
 0xc26   :  { %6335 = vmatpush3.bf16.msra.mxu1 %v8544_v61  ;;  %v8926_v61 = vld [vmem:[#allocation20 + $0x18] sm:$0xff]  }
 0xc27   :  { %6336 = vmatprep.subr.bf16.mxu1 %v10317_v34  ;;  %10382 = vst [vmem:[#allocation90_spill] sm:$0xff] %v8926_v61 }
 0xc28   :  { %6315 = vmatpush3.bf16.msra.mxu0 %v8926_v61 }
 0xc29   :  { %6316 = vmatprep.subr.bf16.mxu0 %v10317_v34 }
 0xc2a   :  { %6337 = vmatpush3.bf16.msra.mxu1 %v8548_v63  ;;  %v8930_v63 = vld [vmem:[#allocation20 + $0x10] sm:$0xff]  }
 0xc2b   :  { %6338 = vmatprep.subr.bf16.mxu1 %v10317_v34  ;;  %10383 = vst [vmem:[#allocation91_spill] sm:$0xff] %v8930_v63 }
 0xc2c   :  { %6317 = vmatpush3.bf16.msra.mxu0 %v8930_v63 }
 0xc2d   :  { %6318 = vmatprep.subr.bf16.mxu0 %v10317_v34 }
 0xc2e   :  { %6339 = vmatpush3.bf16.msra.mxu1 %v8552_v0  ;;  %v8934_v0 = vld [vmem:[#allocation20 + $0x8] sm:$0xff]  }
 0xc2f   :  { %6340 = vmatprep.subr.bf16.mxu1 %v10317_v34  ;;  %10384 = vst [vmem:[#allocation92_spill] sm:$0xff] %v8934_v0 }
 0xc30   :  { %6319 = vmatpush3.bf16.msra.mxu0 %v8934_v0  ;;  %v1967_v0 = vld [vmem:[%s10099_s15] sm:$0x7] }
 0xc31   :  { %6320 = vmatprep.subr.bf16.mxu0 %v10317_v34 }
 0xc32   :  { %6341 = vmatpush3.bf16.msra.mxu1 %v8556_v1  ;;  %v8938_v1 = vld [vmem:[#allocation20] sm:$0xff]  }
 0xc33   :  { %6366 = vmatprep.subr.bf16.mxu1 %v8562_v2  ;;  %10385 = vst [vmem:[#allocation93_spill] sm:$0xff] %v8938_v1 }
 0xc34   :  { %6321 = vmatpush3.bf16.msra.mxu0 %v8938_v1  ;;  %v10386_v1 = vld [vmem:[#allocation32_spill] sm:$0xff] }
 0xc35   :  { %6346 = vmatprep.subr.bf16.mxu0 %v10317_v34  ;;  %v8950_v21 = vrot.slane %v1967_v0, %v10386_v1  ;;  %v8953_v14 = vrot.slane %v1968_v20, %v10386_v1 }
 0xc37   :  { %10387 = vst [vmem:[#allocation32_spill] sm:$0xff] %v8950_v21  ;;  %10388 = vst [vmem:[#allocation94_spill] sm:$0xff] %v8953_v14 }
 0xcb5   :  { %v2733_v2 = vpop.f32.mrf.mxu1  ;;  %v5694_v52 = vpop.f32.mrf.mxu0 }
 0xcb7   :  { %v2735_v61 = vpop.f32.mrf.mxu1  ;;  %v5695_v58 = vpop.f32.mrf.mxu0 }
 0xcb8   :  { %v5696_v56 = vadd.f32 %v5695_v58, %v5694_v52 }
 0xcb9   :  { %v2737_v63 = vpop.f32.mrf.mxu1  ;;  %v5697_v53 = vpop.f32.mrf.mxu0 }
 0xcba   :  { %v2734_v53 = vadd.f32 %v2733_v2, %v8950_v21 }
 0xcbb   :  { %v2738_v50 = vpop.f32.mrf.mxu1  ;;  %v5698_v39 = vpop.f32.mrf.mxu0 }
 0xcbc   :  { %v10389_v50 = vld [vmem:[#allocation33_spill] sm:$0xff] }
 0xcbd   :  { %v8958_v63 = vrot.slane %v1968_v20, %v10389_v50  ;;  %v8961_v60 = vrot.slane %v1967_v0, %v10389_v50  ;;  %v10392_v50 = vld [vmem:[#allocation31_spill] sm:$0xff] }
 0xcbe   :  { %v8966_v57 = vrot.slane %v1968_v20, %v10392_v50 }
 0xcbf   :  { %10390 = vst [vmem:[#allocation33_spill] sm:$0xff] %v8958_v63  ;;  %10391 = vst [vmem:[#allocation95_spill] sm:$0xff] %v8961_v60  ;;  %v2736_v2 = vadd.f32 %v2735_v61, %v8961_v60 }
 0xcc0   :  { %10393 = vst [vmem:[#allocation31_spill] sm:$0xff] %v8966_v57 }
 0xcd5   :  { %v2958_v5 = vpop.f32.mrf.mxu0  ;;  %v2999_v58 = vpop.f32.mrf.mxu1 }
 0xcd6   :  { %v2959_v39 = vadd.f32 %v2958_v5, %v8953_v14 }
 0xcd7   :  { %v2960_v52 = vpop.f32.mrf.mxu0  ;;  %v6304_v44 = vpop.f32.mrf.mxu1 }
 0xcd8   :  { %v3005_v31 = vadd.f32 %v2959_v39, %v2734_v53  ;;  %v2961_v1 = vadd.f32 %v2960_v52, %v8958_v63  ;;  %v9000_v52 = vld [vmem:[%s10094_s10 + $0x28] sm:$0xff]  }
 0xcd9   :  { %v2962_v46 = vpop.f32.mrf.mxu0  ;;  %v3002_v40 = vpop.f32.mrf.mxu1 }
 0xcda   :  { %v5513_v12 = vmul.f32 -1.442695, %v3005_v31  ;;  %v3012_v5 = vadd.f32 %v2961_v1, %v2736_v2  ;;  %v8969_v40 = vrot.slane %v1967_v0, %v10392_v50  ;;  %v9007_v1 = vld [vmem:[%s10094_s10 + $0x20] sm:$0xff]   ;;  %v9014_v2 = vld [vmem:[%s10094_s10 + $0x18] sm:$0xff]  }
 0xcdb   :  { %v2963_v59 = vpop.f32.mrf.mxu0  ;;  %v6305_v27 = vpop.f32.mrf.mxu1  ;;  %v9035_v50 = vld [vmem:[%s10094_s10] sm:$0xff]  }
 0xcdc   :  { %7089 = vpow2.f32 %v5513_v12  ;;  %v5514_v14 = vmul.f32 -1.442695, %v3012_v5  ;;  %10394 = vst [vmem:[#allocation96_spill] sm:$0xff] %v8969_v40  ;;  %v3000_v59 = vadd.f32 %v2999_v58, %v8966_v57  ;;  %v2775_v31 = vadd.f32 %v5696_v56, %v8969_v40  ;;  %v8984_v56 = vld [vmem:[%s10094_s10 + $0x38] sm:$0xff]   ;;  %v8993_v58 = vld [vmem:[%s10094_s10 + $0x30] sm:$0xff]  }
 0xcdd   :  { %v9021_v5 = vld [vmem:[%s10094_s10 + $0x10] sm:$0xff]  }
 0xcde   :  { %7091 = vpow2.f32 %v5514_v14 }
 0xce9   :  { %v7090_v21 = vpop.eup %7089 }
 0xcea   :  { %v3009_v42 = vadd.f32 1.0, %v7090_v21 }
 0xceb   :  { %v7092_v44 = vpop.eup %7091 }
 0xcec   :  { %7093 = vrcp.f32 %v3009_v42  ;;  %v3016_v46 = vadd.f32 1.0, %v7092_v44  ;;  %v9028_v44 = vld [vmem:[%s10094_s10 + $0x8] sm:$0xff]  }
 0xcee   :  { %7095 = vrcp.f32 %v3016_v46  ;;  %v10406_v46 = vld [vmem:[#allocation63_spill] sm:$0xff] }
 0xcf9   :  { %v7094_v27 = vpop.eup %7093 }
 0xcfa   :  { %v3019_v12 = vmul.f32 %v7094_v27, %v3000_v59 }
 0xcfb   :  { %v7096_v14 = vpop.eup %7095 }
 0xcfc   :  { %v3020_v61 = vadd.f32 %v3019_v12, %v2775_v31  ;;  %v3022_v21 = vsub.f32 1.0, %v7096_v14  ;;  %v3024_v20 = vmul.f32 %v7096_v14, %v8574_v29 }
 0xcfe   :  { %7097 = vtanh.f32 %v3020_v61 }
 0xd0b   :  { %v7098_v42 = vpop.eup %7097 }
 0xd0c   :  { %v3023_v53 = vmul.f32 %v7098_v42, %v3022_v21 }
 0xd0e   :  { %v8974_v39 = vadd.f32 %v3024_v20, %v3023_v53 }
 0xd10   :  { %v8978_v0 = vpack.c.bf16 %v8974_v39, %v8974_v39 }
 0xd12   :  { %6323 = vmatmul.mubr.bf16.vlgmr.msra.gmra.mxu0 %v8978_v0 }
 0xd13   :  { %6347 = vmatpush3.bf16.msra.mxu0 %v8984_v56  ;;  %6362 = vmatprep.mubr.msk.bf16.mxu0 %vm7824_vm1, %v10317_v34 }
 0xd14   :  { %6348 = vmatprep.subr.bf16.mxu0 %v10317_v34 }
 0xd17   :  { %6349 = vmatpush3.bf16.msra.mxu0 %v8993_v58 }
 0xd18   :  { %6350 = vmatprep.subr.bf16.mxu0 %v10317_v34 }
 0xd1b   :  { %6351 = vmatpush3.bf16.msra.mxu0 %v9000_v52 }
 0xd1c   :  { %6352 = vmatprep.subr.bf16.mxu0 %v10317_v34 }
 0xd1f   :  { %6353 = vmatpush3.bf16.msra.mxu0 %v9007_v1 }
 0xd20   :  { %6354 = vmatprep.subr.bf16.mxu0 %v10317_v34 }
 0xd23   :  { %6355 = vmatpush3.bf16.msra.mxu0 %v9014_v2 }
 0xd24   :  { %6356 = vmatprep.subr.bf16.mxu0 %v10317_v34 }
 0xd27   :  { %6357 = vmatpush3.bf16.msra.mxu0 %v9021_v5 }
 0xd28   :  { %6358 = vmatprep.subr.bf16.mxu0 %v10317_v34 }
 0xd2b   :  { %6359 = vmatpush3.bf16.msra.mxu0 %v9028_v44 }
 0xd2c   :  { %6360 = vmatprep.subr.bf16.mxu0 %v10317_v34 }
 0xd2f   :  { %6361 = vmatpush3.bf16.msra.mxu0 %v9035_v50 }
 0xd30   :  { %3439 = vmatprep.subr.bf16.mxu0 %v8636_v6  ;;  %v10395_v6 = vld [vmem:[#allocation52_spill] sm:$0xff] }
 0xd32   :  { %6363 = vmatmul.mubr.bf16.vlgmr.msra.gmra.mxu0 %v8978_v0 }
 0xd33   :  { %3440 = vmatpush1.bf16.msra.mxu0 %v8638_v7  ;;  %v10396_v7 = vld [vmem:[#allocation53_spill] sm:$0xff] }
 0xd34   :  { %3441 = vmatprep.subr.bf16.mxu0 %v8640_v8  ;;  %v10397_v8 = vld [vmem:[#allocation54_spill] sm:$0xff] }
 0xd37   :  { %3442 = vmatpush1.bf16.msra.mxu0 %v8644_v9  ;;  %v10398_v9 = vld [vmem:[#allocation55_spill] sm:$0xff] }
 0xd38   :  { %3443 = vmatprep.subr.bf16.mxu0 %v8647_v10  ;;  %v10399_v10 = vld [vmem:[#allocation56_spill] sm:$0xff] }
 0xd3b   :  { %3444 = vmatpush1.bf16.msra.mxu0 %v8654_v36  ;;  %v10400_v36 = vld [vmem:[#allocation57_spill] sm:$0xff] }
 0xd3c   :  { %3445 = vmatprep.subr.bf16.mxu0 %v8660_v48  ;;  %v10401_v48 = vld [vmem:[#allocation58_spill] sm:$0xff] }
 0xd3f   :  { %3446 = vmatpush1.bf16.msra.mxu0 %v8669_v30  ;;  %v10402_v30 = vld [vmem:[#allocation59_spill] sm:$0xff] }
 0xd40   :  { %3447 = vmatprep.subr.bf16.mxu0 %v8672_v19  ;;  %v10403_v19 = vld [vmem:[#allocation60_spill] sm:$0xff] }
 0xd43   :  { %3448 = vmatpush1.bf16.msra.mxu0 %v8681_v37  ;;  %v10404_v37 = vld [vmem:[#allocation61_spill] sm:$0xff] }
 0xd44   :  { %3449 = vmatprep.subr.bf16.mxu0 %v8684_v32  ;;  %v10405_v32 = vld [vmem:[#allocation62_spill] sm:$0xff] }
 0xd47   :  { %3450 = vmatpush1.bf16.msra.mxu0 %v10395_v6 }
 0xd48   :  { %3451 = vmatprep.subr.bf16.mxu0 %v10396_v7  ;;  %v10407_v7 = vld [vmem:[#allocation36_spill] sm:$0xff] }
 0xd4b   :  { %3452 = vmatpush1.bf16.msra.mxu0 %v10397_v8 }
 0xd4c   :  { %3453 = vmatprep.subr.bf16.mxu0 %v10398_v9 }
 0xd4f   :  { %3454 = vmatpush1.bf16.msra.mxu0 %v10399_v10 }
 0xd50   :  { %3455 = vmatprep.subr.bf16.mxu0 %v10400_v36 }
 0xd53   :  { %3456 = vmatpush2.bf16.msra.mxu0 %v10401_v48 }
 0xd54   :  { %3457 = vmatprep.subr.bf16.mxu0 %v10402_v30 }
 0xd57   :  { %3458 = vmatpush2.bf16.msra.mxu0 %v10403_v19 }
 0xd58   :  { %3459 = vmatprep.subr.bf16.mxu0 %v10404_v37  ;;  %v10408_v37 = vld [vmem:[#allocation34_spill] sm:$0xff] }
 0xd5b   :  { %3460 = vmatpush2.bf16.msra.mxu0 %v10405_v32 }
 0xd5c   :  { %3461 = vmatprep.subr.bf16.mxu0 %v10406_v46  ;;  %v10409_v46 = vld [vmem:[#allocation39_spill] sm:$0xff] }
 0xd5f   :  { %3462 = vmatpush2.bf16.msra.mxu0 %v8742_v47  ;;  %v9075_v47 = vld [vmem:[%s10102_s18] ss:$0 sm:$0xff] }
 0xd60   :  { %3463 = vmatprep.subr.bf16.mxu0 %v8748_v25 }
 0xd63   :  { %3464 = vmatpush2.bf16.msra.mxu0 %v8752_v11 }
 0xd64   :  { %3465 = vmatprep.subr.bf16.mxu0 %v8760_v13 }
 0xd67   :  { %3466 = vmatpush2.bf16.msra.mxu0 %v8764_v43 }
 0xd68   :  { %3467 = vmatprep.subr.bf16.mxu0 %v8772_v51 }
 0xd6b   :  { %3468 = vmatpush2.bf16.msra.mxu0 %v8776_v15 }
 0xd6c   :  { %3469 = vmatprep.subr.bf16.mxu0 %v8784_v23 }
 0xd6f   :  { %3470 = vmatpush2.bf16.msra.mxu0 %v8788_v33 }
 0xd70   :  { %6390 = vmatprep.subr.bf16.mxu0 %v10317_v34 }
 0xdd2   :  { %v3115_v25 = vpop.f32.mrf.mxu0 }
 0xdd3   :  { %v3116_v11 = vadd.f32 %v9075_v47, %v3115_v25 }
 0xdd4   :  { %v6324_v13 = vpop.f32.mrf.mxu0 }
 0xdd5   :  { %3121 = vmax.xlane.f32.xlu1 %v3116_v11 }
 0xdd6   :  { %v3118_v43 = vpop.f32.mrf.mxu0 }
 0xdd8   :  { %v6325_v51 = vpop.f32.mrf.mxu0 }
 0xdf2   :  { %v9078_v59 = vpop.f32.mrf.mxu0 }
 0xdf3   :  { %v3234_v32 = vadd.f32 %v9078_v59, %v10408_v37  ;;  %v3235_v25 = vadd.f32 %v9078_v59, %v10409_v46 }
 0xdf4   :  { %v6364_v15 = vpop.f32.mrf.mxu0 }
 0xdf6   :  { %v3231_v23 = vpop.f32.mrf.mxu0 }
 0xdf8   :  { %v6365_v27 = vpop.f32.mrf.mxu0 }
 0xe5e   :  { %v3122_v33 = vpop.xlane.xlu1 %3121 }
 0xe5f   :  { %v3123_v31 = vsub.f32 %v3116_v11, %v3122_v33 }
 0xe61   :  { %v3124_v12 = vmul.f32 1.442695, %v3123_v31  ;;  %v10410_v31 = vmov 1.0|1.0  }
 0xe63   :  { %7099 = vpow2.f32 %v3124_v12  ;;  %v9090_v12 = vld [vmem:[%s10095_s11 + $0x38] sm:$0xff]  }
 0xe70   :  { %v7100_v61 = vpop.eup %7099 }
 0xe71   :  { %3126 = vadd.xlane.f32.xlu0 %v7100_v61  ;;  %v9096_v61 = vld [vmem:[%s10095_s11 + $0x30] sm:$0xff]  }
 0xe72   :  { %10411 = vst [vmem:[#allocation52_spill] sm:$0xff] %v9096_v61 }
 0xefa   :  { %v3127_v14 = vpop.xlane.xlu0 %3126 }
 0xefb   :  { %7101 = vlog2.f32 %v3127_v14  ;;  %v9103_v14 = vld [vmem:[%s10095_s11 + $0x28] sm:$0xff]  }
 0xefc   :  { %7103 = vtanh.f32 %v3234_v32  ;;  %10412 = vst [vmem:[#allocation53_spill] sm:$0xff] %v9103_v14  ;;  %v9134_v32 = vld [vmem:[%s10095_s11 + $0x10] sm:$0xff]  }
 0xefd   :  { %7105 = vtanh.f32 %v3235_v25  ;;  %10420 = vst [vmem:[#allocation56_spill] sm:$0xff] %v9134_v32  ;;  %v10421_v25 = vld [vmem:[#allocation44_spill] sm:$0xff] }
 0xf08   :  { %v7102_v21 = vpop.eup %7101 }
 0xf09   :  { %v3129_v42 = vmul.f32 0.6931472, %v7102_v21  ;;  %v7104_v15 = vpop.eup %7103  ;;  %v10413_v21 = vld [vmem:[#allocation37_spill] sm:$0xff] }
 0xf0a   :  { %v7106_v23 = vpop.eup %7105 }
 0xf0b   :  { %v3130_v53 = vadd.f32 %v3129_v42, %v3122_v33  ;;  %v3250_v33 = vpack.c.bf16 %v7106_v23, %v7104_v15  ;;  %v3236_v42 = vadd.f32 %v9078_v59, %v10413_v21  ;;  %v9150_v15 = vld [vmem:[%s10095_s11] sm:$0xff]  }
 0xf0c   :  { %10423 = vst [vmem:[#allocation58_spill] sm:$0xff] %v9150_v15 }
 0xf0d   :  { %v3131_v20 = vsub.f32 %v3116_v11, %v3130_v53  ;;  %v10414_v53 = vld [vmem:[#allocation38_spill] sm:$0xff]  ;;  %7107 = vtanh.f32 %v3236_v42 }
 0xf0f   :  { %3132 = vmax.xlane.f32.xlu0 %v3131_v20  ;;  %5300 = vst [vmem:[#allocation22] sm:$0xff] %v3131_v20 }
 0xf98   :  { %v3133_v6 = vpop.xlane.xlu0 %3132 }
 0xf99   :  { %vm3134_vm5 = vcmp.eq.f32.partialorder %v3131_v20, %v3133_v6  ;;  %v3237_v20 = vadd.f32 %v9078_v59, %v10414_v53  ;;  %v9114_v6 = vld [vmem:[%s10095_s11 + $0x20] sm:$0xff]  }
 0xf9a   :  { %v3135_v8 = vsel %vm3134_vm5, %v10407_v7, 128  ;;  %10415 = vst [vmem:[#allocation54_spill] sm:$0xff] %v9114_v6 }
 0xf9b   :  { %v3137_v9 = vshra.s32 %v3135_v8, 16  ;;  %v3136_v36 = vand.u32 65535, %v3135_v8  ;;  %v10416_v8 = vld [vmem:[#allocation42_spill] sm:$0xff]  ;;  %7109 = vtanh.f32 %v3237_v20 }
 0xf9c   :  { %v10425_v20 = vld [vmem:[#allocation46_spill] sm:$0xff] }
 0xf9d   :  { %v3139_v10 = vcvt.s32.f32 %v3137_v9  ;;  %v3138_v30 = vcvt.s32.f32 %v3136_v36  ;;  %v3238_v9 = vadd.f32 %v9078_v59, %v10416_v8 }
 0xf9f   :  { %3140 = vmin.xlane.f32.xlu1 %v3139_v10  ;;  %7111 = vtanh.f32 %v3238_v9 }
0x1028   :  { %v3141_v48 = vpop.xlane.xlu1 %3140 }
0x1029   :  { %vm3142_vm6 = vcmp.eq.f32.partialorder %v3139_v10, %v3141_v48  ;;  %v3147_v11 = vcvt.f32.s32 %v3141_v48  ;;  %v10417_v10 = vld [vmem:[#allocation35_spill] sm:$0xff] }
0x102a   :  { %v3143_v19 = vsel %vm3142_vm6, %v3138_v30, inf  ;;  %v3239_v36 = vadd.f32 %v9078_v59, %v10417_v10  ;;  %v9125_v48 = vld [vmem:[%s10095_s11 + $0x18] sm:$0xff]  }
0x102b   :  { %3144 = vmin.xlane.f32.xlu0 %v3143_v19  ;;  %v3148_v43 = vshll.u32 %v3147_v11, 16  ;;  %10418 = vst [vmem:[#allocation55_spill] sm:$0xff] %v9125_v48  ;;  %v10419_v30 = vld [vmem:[#allocation43_spill] sm:$0xff]  ;;  %v3241_v11 = vadd.f32 %v9078_v59, %v10421_v25  ;;  %v10428_v25 = vld [vmem:[#allocation49_spill] sm:$0xff] }
0x102c   :  { %7113 = vtanh.f32 %v3239_v36  ;;  %v3240_v19 = vadd.f32 %v9078_v59, %v10419_v30  ;;  %v10426_v36 = vld [vmem:[#allocation47_spill] sm:$0xff] }
0x102e   :  { %7115 = vtanh.f32 %v3240_v19 }
0x102f   :  { %7117 = vtanh.f32 %v3241_v11  ;;  %v10427_v11 = vld [vmem:[#allocation48_spill] sm:$0xff] }
0x10b4   :  { %v3145_v13 = vpop.xlane.xlu0 %3144 }
0x10b5   :  { %v3146_v51 = vcvt.f32.s32 %v3145_v13  ;;  %v9143_v13 = vld [vmem:[%s10095_s11 + $0x8] sm:$0xff]  }
0x10b6   :  { %10422 = vst [vmem:[#allocation57_spill] sm:$0xff] %v9143_v13 }
0x10b7   :  { %v3149_v27 = vadd.s32 %v3148_v43, %v3146_v51  ;;  %v7108_v43 = vpop.eup %7107 }
0x10b8   :  { %v7110_v51 = vpop.eup %7109 }
0x10b9   :  { %vm3150_vm7 = vcmp.eq.s32.totalorder %v10407_v7, %v3149_v27  ;;  %v7112_v59 = vpop.eup %7111  ;;  %v3251_v27 = vpack.c.bf16 %v7110_v51, %v7108_v43  ;;  %v10430_v43 = vld [vmem:[#allocation51_spill] sm:$0xff] }
0x10ba   :  { %vm5525_vm8 = vmpackc.low %vm3150_vm7, %vm3150_vm7  ;;  %v7114_v23 = vpop.eup %7113 }
0x10bb   :  { %6343 = vmatmul.mubr.msk.bf16.vlgmr.msra.gmra.mxu1 %vm5525_vm8, %v10410_v31  ;;  %v3252_v42 = vpack.c.bf16 %v7114_v23, %v7112_v59  ;;  %v7116_v9 = vpop.eup %7115 }
0x10bc   :  { %6367 = vmatpush3.bf16.msra.mxu1 %v9090_v12  ;;  %6382 = vmatprep.mubr.bf16.mxu1 %v3250_v33  ;;  %v10424_v33 = vld [vmem:[#allocation45_spill] sm:$0xff]  ;;  %v7118_v19 = vpop.eup %7117 }
0x10bd   :  { %6368 = vmatprep.subr.bf16.mxu1 %v9096_v61 }
0x10c0   :  { %6369 = vmatpush3.bf16.msra.mxu1 %v9096_v61 }
0x10c1   :  { %6370 = vmatprep.subr.bf16.mxu1 %v9103_v14 }
0x10c4   :  { %6371 = vmatpush3.bf16.msra.mxu1 %v9103_v14 }
0x10c5   :  { %6372 = vmatprep.subr.bf16.mxu1 %v9114_v6 }
0x10c8   :  { %6373 = vmatpush3.bf16.msra.mxu1 %v9114_v6 }
0x10c9   :  { %6374 = vmatprep.subr.bf16.mxu1 %v9125_v48 }
0x10cc   :  { %6375 = vmatpush3.bf16.msra.mxu1 %v9125_v48 }
0x10cd   :  { %6376 = vmatprep.subr.bf16.mxu1 %v9134_v32 }
0x10d0   :  { %6377 = vmatpush3.bf16.msra.mxu1 %v9134_v32  ;;  %v10429_v32 = vld [vmem:[#allocation50_spill] sm:$0xff] }
0x10d1   :  { %6378 = vmatprep.subr.bf16.mxu1 %v9143_v13 }
0x10d4   :  { %6379 = vmatpush3.bf16.msra.mxu1 %v9143_v13  ;;  %v3253_v13 = vpack.c.bf16 %v7118_v19, %v7116_v9 }
0x10d5   :  { %6380 = vmatprep.subr.bf16.mxu1 %v9150_v15 }
0x10d8   :  { %6381 = vmatpush3.bf16.msra.mxu1 %v9150_v15 }
0x10d9   :  { %5748 = vmatprep.subr.bf16.mxu1 %v10424_v33 }
0x10db   :  { %6383 = vmatmul.mubr.bf16.vlgmr.msra.gmra.mxu1 %v3251_v27 }
0x10dc   :  { %6386 = vmatprep.mubr.bf16.mxu1 %v3252_v42  ;;  %5749 = vmatpush3.bf16.msra.mxu1 %v10425_v20 }
0x10dd   :  { %5750 = vmatprep.subr.bf16.mxu1 %v10426_v36 }
0x10e0   :  { %5751 = vmatpush3.bf16.msra.mxu1 %v10427_v11 }
0x10e1   :  { %5752 = vmatprep.subr.bf16.mxu1 %v10428_v25  ;;  %v10431_v25 = vld [vmem:[#allocation64_spill] sm:$0xff] }
0x10e3   :  { %6387 = vmatmul.mubr.bf16.gmra.mxu1 %v3253_v13  ;;  %v10432_v13 = vld [vmem:[#allocation65_spill] sm:$0xff] }
0x10e4   :  { %5753 = vmatpush3.bf16.msra.mxu1 %v10429_v32  ;;  %v10433_v32 = vld [vmem:[#allocation66_spill] sm:$0xff] }
0x10e5   :  { %5754 = vmatprep.subr.bf16.mxu1 %v10430_v43 }
0x10e8   :  { %5755 = vmatpush3.bf16.msra.mxu1 %v8744_v3 }
0x10e9   :  { %5756 = vmatprep.subr.bf16.mxu1 %v8750_v16 }
0x10ec   :  { %5757 = vmatpush3.bf16.msra.mxu1 %v8754_v55 }
0x10ed   :  { %5758 = vmatprep.subr.bf16.mxu1 %v8762_v38 }
0x10f0   :  { %5759 = vmatpush3.bf16.msra.mxu1 %v8766_v54 }
0x10f1   :  { %5760 = vmatprep.subr.bf16.mxu1 %v8774_v28 }
0x10f4   :  { %5761 = vmatpush3.bf16.msra.mxu1 %v8778_v49 }
0x10f5   :  { %5762 = vmatprep.subr.bf16.mxu1 %v10431_v25 }
0x10f8   :  { %5763 = vmatpush3.bf16.msra.mxu1 %v10432_v13 }
0x10f9   :  { %3520 = vmatprep.subr.bf16.mxu1 %v10433_v32 }
0x117b   :  { %v3188_v51 = vpop.f32.mrf.mxu1 }
0x117c   :  { %v3438_v3 = vpack.c.bf16 %v3188_v51, %v3188_v51 }
0x117d   :  { %v6344_v59 = vpop.f32.mrf.mxu1 }
0x117e   :  { %3471 = vmatprep.mubr.bf16.mxu0 %v3438_v3  ;;  %3512 = vmatprep.mubr.bf16.mxu1 %v3438_v3 }
0x117f   :  { %v3191_v16 = vpop.f32.mrf.mxu1 }
0x1181   :  { %v6345_v55 = vpop.f32.mrf.mxu1 }
0x119b   :  { %v6384_v38 = vpop.f32.mrf.mxu1 }
0x119c   :  { %v3321_v43 = vsel %vm2306_vm4, %v6384_v38, -inf }
0x119d   :  { %v3288_v23 = vpop.f32.mrf.mxu1 }
0x119e   :  { %v3319_v25 = vsel %vm2306_vm4, %v3288_v23, -inf }
0x119f   :  { %v6385_v54 = vpop.f32.mrf.mxu1 }
0x11a0   :  { %v3322_v42 = vsel %vm2306_vm4, %v6385_v54, -inf }
0x11a1   :  { %v3291_v27 = vpop.f32.mrf.mxu1 }
0x11a2   :  { %v3320_v13 = vsel %vm2306_vm4, %v3291_v27, -inf }
0x11a3   :  { %v6388_v28 = vpop.f32.mrf.mxu1 }
0x11a4   :  { %v3327_v20 = vsel %vm2306_vm4, %v6388_v28, -inf }
0x11a5   :  { %v3304_v33 = vpop.f32.mrf.mxu1  ;;  %v3328_v51 = vmax.f32 %v3321_v43, %v3327_v20 }
0x11a6   :  { %v3323_v9 = vsel %vm2306_vm4, %v3304_v33, -inf }
0x11a7   :  { %v6389_v49 = vpop.f32.mrf.mxu1  ;;  %v3324_v3 = vmax.f32 %v3319_v25, %v3323_v9 }
0x11a8   :  { %v3329_v36 = vsel %vm2306_vm4, %v6389_v49, -inf }
0x11a9   :  { %v3330_v19 = vmax.f32 %v3322_v42, %v3329_v36  ;;  %v3307_v11 = vpop.f32.mrf.mxu1 }
0x11aa   :  { %v3325_v32 = vsel %vm2306_vm4, %v3307_v11, -inf }
0x11ab   :  { %v3326_v59 = vmax.f32 %v3320_v13, %v3325_v32  ;;  %v3332_v16 = vmax.f32 %v3328_v51, %v3330_v19 }
0x11ad   :  { %v3331_v55 = vmax.f32 %v3324_v3, %v3326_v59 }
0x11af   :  { %v3333_v15 = vmax.f32 %v3331_v55, %v3332_v16 }
0x11b1   :  { %v3334_v30 = vsub.f32 %v3288_v23, %v3333_v15  ;;  %v3335_v48 = vsub.f32 %v3291_v27, %v3333_v15  ;;  %v3336_v10 = vsub.f32 %v6384_v38, %v3333_v15  ;;  %v3337_v8 = vsub.f32 %v6385_v54, %v3333_v15 }
0x11b2   :  { %v3338_v42 = vsub.f32 %v3304_v33, %v3333_v15  ;;  %v3339_v21 = vsub.f32 %v3307_v11, %v3333_v15  ;;  %v3340_v61 = vsub.f32 %v6388_v28, %v3333_v15  ;;  %v3341_v20 = vsub.f32 %v6389_v49, %v3333_v15 }
0x11b3   :  { %v3342_v36 = vmul.f32 1.442695, %v3334_v30  ;;  %v3344_v6 = vmul.f32 1.442695, %v3335_v48  ;;  %v3346_v53 = vmul.f32 1.442695, %v3336_v10 }
0x11b4   :  { %v3348_v14 = vmul.f32 1.442695, %v3337_v8  ;;  %v3350_v31 = vmul.f32 1.442695, %v3338_v42  ;;  %v3352_v9 = vmul.f32 1.442695, %v3339_v21 }
0x11b5   :  { %7119 = vpow2.f32 %v3342_v36  ;;  %v3354_v19 = vmul.f32 1.442695, %v3340_v61  ;;  %v3356_v23 = vmul.f32 1.442695, %v3341_v20 }
0x11b6   :  { %7121 = vpow2.f32 %v3344_v6 }
0x11b7   :  { %7123 = vpow2.f32 %v3346_v53 }
0x11b8   :  { %7125 = vpow2.f32 %v3348_v14 }
0x11b9   :  { %7127 = vpow2.f32 %v3350_v31 }
0x11ba   :  { %7129 = vpow2.f32 %v3352_v9 }
0x11bb   :  { %7131 = vpow2.f32 %v3354_v19 }
0x11bc   :  { %7133 = vpow2.f32 %v3356_v23 }
0x11c2   :  { %v7120_v38 = vpop.eup %7119 }
0x11c3   :  { %v7122_v30 = vpop.eup %7121  ;;  %v3358_v10 = vsel %vm2306_vm4, %v7120_v38, 0.0 }
0x11c4   :  { %v7124_v48 = vpop.eup %7123  ;;  %v3359_v8 = vsel %vm2306_vm4, %v7122_v30, 0.0 }
0x11c5   :  { %v7126_v54 = vpop.eup %7125  ;;  %v3360_v6 = vadd.f32 %v3359_v8, %v3358_v10  ;;  %v3361_v53 = vsel %vm2306_vm4, %v7124_v48, 0.0  ;;  %v10434_v8 = vld [vmem:[#allocation41_spill] sm:$0xff] }
0x11c6   :  { %v7128_v15 = vpop.eup %7127  ;;  %v3363_v31 = vsel %vm2306_vm4, %v7126_v54, 0.0 }
0x11c7   :  { %v3362_v14 = vadd.f32 %v3361_v53, %v3360_v6  ;;  %v7130_v61 = vpop.eup %7129  ;;  %v3365_v27 = vsel %vm2306_vm4, %v7128_v15, 0.0 }
0x11c8   :  { %v7132_v28 = vpop.eup %7131  ;;  %v3367_v49 = vsel %vm2306_vm4, %v7130_v61, 0.0 }
0x11c9   :  { %v3364_v21 = vadd.f32 %v3363_v31, %v3362_v14  ;;  %v7134_v11 = vpop.eup %7133  ;;  %v3369_v25 = vsel %vm2306_vm4, %v7132_v28, 0.0 }
0x11ca   :  { %v3371_v32 = vsel %vm2306_vm4, %v7134_v11, 0.0 }
0x11cb   :  { %v3366_v33 = vadd.f32 %v3365_v27, %v3364_v21 }
0x11cd   :  { %v3368_v43 = vadd.f32 %v3367_v49, %v3366_v33 }
0x11cf   :  { %v3370_v13 = vadd.f32 %v3369_v25, %v3368_v43 }
0x11d1   :  { %v3372_v51 = vadd.f32 %v3371_v32, %v3370_v13 }
0x11d3   :  { %7135 = vrcp.f32 %v3372_v51 }
0x11e0   :  { %v7136_v3 = vpop.eup %7135 }
0x11e1   :  { %v3375_v59 = vmul.f32 %v7136_v3, %v7122_v30  ;;  %v3374_v16 = vmul.f32 %v7136_v3, %v7120_v38  ;;  %v3378_v55 = vmul.f32 %v7136_v3, %v7128_v15  ;;  %v3376_v42 = vmul.f32 %v7136_v3, %v7124_v48  ;;  %v10435_v30 = vld [vmem:[#allocation40_spill] sm:$0xff] }
0x11e2   :  { %v3380_v36 = vmul.f32 %v7136_v3, %v7132_v28  ;;  %v3377_v20 = vmul.f32 %v7136_v3, %v7126_v54  ;;  %v3379_v9 = vmul.f32 %v7136_v3, %v7130_v61  ;;  %v3381_v19 = vmul.f32 %v7136_v3, %v7134_v11 }
0x11e3   :  { %3389 = vperm.xlu0 %6765, %v3375_v59   ;;  %3384 = vperm.xlu1 %6766, %v3374_v16   ;;  %v10436_v16 = vld [vmem:[#allocation67_spill] sm:$0xff] }
0x11e7   :  { %3404 = vperm.xlu0 %6765, %v3378_v55   ;;  %3394 = vperm.xlu1 %6766, %v3376_v42   ;;  %v10437_v55 = vld [vmem:[#allocation68_spill] sm:$0xff] }
0x11e8   :  { %v10441_v42 = vld [vmem:[#allocation72_spill] sm:$0xff] }
0x11eb   :  { %3414 = vperm.xlu0 %6765, %v3380_v36   ;;  %3399 = vperm.xlu1 %6766, %v3377_v20   ;;  %v10442_v36 = vld [vmem:[#allocation73_spill] sm:$0xff]  ;;  %v10443_v20 = vld [vmem:[#allocation74_spill] sm:$0xff] }
0x11ef   :  { %3409 = vperm.xlu1 %6766, %v3379_v9   ;;  %v10445_v9 = vld [vmem:[#allocation76_spill] sm:$0xff] }
0x11f3   :  { %3419 = vperm.xlu1 %6766, %v3381_v19   ;;  %v10446_v19 = vld [vmem:[#allocation77_spill] sm:$0xff] }
0x125e   :  { %v3390_v23 = vpop.permute.xlu0 %3389  ;;  %v3385_v10 = vpop.permute.xlu1 %3384 }
0x125f   :  { %v3423_v6 = vmul.f32 %v3390_v23, %v10434_v8  ;;  %v3422_v38 = vmul.f32 %v3385_v10, %v10435_v30  ;;  %v10447_v23 = vld [vmem:[#allocation78_spill] sm:$0xff]  ;;  %v10448_v10 = vld [vmem:[#allocation79_spill] sm:$0xff] }
0x1261   :  { %v3430_v14 = vadd.f32 %v3423_v6, %v3422_v38  ;;  %v10449_v6 = vld [vmem:[#allocation80_spill] sm:$0xff]  ;;  %v10450_v38 = vld [vmem:[#allocation81_spill] sm:$0xff] }
0x1262   :  { %v3395_v53 = vpop.permute.xlu1 %3394  ;;  %v3405_v48 = vpop.permute.xlu0 %3404 }
0x1263   :  { %v3424_v15 = vmul.f32 %v3395_v53, %v8296_v22  ;;  %v3426_v61 = vmul.f32 %v3405_v48, %v8389_v41  ;;  %v10451_v53 = vld [vmem:[#allocation82_spill] sm:$0xff]  ;;  %v10453_v48 = vld [vmem:[#allocation84_spill] sm:$0xff] }
0x1265   :  { %v3431_v21 = vadd.f32 %v3430_v14, %v3424_v15  ;;  %v10452_v15 = vld [vmem:[#allocation83_spill] sm:$0xff]  ;;  %v10454_v14 = vld [vmem:[#allocation85_spill] sm:$0xff] }
0x1266   :  { %v3400_v31 = vpop.permute.xlu1 %3399  ;;  %v3415_v28 = vpop.permute.xlu0 %3414 }
0x1267   :  { %v3425_v54 = vmul.f32 %v3400_v31, %v8343_v35  ;;  %v3428_v43 = vmul.f32 %v3415_v28, %v8461_v62  ;;  %v10455_v31 = vld [vmem:[#allocation86_spill] sm:$0xff]  ;;  %v10458_v28 = vld [vmem:[#allocation89_spill] sm:$0xff] }
0x1269   :  { %v3432_v27 = vadd.f32 %v3431_v21, %v3425_v54  ;;  %v9236_v21 = vld [vmem:[#allocation16 + $0x38] sm:$0xff]   ;;  %v10456_v54 = vld [vmem:[#allocation87_spill] sm:$0xff] }
0x126a   :  { %v3410_v33 = vpop.permute.xlu1 %3409 }
0x126b   :  { %v3433_v49 = vadd.f32 %v3432_v27, %v3426_v61  ;;  %v3427_v11 = vmul.f32 %v3410_v33, %v8436_v17  ;;  %v10457_v61 = vld [vmem:[#allocation88_spill] sm:$0xff]  ;;  %v9250_v27 = vld [vmem:[#allocation16 + $0x28] sm:$0xff]   ;;  %v9256_v33 = vld [vmem:[#allocation16 + $0x20] sm:$0xff]  }
0x126d   :  { %v3434_v25 = vadd.f32 %v3433_v49, %v3427_v11  ;;  %v10459_v49 = vld [vmem:[#allocation90_spill] sm:$0xff]  ;;  %v9262_v11 = vld [vmem:[#allocation16 + $0x18] sm:$0xff]  }
0x126e   :  { %v3420_v13 = vpop.permute.xlu1 %3419 }
0x126f   :  { %v3435_v32 = vadd.f32 %v3434_v25, %v3428_v43  ;;  %v3429_v51 = vmul.f32 %v3420_v13, %v8574_v29  ;;  %v10460_v43 = vld [vmem:[#allocation91_spill] sm:$0xff]  ;;  %v9268_v25 = vld [vmem:[#allocation16 + $0x10] sm:$0xff]  }
0x1270   :  { %v10461_v13 = vld [vmem:[#allocation92_spill] sm:$0xff] }
0x1271   :  { %v3436_v3 = vadd.f32 %v3435_v32, %v3429_v51  ;;  %v9274_v32 = vld [vmem:[#allocation16 + $0x8] sm:$0xff]   ;;  %v10462_v51 = vld [vmem:[#allocation93_spill] sm:$0xff] }
0x1273   :  { %v3437_v59 = vpack.c.bf16 %v3436_v3, %v3436_v3  ;;  %v9280_v3 = vld [vmem:[#allocation16] sm:$0xff]  }
0x1275   :  { %3472 = vmatmul.mubr.bf16.vlgmr.msra.gmra.mxu0 %v3437_v59  ;;  %3513 = vmatmul.mubr.bf16.vlgmr.msra.gmra.mxu1 %v3437_v59 }
0x1276   :  { %3521 = vmatpush1.bf16.msra.mxu1 %v8808_v45  ;;  %6391 = vmatpush3.bf16.msra.mxu0 %v8810_v4  ;;  %v10438_v45 = vld [vmem:[#allocation69_spill] sm:$0xff]  ;;  %v10439_v4 = vld [vmem:[#allocation70_spill] sm:$0xff] }
0x1277   :  { %3522 = vmatprep.subr.bf16.mxu1 %v8812_v18  ;;  %6392 = vmatprep.subr.bf16.mxu0 %v10317_v34  ;;  %v10440_v18 = vld [vmem:[#allocation71_spill] sm:$0xff] }
0x1278   :  { %3552 = vmatprep.mubr.bf16.mxu1 %v10318_v26  ;;  %6406 = vmatprep.mubr.msk.bf16.mxu0 %vm7824_vm1, %v10317_v34 }
0x127a   :  { %3523 = vmatpush1.bf16.msra.mxu1 %v8816_v24  ;;  %6393 = vmatpush3.bf16.msra.mxu0 %v10436_v16  ;;  %v10444_v24 = vld [vmem:[#allocation75_spill] sm:$0xff] }
0x127b   :  { %3524 = vmatprep.subr.bf16.mxu1 %v10437_v55  ;;  %6394 = vmatprep.subr.bf16.mxu0 %v10317_v34 }
0x127e   :  { %3525 = vmatpush1.bf16.msra.mxu1 %v10438_v45  ;;  %6395 = vmatpush3.bf16.msra.mxu0 %v10439_v4 }
0x127f   :  { %3526 = vmatprep.subr.bf16.mxu1 %v10440_v18  ;;  %6396 = vmatprep.subr.bf16.mxu0 %v10317_v34 }
0x1282   :  { %3527 = vmatpush1.bf16.msra.mxu1 %v10441_v42  ;;  %6397 = vmatpush3.bf16.msra.mxu0 %v10442_v36 }
0x1283   :  { %3528 = vmatprep.subr.bf16.mxu1 %v10443_v20  ;;  %6398 = vmatprep.subr.bf16.mxu0 %v10317_v34 }
0x1286   :  { %3529 = vmatpush1.bf16.msra.mxu1 %v10444_v24  ;;  %6399 = vmatpush3.bf16.msra.mxu0 %v10445_v9 }
0x1287   :  { %3530 = vmatprep.subr.bf16.mxu1 %v10446_v19  ;;  %6400 = vmatprep.subr.bf16.mxu0 %v10317_v34  ;;  %v10463_v19 = vld [vmem:[#allocation32_spill] sm:$0xff] }
0x128a   :  { %3531 = vmatpush1.bf16.msra.mxu1 %v10447_v23  ;;  %6401 = vmatpush3.bf16.msra.mxu0 %v10448_v10  ;;  %v10464_v10 = vld [vmem:[#allocation94_spill] sm:$0xff] }
0x128b   :  { %3532 = vmatprep.subr.bf16.mxu1 %v10449_v6  ;;  %6402 = vmatprep.subr.bf16.mxu0 %v10317_v34 }
0x128e   :  { %3533 = vmatpush1.bf16.msra.mxu1 %v10450_v38  ;;  %6403 = vmatpush3.bf16.msra.mxu0 %v10451_v53 }
0x128f   :  { %3534 = vmatprep.subr.bf16.mxu1 %v10452_v15  ;;  %6404 = vmatprep.subr.bf16.mxu0 %v10317_v34 }
0x1292   :  { %3535 = vmatpush1.bf16.msra.mxu1 %v10453_v48  ;;  %6405 = vmatpush3.bf16.msra.mxu0 %v10454_v14 }
0x1293   :  { %6410 = vmatprep.subr.bf16.mxu1 %v10317_v34  ;;  %6430 = vmatprep.subr.bf16.mxu0 %v10317_v34 }
0x1295   :  { %3553 = vmatmul.mubr.bf16.vlgmr.msra.gmra.mxu1 %v8978_v0  ;;  %6407 = vmatmul.mubr.bf16.vlgmr.msra.gmra.mxu0 %v8978_v0  ;;  %v9244_v0 = vld [vmem:[#allocation16 + $0x30] sm:$0xff]  }
0x1296   :  { %6411 = vmatpush3.bf16.msra.mxu1 %v10455_v31  ;;  %6426 = vmatprep.mubr.msk.bf16.mxu1 %vm7824_vm1, %v10317_v34 }
0x1297   :  { %6412 = vmatprep.subr.bf16.mxu1 %v10317_v34  ;;  %6431 = vmatpush3.bf16.msra.mxu0 %v9236_v21 }
0x1298   :  { %6432 = vmatprep.subr.bf16.mxu0 %v10317_v34  ;;  %6446 = vmatprep.mubr.msk.bf16.mxu0 %vm7824_vm1, %v10317_v34 }
0x129a   :  { %6413 = vmatpush3.bf16.msra.mxu1 %v10456_v54 }
0x129b   :  { %6414 = vmatprep.subr.bf16.mxu1 %v10317_v34  ;;  %6433 = vmatpush3.bf16.msra.mxu0 %v9244_v0 }
0x129c   :  { %6434 = vmatprep.subr.bf16.mxu0 %v10317_v34 }
0x129e   :  { %6415 = vmatpush3.bf16.msra.mxu1 %v10457_v61 }
0x129f   :  { %6416 = vmatprep.subr.bf16.mxu1 %v10317_v34  ;;  %6435 = vmatpush3.bf16.msra.mxu0 %v9250_v27 }
0x12a0   :  { %6436 = vmatprep.subr.bf16.mxu0 %v10317_v34 }
0x12a2   :  { %6417 = vmatpush3.bf16.msra.mxu1 %v10458_v28 }
0x12a3   :  { %6418 = vmatprep.subr.bf16.mxu1 %v10317_v34  ;;  %6437 = vmatpush3.bf16.msra.mxu0 %v9256_v33 }
0x12a4   :  { %6438 = vmatprep.subr.bf16.mxu0 %v10317_v34 }
0x12a6   :  { %6419 = vmatpush3.bf16.msra.mxu1 %v10459_v49 }
0x12a7   :  { %6420 = vmatprep.subr.bf16.mxu1 %v10317_v34  ;;  %6439 = vmatpush3.bf16.msra.mxu0 %v9262_v11 }
0x12a8   :  { %6440 = vmatprep.subr.bf16.mxu0 %v10317_v34 }
0x12aa   :  { %6421 = vmatpush3.bf16.msra.mxu1 %v10460_v43 }
0x12ab   :  { %6422 = vmatprep.subr.bf16.mxu1 %v10317_v34  ;;  %6441 = vmatpush3.bf16.msra.mxu0 %v9268_v25 }
0x12ac   :  { %6442 = vmatprep.subr.bf16.mxu0 %v10317_v34 }
0x12ae   :  { %6423 = vmatpush3.bf16.msra.mxu1 %v10461_v13 }
0x12af   :  { %6424 = vmatprep.subr.bf16.mxu1 %v10317_v34  ;;  %6443 = vmatpush3.bf16.msra.mxu0 %v9274_v32 }
0x12b0   :  { %6444 = vmatprep.subr.bf16.mxu0 %v10317_v34 }
0x12b2   :  { %6425 = vmatpush3.bf16.msra.mxu1 %v10462_v51 }
0x12b3   :  { %6450 = vmatprep.subr.bf16.mxu1 %v10317_v34  ;;  %6445 = vmatpush3.bf16.msra.mxu0 %v9280_v3 }
0x12b4   :  { %6470 = vmatprep.subr.bf16.mxu0 %v9090_v12 }
0x1335   :  { %v3473_v59 = vpop.f32.mrf.mxu0  ;;  %v5764_v16 = vpop.f32.mrf.mxu1 }
0x1336   :  { %v3474_v23 = vadd.f32 %v3473_v59, %v10463_v19 }
0x1337   :  { %v3475_v55 = vpop.f32.mrf.mxu0  ;;  %v5765_v45 = vpop.f32.mrf.mxu1 }
0x1338   :  { %v5766_v4 = vadd.f32 %v5765_v45, %v5764_v16  ;;  %v3476_v49 = vadd.f32 %v3475_v55, %v8961_v60 }
0x1339   :  { %v3477_v18 = vpop.f32.mrf.mxu0  ;;  %v5767_v42 = vpop.f32.mrf.mxu1 }
0x133b   :  { %v3478_v36 = vpop.f32.mrf.mxu0  ;;  %v5768_v20 = vpop.f32.mrf.mxu1 }
0x133c   :  { %v3515_v36 = vadd.f32 %v5766_v4, %v8969_v40  ;;  %v9343_v4 = vld [vmem:[#allocation17 + $0x48] ss:$12 sps:$4 sm:$0xff]  }
0x133d   :  { %10469 = vst [vmem:[#allocation63_spill] sm:$0xff] %v9343_v4 }
0x1355   :  { %v3554_v24 = vpop.f32.mrf.mxu1  ;;  %v3595_v9 = vpop.f32.mrf.mxu0 }
0x1356   :  { %v3555_v6 = vadd.f32 %v3554_v24, %v10464_v10  ;;  %v3596_v18 = vadd.f32 %v3595_v9, %v8966_v57  ;;  %v9346_v9 = vld [vmem:[#allocation17 + $0x34] ss:$12 sps:$4 sm:$0xff]  }
0x1357   :  { %v3556_v38 = vpop.f32.mrf.mxu1  ;;  %v6408_v53 = vpop.f32.mrf.mxu0  ;;  %10470 = vst [vmem:[#allocation45_spill] sm:$0xff] %v9346_v9 }
0x1358   :  { %v3601_v15 = vadd.f32 %v3555_v6, %v3474_v23  ;;  %v3557_v54 = vadd.f32 %v3556_v38, %v8958_v63 }
0x1359   :  { %v3558_v48 = vpop.f32.mrf.mxu1  ;;  %v3598_v14 = vpop.f32.mrf.mxu0 }
0x135a   :  { %v5527_v31 = vmul.f32 -1.442695, %v3601_v15  ;;  %v3608_v43 = vadd.f32 %v3557_v54, %v3476_v49  ;;  %v9349_v14 = vld [vmem:[#allocation17 + $0x30] ss:$12 sps:$4 sm:$0xff]   ;;  %v9355_v54 = vld [vmem:[#allocation17 + $0x18] ss:$12 sps:$4 sm:$0xff]  }
0x135b   :  { %v3559_v61 = vpop.f32.mrf.mxu1  ;;  %v6409_v28 = vpop.f32.mrf.mxu0  ;;  %10471 = vst [vmem:[#allocation46_spill] sm:$0xff] %v9349_v14  ;;  %10473 = vst [vmem:[#allocation48_spill] sm:$0xff] %v9355_v54  ;;  %v9364_v49 = vld [vmem:[#allocation17 + $0x16c] ss:$12 sps:$4 sm:$0xff]  }
0x135c   :  { %7137 = vpow2.f32 %v5527_v31  ;;  %v5528_v13 = vmul.f32 -1.442695, %v3608_v43  ;;  %v9352_v31 = vld [vmem:[#allocation17 + $0x1c] ss:$12 sps:$4 sm:$0xff]   ;;  %v9358_v61 = vld [vmem:[#allocation17 + $0x4] ss:$12 sps:$4 sm:$0xff]  }
0x135d   :  { %10472 = vst [vmem:[#allocation47_spill] sm:$0xff] %v9352_v31  ;;  %10474 = vst [vmem:[#allocation49_spill] sm:$0xff] %v9358_v61  ;;  %v9361_v28 = vld [vmem:[#allocation17] ss:$12 sps:$4 sm:$0xff]   ;;  %v9367_v43 = vld [vmem:[#allocation17 + $0x168] ss:$12 sps:$4 sm:$0xff]  }
0x135e   :  { %7139 = vpow2.f32 %v5528_v13  ;;  %10475 = vst [vmem:[#allocation50_spill] sm:$0xff] %v9361_v28  ;;  %10476 = vst [vmem:[#allocation51_spill] sm:$0xff] %v9364_v49  ;;  %v9370_v13 = vld [vmem:[#allocation17 + $0x154] ss:$12 sps:$4 sm:$0xff]  }
0x135f   :  { %10477 = vst [vmem:[#allocation64_spill] sm:$0xff] %v9367_v43  ;;  %10478 = vst [vmem:[#allocation65_spill] sm:$0xff] %v9370_v13 }
0x1369   :  { %v7138_v51 = vpop.eup %7137 }
0x136a   :  { %v3605_v59 = vadd.f32 1.0, %v7138_v51  ;;  %v9373_v51 = vld [vmem:[#allocation17 + $0x150] ss:$12 sps:$4 sm:$0xff]  }
0x136b   :  { %v7140_v16 = vpop.eup %7139  ;;  %10479 = vst [vmem:[#allocation66_spill] sm:$0xff] %v9373_v51 }
0x136c   :  { %7141 = vrcp.f32 %v3605_v59  ;;  %v3612_v45 = vadd.f32 1.0, %v7140_v16  ;;  %v9376_v59 = vld [vmem:[#allocation17 + $0x13c] ss:$12 sps:$4 sm:$0xff]   ;;  %v9379_v16 = vld [vmem:[#allocation17 + $0x138] ss:$12 sps:$4 sm:$0xff]  }
0x136d   :  { %10480 = vst [vmem:[#allocation41_spill] sm:$0xff] %v9376_v59  ;;  %10481 = vst [vmem:[#allocation40_spill] sm:$0xff] %v9379_v16 }
0x136e   :  { %7143 = vrcp.f32 %v3612_v45  ;;  %v9382_v45 = vld [vmem:[#allocation17 + $0x124] ss:$12 sps:$4 sm:$0xff]  }
0x136f   :  { %10482 = vst [vmem:[#allocation67_spill] sm:$0xff] %v9382_v45 }
0x1379   :  { %v7142_v42 = vpop.eup %7141 }
0x137a   :  { %v3615_v20 = vmul.f32 %v7142_v42, %v3596_v18  ;;  %v9385_v18 = vld [vmem:[#allocation17 + $0x120] ss:$12 sps:$4 sm:$0xff]  }
0x137b   :  { %v7144_v23 = vpop.eup %7143  ;;  %10483 = vst [vmem:[#allocation68_spill] sm:$0xff] %v9385_v18  ;;  %v9388_v42 = vld [vmem:[#allocation17 + $0x10c] ss:$12 sps:$4 sm:$0xff]  }
0x137c   :  { %v3616_v24 = vadd.f32 %v3615_v20, %v3515_v36  ;;  %v3618_v55 = vsub.f32 1.0, %v7144_v23  ;;  %v3620_v53 = vmul.f32 %v7144_v23, %v8974_v39  ;;  %v9315_v39 = vld [vmem:[#allocation17 + $0xac] ss:$12 sps:$4 sm:$0xff]   ;;  %10484 = vst [vmem:[#allocation69_spill] sm:$0xff] %v9388_v42  ;;  %v9391_v36 = vld [vmem:[#allocation17 + $0x108] ss:$12 sps:$4 sm:$0xff]  }
0x137d   :  { %10485 = vst [vmem:[#allocation70_spill] sm:$0xff] %v9391_v36  ;;  %v9394_v20 = vld [vmem:[#allocation17 + $0xf4] ss:$12 sps:$4 sm:$0xff]   ;;  %v9400_v23 = vld [vmem:[#allocation17 + $0xdc] ss:$12 sps:$4 sm:$0xff]  }
0x137e   :  { %7145 = vtanh.f32 %v3616_v24  ;;  %10486 = vst [vmem:[#allocation71_spill] sm:$0xff] %v9394_v20  ;;  %v9397_v24 = vld [vmem:[#allocation17 + $0xf0] ss:$12 sps:$4 sm:$0xff]   ;;  %10488 = vst [vmem:[#allocation73_spill] sm:$0xff] %v9400_v23 }
0x137f   :  { %10487 = vst [vmem:[#allocation72_spill] sm:$0xff] %v9397_v24 }
0x138b   :  { %v7146_v6 = vpop.eup %7145 }
0x138c   :  { %v3619_v38 = vmul.f32 %v7146_v6, %v3618_v55  ;;  %v9403_v55 = vld [vmem:[#allocation17 + $0xd8] ss:$12 sps:$4 sm:$0xff]  }
0x138d   :  { %10489 = vst [vmem:[#allocation74_spill] sm:$0xff] %v9403_v55  ;;  %v9406_v6 = vld [vmem:[#allocation17 + $0xc4] ss:$12 sps:$4 sm:$0xff]  }
0x138e   :  { %v9291_v15 = vadd.f32 %v3620_v53, %v3619_v38  ;;  %10490 = vst [vmem:[#allocation75_spill] sm:$0xff] %v9406_v6  ;;  %v9409_v38 = vld [vmem:[#allocation17 + $0xc0] ss:$12 sps:$4 sm:$0xff]  }
0x138f   :  { %10491 = vst [vmem:[#allocation76_spill] sm:$0xff] %v9409_v38 }
0x1390   :  { %v9295_v48 = vpack.c.bf16 %v9291_v15, %v9291_v15 }
0x1392   :  { %6427 = vmatmul.mubr.bf16.vlgmr.msra.gmra.mxu1 %v9295_v48 }
0x1393   :  { %6451 = vmatpush3.bf16.msra.mxu1 %v8984_v56  ;;  %6466 = vmatprep.mubr.msk.bf16.mxu1 %vm7824_vm1, %v10317_v34  ;;  %v9319_v56 = vld [vmem:[#allocation17 + $0xa8] ss:$12 sps:$4 sm:$0xff]  }
0x1394   :  { %6452 = vmatprep.subr.bf16.mxu1 %v10317_v34 }
0x1397   :  { %6453 = vmatpush3.bf16.msra.mxu1 %v8993_v58  ;;  %v9322_v58 = vld [vmem:[#allocation17 + $0x94] ss:$12 sps:$4 sm:$0xff]  }
0x1398   :  { %6454 = vmatprep.subr.bf16.mxu1 %v10317_v34 }
0x139b   :  { %6455 = vmatpush3.bf16.msra.mxu1 %v9000_v52  ;;  %v9325_v52 = vld [vmem:[#allocation17 + $0x90] ss:$12 sps:$4 sm:$0xff]  }
0x139c   :  { %6456 = vmatprep.subr.bf16.mxu1 %v10317_v34 }
0x139f   :  { %6457 = vmatpush3.bf16.msra.mxu1 %v9007_v1  ;;  %v9328_v1 = vld [vmem:[#allocation17 + $0x7c] ss:$12 sps:$4 sm:$0xff]  }
0x13a0   :  { %6458 = vmatprep.subr.bf16.mxu1 %v10317_v34 }
0x13a3   :  { %6459 = vmatpush3.bf16.msra.mxu1 %v9014_v2  ;;  %v9331_v2 = vld [vmem:[#allocation17 + $0x78] ss:$12 sps:$4 sm:$0xff]  }
0x13a4   :  { %6460 = vmatprep.subr.bf16.mxu1 %v10317_v34  ;;  %10465 = vst [vmem:[#allocation59_spill] sm:$0xff] %v9331_v2 }
0x13a7   :  { %6461 = vmatpush3.bf16.msra.mxu1 %v9021_v5  ;;  %v9334_v5 = vld [vmem:[#allocation17 + $0x64] ss:$12 sps:$4 sm:$0xff]  }
0x13a8   :  { %6462 = vmatprep.subr.bf16.mxu1 %v10317_v34  ;;  %10466 = vst [vmem:[#allocation60_spill] sm:$0xff] %v9334_v5 }
0x13ab   :  { %6463 = vmatpush3.bf16.msra.mxu1 %v9028_v44  ;;  %v9337_v44 = vld [vmem:[#allocation17 + $0x60] ss:$12 sps:$4 sm:$0xff]  }
0x13ac   :  { %6464 = vmatprep.subr.bf16.mxu1 %v10317_v34  ;;  %10467 = vst [vmem:[#allocation61_spill] sm:$0xff] %v9337_v44 }
0x13af   :  { %6465 = vmatpush3.bf16.msra.mxu1 %v9035_v50  ;;  %v9340_v50 = vld [vmem:[#allocation17 + $0x4c] ss:$12 sps:$4 sm:$0xff]  }
0x13b0   :  { %3981 = vmatprep.subr.bf16.mxu1 %v9315_v39  ;;  %10468 = vst [vmem:[#allocation62_spill] sm:$0xff] %v9340_v50 }
0x13b2   :  { %6467 = vmatmul.mubr.bf16.vlgmr.msra.gmra.mxu1 %v9295_v48 }
0x13b3   :  { %3982 = vmatpush1.bf16.msra.mxu1 %v9319_v56 }
0x13b4   :  { %3983 = vmatprep.subr.bf16.mxu1 %v9322_v58 }
0x13b7   :  { %3984 = vmatpush1.bf16.msra.mxu1 %v9325_v52 }
0x13b8   :  { %3985 = vmatprep.subr.bf16.mxu1 %v9328_v1 }
0x13bb   :  { %3986 = vmatpush1.bf16.msra.mxu1 %v9331_v2 }
0x13bc   :  { %3987 = vmatprep.subr.bf16.mxu1 %v9334_v5 }
0x13bf   :  { %3988 = vmatpush1.bf16.msra.mxu1 %v9337_v44 }
0x13c0   :  { %3989 = vmatprep.subr.bf16.mxu1 %v9340_v50 }
0x13c3   :  { %3990 = vmatpush1.bf16.msra.mxu1 %v9343_v4 }
0x13c4   :  { %3991 = vmatprep.subr.bf16.mxu1 %v9346_v9 }
0x13c7   :  { %3992 = vmatpush1.bf16.msra.mxu1 %v9349_v14 }
0x13c8   :  { %3993 = vmatprep.subr.bf16.mxu1 %v9352_v31 }
0x13cb   :  { %3994 = vmatpush1.bf16.msra.mxu1 %v9355_v54 }
0x13cc   :  { %3995 = vmatprep.subr.bf16.mxu1 %v9358_v61 }
0x13cf   :  { %3996 = vmatpush1.bf16.msra.mxu1 %v9361_v28 }
0x13d0   :  { %3997 = vmatprep.subr.bf16.mxu1 %v9364_v49 }
0x13d3   :  { %3998 = vmatpush2.bf16.msra.mxu1 %v9367_v43 }
0x13d4   :  { %3999 = vmatprep.subr.bf16.mxu1 %v9370_v13 }
0x13d7   :  { %4000 = vmatpush2.bf16.msra.mxu1 %v9373_v51 }
0x13d8   :  { %4001 = vmatprep.subr.bf16.mxu1 %v9376_v59 }
0x13db   :  { %4002 = vmatpush2.bf16.msra.mxu1 %v9379_v16 }
0x13dc   :  { %4003 = vmatprep.subr.bf16.mxu1 %v9382_v45 }
0x13df   :  { %4004 = vmatpush2.bf16.msra.mxu1 %v9385_v18 }
0x13e0   :  { %4005 = vmatprep.subr.bf16.mxu1 %v9388_v42 }
0x13e3   :  { %4006 = vmatpush2.bf16.msra.mxu1 %v9391_v36 }
0x13e4   :  { %4007 = vmatprep.subr.bf16.mxu1 %v9394_v20 }
0x13e7   :  { %4008 = vmatpush2.bf16.msra.mxu1 %v9397_v24 }
0x13e8   :  { %4009 = vmatprep.subr.bf16.mxu1 %v9400_v23 }
0x13eb   :  { %4010 = vmatpush2.bf16.msra.mxu1 %v9403_v55 }
0x13ec   :  { %4011 = vmatprep.subr.bf16.mxu1 %v9406_v6 }
0x13ef   :  { %4012 = vmatpush2.bf16.msra.mxu1 %v9409_v38 }
0x13f0   :  { %6494 = vmatprep.subr.bf16.mxu1 %v10317_v34 }
0x1452   :  { %v3657_v53 = vpop.f32.mrf.mxu1 }
0x1453   :  { %v3658_v24 = vadd.f32 %v9075_v47, %v3657_v53 }
0x1454   :  { %v6428_v20 = vpop.f32.mrf.mxu1 }
0x1455   :  { %3663 = vmax.xlane.f32.xlu0 %v3658_v24 }
0x1456   :  { %v3660_v23 = vpop.f32.mrf.mxu1 }
0x1458   :  { %v6429_v36 = vpop.f32.mrf.mxu1 }
0x1472   :  { %v9414_v42 = vpop.f32.mrf.mxu1 }
0x1474   :  { %v6468_v55 = vpop.f32.mrf.mxu1 }
0x1476   :  { %v3773_v18 = vpop.f32.mrf.mxu1 }
0x1478   :  { %v6469_v45 = vpop.f32.mrf.mxu1 }
0x14de   :  { %v3664_v16 = vpop.xlane.xlu0 %3663 }
0x14df   :  { %v3665_v6 = vsub.f32 %v3658_v24, %v3664_v16 }
0x14e1   :  { %v3666_v59 = vmul.f32 1.442695, %v3665_v6 }
0x14e3   :  { %7147 = vpow2.f32 %v3666_v59 }
0x14f0   :  { %v7148_v51 = vpop.eup %7147 }
0x14f1   :  { %3668 = vadd.xlane.f32.xlu1 %v7148_v51 }
0x157a   :  { %v3669_v38 = vpop.xlane.xlu1 %3668 }
0x157b   :  { %7149 = vlog2.f32 %v3669_v38 }
0x1588   :  { %v7150_v13 = vpop.eup %7149 }
0x1589   :  { %v3671_v43 = vmul.f32 0.6931472, %v7150_v13  ;;  %v3776_v13 = vadd.f32 %v9414_v42, %v10408_v37 }
0x158b   :  { %v3672_v47 = vadd.f32 %v3671_v43, %v3664_v16  ;;  %v3777_v43 = vadd.f32 %v9414_v42, %v10409_v46  ;;  %7151 = vtanh.f32 %v3776_v13 }
0x158d   :  { %v3673_v20 = vsub.f32 %v3658_v24, %v3672_v47  ;;  %7153 = vtanh.f32 %v3777_v43  ;;  %v10497_v43 = vld [vmem:[#allocation54_spill] sm:$0xff] }
0x158f   :  { %3674 = vmax.xlane.f32.xlu0 %v3673_v20  ;;  %5301 = vst [vmem:[#allocation22 + $0x8] sm:$0xff] %v3673_v20 }
0x1598   :  { %v7152_v47 = vpop.eup %7151 }
0x1618   :  { %v3675_v36 = vpop.xlane.xlu0 %3674 }
0x1619   :  { %vm3676_vm9 = vcmp.eq.f32.partialorder %v3673_v20, %v3675_v36  ;;  %v7154_v20 = vpop.eup %7153 }
0x161a   :  { %v3677_v23 = vsel %vm3676_vm9, %v10407_v7, 128 }
0x161b   :  { %v3679_v18 = vshra.s32 %v3677_v23, 16  ;;  %v3678_v55 = vand.u32 65535, %v3677_v23  ;;  %v3792_v23 = vpack.c.bf16 %v7154_v20, %v7152_v47  ;;  %v10501_v47 = vld [vmem:[#allocation43_spill] sm:$0xff] }
0x161c   :  { %v3782_v20 = vadd.f32 %v9414_v42, %v10501_v47  ;;  %v9450_v47 = vld [vmem:[#allocation17 + $0x170] ss:$12 sps:$4 sm:$0xff]  }
0x161d   :  { %v3681_v45 = vcvt.s32.f32 %v3679_v18  ;;  %v3680_v59 = vcvt.s32.f32 %v3678_v55  ;;  %v10492_v18 = vmov 1.0|1.0   ;;  %v10494_v55 = vld [vmem:[#allocation53_spill] sm:$0xff]  ;;  %10506 = vst [vmem:[#allocation77_spill] sm:$0xff] %v9450_v47 }
0x161f   :  { %3682 = vmin.xlane.f32.xlu0 %v3681_v45 }
0x16a8   :  { %v3683_v6 = vpop.xlane.xlu0 %3682 }
0x16a9   :  { %vm3684_vm10 = vcmp.eq.f32.partialorder %v3681_v45, %v3683_v6  ;;  %v3689_v16 = vcvt.f32.s32 %v3683_v6  ;;  %v10493_v45 = vld [vmem:[#allocation52_spill] sm:$0xff]  ;;  %v10495_v6 = vld [vmem:[#allocation37_spill] sm:$0xff] }
0x16aa   :  { %v3685_v51 = vsel %vm3684_vm10, %v3680_v59, inf  ;;  %v3778_v59 = vadd.f32 %v9414_v42, %v10495_v6 }
0x16ab   :  { %3686 = vmin.xlane.f32.xlu1 %v3685_v51  ;;  %v3690_v38 = vshll.u32 %v3689_v16, 16  ;;  %v10496_v51 = vld [vmem:[#allocation38_spill] sm:$0xff] }
0x16ac   :  { %v3779_v13 = vadd.f32 %v9414_v42, %v10496_v51  ;;  %v10498_v16 = vld [vmem:[#allocation42_spill] sm:$0xff]  ;;  %7155 = vtanh.f32 %v3778_v59 }
0x16ae   :  { %7157 = vtanh.f32 %v3779_v13 }
0x16b9   :  { %v7156_v59 = vpop.eup %7155 }
0x16bb   :  { %v7158_v13 = vpop.eup %7157 }
0x1734   :  { %v3687_v24 = vpop.xlane.xlu1 %3686 }
0x1735   :  { %v3688_v53 = vcvt.f32.s32 %v3687_v24  ;;  %v10499_v24 = vld [vmem:[#allocation35_spill] sm:$0xff] }
0x1737   :  { %v3691_v36 = vadd.s32 %v3690_v38, %v3688_v53  ;;  %v3781_v38 = vadd.f32 %v9414_v42, %v10499_v24  ;;  %v10500_v53 = vld [vmem:[#allocation55_spill] sm:$0xff] }
0x1739   :  { %vm3692_vm11 = vcmp.eq.s32.totalorder %v10407_v7, %v3691_v36  ;;  %v10502_v36 = vld [vmem:[#allocation56_spill] sm:$0xff] }
0x173a   :  { %vm5530_vm12 = vmpackc.low %vm3692_vm11, %vm3692_vm11 }
0x173b   :  { %6447 = vmatmul.mubr.msk.bf16.vlgmr.msra.gmra.mxu0 %vm5530_vm12, %v10492_v18 }
0x173c   :  { %6471 = vmatpush3.bf16.msra.mxu0 %v9090_v12  ;;  %6486 = vmatprep.mubr.bf16.mxu0 %v3792_v23  ;;  %v3780_v12 = vadd.f32 %v9414_v42, %v10498_v16  ;;  %v10503_v23 = vld [vmem:[#allocation44_spill] sm:$0xff] }
0x173d   :  { %6472 = vmatprep.subr.bf16.mxu0 %v10493_v45 }
0x173e   :  { %7159 = vtanh.f32 %v3780_v12 }
0x173f   :  { %7161 = vtanh.f32 %v3781_v38 }
0x1740   :  { %6473 = vmatpush3.bf16.msra.mxu0 %v10493_v45  ;;  %v3783_v45 = vadd.f32 %v9414_v42, %v10503_v23  ;;  %7163 = vtanh.f32 %v3782_v20  ;;  %v9453_v20 = vld [vmem:[#allocation17 + $0xb0] ss:$12 sps:$4 sm:$0xff]   ;;  %v9459_v23 = vld [vmem:[#allocation17 + $0x98] ss:$12 sps:$4 sm:$0xff]  }
0x1741   :  { %6474 = vmatprep.subr.bf16.mxu0 %v10494_v55  ;;  %10507 = vst [vmem:[#allocation78_spill] sm:$0xff] %v9453_v20  ;;  %10509 = vst [vmem:[#allocation80_spill] sm:$0xff] %v9459_v23 }
0x1742   :  { %7165 = vtanh.f32 %v3783_v45  ;;  %v9456_v45 = vld [vmem:[#allocation17 + $0x158] ss:$12 sps:$4 sm:$0xff]  }
0x1743   :  { %10508 = vst [vmem:[#allocation79_spill] sm:$0xff] %v9456_v45 }
0x1744   :  { %6475 = vmatpush3.bf16.msra.mxu0 %v10494_v55  ;;  %v10504_v55 = vld [vmem:[#allocation57_spill] sm:$0xff] }
0x1745   :  { %6476 = vmatprep.subr.bf16.mxu0 %v10497_v43 }
0x1748   :  { %6477 = vmatpush3.bf16.msra.mxu0 %v10497_v43  ;;  %v10505_v43 = vld [vmem:[#allocation58_spill] sm:$0xff] }
0x1749   :  { %6478 = vmatprep.subr.bf16.mxu0 %v10500_v53 }
0x174b   :  { %v7160_v12 = vpop.eup %7159 }
0x174c   :  { %6479 = vmatpush3.bf16.msra.mxu0 %v10500_v53  ;;  %v7162_v38 = vpop.eup %7161  ;;  %v3793_v53 = vpack.c.bf16 %v7158_v13, %v7156_v59  ;;  %v9462_v13 = vld [vmem:[#allocation17 + $0x140] ss:$12 sps:$4 sm:$0xff]  }
0x174d   :  { %6480 = vmatprep.subr.bf16.mxu0 %v10502_v36  ;;  %v3794_v42 = vpack.c.bf16 %v7162_v38, %v7160_v12  ;;  %10510 = vst [vmem:[#allocation81_spill] sm:$0xff] %v9462_v13  ;;  %v9468_v12 = vld [vmem:[#allocation17 + $0x128] ss:$12 sps:$4 sm:$0xff]  }
0x174e   :  { %10512 = vst [vmem:[#allocation83_spill] sm:$0xff] %v9468_v12  ;;  %v9471_v38 = vld [vmem:[#allocation17 + $0x68] ss:$12 sps:$4 sm:$0xff]  }
0x174f   :  { %10513 = vst [vmem:[#allocation84_spill] sm:$0xff] %v9471_v38 }
0x1750   :  { %6481 = vmatpush3.bf16.msra.mxu0 %v10502_v36  ;;  %v7164_v36 = vpop.eup %7163 }
0x1751   :  { %6482 = vmatprep.subr.bf16.mxu0 %v10504_v55 }
0x1754   :  { %6483 = vmatpush3.bf16.msra.mxu0 %v10504_v55  ;;  %v7166_v55 = vpop.eup %7165 }
0x1755   :  { %6484 = vmatprep.subr.bf16.mxu0 %v10505_v43  ;;  %v3795_v59 = vpack.c.bf16 %v7166_v55, %v7164_v36  ;;  %v9480_v36 = vld [vmem:[#allocation17 + $0xf8] ss:$12 sps:$4 sm:$0xff]  }
0x1756   :  { %10516 = vst [vmem:[#allocation87_spill] sm:$0xff] %v9480_v36  ;;  %v9483_v55 = vld [vmem:[#allocation17 + $0x38] ss:$12 sps:$4 sm:$0xff]  }
0x1757   :  { %10517 = vst [vmem:[#allocation88_spill] sm:$0xff] %v9483_v55 }
0x1758   :  { %6485 = vmatpush3.bf16.msra.mxu0 %v10505_v43  ;;  %v9465_v43 = vld [vmem:[#allocation17 + $0x80] ss:$12 sps:$4 sm:$0xff]  }
0x1759   :  { %5818 = vmatprep.subr.bf16.mxu0 %v9450_v47  ;;  %10511 = vst [vmem:[#allocation82_spill] sm:$0xff] %v9465_v43 }
0x175b   :  { %6487 = vmatmul.mubr.bf16.vlgmr.msra.gmra.mxu0 %v3793_v53  ;;  %v9474_v53 = vld [vmem:[#allocation17 + $0x110] ss:$12 sps:$4 sm:$0xff]  }
0x175c   :  { %6490 = vmatprep.mubr.bf16.mxu0 %v3794_v42  ;;  %5819 = vmatpush3.bf16.msra.mxu0 %v9453_v20  ;;  %10514 = vst [vmem:[#allocation85_spill] sm:$0xff] %v9474_v53  ;;  %v9477_v42 = vld [vmem:[#allocation17 + $0x50] ss:$12 sps:$4 sm:$0xff]  }
0x175d   :  { %5820 = vmatprep.subr.bf16.mxu0 %v9456_v45  ;;  %10515 = vst [vmem:[#allocation86_spill] sm:$0xff] %v9477_v42 }
0x1760   :  { %5821 = vmatpush3.bf16.msra.mxu0 %v9459_v23 }
0x1761   :  { %5822 = vmatprep.subr.bf16.mxu0 %v9462_v13 }
0x1763   :  { %6491 = vmatmul.mubr.bf16.gmra.mxu0 %v3795_v59  ;;  %v9486_v59 = vld [vmem:[#allocation17 + $0xe0] ss:$12 sps:$4 sm:$0xff]  }
0x1764   :  { %5823 = vmatpush3.bf16.msra.mxu0 %v9465_v43  ;;  %10518 = vst [vmem:[#allocation89_spill] sm:$0xff] %v9486_v59 }
0x1765   :  { %5824 = vmatprep.subr.bf16.mxu0 %v9468_v12 }
0x1768   :  { %5825 = vmatpush3.bf16.msra.mxu0 %v9471_v38  ;;  %v9489_v38 = vld [vmem:[#allocation17 + $0x20] ss:$12 sps:$4 sm:$0xff]  }
0x1769   :  { %5826 = vmatprep.subr.bf16.mxu0 %v9474_v53  ;;  %10519 = vst [vmem:[#allocation90_spill] sm:$0xff] %v9489_v38  ;;  %v9492_v53 = vld [vmem:[#allocation17 + $0xc8] ss:$12 sps:$4 sm:$0xff]  }
0x176a   :  { %10520 = vst [vmem:[#allocation91_spill] sm:$0xff] %v9492_v53 }
0x176c   :  { %5827 = vmatpush3.bf16.msra.mxu0 %v9477_v42  ;;  %v9495_v42 = vld [vmem:[#allocation17 + $0x8] ss:$12 sps:$4 sm:$0xff]  }
0x176d   :  { %5828 = vmatprep.subr.bf16.mxu0 %v9480_v36  ;;  %10521 = vst [vmem:[#allocation92_spill] sm:$0xff] %v9495_v42  ;;  %v9498_v36 = vld [vmem:[#allocation19 + $0xac] ss:$12 sps:$4 sm:$0xff]  }
0x176e   :  { %10522 = vst [vmem:[#allocation93_spill] sm:$0xff] %v9498_v36 }
0x1770   :  { %5829 = vmatpush3.bf16.msra.mxu0 %v9483_v55 }
0x1771   :  { %5830 = vmatprep.subr.bf16.mxu0 %v9486_v59 }
0x1774   :  { %5831 = vmatpush3.bf16.msra.mxu0 %v9489_v38 }
0x1775   :  { %5832 = vmatprep.subr.bf16.mxu0 %v9492_v53 }
0x1778   :  { %5833 = vmatpush3.bf16.msra.mxu0 %v9495_v42 }
0x1779   :  { %4062 = vmatprep.subr.bf16.mxu0 %v9498_v36 }
0x17fb   :  { %v3730_v55 = vpop.f32.mrf.mxu0 }
0x17fc   :  { %v3980_v12 = vpack.c.bf16 %v3730_v55, %v3730_v55 }
0x17fd   :  { %v6448_v43 = vpop.f32.mrf.mxu0 }
0x17fe   :  { %4013 = vmatprep.mubr.bf16.mxu1 %v3980_v12  ;;  %4054 = vmatprep.mubr.bf16.mxu0 %v3980_v12 }
0x17ff   :  { %v3733_v59 = vpop.f32.mrf.mxu0 }
0x1801   :  { %v6449_v13 = vpop.f32.mrf.mxu0 }
0x181b   :  { %v6488_v38 = vpop.f32.mrf.mxu0 }
0x181c   :  { %v3863_v12 = vsel %vm2306_vm4, %v6488_v38, -inf }
0x181d   :  { %v3830_v23 = vpop.f32.mrf.mxu0 }
0x181e   :  { %v3861_v13 = vsel %vm2306_vm4, %v3830_v23, -inf }
0x181f   :  { %v6489_v45 = vpop.f32.mrf.mxu0 }
0x1820   :  { %v3864_v42 = vsel %vm2306_vm4, %v6489_v45, -inf }
0x1821   :  { %v3833_v20 = vpop.f32.mrf.mxu0 }
0x1822   :  { %v3862_v59 = vsel %vm2306_vm4, %v3833_v20, -inf }
0x1823   :  { %v6492_v53 = vpop.f32.mrf.mxu0 }
0x1824   :  { %v3869_v16 = vsel %vm2306_vm4, %v6492_v53, -inf }
0x1825   :  { %v3846_v47 = vpop.f32.mrf.mxu0  ;;  %v3870_v18 = vmax.f32 %v3863_v12, %v3869_v16 }
0x1826   :  { %v3865_v36 = vsel %vm2306_vm4, %v3846_v47, -inf }
0x1827   :  { %v6493_v24 = vpop.f32.mrf.mxu0  ;;  %v3866_v46 = vmax.f32 %v3861_v13, %v3865_v36 }
0x1828   :  { %v3871_v55 = vsel %vm2306_vm4, %v6493_v24, -inf }
0x1829   :  { %v3872_v43 = vmax.f32 %v3864_v42, %v3871_v55  ;;  %v3849_v51 = vpop.f32.mrf.mxu0 }
0x182a   :  { %v3867_v6 = vsel %vm2306_vm4, %v3849_v51, -inf }
0x182b   :  { %v3868_v37 = vmax.f32 %v3862_v59, %v3867_v6  ;;  %v3874_v7 = vmax.f32 %v3870_v18, %v3872_v43 }
0x182d   :  { %v3873_v49 = vmax.f32 %v3866_v46, %v3868_v37 }
0x182f   :  { %v3875_v28 = vmax.f32 %v3873_v49, %v3874_v7 }
0x1831   :  { %v3876_v61 = vsub.f32 %v3830_v23, %v3875_v28  ;;  %v3877_v54 = vsub.f32 %v3833_v20, %v3875_v28  ;;  %v3878_v31 = vsub.f32 %v6488_v38, %v3875_v28  ;;  %v3879_v14 = vsub.f32 %v6489_v45, %v3875_v28 }
0x1832   :  { %v3880_v42 = vsub.f32 %v3846_v47, %v3875_v28  ;;  %v3881_v50 = vsub.f32 %v3849_v51, %v3875_v28  ;;  %v3882_v5 = vsub.f32 %v6492_v53, %v3875_v28  ;;  %v3883_v16 = vsub.f32 %v6493_v24, %v3875_v28 }
0x1833   :  { %v3884_v55 = vmul.f32 1.442695, %v3876_v61  ;;  %v3886_v9 = vmul.f32 1.442695, %v3877_v54  ;;  %v3888_v4 = vmul.f32 1.442695, %v3878_v31 }
0x1834   :  { %v3890_v44 = vmul.f32 1.442695, %v3879_v14  ;;  %v3892_v2 = vmul.f32 1.442695, %v3880_v42  ;;  %v3894_v18 = vmul.f32 1.442695, %v3881_v50 }
0x1835   :  { %7167 = vpow2.f32 %v3884_v55  ;;  %v3896_v7 = vmul.f32 1.442695, %v3882_v5  ;;  %v3898_v37 = vmul.f32 1.442695, %v3883_v16 }
0x1836   :  { %7169 = vpow2.f32 %v3886_v9 }
0x1837   :  { %7171 = vpow2.f32 %v3888_v4 }
0x1838   :  { %7173 = vpow2.f32 %v3890_v44 }
0x1839   :  { %7175 = vpow2.f32 %v3892_v2 }
0x183a   :  { %7177 = vpow2.f32 %v3894_v18 }
0x183b   :  { %7179 = vpow2.f32 %v3896_v7 }
0x183c   :  { %7181 = vpow2.f32 %v3898_v37 }
0x1842   :  { %v7168_v46 = vpop.eup %7167 }
0x1843   :  { %v7170_v61 = vpop.eup %7169  ;;  %v3900_v31 = vsel %vm2306_vm4, %v7168_v46, 0.0 }
0x1844   :  { %v7172_v54 = vpop.eup %7171  ;;  %v3901_v14 = vsel %vm2306_vm4, %v7170_v61, 0.0 }
0x1845   :  { %v7174_v49 = vpop.eup %7173  ;;  %v3902_v9 = vadd.f32 %v3901_v14, %v3900_v31  ;;  %v3903_v4 = vsel %vm2306_vm4, %v7172_v54, 0.0 }
0x1846   :  { %v7176_v28 = vpop.eup %7175  ;;  %v3905_v2 = vsel %vm2306_vm4, %v7174_v49, 0.0 }
0x1847   :  { %v3904_v44 = vadd.f32 %v3903_v4, %v3902_v9  ;;  %v7178_v5 = vpop.eup %7177  ;;  %v3907_v6 = vsel %vm2306_vm4, %v7176_v28, 0.0 }
0x1848   :  { %v7180_v51 = vpop.eup %7179  ;;  %v3909_v47 = vsel %vm2306_vm4, %v7178_v5, 0.0 }
0x1849   :  { %v3906_v50 = vadd.f32 %v3905_v2, %v3904_v44  ;;  %v7182_v23 = vpop.eup %7181  ;;  %v3911_v45 = vsel %vm2306_vm4, %v7180_v51, 0.0 }
0x184a   :  { %v3913_v53 = vsel %vm2306_vm4, %v7182_v23, 0.0 }
0x184b   :  { %v3908_v24 = vadd.f32 %v3907_v6, %v3906_v50 }
0x184d   :  { %v3910_v20 = vadd.f32 %v3909_v47, %v3908_v24 }
0x184f   :  { %v3912_v38 = vadd.f32 %v3911_v45, %v3910_v20 }
0x1851   :  { %v3914_v36 = vadd.f32 %v3913_v53, %v3912_v38 }
0x1853   :  { %7183 = vrcp.f32 %v3914_v36 }
0x1860   :  { %v7184_v43 = vpop.eup %7183 }
0x1861   :  { %v3917_v12 = vmul.f32 %v7184_v43, %v7170_v61  ;;  %v3916_v13 = vmul.f32 %v7184_v43, %v7168_v46  ;;  %v3918_v59 = vmul.f32 %v7184_v43, %v7172_v54  ;;  %v3919_v42 = vmul.f32 %v7184_v43, %v7174_v49 }
0x1862   :  { %v3920_v55 = vmul.f32 %v7184_v43, %v7176_v28  ;;  %v3921_v16 = vmul.f32 %v7184_v43, %v7178_v5  ;;  %v3922_v18 = vmul.f32 %v7184_v43, %v7180_v51  ;;  %v3923_v7 = vmul.f32 %v7184_v43, %v7182_v23  ;;  %v9525_v43 = vld [vmem:[#allocation19 + $0xa8] ss:$12 sps:$4 sm:$0xff]  }
0x1863   :  { %3931 = vperm.xlu1 %6766, %v3917_v12   ;;  %3926 = vperm.xlu0 %6765, %v3916_v13   ;;  %v9528_v12 = vld [vmem:[#allocation19 + $0xb0] ss:$12 sps:$4 sm:$0xff]   ;;  %v9531_v13 = vld [vmem:[#allocation19 + $0x94] ss:$12 sps:$4 sm:$0xff]  }
0x1867   :  { %3936 = vperm.xlu1 %6766, %v3918_v59   ;;  %3941 = vperm.xlu0 %6765, %v3919_v42   ;;  %v9538_v59 = vld [vmem:[#allocation19 + $0x90] ss:$12 sps:$4 sm:$0xff]   ;;  %v9541_v42 = vld [vmem:[#allocation19 + $0x98] ss:$12 sps:$4 sm:$0xff]  }
0x186b   :  { %3946 = vperm.xlu1 %6766, %v3920_v55   ;;  %3951 = vperm.xlu0 %6765, %v3921_v16   ;;  %v9544_v55 = vld [vmem:[#allocation19 + $0x7c] ss:$12 sps:$4 sm:$0xff]   ;;  %v9548_v16 = vld [vmem:[#allocation19 + $0x78] ss:$12 sps:$4 sm:$0xff]  }
0x186f   :  { %3956 = vperm.xlu1 %6766, %v3922_v18   ;;  %3961 = vperm.xlu0 %6765, %v3923_v7   ;;  %v9551_v18 = vld [vmem:[#allocation19 + $0x80] ss:$12 sps:$4 sm:$0xff]   ;;  %v9554_v7 = vld [vmem:[#allocation19 + $0x64] ss:$12 sps:$4 sm:$0xff]  }
0x18de   :  { %v3932_v37 = vpop.permute.xlu1 %3931  ;;  %v3927_v31 = vpop.permute.xlu0 %3926 }
0x18df   :  { %v3965_v14 = vmul.f32 %v3932_v37, %v10434_v8  ;;  %v3964_v46 = vmul.f32 %v3927_v31, %v10435_v30  ;;  %v9558_v37 = vld [vmem:[#allocation19 + $0x60] ss:$12 sps:$4 sm:$0xff]   ;;  %v9561_v31 = vld [vmem:[#allocation19 + $0x68] ss:$12 sps:$4 sm:$0xff]  }
0x18e1   :  { %v3972_v54 = vadd.f32 %v3965_v14, %v3964_v46  ;;  %v9564_v14 = vld [vmem:[#allocation19 + $0x4c] ss:$12 sps:$4 sm:$0xff]   ;;  %v9568_v46 = vld [vmem:[#allocation19 + $0x48] ss:$12 sps:$4 sm:$0xff]  }
0x18e2   :  { %v3937_v61 = vpop.permute.xlu1 %3936  ;;  %v3942_v9 = vpop.permute.xlu0 %3941 }
0x18e3   :  { %v3966_v49 = vmul.f32 %v3937_v61, %v8296_v22  ;;  %v3967_v28 = vmul.f32 %v3942_v9, %v8343_v35  ;;  %v9571_v61 = vld [vmem:[#allocation19 + $0x50] ss:$12 sps:$4 sm:$0xff]   ;;  %v9574_v9 = vld [vmem:[#allocation19 + $0x34] ss:$12 sps:$4 sm:$0xff]  }
0x18e5   :  { %v3973_v4 = vadd.f32 %v3972_v54, %v3966_v49  ;;  %v9578_v54 = vld [vmem:[#allocation19 + $0x30] ss:$12 sps:$4 sm:$0xff]   ;;  %v9581_v49 = vld [vmem:[#allocation19 + $0x38] ss:$12 sps:$4 sm:$0xff]  }
0x18e6   :  { %v3947_v44 = vpop.permute.xlu1 %3946  ;;  %v3952_v2 = vpop.permute.xlu0 %3951 }
0x18e7   :  { %v3974_v5 = vadd.f32 %v3973_v4, %v3967_v28  ;;  %v3968_v50 = vmul.f32 %v3947_v44, %v8389_v41  ;;  %v3969_v51 = vmul.f32 %v3952_v2, %v8436_v17  ;;  %v9584_v4 = vld [vmem:[#allocation19 + $0x1c] ss:$12 sps:$4 sm:$0xff]   ;;  %v9588_v28 = vld [vmem:[#allocation19 + $0x18] ss:$12 sps:$4 sm:$0xff]   ;;  %v9591_v44 = vld [vmem:[#allocation19 + $0x20] ss:$12 sps:$4 sm:$0xff]  }
0x18e8   :  { %v9594_v2 = vld [vmem:[#allocation19 + $0x4] ss:$12 sps:$4 sm:$0xff]  }
0x18e9   :  { %v3975_v6 = vadd.f32 %v3974_v5, %v3968_v50  ;;  %10523 = vst [vmem:[#allocation52_spill] sm:$0xff] %v9594_v2  ;;  %v9598_v5 = vld [vmem:[#allocation19] ss:$12 sps:$4 sm:$0xff]   ;;  %v9601_v50 = vld [vmem:[#allocation19 + $0x8] ss:$12 sps:$4 sm:$0xff]  }
0x18ea   :  { %v3957_v24 = vpop.permute.xlu1 %3956  ;;  %v3962_v47 = vpop.permute.xlu0 %3961  ;;  %10524 = vst [vmem:[#allocation53_spill] sm:$0xff] %v9598_v5  ;;  %10525 = vst [vmem:[#allocation54_spill] sm:$0xff] %v9601_v50 }
0x18eb   :  { %v3976_v23 = vadd.f32 %v3975_v6, %v3969_v51  ;;  %v3970_v20 = vmul.f32 %v3957_v24, %v8461_v62  ;;  %v3971_v38 = vmul.f32 %v3962_v47, %v8574_v29  ;;  %v9608_v6 = vld [vmem:[#allocation20 + $0x38] sm:$0xff]   ;;  %v9618_v51 = vld [vmem:[#allocation20 + $0x30] sm:$0xff]  }
0x18ec   :  { %10526 = vst [vmem:[#allocation55_spill] sm:$0xff] %v9608_v6  ;;  %10527 = vst [vmem:[#allocation56_spill] sm:$0xff] %v9618_v51 }
0x18ed   :  { %v3977_v45 = vadd.f32 %v3976_v23, %v3970_v20 }
0x18ef   :  { %v3978_v53 = vadd.f32 %v3977_v45, %v3971_v38 }
0x18f1   :  { %v3979_v36 = vpack.c.bf16 %v3978_v53, %v3978_v53 }
0x18f3   :  { %4014 = vmatmul.mubr.bf16.vlgmr.msra.gmra.mxu1 %v3979_v36  ;;  %4055 = vmatmul.mubr.bf16.vlgmr.msra.gmra.mxu0 %v3979_v36 }
0x18f4   :  { %4063 = vmatpush1.bf16.msra.mxu0 %v9525_v43  ;;  %6495 = vmatpush3.bf16.msra.mxu1 %v9528_v12 }
0x18f5   :  { %4064 = vmatprep.subr.bf16.mxu0 %v9531_v13  ;;  %6496 = vmatprep.subr.bf16.mxu1 %v10317_v34 }
0x18f6   :  { %4094 = vmatprep.mubr.bf16.mxu0 %v10318_v26  ;;  %6510 = vmatprep.mubr.msk.bf16.mxu1 %vm7824_vm1, %v10317_v34 }
0x18f8   :  { %4065 = vmatpush1.bf16.msra.mxu0 %v9538_v59  ;;  %6497 = vmatpush3.bf16.msra.mxu1 %v9541_v42 }
0x18f9   :  { %4066 = vmatprep.subr.bf16.mxu0 %v9544_v55  ;;  %6498 = vmatprep.subr.bf16.mxu1 %v10317_v34 }
0x18fc   :  { %4067 = vmatpush1.bf16.msra.mxu0 %v9548_v16  ;;  %6499 = vmatpush3.bf16.msra.mxu1 %v9551_v18 }
0x18fd   :  { %4068 = vmatprep.subr.bf16.mxu0 %v9554_v7  ;;  %6500 = vmatprep.subr.bf16.mxu1 %v10317_v34 }
0x1900   :  { %4069 = vmatpush1.bf16.msra.mxu0 %v9558_v37  ;;  %6501 = vmatpush3.bf16.msra.mxu1 %v9561_v31 }
0x1901   :  { %4070 = vmatprep.subr.bf16.mxu0 %v9564_v14  ;;  %6502 = vmatprep.subr.bf16.mxu1 %v10317_v34 }
0x1904   :  { %4071 = vmatpush1.bf16.msra.mxu0 %v9568_v46  ;;  %6503 = vmatpush3.bf16.msra.mxu1 %v9571_v61 }
0x1905   :  { %4072 = vmatprep.subr.bf16.mxu0 %v9574_v9  ;;  %6504 = vmatprep.subr.bf16.mxu1 %v10317_v34 }
0x1908   :  { %4073 = vmatpush1.bf16.msra.mxu0 %v9578_v54  ;;  %6505 = vmatpush3.bf16.msra.mxu1 %v9581_v49 }
0x1909   :  { %4074 = vmatprep.subr.bf16.mxu0 %v9584_v4  ;;  %6506 = vmatprep.subr.bf16.mxu1 %v10317_v34 }
0x190c   :  { %4075 = vmatpush1.bf16.msra.mxu0 %v9588_v28  ;;  %6507 = vmatpush3.bf16.msra.mxu1 %v9591_v44 }
0x190d   :  { %4076 = vmatprep.subr.bf16.mxu0 %v9594_v2  ;;  %6508 = vmatprep.subr.bf16.mxu1 %v10317_v34 }
0x1910   :  { %4077 = vmatpush1.bf16.msra.mxu0 %v9598_v5  ;;  %6509 = vmatpush3.bf16.msra.mxu1 %v9601_v50 }
0x1911   :  { %6514 = vmatprep.subr.bf16.mxu0 %v10317_v34  ;;  %6534 = vmatprep.subr.bf16.mxu1 %v10317_v34 }
0x1913   :  { %4095 = vmatmul.mubr.bf16.vlgmr.msra.gmra.mxu0 %v9295_v48  ;;  %6511 = vmatmul.mubr.bf16.vlgmr.msra.gmra.mxu1 %v9295_v48  ;;  %v9624_v48 = vld [vmem:[#allocation20 + $0x28] sm:$0xff]  }
0x1914   :  { %6515 = vmatpush3.bf16.msra.mxu0 %v9608_v6  ;;  %6530 = vmatprep.mubr.msk.bf16.mxu0 %vm7824_vm1, %v10317_v34  ;;  %10528 = vst [vmem:[#allocation57_spill] sm:$0xff] %v9624_v48 }
0x1915   :  { %6516 = vmatprep.subr.bf16.mxu0 %v10317_v34  ;;  %6535 = vmatpush3.bf16.msra.mxu1 %v9236_v21  ;;  %v9630_v21 = vld [vmem:[#allocation20 + $0x20] sm:$0xff]  }
0x1916   :  { %6536 = vmatprep.subr.bf16.mxu1 %v10317_v34  ;;  %6550 = vmatprep.mubr.msk.bf16.mxu1 %vm7824_vm1, %v10317_v34  ;;  %10529 = vst [vmem:[#allocation58_spill] sm:$0xff] %v9630_v21 }
0x1918   :  { %6517 = vmatpush3.bf16.msra.mxu0 %v9618_v51 }
0x1919   :  { %6518 = vmatprep.subr.bf16.mxu0 %v10317_v34  ;;  %6537 = vmatpush3.bf16.msra.mxu1 %v9244_v0  ;;  %v9636_v0 = vld [vmem:[#allocation20 + $0x18] sm:$0xff]  }
0x191a   :  { %6538 = vmatprep.subr.bf16.mxu1 %v10317_v34  ;;  %10530 = vst [vmem:[#allocation97_spill] sm:$0xff] %v9636_v0 }
0x191c   :  { %6519 = vmatpush3.bf16.msra.mxu0 %v9624_v48 }
0x191d   :  { %6520 = vmatprep.subr.bf16.mxu0 %v10317_v34  ;;  %6539 = vmatpush3.bf16.msra.mxu1 %v9250_v27  ;;  %v9642_v27 = vld [vmem:[#allocation20 + $0x10] sm:$0xff]  }
0x191e   :  { %6540 = vmatprep.subr.bf16.mxu1 %v10317_v34  ;;  %10531 = vst [vmem:[#allocation98_spill] sm:$0xff] %v9642_v27 }
0x1920   :  { %6521 = vmatpush3.bf16.msra.mxu0 %v9630_v21 }
0x1921   :  { %6522 = vmatprep.subr.bf16.mxu0 %v10317_v34  ;;  %6541 = vmatpush3.bf16.msra.mxu1 %v9256_v33  ;;  %v9648_v33 = vld [vmem:[#allocation20 + $0x8] sm:$0xff]  }
0x1922   :  { %6542 = vmatprep.subr.bf16.mxu1 %v10317_v34  ;;  %10532 = vst [vmem:[#allocation99_spill] sm:$0xff] %v9648_v33 }
0x1924   :  { %6523 = vmatpush3.bf16.msra.mxu0 %v9636_v0 }
0x1925   :  { %6524 = vmatprep.subr.bf16.mxu0 %v10317_v34  ;;  %6543 = vmatpush3.bf16.msra.mxu1 %v9262_v11  ;;  %v9654_v11 = vld [vmem:[#allocation20] sm:$0xff]  }
0x1926   :  { %6544 = vmatprep.subr.bf16.mxu1 %v10317_v34  ;;  %10533 = vst [vmem:[#allocation100_spill] sm:$0xff] %v9654_v11 }
0x1928   :  { %6525 = vmatpush3.bf16.msra.mxu0 %v9642_v27 }
0x1929   :  { %6526 = vmatprep.subr.bf16.mxu0 %v10317_v34  ;;  %6545 = vmatpush3.bf16.msra.mxu1 %v9268_v25  ;;  %v9662_v25 = vld [vmem:[%s10095_s11 + $0x38] sm:$0xff]  }
0x192a   :  { %6546 = vmatprep.subr.bf16.mxu1 %v10317_v34  ;;  %10534 = vst [vmem:[#allocation101_spill] sm:$0xff] %v9662_v25 }
0x192c   :  { %6527 = vmatpush3.bf16.msra.mxu0 %v9648_v33 }
0x192d   :  { %6528 = vmatprep.subr.bf16.mxu0 %v10317_v34  ;;  %6547 = vmatpush3.bf16.msra.mxu1 %v9274_v32 }
0x192e   :  { %6548 = vmatprep.subr.bf16.mxu1 %v10317_v34 }
0x1930   :  { %6529 = vmatpush3.bf16.msra.mxu0 %v9654_v11 }
0x1931   :  { %6554 = vmatprep.subr.bf16.mxu0 %v10317_v34  ;;  %6549 = vmatpush3.bf16.msra.mxu1 %v9280_v3 }
0x1932   :  { %6574 = vmatprep.subr.bf16.mxu1 %v9662_v25 }
0x19b3   :  { %v4015_v24 = vpop.f32.mrf.mxu1  ;;  %v5834_v47 = vpop.f32.mrf.mxu0 }
0x19b4   :  { %v4016_v3 = vadd.f32 %v4015_v24, %v10463_v19 }
0x19b5   :  { %v4017_v32 = vpop.f32.mrf.mxu1  ;;  %v5835_v23 = vpop.f32.mrf.mxu0 }
0x19b6   :  { %v5836_v20 = vadd.f32 %v5835_v23, %v5834_v47  ;;  %v4018_v23 = vadd.f32 %v4017_v32, %v8961_v60 }
0x19b7   :  { %v4019_v45 = vpop.f32.mrf.mxu1  ;;  %v5837_v38 = vpop.f32.mrf.mxu0 }
0x19b9   :  { %v4020_v53 = vpop.f32.mrf.mxu1  ;;  %v5838_v36 = vpop.f32.mrf.mxu0 }
0x19d3   :  { %v4096_v11 = vpop.f32.mrf.mxu0  ;;  %v4137_v33 = vpop.f32.mrf.mxu1 }
0x19d4   :  { %v4097_v27 = vadd.f32 %v4096_v11, %v10464_v10 }
0x19d5   :  { %v4098_v0 = vpop.f32.mrf.mxu0  ;;  %v6512_v21 = vpop.f32.mrf.mxu1 }
0x19d6   :  { %v4143_v48 = vadd.f32 %v4097_v27, %v4016_v3  ;;  %v4099_v5 = vadd.f32 %v4098_v0, %v8958_v63  ;;  %v4138_v21 = vadd.f32 %v4137_v33, %v8966_v57  ;;  %v9682_v33 = vld [vmem:[%s10094_s10 + $0x38] sm:$0xff]  }
0x19d7   :  { %v4100_v51 = vpop.f32.mrf.mxu0  ;;  %v4140_v6 = vpop.f32.mrf.mxu1  ;;  %10536 = vst [vmem:[#allocation103_spill] sm:$0xff] %v9682_v33 }
0x19d8   :  { %v5532_v50 = vmul.f32 -1.442695, %v4143_v48  ;;  %v4150_v45 = vadd.f32 %v4099_v5, %v4018_v23  ;;  %v4057_v6 = vadd.f32 %v5836_v20, %v8969_v40  ;;  %v9698_v20 = vld [vmem:[%s10094_s10 + $0x28] sm:$0xff]   ;;  %v9705_v23 = vld [vmem:[%s10094_s10 + $0x20] sm:$0xff]  }
0x19d9   :  { %v4101_v2 = vpop.f32.mrf.mxu0  ;;  %v6513_v47 = vpop.f32.mrf.mxu1  ;;  %10538 = vst [vmem:[#allocation105_spill] sm:$0xff] %v9698_v20  ;;  %10539 = vst [vmem:[#allocation106_spill] sm:$0xff] %v9705_v23 }
0x19da   :  { %7185 = vpow2.f32 %v5532_v50  ;;  %v5533_v38 = vmul.f32 -1.442695, %v4150_v45  ;;  %v9712_v45 = vld [vmem:[%s10094_s10 + $0x18] sm:$0xff]  }
0x19db   :  { %10540 = vst [vmem:[#allocation107_spill] sm:$0xff] %v9712_v45 }
0x19dc   :  { %7187 = vpow2.f32 %v5533_v38  ;;  %v9719_v38 = vld [vmem:[%s10094_s10 + $0x10] sm:$0xff]  }
0x19dd   :  { %10541 = vst [vmem:[#allocation108_spill] sm:$0xff] %v9719_v38 }
0x19e7   :  { %v7186_v53 = vpop.eup %7185 }
0x19e8   :  { %v4147_v24 = vadd.f32 1.0, %v7186_v53  ;;  %v9726_v53 = vld [vmem:[%s10094_s10 + $0x8] sm:$0xff]  }
0x19e9   :  { %v7188_v11 = vpop.eup %7187  ;;  %10542 = vst [vmem:[#allocation109_spill] sm:$0xff] %v9726_v53 }
0x19ea   :  { %7189 = vrcp.f32 %v4147_v24  ;;  %v4154_v36 = vadd.f32 1.0, %v7188_v11  ;;  %v9733_v24 = vld [vmem:[%s10094_s10] sm:$0xff]   ;;  %v10544_v11 = vld [vmem:[#allocation59_spill] sm:$0xff] }
0x19eb   :  { %10543 = vst [vmem:[#allocation110_spill] sm:$0xff] %v9733_v24 }
0x19ec   :  { %7191 = vrcp.f32 %v4154_v36  ;;  %v10545_v36 = vld [vmem:[#allocation60_spill] sm:$0xff] }
0x19f7   :  { %v7190_v51 = vpop.eup %7189 }
0x19f8   :  { %v4157_v48 = vmul.f32 %v7190_v51, %v4138_v21  ;;  %v10546_v21 = vld [vmem:[#allocation61_spill] sm:$0xff]  ;;  %v10547_v51 = vld [vmem:[#allocation62_spill] sm:$0xff] }
0x19f9   :  { %v7192_v0 = vpop.eup %7191 }
0x19fa   :  { %v4158_v2 = vadd.f32 %v4157_v48, %v4057_v6  ;;  %v4160_v27 = vsub.f32 1.0, %v7192_v0  ;;  %v4162_v32 = vmul.f32 %v7192_v0, %v9291_v15  ;;  %v9691_v15 = vld [vmem:[%s10094_s10 + $0x30] sm:$0xff]   ;;  %v10556_v0 = vld [vmem:[#allocation64_spill] sm:$0xff] }
0x19fb   :  { %10537 = vst [vmem:[#allocation104_spill] sm:$0xff] %v9691_v15  ;;  %v10548_v6 = vld [vmem:[#allocation63_spill] sm:$0xff]  ;;  %v10550_v48 = vld [vmem:[#allocation46_spill] sm:$0xff] }
0x19fc   :  { %7193 = vtanh.f32 %v4158_v2  ;;  %v10555_v2 = vld [vmem:[#allocation51_spill] sm:$0xff] }
0x1a09   :  { %v7194_v50 = vpop.eup %7193 }
0x1a0a   :  { %v4161_v5 = vmul.f32 %v7194_v50, %v4160_v27  ;;  %v10557_v27 = vld [vmem:[#allocation65_spill] sm:$0xff]  ;;  %v10558_v50 = vld [vmem:[#allocation66_spill] sm:$0xff] }
0x1a0c   :  { %v9672_v3 = vadd.f32 %v4162_v32, %v4161_v5  ;;  %v10559_v5 = vld [vmem:[#allocation41_spill] sm:$0xff]  ;;  %v10560_v32 = vld [vmem:[#allocation40_spill] sm:$0xff] }
0x1a0e   :  { %10535 = vst [vmem:[#allocation102_spill] sm:$0xff] %v9672_v3  ;;  %v9676_v47 = vpack.c.bf16 %v9672_v3, %v9672_v3 }
0x1a10   :  { %6531 = vmatmul.mubr.bf16.vlgmr.msra.gmra.mxu0 %v9676_v47 }
0x1a11   :  { %6555 = vmatpush3.bf16.msra.mxu0 %v9682_v33  ;;  %6570 = vmatprep.mubr.msk.bf16.mxu0 %vm7824_vm1, %v10317_v34 }
0x1a12   :  { %6556 = vmatprep.subr.bf16.mxu0 %v10317_v34 }
0x1a15   :  { %6557 = vmatpush3.bf16.msra.mxu0 %v9691_v15 }
0x1a16   :  { %6558 = vmatprep.subr.bf16.mxu0 %v10317_v34 }
0x1a19   :  { %6559 = vmatpush3.bf16.msra.mxu0 %v9698_v20 }
0x1a1a   :  { %6560 = vmatprep.subr.bf16.mxu0 %v10317_v34 }
0x1a1d   :  { %6561 = vmatpush3.bf16.msra.mxu0 %v9705_v23 }
0x1a1e   :  { %6562 = vmatprep.subr.bf16.mxu0 %v10317_v34 }
0x1a21   :  { %6563 = vmatpush3.bf16.msra.mxu0 %v9712_v45 }
0x1a22   :  { %6564 = vmatprep.subr.bf16.mxu0 %v10317_v34 }
0x1a25   :  { %6565 = vmatpush3.bf16.msra.mxu0 %v9719_v38 }
0x1a26   :  { %6566 = vmatprep.subr.bf16.mxu0 %v10317_v34 }
0x1a29   :  { %6567 = vmatpush3.bf16.msra.mxu0 %v9726_v53 }
0x1a2a   :  { %6568 = vmatprep.subr.bf16.mxu0 %v10317_v34 }
0x1a2d   :  { %6569 = vmatpush3.bf16.msra.mxu0 %v9733_v24 }
0x1a2e   :  { %4523 = vmatprep.subr.bf16.mxu0 %v9315_v39  ;;  %v10549_v39 = vld [vmem:[#allocation45_spill] sm:$0xff] }
0x1a30   :  { %6571 = vmatmul.mubr.bf16.vlgmr.msra.gmra.mxu0 %v9676_v47 }
0x1a31   :  { %4524 = vmatpush1.bf16.msra.mxu0 %v9319_v56  ;;  %v10551_v56 = vld [vmem:[#allocation47_spill] sm:$0xff] }
0x1a32   :  { %4525 = vmatprep.subr.bf16.mxu0 %v9322_v58  ;;  %v10552_v58 = vld [vmem:[#allocation48_spill] sm:$0xff] }
0x1a35   :  { %4526 = vmatpush1.bf16.msra.mxu0 %v9325_v52  ;;  %v10553_v52 = vld [vmem:[#allocation49_spill] sm:$0xff] }
0x1a36   :  { %4527 = vmatprep.subr.bf16.mxu0 %v9328_v1  ;;  %v10554_v1 = vld [vmem:[#allocation50_spill] sm:$0xff] }
0x1a39   :  { %4528 = vmatpush1.bf16.msra.mxu0 %v10544_v11  ;;  %v10561_v11 = vld [vmem:[#allocation67_spill] sm:$0xff] }
0x1a3a   :  { %4529 = vmatprep.subr.bf16.mxu0 %v10545_v36  ;;  %v10562_v36 = vld [vmem:[#allocation68_spill] sm:$0xff] }
0x1a3d   :  { %4530 = vmatpush1.bf16.msra.mxu0 %v10546_v21  ;;  %v10563_v21 = vld [vmem:[#allocation69_spill] sm:$0xff] }
0x1a3e   :  { %4531 = vmatprep.subr.bf16.mxu0 %v10547_v51  ;;  %v10564_v51 = vld [vmem:[#allocation70_spill] sm:$0xff] }
0x1a41   :  { %4532 = vmatpush1.bf16.msra.mxu0 %v10548_v6  ;;  %v10565_v6 = vld [vmem:[#allocation71_spill] sm:$0xff] }
0x1a42   :  { %4533 = vmatprep.subr.bf16.mxu0 %v10549_v39  ;;  %v10566_v39 = vld [vmem:[#allocation72_spill] sm:$0xff] }
0x1a45   :  { %4534 = vmatpush1.bf16.msra.mxu0 %v10550_v48  ;;  %v10567_v48 = vld [vmem:[#allocation73_spill] sm:$0xff] }
0x1a46   :  { %4535 = vmatprep.subr.bf16.mxu0 %v10551_v56  ;;  %v10568_v56 = vld [vmem:[#allocation74_spill] sm:$0xff] }
0x1a49   :  { %4536 = vmatpush1.bf16.msra.mxu0 %v10552_v58  ;;  %v10569_v58 = vld [vmem:[#allocation75_spill] sm:$0xff] }
0x1a4a   :  { %4537 = vmatprep.subr.bf16.mxu0 %v10553_v52  ;;  %v10570_v52 = vld [vmem:[#allocation76_spill] sm:$0xff] }
0x1a4d   :  { %4538 = vmatpush1.bf16.msra.mxu0 %v10554_v1 }
0x1a4e   :  { %4539 = vmatprep.subr.bf16.mxu0 %v10555_v2  ;;  %v9773_v2 = vld [vmem:[%s10102_s18] ss:$0 sm:$0xff] }
0x1a4f   :  { %10571 = vst [vmem:[#allocation59_spill] sm:$0xff] %v9773_v2 }
0x1a51   :  { %4540 = vmatpush2.bf16.msra.mxu0 %v10556_v0 }
0x1a52   :  { %4541 = vmatprep.subr.bf16.mxu0 %v10557_v27 }
0x1a55   :  { %4542 = vmatpush2.bf16.msra.mxu0 %v10558_v50 }
0x1a56   :  { %4543 = vmatprep.subr.bf16.mxu0 %v10559_v5 }
0x1a59   :  { %4544 = vmatpush2.bf16.msra.mxu0 %v10560_v32 }
0x1a5a   :  { %4545 = vmatprep.subr.bf16.mxu0 %v10561_v11 }
0x1a5d   :  { %4546 = vmatpush2.bf16.msra.mxu0 %v10562_v36 }
0x1a5e   :  { %4547 = vmatprep.subr.bf16.mxu0 %v10563_v21 }
0x1a61   :  { %4548 = vmatpush2.bf16.msra.mxu0 %v10564_v51 }
0x1a62   :  { %4549 = vmatprep.subr.bf16.mxu0 %v10565_v6 }
0x1a65   :  { %4550 = vmatpush2.bf16.msra.mxu0 %v10566_v39 }
0x1a66   :  { %4551 = vmatprep.subr.bf16.mxu0 %v10567_v48 }
0x1a69   :  { %4552 = vmatpush2.bf16.msra.mxu0 %v10568_v56 }
0x1a6a   :  { %4553 = vmatprep.subr.bf16.mxu0 %v10569_v58 }
0x1a6d   :  { %4554 = vmatpush2.bf16.msra.mxu0 %v10570_v52 }
0x1a6e   :  { %6598 = vmatprep.subr.bf16.mxu0 %v10317_v34 }
0x1ad0   :  { %v4199_v1 = vpop.f32.mrf.mxu0 }
0x1ad1   :  { %v4200_v0 = vadd.f32 %v9773_v2, %v4199_v1 }
0x1ad2   :  { %v6532_v27 = vpop.f32.mrf.mxu0 }
0x1ad3   :  { %4205 = vmax.xlane.f32.xlu1 %v4200_v0 }
0x1ad4   :  { %v4202_v50 = vpop.f32.mrf.mxu0 }
0x1ad6   :  { %v6533_v5 = vpop.f32.mrf.mxu0 }
0x1ad7   :  { %v10572_v5 = vld [vmem:[#allocation36_spill] sm:$0xff] }
0x1af0   :  { %v9776_v32 = vpop.f32.mrf.mxu0 }
0x1af2   :  { %v6572_v11 = vpop.f32.mrf.mxu0 }
0x1af4   :  { %v4315_v36 = vpop.f32.mrf.mxu0 }
0x1af6   :  { %v6573_v21 = vpop.f32.mrf.mxu0 }
0x1b5c   :  { %v4206_v51 = vpop.xlane.xlu1 %4205 }
0x1b5d   :  { %v4207_v6 = vsub.f32 %v4200_v0, %v4206_v51 }
0x1b5f   :  { %v4208_v39 = vmul.f32 1.442695, %v4207_v6 }
0x1b61   :  { %7195 = vpow2.f32 %v4208_v39 }
0x1b6e   :  { %v7196_v48 = vpop.eup %7195 }
0x1b6f   :  { %4210 = vadd.xlane.f32.xlu0 %v7196_v48 }
0x1bf8   :  { %v4211_v56 = vpop.xlane.xlu0 %4210 }
0x1bf9   :  { %7197 = vlog2.f32 %v4211_v56  ;;  %v10573_v56 = vld [vmem:[#allocation34_spill] sm:$0xff] }
0x1c06   :  { %v7198_v58 = vpop.eup %7197 }
0x1c07   :  { %v4213_v52 = vmul.f32 0.6931472, %v7198_v58  ;;  %v4318_v58 = vadd.f32 %v9776_v32, %v10573_v56 }
0x1c09   :  { %v4214_v1 = vadd.f32 %v4213_v52, %v4206_v51  ;;  %v10574_v51 = vld [vmem:[#allocation39_spill] sm:$0xff]  ;;  %7199 = vtanh.f32 %v4318_v58  ;;  %v10579_v58 = vld [vmem:[#allocation38_spill] sm:$0xff] }
0x1c0b   :  { %v4215_v27 = vsub.f32 %v4200_v0, %v4214_v1  ;;  %v4319_v0 = vadd.f32 %v9776_v32, %v10574_v51  ;;  %v10594_v51 = vld [vmem:[#allocation82_spill] sm:$0xff] }
0x1c0d   :  { %4216 = vmax.xlane.f32.xlu0 %v4215_v27  ;;  %5302 = vst [vmem:[#allocation22 + $0x10] sm:$0xff] %v4215_v27  ;;  %7201 = vtanh.f32 %v4319_v0  ;;  %v4321_v0 = vadd.f32 %v9776_v32, %v10579_v58 }
0x1c96   :  { %v4217_v50 = vpop.xlane.xlu0 %4216 }
0x1c97   :  { %vm4218_vm13 = vcmp.eq.f32.partialorder %v4215_v27, %v4217_v50 }
0x1c98   :  { %v4219_v11 = vsel %vm4218_vm13, %v10572_v5, 128 }
0x1c99   :  { %v4221_v36 = vshra.s32 %v4219_v11, 16  ;;  %v4220_v2 = vand.u32 65535, %v4219_v11 }
0x1c9b   :  { %v4223_v21 = vcvt.s32.f32 %v4221_v36  ;;  %v4222_v39 = vcvt.s32.f32 %v4220_v2  ;;  %v7200_v36 = vpop.eup %7199 }
0x1c9c   :  { %v7202_v24 = vpop.eup %7201 }
0x1c9d   :  { %4224 = vmin.xlane.f32.xlu1 %v4223_v21  ;;  %v4334_v2 = vpack.c.bf16 %v7202_v24, %v7200_v36  ;;  %v10578_v24 = vld [vmem:[#allocation37_spill] sm:$0xff] }
0x1d26   :  { %v4225_v6 = vpop.xlane.xlu1 %4224 }
0x1d27   :  { %vm4226_vm14 = vcmp.eq.f32.partialorder %v4223_v21, %v4225_v6  ;;  %v4231_v52 = vcvt.f32.s32 %v4225_v6  ;;  %v10575_v21 = vmov 1.0|1.0   ;;  %v9796_v6 = vld [vmem:[%s10095_s11 + $0x28] sm:$0xff]  }
0x1d28   :  { %v4227_v48 = vsel %vm4226_vm14, %v4222_v39, inf  ;;  %v9789_v39 = vld [vmem:[%s10095_s11 + $0x30] sm:$0xff]   ;;  %10577 = vst [vmem:[#allocation61_spill] sm:$0xff] %v9796_v6 }
0x1d29   :  { %4228 = vmin.xlane.f32.xlu0 %v4227_v48  ;;  %v4232_v27 = vshll.u32 %v4231_v52, 16  ;;  %10576 = vst [vmem:[#allocation60_spill] sm:$0xff] %v9789_v39  ;;  %v4320_v48 = vadd.f32 %v9776_v32, %v10578_v24  ;;  %v9807_v52 = vld [vmem:[%s10095_s11 + $0x20] sm:$0xff]  }
0x1d2a   :  { %10580 = vst [vmem:[#allocation62_spill] sm:$0xff] %v9807_v52 }
0x1d2b   :  { %7203 = vtanh.f32 %v4320_v48 }
0x1d2c   :  { %7205 = vtanh.f32 %v4321_v0  ;;  %v9829_v0 = vld [vmem:[%s10095_s11 + $0x10] sm:$0xff]  }
0x1d2d   :  { %10586 = vst [vmem:[#allocation45_spill] sm:$0xff] %v9829_v0 }
0x1db2   :  { %v4229_v1 = vpop.xlane.xlu0 %4228 }
0x1db3   :  { %v4230_v50 = vcvt.f32.s32 %v4229_v1  ;;  %v10581_v1 = vld [vmem:[#allocation42_spill] sm:$0xff] }
0x1db5   :  { %v4233_v11 = vadd.s32 %v4232_v27, %v4230_v50  ;;  %v4322_v27 = vadd.f32 %v9776_v32, %v10581_v1  ;;  %v10582_v50 = vld [vmem:[#allocation35_spill] sm:$0xff]  ;;  %v10585_v1 = vld [vmem:[#allocation44_spill] sm:$0xff] }
0x1db6   :  { %v4323_v36 = vadd.f32 %v9776_v32, %v10582_v50  ;;  %v4325_v48 = vadd.f32 %v9776_v32, %v10585_v1  ;;  %v9843_v1 = vld [vmem:[%s10095_s11] sm:$0xff]   ;;  %v10590_v50 = vld [vmem:[#allocation78_spill] sm:$0xff] }
0x1db7   :  { %vm4234_vm15 = vcmp.eq.s32.totalorder %v10572_v5, %v4233_v11  ;;  %v9818_v11 = vld [vmem:[%s10095_s11 + $0x18] sm:$0xff]   ;;  %7207 = vtanh.f32 %v4322_v27  ;;  %v9836_v27 = vld [vmem:[%s10095_s11 + $0x8] sm:$0xff]   ;;  %10588 = vst [vmem:[#allocation47_spill] sm:$0xff] %v9843_v1 }
0x1db8   :  { %vm5535_vm0 = vmpackc.low %vm4234_vm15, %vm4234_vm15  ;;  %10583 = vst [vmem:[#allocation63_spill] sm:$0xff] %v9818_v11  ;;  %7209 = vtanh.f32 %v4323_v36  ;;  %v7204_v36 = vpop.eup %7203 }
0x1db9   :  { %6551 = vmatmul.mubr.msk.bf16.vlgmr.msra.gmra.mxu1 %vm5535_vm0, %v10575_v21  ;;  %10587 = vst [vmem:[#allocation46_spill] sm:$0xff] %v9836_v27  ;;  %v10593_v21 = vld [vmem:[#allocation81_spill] sm:$0xff] }
0x1dba   :  { %6575 = vmatpush3.bf16.msra.mxu1 %v9662_v25  ;;  %6590 = vmatprep.mubr.bf16.mxu1 %v4334_v2  ;;  %v10584_v2 = vld [vmem:[#allocation43_spill] sm:$0xff] }
0x1dbb   :  { %6576 = vmatprep.subr.bf16.mxu1 %v9789_v39  ;;  %v4324_v58 = vadd.f32 %v9776_v32, %v10584_v2  ;;  %v7206_v32 = vpop.eup %7205  ;;  %v10589_v2 = vld [vmem:[#allocation77_spill] sm:$0xff] }
0x1dbd   :  { %7211 = vtanh.f32 %v4324_v58 }
0x1dbe   :  { %6577 = vmatpush3.bf16.msra.mxu1 %v9789_v39  ;;  %7213 = vtanh.f32 %v4325_v48 }
0x1dbf   :  { %6578 = vmatprep.subr.bf16.mxu1 %v9796_v6 }
0x1dc2   :  { %6579 = vmatpush3.bf16.msra.mxu1 %v9796_v6  ;;  %v10592_v6 = vld [vmem:[#allocation80_spill] sm:$0xff] }
0x1dc3   :  { %6580 = vmatprep.subr.bf16.mxu1 %v9807_v52 }
0x1dc4   :  { %v7208_v58 = vpop.eup %7207 }
0x1dc5   :  { %v7210_v48 = vpop.eup %7209 }
0x1dc6   :  { %6581 = vmatpush3.bf16.msra.mxu1 %v9807_v52  ;;  %v10591_v52 = vld [vmem:[#allocation79_spill] sm:$0xff] }
0x1dc7   :  { %6582 = vmatprep.subr.bf16.mxu1 %v9818_v11 }
0x1dca   :  { %6583 = vmatpush3.bf16.msra.mxu1 %v9818_v11  ;;  %v4336_v11 = vpack.c.bf16 %v7210_v48, %v7208_v58 }
0x1dcb   :  { %6584 = vmatprep.subr.bf16.mxu1 %v9829_v0 }
0x1dce   :  { %6585 = vmatpush3.bf16.msra.mxu1 %v9829_v0  ;;  %v4335_v0 = vpack.c.bf16 %v7206_v32, %v7204_v36  ;;  %v10595_v36 = vld [vmem:[#allocation83_spill] sm:$0xff]  ;;  %v10601_v32 = vld [vmem:[#allocation89_spill] sm:$0xff] }
0x1dcf   :  { %6586 = vmatprep.subr.bf16.mxu1 %v9836_v27 }
0x1dd2   :  { %6587 = vmatpush3.bf16.msra.mxu1 %v9836_v27  ;;  %v7212_v27 = vpop.eup %7211 }
0x1dd3   :  { %6588 = vmatprep.subr.bf16.mxu1 %v9843_v1  ;;  %v7214_v24 = vpop.eup %7213 }
0x1dd4   :  { %v4337_v39 = vpack.c.bf16 %v7214_v24, %v7212_v27 }
0x1dd6   :  { %6589 = vmatpush3.bf16.msra.mxu1 %v9843_v1 }
0x1dd7   :  { %5888 = vmatprep.subr.bf16.mxu1 %v10589_v2  ;;  %v10596_v2 = vld [vmem:[#allocation84_spill] sm:$0xff] }
0x1dd9   :  { %6591 = vmatmul.mubr.bf16.vlgmr.msra.gmra.mxu1 %v4335_v0  ;;  %v10597_v0 = vld [vmem:[#allocation85_spill] sm:$0xff] }
0x1dda   :  { %6594 = vmatprep.mubr.bf16.mxu1 %v4336_v11  ;;  %5889 = vmatpush3.bf16.msra.mxu1 %v10590_v50  ;;  %v10598_v11 = vld [vmem:[#allocation86_spill] sm:$0xff]  ;;  %v10599_v50 = vld [vmem:[#allocation87_spill] sm:$0xff] }
0x1ddb   :  { %5890 = vmatprep.subr.bf16.mxu1 %v10591_v52  ;;  %v10600_v52 = vld [vmem:[#allocation88_spill] sm:$0xff] }
0x1dde   :  { %5891 = vmatpush3.bf16.msra.mxu1 %v10592_v6  ;;  %v10602_v6 = vld [vmem:[#allocation90_spill] sm:$0xff] }
0x1ddf   :  { %5892 = vmatprep.subr.bf16.mxu1 %v10593_v21  ;;  %v10603_v21 = vld [vmem:[#allocation91_spill] sm:$0xff] }
0x1de1   :  { %6595 = vmatmul.mubr.bf16.gmra.mxu1 %v4337_v39  ;;  %v10604_v39 = vld [vmem:[#allocation92_spill] sm:$0xff] }
0x1de2   :  { %5893 = vmatpush3.bf16.msra.mxu1 %v10594_v51  ;;  %v10605_v51 = vld [vmem:[#allocation93_spill] sm:$0xff] }
0x1de3   :  { %5894 = vmatprep.subr.bf16.mxu1 %v10595_v36 }
0x1de6   :  { %5895 = vmatpush3.bf16.msra.mxu1 %v10596_v2 }
0x1de7   :  { %5896 = vmatprep.subr.bf16.mxu1 %v10597_v0 }
0x1dea   :  { %5897 = vmatpush3.bf16.msra.mxu1 %v10598_v11 }
0x1deb   :  { %5898 = vmatprep.subr.bf16.mxu1 %v10599_v50 }
0x1dee   :  { %5899 = vmatpush3.bf16.msra.mxu1 %v10600_v52 }
0x1def   :  { %5900 = vmatprep.subr.bf16.mxu1 %v10601_v32 }
0x1df2   :  { %5901 = vmatpush3.bf16.msra.mxu1 %v10602_v6 }
0x1df3   :  { %5902 = vmatprep.subr.bf16.mxu1 %v10603_v21 }
0x1df6   :  { %5903 = vmatpush3.bf16.msra.mxu1 %v10604_v39 }
0x1df7   :  { %4604 = vmatprep.subr.bf16.mxu1 %v10605_v51 }
0x1e79   :  { %v4272_v24 = vpop.f32.mrf.mxu1 }
0x1e7a   :  { %v4522_v27 = vpack.c.bf16 %v4272_v24, %v4272_v24 }
0x1e7b   :  { %v6552_v58 = vpop.f32.mrf.mxu1 }
0x1e7c   :  { %4555 = vmatprep.mubr.bf16.mxu0 %v4522_v27  ;;  %4596 = vmatprep.mubr.bf16.mxu1 %v4522_v27 }
0x1e7d   :  { %v4275_v48 = vpop.f32.mrf.mxu1 }
0x1e7f   :  { %v6553_v36 = vpop.f32.mrf.mxu1 }
0x1e99   :  { %v6592_v2 = vpop.f32.mrf.mxu1 }
0x1e9a   :  { %v4405_v27 = vsel %vm2306_vm4, %v6592_v2, -inf }
0x1e9b   :  { %v4372_v0 = vpop.f32.mrf.mxu1 }
0x1e9c   :  { %v4403_v48 = vsel %vm2306_vm4, %v4372_v0, -inf }
0x1e9d   :  { %v6593_v11 = vpop.f32.mrf.mxu1 }
0x1e9e   :  { %v4406_v21 = vsel %vm2306_vm4, %v6593_v11, -inf }
0x1e9f   :  { %v4375_v50 = vpop.f32.mrf.mxu1 }
0x1ea0   :  { %v4404_v36 = vsel %vm2306_vm4, %v4375_v50, -inf }
0x1ea1   :  { %v6596_v52 = vpop.f32.mrf.mxu1 }
0x1ea2   :  { %v4411_v39 = vsel %vm2306_vm4, %v6596_v52, -inf }
0x1ea3   :  { %v4388_v32 = vpop.f32.mrf.mxu1  ;;  %v4412_v5 = vmax.f32 %v4405_v27, %v4411_v39 }
0x1ea4   :  { %v4407_v51 = vsel %vm2306_vm4, %v4388_v32, -inf }
0x1ea5   :  { %v6597_v6 = vpop.f32.mrf.mxu1  ;;  %v4408_v53 = vmax.f32 %v4403_v48, %v4407_v51 }
0x1ea6   :  { %v4413_v24 = vsel %vm2306_vm4, %v6597_v6, -inf }
0x1ea7   :  { %v4414_v58 = vmax.f32 %v4406_v21, %v4413_v24  ;;  %v4391_v1 = vpop.f32.mrf.mxu1 }
0x1ea8   :  { %v4409_v56 = vsel %vm2306_vm4, %v4391_v1, -inf }
0x1ea9   :  { %v4410_v38 = vmax.f32 %v4404_v36, %v4409_v56  ;;  %v4416_v45 = vmax.f32 %v4412_v5, %v4414_v58 }
0x1eab   :  { %v4415_v23 = vmax.f32 %v4408_v53, %v4410_v38 }
0x1ead   :  { %v4417_v20 = vmax.f32 %v4415_v23, %v4416_v45 }
0x1eaf   :  { %v4418_v15 = vsub.f32 %v4372_v0, %v4417_v20  ;;  %v4419_v33 = vsub.f32 %v4375_v50, %v4417_v20  ;;  %v4420_v3 = vsub.f32 %v6592_v2, %v4417_v20  ;;  %v4421_v40 = vsub.f32 %v6593_v11, %v4417_v20 }
0x1eb0   :  { %v4422_v21 = vsub.f32 %v4388_v32, %v4417_v20  ;;  %v4423_v63 = vsub.f32 %v4391_v1, %v4417_v20  ;;  %v4424_v19 = vsub.f32 %v6596_v52, %v4417_v20  ;;  %v4425_v39 = vsub.f32 %v6597_v6, %v4417_v20 }
0x1eb1   :  { %v4426_v24 = vmul.f32 1.442695, %v4418_v15  ;;  %v4428_v57 = vmul.f32 1.442695, %v4419_v33  ;;  %v4430_v60 = vmul.f32 1.442695, %v4420_v3 }
0x1eb2   :  { %v4432_v10 = vmul.f32 1.442695, %v4421_v40  ;;  %v4434_v25 = vmul.f32 1.442695, %v4422_v21  ;;  %v4436_v5 = vmul.f32 1.442695, %v4423_v63 }
0x1eb3   :  { %7215 = vpow2.f32 %v4426_v24  ;;  %v4438_v23 = vmul.f32 1.442695, %v4424_v19  ;;  %v4440_v45 = vmul.f32 1.442695, %v4425_v39 }
0x1eb4   :  { %7217 = vpow2.f32 %v4428_v57 }
0x1eb5   :  { %7219 = vpow2.f32 %v4430_v60 }
0x1eb6   :  { %7221 = vpow2.f32 %v4432_v10 }
0x1eb7   :  { %7223 = vpow2.f32 %v4434_v25 }
0x1eb8   :  { %7225 = vpow2.f32 %v4436_v5 }
0x1eb9   :  { %7227 = vpow2.f32 %v4438_v23 }
0x1eba   :  { %7229 = vpow2.f32 %v4440_v45 }
0x1ec0   :  { %v7216_v38 = vpop.eup %7215 }
0x1ec1   :  { %v7218_v15 = vpop.eup %7217  ;;  %v4442_v3 = vsel %vm2306_vm4, %v7216_v38, 0.0 }
0x1ec2   :  { %v7220_v33 = vpop.eup %7219  ;;  %v4443_v40 = vsel %vm2306_vm4, %v7218_v15, 0.0 }
0x1ec3   :  { %v7222_v53 = vpop.eup %7221  ;;  %v4444_v57 = vadd.f32 %v4443_v40, %v4442_v3  ;;  %v4445_v60 = vsel %vm2306_vm4, %v7220_v33, 0.0 }
0x1ec4   :  { %v7224_v20 = vpop.eup %7223  ;;  %v4447_v63 = vsel %vm2306_vm4, %v7222_v53, 0.0 }
0x1ec5   :  { %v4446_v10 = vadd.f32 %v4445_v60, %v4444_v57  ;;  %v7226_v19 = vpop.eup %7225  ;;  %v4449_v56 = vsel %vm2306_vm4, %v7224_v20, 0.0 }
0x1ec6   :  { %v7228_v1 = vpop.eup %7227  ;;  %v4451_v0 = vsel %vm2306_vm4, %v7226_v19, 0.0 }
0x1ec7   :  { %v4448_v25 = vadd.f32 %v4447_v63, %v4446_v10  ;;  %v7230_v11 = vpop.eup %7229  ;;  %v4453_v52 = vsel %vm2306_vm4, %v7228_v1, 0.0 }
0x1ec8   :  { %v4455_v6 = vsel %vm2306_vm4, %v7230_v11, 0.0 }
0x1ec9   :  { %v4450_v2 = vadd.f32 %v4449_v56, %v4448_v25 }
0x1ecb   :  { %v4452_v50 = vadd.f32 %v4451_v0, %v4450_v2 }
0x1ecd   :  { %v4454_v32 = vadd.f32 %v4453_v52, %v4452_v50 }
0x1ecf   :  { %v4456_v51 = vadd.f32 %v4455_v6, %v4454_v32 }
0x1ed1   :  { %7231 = vrcp.f32 %v4456_v51 }
0x1ede   :  { %v7232_v58 = vpop.eup %7231 }
0x1edf   :  { %v4459_v27 = vmul.f32 %v7232_v58, %v7218_v15  ;;  %v4458_v48 = vmul.f32 %v7232_v58, %v7216_v38  ;;  %v4462_v36 = vmul.f32 %v7232_v58, %v7224_v20  ;;  %v4460_v21 = vmul.f32 %v7232_v58, %v7220_v33 }
0x1ee0   :  { %v4464_v24 = vmul.f32 %v7232_v58, %v7228_v1  ;;  %v4461_v39 = vmul.f32 %v7232_v58, %v7222_v53  ;;  %v4463_v5 = vmul.f32 %v7232_v58, %v7226_v19  ;;  %v4465_v23 = vmul.f32 %v7232_v58, %v7230_v11 }
0x1ee1   :  { %4473 = vperm.xlu0 %6765, %v4459_v27   ;;  %4468 = vperm.xlu1 %6766, %v4458_v48  }
0x1ee5   :  { %4488 = vperm.xlu0 %6765, %v4462_v36   ;;  %4478 = vperm.xlu1 %6766, %v4460_v21  }
0x1ee9   :  { %4498 = vperm.xlu0 %6765, %v4464_v24   ;;  %4483 = vperm.xlu1 %6766, %v4461_v39  }
0x1eed   :  { %4493 = vperm.xlu1 %6766, %v4463_v5  }
0x1ef1   :  { %4503 = vperm.xlu1 %6766, %v4465_v23  }
0x1f5c   :  { %v4474_v45 = vpop.permute.xlu0 %4473  ;;  %v4469_v3 = vpop.permute.xlu1 %4468 }
0x1f5d   :  { %v4507_v40 = vmul.f32 %v4474_v45, %v10434_v8  ;;  %v4506_v38 = vmul.f32 %v4469_v3, %v10435_v30  ;;  %v10618_v3 = vld [vmem:[#allocation32_spill] sm:$0xff] }
0x1f5f   :  { %v4514_v60 = vadd.f32 %v4507_v40, %v4506_v38  ;;  %v10619_v38 = vld [vmem:[#allocation94_spill] sm:$0xff] }
0x1f60   :  { %v4479_v15 = vpop.permute.xlu1 %4478  ;;  %v4489_v33 = vpop.permute.xlu0 %4488 }
0x1f61   :  { %v4508_v57 = vmul.f32 %v4479_v15, %v8296_v22  ;;  %v4510_v63 = vmul.f32 %v4489_v33, %v8389_v41 }
0x1f63   :  { %v4515_v10 = vadd.f32 %v4514_v60, %v4508_v57 }
0x1f64   :  { %v4484_v20 = vpop.permute.xlu1 %4483  ;;  %v4499_v25 = vpop.permute.xlu0 %4498 }
0x1f65   :  { %v4509_v53 = vmul.f32 %v4484_v20, %v8343_v35  ;;  %v4512_v0 = vmul.f32 %v4499_v25, %v8461_v62 }
0x1f67   :  { %v4516_v19 = vadd.f32 %v4515_v10, %v4509_v53 }
0x1f68   :  { %v4494_v56 = vpop.permute.xlu1 %4493 }
0x1f69   :  { %v4517_v1 = vadd.f32 %v4516_v19, %v4510_v63  ;;  %v4511_v2 = vmul.f32 %v4494_v56, %v8436_v17  ;;  %v10620_v63 = vld [vmem:[#allocation33_spill] sm:$0xff] }
0x1f6b   :  { %v4518_v11 = vadd.f32 %v4517_v1, %v4511_v2  ;;  %v10621_v1 = vld [vmem:[#allocation95_spill] sm:$0xff] }
0x1f6c   :  { %v4504_v50 = vpop.permute.xlu1 %4503 }
0x1f6d   :  { %v4519_v52 = vadd.f32 %v4518_v11, %v4512_v0  ;;  %v4513_v32 = vmul.f32 %v4504_v50, %v8574_v29 }
0x1f6f   :  { %v4520_v6 = vadd.f32 %v4519_v52, %v4513_v32 }
0x1f71   :  { %v4521_v51 = vpack.c.bf16 %v4520_v6, %v4520_v6 }
0x1f73   :  { %4556 = vmatmul.mubr.bf16.vlgmr.msra.gmra.mxu0 %v4521_v51  ;;  %4597 = vmatmul.mubr.bf16.vlgmr.msra.gmra.mxu1 %v4521_v51  ;;  %v10622_v51 = vld [vmem:[#allocation31_spill] sm:$0xff] }
0x1f74   :  { %4605 = vmatpush1.bf16.msra.mxu1 %v9525_v43  ;;  %6599 = vmatpush3.bf16.msra.mxu0 %v9528_v12  ;;  %v10606_v43 = vld [vmem:[#allocation52_spill] sm:$0xff]  ;;  %v10607_v12 = vld [vmem:[#allocation53_spill] sm:$0xff] }
0x1f75   :  { %4606 = vmatprep.subr.bf16.mxu1 %v9531_v13  ;;  %6600 = vmatprep.subr.bf16.mxu0 %v10317_v34  ;;  %v10608_v13 = vld [vmem:[#allocation54_spill] sm:$0xff] }
0x1f76   :  { %4636 = vmatprep.mubr.bf16.mxu1 %v10318_v26  ;;  %6614 = vmatprep.mubr.msk.bf16.mxu0 %vm7824_vm1, %v10317_v34 }
0x1f78   :  { %4607 = vmatpush1.bf16.msra.mxu1 %v9538_v59  ;;  %6601 = vmatpush3.bf16.msra.mxu0 %v9541_v42  ;;  %v10609_v59 = vld [vmem:[#allocation55_spill] sm:$0xff]  ;;  %v7440_v42 = vld [vmem:[#allocation16 + $0x38] sm:$0xff]  }
0x1f79   :  { %4608 = vmatprep.subr.bf16.mxu1 %v9544_v55  ;;  %6602 = vmatprep.subr.bf16.mxu0 %v10317_v34  ;;  %v10610_v55 = vld [vmem:[#allocation56_spill] sm:$0xff] }
0x1f7c   :  { %4609 = vmatpush1.bf16.msra.mxu1 %v9548_v16  ;;  %6603 = vmatpush3.bf16.msra.mxu0 %v9551_v18  ;;  %v7441_v16 = vld [vmem:[#allocation16 + $0x30] sm:$0xff]   ;;  %v10611_v18 = vld [vmem:[#allocation57_spill] sm:$0xff] }
0x1f7d   :  { %4610 = vmatprep.subr.bf16.mxu1 %v9554_v7  ;;  %6604 = vmatprep.subr.bf16.mxu0 %v10317_v34  ;;  %v7442_v7 = vld [vmem:[#allocation16 + $0x28] sm:$0xff]  }
0x1f80   :  { %4611 = vmatpush1.bf16.msra.mxu1 %v9558_v37  ;;  %6605 = vmatpush3.bf16.msra.mxu0 %v9561_v31  ;;  %v10612_v37 = vld [vmem:[#allocation58_spill] sm:$0xff] }
0x1f81   :  { %4612 = vmatprep.subr.bf16.mxu1 %v9564_v14  ;;  %6606 = vmatprep.subr.bf16.mxu0 %v10317_v34  ;;  %v7443_v31 = vld [vmem:[#allocation16 + $0x20] sm:$0xff]   ;;  %v10613_v14 = vld [vmem:[#allocation97_spill] sm:$0xff] }
0x1f84   :  { %4613 = vmatpush1.bf16.msra.mxu1 %v9568_v46  ;;  %6607 = vmatpush3.bf16.msra.mxu0 %v9571_v61  ;;  %v7444_v46 = vld [vmem:[#allocation16 + $0x18] sm:$0xff]   ;;  %v10614_v61 = vld [vmem:[#allocation98_spill] sm:$0xff] }
0x1f85   :  { %4614 = vmatprep.subr.bf16.mxu1 %v9574_v9  ;;  %6608 = vmatprep.subr.bf16.mxu0 %v10317_v34  ;;  %v7445_v9 = vld [vmem:[#allocation16 + $0x10] sm:$0xff]  }
0x1f88   :  { %4615 = vmatpush1.bf16.msra.mxu1 %v9578_v54  ;;  %6609 = vmatpush3.bf16.msra.mxu0 %v9581_v49  ;;  %v10615_v54 = vld [vmem:[#allocation99_spill] sm:$0xff] }
0x1f89   :  { %4616 = vmatprep.subr.bf16.mxu1 %v9584_v4  ;;  %6610 = vmatprep.subr.bf16.mxu0 %v10317_v34  ;;  %v7446_v49 = vld [vmem:[#allocation16 + $0x8] sm:$0xff]   ;;  %v10616_v4 = vld [vmem:[#allocation100_spill] sm:$0xff] }
0x1f8c   :  { %4617 = vmatpush1.bf16.msra.mxu1 %v9588_v28  ;;  %6611 = vmatpush3.bf16.msra.mxu0 %v9591_v44  ;;  %v7447_v28 = vld [vmem:[#allocation16] sm:$0xff]   ;;  %v10617_v44 = vld [vmem:[#allocation101_spill] sm:$0xff] }
0x1f8d   :  { %4618 = vmatprep.subr.bf16.mxu1 %v10606_v43  ;;  %6612 = vmatprep.subr.bf16.mxu0 %v10317_v34 }
0x1f90   :  { %4619 = vmatpush1.bf16.msra.mxu1 %v10607_v12  ;;  %6613 = vmatpush3.bf16.msra.mxu0 %v10608_v13  ;;  %v10623_v13 = vld [vmem:[#allocation96_spill] sm:$0xff] }
0x1f91   :  { %6618 = vmatprep.subr.bf16.mxu1 %v10317_v34  ;;  %6638 = vmatprep.subr.bf16.mxu0 %v10317_v34 }
0x1f93   :  { %4637 = vmatmul.mubr.bf16.vlgmr.msra.gmra.mxu1 %v9676_v47  ;;  %6615 = vmatmul.mubr.bf16.vlgmr.msra.gmra.mxu0 %v9676_v47 }
0x1f94   :  { %6619 = vmatpush3.bf16.msra.mxu1 %v10609_v59  ;;  %6634 = vmatprep.mubr.msk.bf16.mxu1 %vm7824_vm1, %v10317_v34 }
0x1f95   :  { %6620 = vmatprep.subr.bf16.mxu1 %v10317_v34  ;;  %6639 = vmatpush3.bf16.msra.mxu0 %v7440_v42 }
0x1f96   :  { %6640 = vmatprep.subr.bf16.mxu0 %v10317_v34  ;;  %6654 = vmatprep.mubr.msk.bf16.mxu0 %vm7824_vm1, %v10317_v34 }
0x1f98   :  { %6621 = vmatpush3.bf16.msra.mxu1 %v10610_v55 }
0x1f99   :  { %6622 = vmatprep.subr.bf16.mxu1 %v10317_v34  ;;  %6641 = vmatpush3.bf16.msra.mxu0 %v7441_v16 }
0x1f9a   :  { %6642 = vmatprep.subr.bf16.mxu0 %v10317_v34 }
0x1f9c   :  { %6623 = vmatpush3.bf16.msra.mxu1 %v10611_v18 }
0x1f9d   :  { %6624 = vmatprep.subr.bf16.mxu1 %v10317_v34  ;;  %6643 = vmatpush3.bf16.msra.mxu0 %v7442_v7 }
0x1f9e   :  { %6644 = vmatprep.subr.bf16.mxu0 %v10317_v34 }
0x1fa0   :  { %6625 = vmatpush3.bf16.msra.mxu1 %v10612_v37 }
0x1fa1   :  { %6626 = vmatprep.subr.bf16.mxu1 %v10317_v34  ;;  %6645 = vmatpush3.bf16.msra.mxu0 %v7443_v31  ;;  %v10624_v31 = vld [vmem:[#allocation102_spill] sm:$0xff] }
0x1fa2   :  { %6646 = vmatprep.subr.bf16.mxu0 %v10317_v34 }
0x1fa4   :  { %6627 = vmatpush3.bf16.msra.mxu1 %v10613_v14 }
0x1fa5   :  { %6628 = vmatprep.subr.bf16.mxu1 %v10317_v34  ;;  %6647 = vmatpush3.bf16.msra.mxu0 %v7444_v46 }
0x1fa6   :  { %6648 = vmatprep.subr.bf16.mxu0 %v10317_v34 }
0x1fa8   :  { %6629 = vmatpush3.bf16.msra.mxu1 %v10614_v61 }
0x1fa9   :  { %6630 = vmatprep.subr.bf16.mxu1 %v10317_v34  ;;  %6649 = vmatpush3.bf16.msra.mxu0 %v7445_v9  ;;  %v10625_v9 = vld [vmem:[#allocation103_spill] sm:$0xff] }
0x1faa   :  { %6650 = vmatprep.subr.bf16.mxu0 %v10317_v34 }
0x1fac   :  { %6631 = vmatpush3.bf16.msra.mxu1 %v10615_v54  ;;  %v10626_v54 = vld [vmem:[#allocation104_spill] sm:$0xff] }
0x1fad   :  { %6632 = vmatprep.subr.bf16.mxu1 %v10317_v34  ;;  %6651 = vmatpush3.bf16.msra.mxu0 %v7446_v49  ;;  %v10627_v49 = vld [vmem:[#allocation105_spill] sm:$0xff] }
0x1fae   :  { %6652 = vmatprep.subr.bf16.mxu0 %v10317_v34 }
0x1fb0   :  { %6633 = vmatpush3.bf16.msra.mxu1 %v10616_v4  ;;  %v10628_v4 = vld [vmem:[#allocation106_spill] sm:$0xff] }
0x1fb1   :  { %6658 = vmatprep.subr.bf16.mxu1 %v10317_v34  ;;  %6653 = vmatpush3.bf16.msra.mxu0 %v7447_v28  ;;  %v10629_v28 = vld [vmem:[#allocation107_spill] sm:$0xff] }
0x1fb2   :  { %6678 = vmatprep.subr.bf16.mxu0 %v10617_v44  ;;  %v10630_v44 = vld [vmem:[#allocation108_spill] sm:$0xff] }
0x2033   :  { %v4557_v47 = vpop.f32.mrf.mxu0  ;;  %v5904_v58 = vpop.f32.mrf.mxu1 }
0x2034   :  { %v4558_v40 = vadd.f32 %v4557_v47, %v10618_v3  ;;  %v10631_v47 = vld [vmem:[#allocation109_spill] sm:$0xff] }
0x2035   :  { %v4559_v27 = vpop.f32.mrf.mxu0  ;;  %v5905_v48 = vpop.f32.mrf.mxu1 }
0x2036   :  { %v5906_v36 = vadd.f32 %v5905_v48, %v5904_v58  ;;  %v4560_v2 = vadd.f32 %v4559_v27, %v10621_v1  ;;  %v10632_v58 = vld [vmem:[#allocation110_spill] sm:$0xff]  ;;  %v7448_v27 = vld [vmem:[#allocation17 + $0xac] ss:$12 sps:$4 sm:$0xff]   ;;  %v7449_v48 = vld [vmem:[#allocation17 + $0xa8] ss:$12 sps:$4 sm:$0xff]  }
0x2037   :  { %v4561_v21 = vpop.f32.mrf.mxu0  ;;  %v5907_v24 = vpop.f32.mrf.mxu1 }
0x2038   :  { %v4599_v59 = vadd.f32 %v5906_v36, %v10623_v13  ;;  %v7450_v36 = vld [vmem:[#allocation17 + $0x94] ss:$12 sps:$4 sm:$0xff]   ;;  %v7451_v21 = vld [vmem:[#allocation17 + $0x90] ss:$12 sps:$4 sm:$0xff]  }
0x2039   :  { %v4562_v39 = vpop.f32.mrf.mxu0  ;;  %v5908_v5 = vpop.f32.mrf.mxu1  ;;  %v7452_v24 = vld [vmem:[#allocation17 + $0x7c] ss:$12 sps:$4 sm:$0xff]  }
0x203a   :  { %v7453_v39 = vld [vmem:[#allocation17 + $0x78] ss:$12 sps:$4 sm:$0xff]  }
0x203b   :  { %v7454_v5 = vld [vmem:[#allocation17 + $0x64] ss:$12 sps:$4 sm:$0xff]  }
0x2053   :  { %v4638_v23 = vpop.f32.mrf.mxu1  ;;  %v4679_v45 = vpop.f32.mrf.mxu0 }
0x2054   :  { %v4639_v15 = vadd.f32 %v4638_v23, %v10619_v38  ;;  %v4680_v43 = vadd.f32 %v4679_v45, %v10622_v51  ;;  %v7455_v23 = vld [vmem:[#allocation17 + $0x60] ss:$12 sps:$4 sm:$0xff]  }
0x2055   :  { %v4640_v57 = vpop.f32.mrf.mxu1  ;;  %v6616_v33 = vpop.f32.mrf.mxu0  ;;  %v7456_v45 = vld [vmem:[#allocation17 + $0x4c] ss:$12 sps:$4 sm:$0xff]  }
0x2056   :  { %v4685_v60 = vadd.f32 %v4639_v15, %v4558_v40  ;;  %v4641_v19 = vadd.f32 %v4640_v57, %v10620_v63  ;;  %v7457_v40 = vld [vmem:[#allocation17 + $0x48] ss:$12 sps:$4 sm:$0xff]   ;;  %v7459_v57 = vld [vmem:[#allocation17 + $0x30] ss:$12 sps:$4 sm:$0xff]  }
0x2057   :  { %v4642_v20 = vpop.f32.mrf.mxu1  ;;  %v4682_v10 = vpop.f32.mrf.mxu0  ;;  %v7458_v15 = vld [vmem:[#allocation17 + $0x34] ss:$12 sps:$4 sm:$0xff]   ;;  %v7460_v33 = vld [vmem:[#allocation17 + $0x1c] ss:$12 sps:$4 sm:$0xff]  }
0x2058   :  { %v5537_v53 = vmul.f32 -1.442695, %v4685_v60  ;;  %v4692_v0 = vadd.f32 %v4641_v19, %v4560_v2  ;;  %v7461_v60 = vld [vmem:[#allocation17 + $0x18] ss:$12 sps:$4 sm:$0xff]   ;;  %v7463_v10 = vld [vmem:[#allocation17] ss:$12 sps:$4 sm:$0xff]  }
0x2059   :  { %v4643_v25 = vpop.f32.mrf.mxu1  ;;  %v6617_v56 = vpop.f32.mrf.mxu0  ;;  %v7462_v20 = vld [vmem:[#allocation17 + $0x4] ss:$12 sps:$4 sm:$0xff]   ;;  %v7465_v19 = vld [vmem:[#allocation17 + $0x168] ss:$12 sps:$4 sm:$0xff]  }
0x205a   :  { %7233 = vpow2.f32 %v5537_v53  ;;  %v5538_v11 = vmul.f32 -1.442695, %v4692_v0  ;;  %v7464_v53 = vld [vmem:[#allocation17 + $0x16c] ss:$12 sps:$4 sm:$0xff]   ;;  %v7466_v25 = vld [vmem:[#allocation17 + $0x154] ss:$12 sps:$4 sm:$0xff]  }
0x205b   :  { %v7467_v56 = vld [vmem:[#allocation17 + $0x150] ss:$12 sps:$4 sm:$0xff]   ;;  %v7469_v0 = vld [vmem:[#allocation17 + $0x138] ss:$12 sps:$4 sm:$0xff]  }
0x205c   :  { %7235 = vpow2.f32 %v5538_v11  ;;  %v7468_v2 = vld [vmem:[#allocation17 + $0x13c] ss:$12 sps:$4 sm:$0xff]   ;;  %v7470_v11 = vld [vmem:[#allocation17 + $0x124] ss:$12 sps:$4 sm:$0xff]  }
0x2067   :  { %v7234_v50 = vpop.eup %7233 }
0x2068   :  { %v4689_v52 = vadd.f32 1.0, %v7234_v50  ;;  %v7471_v50 = vld [vmem:[#allocation17 + $0x120] ss:$12 sps:$4 sm:$0xff]  }
0x2069   :  { %v7236_v32 = vpop.eup %7235 }
0x206a   :  { %7237 = vrcp.f32 %v4689_v52  ;;  %v4696_v6 = vadd.f32 1.0, %v7236_v32  ;;  %v7472_v52 = vld [vmem:[#allocation17 + $0x10c] ss:$12 sps:$4 sm:$0xff]   ;;  %v7473_v32 = vld [vmem:[#allocation17 + $0x108] ss:$12 sps:$4 sm:$0xff]  }
0x206c   :  { %7239 = vrcp.f32 %v4696_v6  ;;  %v7474_v6 = vld [vmem:[#allocation17 + $0xf4] ss:$12 sps:$4 sm:$0xff]  }
0x2077   :  { %v7238_v12 = vpop.eup %7237 }
0x2078   :  { %v4699_v42 = vmul.f32 %v7238_v12, %v4680_v43  ;;  %v7475_v43 = vld [vmem:[#allocation17 + $0xf0] ss:$12 sps:$4 sm:$0xff]  }
0x2079   :  { %v7240_v16 = vpop.eup %7239  ;;  %v7476_v12 = vld [vmem:[#allocation17 + $0xdc] ss:$12 sps:$4 sm:$0xff]  }
0x207a   :  { %v4700_v55 = vadd.f32 %v4699_v42, %v4599_v59  ;;  %v4702_v18 = vsub.f32 1.0, %v7240_v16  ;;  %v4704_v14 = vmul.f32 %v7240_v16, %v10624_v31  ;;  %v7477_v59 = vld [vmem:[#allocation17 + $0xd8] ss:$12 sps:$4 sm:$0xff]  }
0x207b   :  { %v7478_v42 = vld [vmem:[#allocation17 + $0xc4] ss:$12 sps:$4 sm:$0xff]  }
0x207c   :  { %7241 = vtanh.f32 %v4700_v55  ;;  %v7479_v55 = vld [vmem:[#allocation17 + $0xc0] ss:$12 sps:$4 sm:$0xff]  }
0x2089   :  { %v7242_v7 = vpop.eup %7241 }
0x208a   :  { %v4703_v37 = vmul.f32 %v7242_v7, %v4702_v18  ;;  %v10633_v18 = vld [vmem:[#allocation59_spill] sm:$0xff] }
0x208c   :  { %v9960_v46 = vadd.f32 %v4704_v14, %v4703_v37 }
0x208e   :  { %v9964_v61 = vpack.c.bf16 %v9960_v46, %v9960_v46 }
0x2090   :  { %6635 = vmatmul.mubr.bf16.vlgmr.msra.gmra.mxu1 %v9964_v61 }
0x2091   :  { %6659 = vmatpush3.bf16.msra.mxu1 %v10625_v9  ;;  %6674 = vmatprep.mubr.msk.bf16.mxu1 %vm7824_vm1, %v10317_v34 }
0x2092   :  { %6660 = vmatprep.subr.bf16.mxu1 %v10317_v34 }
0x2095   :  { %6661 = vmatpush3.bf16.msra.mxu1 %v10626_v54 }
0x2096   :  { %6662 = vmatprep.subr.bf16.mxu1 %v10317_v34 }
0x2099   :  { %6663 = vmatpush3.bf16.msra.mxu1 %v10627_v49 }
0x209a   :  { %6664 = vmatprep.subr.bf16.mxu1 %v10317_v34 }
0x209d   :  { %6665 = vmatpush3.bf16.msra.mxu1 %v10628_v4 }
0x209e   :  { %6666 = vmatprep.subr.bf16.mxu1 %v10317_v34 }
0x20a1   :  { %6667 = vmatpush3.bf16.msra.mxu1 %v10629_v28 }
0x20a2   :  { %6668 = vmatprep.subr.bf16.mxu1 %v10317_v34 }
0x20a5   :  { %6669 = vmatpush3.bf16.msra.mxu1 %v10630_v44 }
0x20a6   :  { %6670 = vmatprep.subr.bf16.mxu1 %v10317_v34 }
0x20a9   :  { %6671 = vmatpush3.bf16.msra.mxu1 %v10631_v47 }
0x20aa   :  { %6672 = vmatprep.subr.bf16.mxu1 %v10317_v34 }
0x20ad   :  { %6673 = vmatpush3.bf16.msra.mxu1 %v10632_v58 }
0x20ae   :  { %5065 = vmatprep.subr.bf16.mxu1 %v7448_v27 }
0x20b0   :  { %6675 = vmatmul.mubr.bf16.vlgmr.msra.gmra.mxu1 %v9964_v61 }
0x20b1   :  { %5066 = vmatpush1.bf16.msra.mxu1 %v7449_v48 }
0x20b2   :  { %5067 = vmatprep.subr.bf16.mxu1 %v7450_v36 }
0x20b5   :  { %5068 = vmatpush1.bf16.msra.mxu1 %v7451_v21 }
0x20b6   :  { %5069 = vmatprep.subr.bf16.mxu1 %v7452_v24 }
0x20b9   :  { %5070 = vmatpush1.bf16.msra.mxu1 %v7453_v39 }
0x20ba   :  { %5071 = vmatprep.subr.bf16.mxu1 %v7454_v5  ;;  %v10634_v5 = vld [vmem:[#allocation36_spill] sm:$0xff] }
0x20bd   :  { %5072 = vmatpush1.bf16.msra.mxu1 %v7455_v23 }
0x20be   :  { %5073 = vmatprep.subr.bf16.mxu1 %v7456_v45 }
0x20c1   :  { %5074 = vmatpush1.bf16.msra.mxu1 %v7457_v40 }
0x20c2   :  { %5075 = vmatprep.subr.bf16.mxu1 %v7458_v15 }
0x20c5   :  { %5076 = vmatpush1.bf16.msra.mxu1 %v7459_v57 }
0x20c6   :  { %5077 = vmatprep.subr.bf16.mxu1 %v7460_v33 }
0x20c9   :  { %5078 = vmatpush1.bf16.msra.mxu1 %v7461_v60 }
0x20ca   :  { %5079 = vmatprep.subr.bf16.mxu1 %v7462_v20  ;;  %v10635_v20 = vld [vmem:[#allocation34_spill] sm:$0xff] }
0x20cd   :  { %5080 = vmatpush1.bf16.msra.mxu1 %v7463_v10 }
0x20ce   :  { %5081 = vmatprep.subr.bf16.mxu1 %v7464_v53  ;;  %v10636_v53 = vld [vmem:[#allocation39_spill] sm:$0xff] }
0x20d1   :  { %5082 = vmatpush2.bf16.msra.mxu1 %v7465_v19 }
0x20d2   :  { %5083 = vmatprep.subr.bf16.mxu1 %v7466_v25 }
0x20d5   :  { %5084 = vmatpush2.bf16.msra.mxu1 %v7467_v56 }
0x20d6   :  { %5085 = vmatprep.subr.bf16.mxu1 %v7468_v2 }
0x20d9   :  { %5086 = vmatpush2.bf16.msra.mxu1 %v7469_v0 }
0x20da   :  { %5087 = vmatprep.subr.bf16.mxu1 %v7470_v11 }
0x20dd   :  { %5088 = vmatpush2.bf16.msra.mxu1 %v7471_v50 }
0x20de   :  { %5089 = vmatprep.subr.bf16.mxu1 %v7472_v52 }
0x20e1   :  { %5090 = vmatpush2.bf16.msra.mxu1 %v7473_v32 }
0x20e2   :  { %5091 = vmatprep.subr.bf16.mxu1 %v7474_v6  ;;  %v10637_v6 = vmov 1.0|1.0  }
0x20e5   :  { %5092 = vmatpush2.bf16.msra.mxu1 %v7475_v43  ;;  %v7480_v43 = vld [vmem:[%s10095_s11 + $0x38] sm:$0xff]  }
0x20e6   :  { %5093 = vmatprep.subr.bf16.mxu1 %v7476_v12  ;;  %v10638_v12 = vld [vmem:[#allocation60_spill] sm:$0xff] }
0x20e9   :  { %5094 = vmatpush2.bf16.msra.mxu1 %v7477_v59  ;;  %v10639_v59 = vld [vmem:[#allocation61_spill] sm:$0xff] }
0x20ea   :  { %5095 = vmatprep.subr.bf16.mxu1 %v7478_v42  ;;  %v10640_v42 = vld [vmem:[#allocation37_spill] sm:$0xff] }
0x20ed   :  { %5096 = vmatpush2.bf16.msra.mxu1 %v7479_v55 }
0x20ee   :  { %6702 = vmatprep.subr.bf16.mxu1 %v10317_v34 }
0x2150   :  { %v4741_v16 = vpop.f32.mrf.mxu1 }
0x2151   :  { %v4742_v7 = vadd.f32 %v10633_v18, %v4741_v16  ;;  %v10641_v16 = vld [vmem:[#allocation38_spill] sm:$0xff] }
0x2152   :  { %v6636_v37 = vpop.f32.mrf.mxu1 }
0x2153   :  { %4747 = vmax.xlane.f32.xlu0 %v4742_v7  ;;  %v10643_v37 = vld [vmem:[#allocation42_spill] sm:$0xff] }
0x2154   :  { %v4744_v31 = vpop.f32.mrf.mxu1 }
0x2156   :  { %v6637_v14 = vpop.f32.mrf.mxu1 }
0x2157   :  { %v10644_v14 = vld [vmem:[#allocation35_spill] sm:$0xff] }
0x2170   :  { %v9987_v9 = vpop.f32.mrf.mxu1 }
0x2171   :  { %v4860_v10 = vadd.f32 %v9987_v9, %v10635_v20  ;;  %v4861_v19 = vadd.f32 %v9987_v9, %v10636_v53  ;;  %v4862_v55 = vadd.f32 %v9987_v9, %v10640_v42  ;;  %v4863_v18 = vadd.f32 %v9987_v9, %v10641_v16  ;;  %v7485_v20 = vld [vmem:[#allocation17 + $0x140] ss:$12 sps:$4 sm:$0xff]   ;;  %v7487_v53 = vld [vmem:[#allocation17 + $0x128] ss:$12 sps:$4 sm:$0xff]  }
0x2172   :  { %v6676_v54 = vpop.f32.mrf.mxu1  ;;  %v4864_v31 = vadd.f32 %v9987_v9, %v10643_v37 }
0x2173   :  { %v4865_v54 = vadd.f32 %v9987_v9, %v10644_v14 }
0x2174   :  { %v4857_v49 = vpop.f32.mrf.mxu1 }
0x2175   :  { %v10645_v49 = vld [vmem:[#allocation63_spill] sm:$0xff] }
0x2176   :  { %v6677_v4 = vpop.f32.mrf.mxu1 }
0x2177   :  { %v10646_v4 = vld [vmem:[#allocation43_spill] sm:$0xff] }
0x21dc   :  { %v4748_v28 = vpop.xlane.xlu0 %4747 }
0x21dd   :  { %v4749_v44 = vsub.f32 %v4742_v7, %v4748_v28 }
0x21df   :  { %v4750_v47 = vmul.f32 1.442695, %v4749_v44  ;;  %v10647_v44 = vld [vmem:[#allocation44_spill] sm:$0xff] }
0x21e1   :  { %7243 = vpow2.f32 %v4750_v47  ;;  %v4867_v47 = vadd.f32 %v9987_v9, %v10647_v44 }
0x21ee   :  { %v7244_v58 = vpop.eup %7243 }
0x21ef   :  { %4752 = vadd.xlane.f32.xlu1 %v7244_v58  ;;  %v10648_v58 = vld [vmem:[#allocation45_spill] sm:$0xff] }
0x2278   :  { %v4753_v27 = vpop.xlane.xlu1 %4752 }
0x2279   :  { %7245 = vlog2.f32 %v4753_v27  ;;  %v10649_v27 = vld [vmem:[#allocation46_spill] sm:$0xff] }
0x227a   :  { %7247 = vtanh.f32 %v4860_v10  ;;  %v7486_v10 = vld [vmem:[#allocation17 + $0x80] ss:$12 sps:$4 sm:$0xff]  }
0x227b   :  { %7249 = vtanh.f32 %v4861_v19  ;;  %v7488_v19 = vld [vmem:[#allocation17 + $0x68] ss:$12 sps:$4 sm:$0xff]  }
0x227c   :  { %7251 = vtanh.f32 %v4862_v55 }
0x227d   :  { %7253 = vtanh.f32 %v4863_v18 }
0x227e   :  { %7255 = vtanh.f32 %v4864_v31 }
0x227f   :  { %7257 = vtanh.f32 %v4865_v54 }
0x2286   :  { %v7246_v48 = vpop.eup %7245 }
0x2287   :  { %v4755_v36 = vmul.f32 0.6931472, %v7246_v48  ;;  %v7248_v11 = vpop.eup %7247 }
0x2288   :  { %v7250_v50 = vpop.eup %7249 }
0x2289   :  { %v4756_v21 = vadd.f32 %v4755_v36, %v4748_v28  ;;  %v4876_v32 = vpack.c.bf16 %v7250_v50, %v7248_v11  ;;  %v4866_v28 = vadd.f32 %v9987_v9, %v10646_v4  ;;  %v7252_v48 = vpop.eup %7251  ;;  %v7481_v9 = vld [vmem:[#allocation17 + $0x170] ss:$12 sps:$4 sm:$0xff]   ;;  %v7493_v11 = vld [vmem:[#allocation17 + $0xe0] ss:$12 sps:$4 sm:$0xff]  }
0x228a   :  { %v7254_v36 = vpop.eup %7253  ;;  %v7494_v50 = vld [vmem:[#allocation17 + $0x20] ss:$12 sps:$4 sm:$0xff]  }
0x228b   :  { %v4757_v24 = vsub.f32 %v4742_v7, %v4756_v21  ;;  %v10642_v7 = vld [vmem:[#allocation62_spill] sm:$0xff]  ;;  %7259 = vtanh.f32 %v4866_v28  ;;  %v10650_v21 = vld [vmem:[#allocation47_spill] sm:$0xff] }
0x228c   :  { %7261 = vtanh.f32 %v4867_v47 }
0x228d   :  { %4758 = vmax.xlane.f32.xlu0 %v4757_v24  ;;  %5303 = vst [vmem:[#allocation22 + $0x18] sm:$0xff] %v4757_v24 }
0x2316   :  { %v4759_v39 = vpop.xlane.xlu0 %4758 }
0x2317   :  { %vm4760_vm2 = vcmp.eq.f32.partialorder %v4757_v24, %v4759_v39  ;;  %v7256_v24 = vpop.eup %7255 }
0x2318   :  { %v4761_v23 = vsel %vm4760_vm2, %v10634_v5, 128  ;;  %v7258_v39 = vpop.eup %7257 }
0x2319   :  { %v4763_v45 = vshra.s32 %v4761_v23, 16  ;;  %v4762_v15 = vand.u32 65535, %v4761_v23  ;;  %v4878_v23 = vpack.c.bf16 %v7258_v39, %v7256_v24 }
0x231b   :  { %v4765_v40 = vcvt.s32.f32 %v4763_v45  ;;  %v4764_v33 = vcvt.s32.f32 %v4762_v15  ;;  %v7482_v45 = vld [vmem:[#allocation17 + $0xb0] ss:$12 sps:$4 sm:$0xff]   ;;  %v7483_v15 = vld [vmem:[#allocation17 + $0x158] ss:$12 sps:$4 sm:$0xff]  }
0x231d   :  { %4766 = vmin.xlane.f32.xlu0 %v4765_v40 }
0x23a6   :  { %v4767_v57 = vpop.xlane.xlu0 %4766 }
0x23a7   :  { %vm4768_vm3 = vcmp.eq.f32.partialorder %v4765_v40, %v4767_v57  ;;  %v4773_v25 = vcvt.f32.s32 %v4767_v57  ;;  %v7260_v40 = vpop.eup %7259 }
0x23a8   :  { %v4769_v60 = vsel %vm4768_vm3, %v4764_v33, inf  ;;  %v7262_v57 = vpop.eup %7261  ;;  %v7484_v33 = vld [vmem:[#allocation17 + $0x98] ss:$12 sps:$4 sm:$0xff]  }
0x23a9   :  { %4770 = vmin.xlane.f32.xlu1 %v4769_v60  ;;  %v4774_v2 = vshll.u32 %v4773_v25, 16  ;;  %v4879_v60 = vpack.c.bf16 %v7262_v57, %v7260_v40  ;;  %v7489_v25 = vld [vmem:[#allocation17 + $0x110] ss:$12 sps:$4 sm:$0xff]  }
0x2432   :  { %v4771_v56 = vpop.xlane.xlu1 %4770 }
0x2433   :  { %v4772_v0 = vcvt.f32.s32 %v4771_v56  ;;  %v7490_v56 = vld [vmem:[#allocation17 + $0x50] ss:$12 sps:$4 sm:$0xff]  }
0x2435   :  { %v4775_v52 = vadd.s32 %v4774_v2, %v4772_v0  ;;  %v7491_v2 = vld [vmem:[#allocation17 + $0xf8] ss:$12 sps:$4 sm:$0xff]  }
0x2436   :  { %v7492_v0 = vld [vmem:[#allocation17 + $0x38] ss:$12 sps:$4 sm:$0xff]  }
0x2437   :  { %vm4776_vm5 = vcmp.eq.s32.totalorder %v10634_v5, %v4775_v52  ;;  %v4877_v5 = vpack.c.bf16 %v7254_v36, %v7252_v48  ;;  %v7495_v52 = vld [vmem:[#allocation17 + $0xc8] ss:$12 sps:$4 sm:$0xff]  }
0x2438   :  { %vm5540_vm6 = vmpackc.low %vm4776_vm5, %vm4776_vm5 }
0x2439   :  { %6655 = vmatmul.mubr.msk.bf16.vlgmr.msra.gmra.mxu0 %vm5540_vm6, %v10637_v6  ;;  %v7497_v6 = vld [vmem:[#allocation19 + $0xac] ss:$12 sps:$4 sm:$0xff]  }
0x243a   :  { %6679 = vmatpush3.bf16.msra.mxu0 %v7480_v43  ;;  %6694 = vmatprep.mubr.bf16.mxu0 %v4876_v32  ;;  %v7496_v32 = vld [vmem:[#allocation17 + $0x8] ss:$12 sps:$4 sm:$0xff]  }
0x243b   :  { %6680 = vmatprep.subr.bf16.mxu0 %v10638_v12 }
0x243e   :  { %6681 = vmatpush3.bf16.msra.mxu0 %v10638_v12 }
0x243f   :  { %6682 = vmatprep.subr.bf16.mxu0 %v10639_v59 }
0x2442   :  { %6683 = vmatpush3.bf16.msra.mxu0 %v10639_v59 }
0x2443   :  { %6684 = vmatprep.subr.bf16.mxu0 %v10642_v7 }
0x2446   :  { %6685 = vmatpush3.bf16.msra.mxu0 %v10642_v7 }
0x2447   :  { %6686 = vmatprep.subr.bf16.mxu0 %v10645_v49 }
0x244a   :  { %6687 = vmatpush3.bf16.msra.mxu0 %v10645_v49 }
0x244b   :  { %6688 = vmatprep.subr.bf16.mxu0 %v10648_v58 }
0x244e   :  { %6689 = vmatpush3.bf16.msra.mxu0 %v10648_v58 }
0x244f   :  { %6690 = vmatprep.subr.bf16.mxu0 %v10649_v27 }
0x2452   :  { %6691 = vmatpush3.bf16.msra.mxu0 %v10649_v27 }
0x2453   :  { %6692 = vmatprep.subr.bf16.mxu0 %v10650_v21 }
0x2456   :  { %6693 = vmatpush3.bf16.msra.mxu0 %v10650_v21 }
0x2457   :  { %5958 = vmatprep.subr.bf16.mxu0 %v7481_v9 }
0x2459   :  { %6695 = vmatmul.mubr.bf16.vlgmr.msra.gmra.mxu0 %v4877_v5 }
0x245a   :  { %6698 = vmatprep.mubr.bf16.mxu0 %v4878_v23  ;;  %5959 = vmatpush3.bf16.msra.mxu0 %v7482_v45 }
0x245b   :  { %5960 = vmatprep.subr.bf16.mxu0 %v7483_v15 }
0x245e   :  { %5961 = vmatpush3.bf16.msra.mxu0 %v7484_v33 }
0x245f   :  { %5962 = vmatprep.subr.bf16.mxu0 %v7485_v20 }
0x2461   :  { %6699 = vmatmul.mubr.bf16.gmra.mxu0 %v4879_v60 }
0x2462   :  { %5963 = vmatpush3.bf16.msra.mxu0 %v7486_v10 }
0x2463   :  { %5964 = vmatprep.subr.bf16.mxu0 %v7487_v53 }
0x2466   :  { %5965 = vmatpush3.bf16.msra.mxu0 %v7488_v19 }
0x2467   :  { %5966 = vmatprep.subr.bf16.mxu0 %v7489_v25 }
0x246a   :  { %5967 = vmatpush3.bf16.msra.mxu0 %v7490_v56 }
0x246b   :  { %5968 = vmatprep.subr.bf16.mxu0 %v7491_v2 }
0x246e   :  { %5969 = vmatpush3.bf16.msra.mxu0 %v7492_v0 }
0x246f   :  { %5970 = vmatprep.subr.bf16.mxu0 %v7493_v11 }
0x2472   :  { %5971 = vmatpush3.bf16.msra.mxu0 %v7494_v50 }
0x2473   :  { %5972 = vmatprep.subr.bf16.mxu0 %v7495_v52 }
0x2476   :  { %5973 = vmatpush3.bf16.msra.mxu0 %v7496_v32 }
0x2477   :  { %5146 = vmatprep.subr.bf16.mxu0 %v7497_v6 }
0x24f9   :  { %v4814_v43 = vpop.f32.mrf.mxu0 }
0x24fa   :  { %v5064_v12 = vpack.c.bf16 %v4814_v43, %v4814_v43 }
0x24fb   :  { %v6656_v59 = vpop.f32.mrf.mxu0 }
0x24fc   :  { %5097 = vmatprep.mubr.bf16.mxu1 %v5064_v12  ;;  %5138 = vmatprep.mubr.bf16.mxu0 %v5064_v12 }
0x24fd   :  { %v4817_v42 = vpop.f32.mrf.mxu0 }
0x24ff   :  { %v6657_v55 = vpop.f32.mrf.mxu0 }
0x2519   :  { %v6696_v16 = vpop.f32.mrf.mxu0 }
0x251a   :  { %v4947_v27 = vsel %vm2306_vm4, %v6696_v16, -inf }
0x251b   :  { %v4914_v18 = vpop.f32.mrf.mxu0 }
0x251c   :  { %v4945_v48 = vsel %vm2306_vm4, %v4914_v18, -inf }
0x251d   :  { %v6697_v7 = vpop.f32.mrf.mxu0 }
0x251e   :  { %v4948_v49 = vsel %vm2306_vm4, %v6697_v7, -inf }
0x251f   :  { %v4917_v37 = vpop.f32.mrf.mxu0 }
0x2520   :  { %v4946_v36 = vsel %vm2306_vm4, %v4917_v37, -inf }
0x2521   :  { %v6700_v31 = vpop.f32.mrf.mxu0 }
0x2522   :  { %v4953_v4 = vsel %vm2306_vm4, %v6700_v31, -inf }
0x2523   :  { %v4930_v14 = vpop.f32.mrf.mxu0  ;;  %v4954_v24 = vmax.f32 %v4947_v27, %v4953_v4 }
0x2524   :  { %v4949_v28 = vsel %vm2306_vm4, %v4930_v14, -inf }
0x2525   :  { %v6701_v54 = vpop.f32.mrf.mxu0  ;;  %v4950_v39 = vmax.f32 %v4945_v48, %v4949_v28 }
0x2526   :  { %v4955_v44 = vsel %vm2306_vm4, %v6701_v54, -inf }
0x2527   :  { %v4956_v47 = vmax.f32 %v4948_v49, %v4955_v44  ;;  %v4933_v58 = vpop.f32.mrf.mxu0 }
0x2528   :  { %v4951_v21 = vsel %vm2306_vm4, %v4933_v58, -inf }
0x2529   :  { %v4952_v5 = vmax.f32 %v4946_v36, %v4951_v21  ;;  %v4958_v9 = vmax.f32 %v4954_v24, %v4956_v47 }
0x252b   :  { %v4957_v23 = vmax.f32 %v4950_v39, %v4952_v5 }
0x252d   :  { %v4959_v45 = vmax.f32 %v4957_v23, %v4958_v9 }
0x252f   :  { %v4960_v40 = vsub.f32 %v4914_v18, %v4959_v45  ;;  %v4961_v15 = vsub.f32 %v4917_v37, %v4959_v45  ;;  %v4962_v57 = vsub.f32 %v6696_v16, %v4959_v45  ;;  %v4963_v33 = vsub.f32 %v6697_v7, %v4959_v45 }
0x2530   :  { %v4964_v60 = vsub.f32 %v4930_v14, %v4959_v45  ;;  %v4965_v19 = vsub.f32 %v4933_v58, %v4959_v45  ;;  %v4966_v56 = vsub.f32 %v6700_v31, %v4959_v45  ;;  %v4967_v0 = vsub.f32 %v6701_v54, %v4959_v45 }
0x2531   :  { %v4968_v20 = vmul.f32 1.442695, %v4960_v40  ;;  %v4970_v10 = vmul.f32 1.442695, %v4961_v15  ;;  %v4972_v53 = vmul.f32 1.442695, %v4962_v57 }
0x2532   :  { %v4974_v25 = vmul.f32 1.442695, %v4963_v33  ;;  %v4976_v2 = vmul.f32 1.442695, %v4964_v60  ;;  %v4978_v11 = vmul.f32 1.442695, %v4965_v19 }
0x2533   :  { %7263 = vpow2.f32 %v4968_v20  ;;  %v4980_v50 = vmul.f32 1.442695, %v4966_v56  ;;  %v4982_v52 = vmul.f32 1.442695, %v4967_v0 }
0x2534   :  { %7265 = vpow2.f32 %v4970_v10 }
0x2535   :  { %7267 = vpow2.f32 %v4972_v53 }
0x2536   :  { %7269 = vpow2.f32 %v4974_v25 }
0x2537   :  { %7271 = vpow2.f32 %v4976_v2 }
0x2538   :  { %7273 = vpow2.f32 %v4978_v11 }
0x2539   :  { %7275 = vpow2.f32 %v4980_v50 }
0x253a   :  { %7277 = vpow2.f32 %v4982_v52 }
0x2540   :  { %v7264_v32 = vpop.eup %7263 }
0x2541   :  { %v7266_v6 = vpop.eup %7265  ;;  %v4984_v43 = vsel %vm2306_vm4, %v7264_v32, 0.0 }
0x2542   :  { %v7268_v12 = vpop.eup %7267  ;;  %v4985_v59 = vsel %vm2306_vm4, %v7266_v6, 0.0 }
0x2543   :  { %v7270_v42 = vpop.eup %7269  ;;  %v4986_v55 = vadd.f32 %v4985_v59, %v4984_v43  ;;  %v4987_v16 = vsel %vm2306_vm4, %v7268_v12, 0.0 }
0x2544   :  { %v7272_v18 = vpop.eup %7271  ;;  %v4989_v37 = vsel %vm2306_vm4, %v7270_v42, 0.0 }
0x2545   :  { %v4988_v7 = vadd.f32 %v4987_v16, %v4986_v55  ;;  %v7274_v31 = vpop.eup %7273  ;;  %v4991_v54 = vsel %vm2306_vm4, %v7272_v18, 0.0  ;;  %v7499_v16 = vld [vmem:[#allocation19 + $0xb0] ss:$12 sps:$4 sm:$0xff]  }
0x2546   :  { %v7276_v49 = vpop.eup %7275  ;;  %v4993_v28 = vsel %vm2306_vm4, %v7274_v31, 0.0 }
0x2547   :  { %v4990_v14 = vadd.f32 %v4989_v37, %v4988_v7  ;;  %v7278_v44 = vpop.eup %7277  ;;  %v4995_v58 = vsel %vm2306_vm4, %v7276_v49, 0.0  ;;  %v7505_v7 = vld [vmem:[#allocation19 + $0x80] ss:$12 sps:$4 sm:$0xff]   ;;  %v7506_v37 = vld [vmem:[#allocation19 + $0x64] ss:$12 sps:$4 sm:$0xff]  }
0x2548   :  { %v4997_v48 = vsel %vm2306_vm4, %v7278_v44, 0.0 }
0x2549   :  { %v4992_v4 = vadd.f32 %v4991_v54, %v4990_v14  ;;  %v7509_v14 = vld [vmem:[#allocation19 + $0x4c] ss:$12 sps:$4 sm:$0xff]   ;;  %v7510_v54 = vld [vmem:[#allocation19 + $0x48] ss:$12 sps:$4 sm:$0xff]  }
0x254b   :  { %v4994_v47 = vadd.f32 %v4993_v28, %v4992_v4  ;;  %v7512_v4 = vld [vmem:[#allocation19 + $0x34] ss:$12 sps:$4 sm:$0xff]   ;;  %v7513_v28 = vld [vmem:[#allocation19 + $0x30] ss:$12 sps:$4 sm:$0xff]  }
0x254d   :  { %v4996_v27 = vadd.f32 %v4995_v58, %v4994_v47  ;;  %v7515_v47 = vld [vmem:[#allocation19 + $0x1c] ss:$12 sps:$4 sm:$0xff]   ;;  %v7516_v58 = vld [vmem:[#allocation19 + $0x18] ss:$12 sps:$4 sm:$0xff]  }
0x254f   :  { %v4998_v36 = vadd.f32 %v4997_v48, %v4996_v27  ;;  %v7517_v27 = vld [vmem:[#allocation19 + $0x20] ss:$12 sps:$4 sm:$0xff]   ;;  %v7518_v48 = vld [vmem:[#allocation19 + $0x4] ss:$12 sps:$4 sm:$0xff]  }
0x2551   :  { %7279 = vrcp.f32 %v4998_v36  ;;  %v7519_v36 = vld [vmem:[#allocation19] ss:$12 sps:$4 sm:$0xff]  }
0x255e   :  { %v7280_v21 = vpop.eup %7279 }
0x255f   :  { %v5001_v24 = vmul.f32 %v7280_v21, %v7266_v6  ;;  %v5000_v39 = vmul.f32 %v7280_v21, %v7264_v32  ;;  %v5002_v5 = vmul.f32 %v7280_v21, %v7268_v12  ;;  %v5003_v9 = vmul.f32 %v7280_v21, %v7270_v42 }
0x2560   :  { %v5004_v23 = vmul.f32 %v7280_v21, %v7272_v18  ;;  %v5005_v45 = vmul.f32 %v7280_v21, %v7274_v31  ;;  %v5006_v40 = vmul.f32 %v7280_v21, %v7276_v49  ;;  %v5007_v15 = vmul.f32 %v7280_v21, %v7278_v44  ;;  %v7504_v18 = vld [vmem:[#allocation19 + $0x78] ss:$12 sps:$4 sm:$0xff]   ;;  %v7508_v31 = vld [vmem:[#allocation19 + $0x68] ss:$12 sps:$4 sm:$0xff]   ;;  %v7511_v49 = vld [vmem:[#allocation19 + $0x50] ss:$12 sps:$4 sm:$0xff]  }
0x2561   :  { %5015 = vperm.xlu1 %6766, %v5001_v24   ;;  %5010 = vperm.xlu0 %6765, %v5000_v39   ;;  %v7514_v44 = vld [vmem:[#allocation19 + $0x38] ss:$12 sps:$4 sm:$0xff]   ;;  %v7520_v21 = vld [vmem:[#allocation19 + $0x8] ss:$12 sps:$4 sm:$0xff]  }
0x2562   :  { %v7521_v24 = vld [vmem:[#allocation20 + $0x38] sm:$0xff]   ;;  %v7522_v39 = vld [vmem:[#allocation20 + $0x30] sm:$0xff]  }
0x2565   :  { %5020 = vperm.xlu1 %6766, %v5002_v5   ;;  %5025 = vperm.xlu0 %6765, %v5003_v9   ;;  %v7523_v5 = vld [vmem:[#allocation20 + $0x28] sm:$0xff]   ;;  %v7524_v9 = vld [vmem:[#allocation20 + $0x20] sm:$0xff]  }
0x2569   :  { %5030 = vperm.xlu1 %6766, %v5004_v23   ;;  %5035 = vperm.xlu0 %6765, %v5005_v45   ;;  %v7526_v23 = vld [vmem:[#allocation20 + $0x10] sm:$0xff]   ;;  %v7527_v45 = vld [vmem:[#allocation20 + $0x8] sm:$0xff]  }
0x256d   :  { %5040 = vperm.xlu1 %6766, %v5006_v40   ;;  %5045 = vperm.xlu0 %6765, %v5007_v15   ;;  %v7528_v40 = vld [vmem:[#allocation20] sm:$0xff]  }
0x25dc   :  { %v5016_v57 = vpop.permute.xlu1 %5015  ;;  %v5011_v33 = vpop.permute.xlu0 %5010 }
0x25dd   :  { %v5049_v60 = vmul.f32 %v5016_v57, %v10434_v8  ;;  %v5048_v20 = vmul.f32 %v5011_v33, %v10435_v30 }
0x25df   :  { %v5056_v19 = vadd.f32 %v5049_v60, %v5048_v20 }
0x25e0   :  { %v5021_v10 = vpop.permute.xlu1 %5020  ;;  %v5026_v53 = vpop.permute.xlu0 %5025 }
0x25e1   :  { %v5050_v25 = vmul.f32 %v5021_v10, %v8296_v22  ;;  %v5051_v2 = vmul.f32 %v5026_v53, %v8343_v35  ;;  %v7498_v35 = vld [vmem:[#allocation19 + $0xa8] ss:$12 sps:$4 sm:$0xff]  }
0x25e3   :  { %v5057_v56 = vadd.f32 %v5056_v19, %v5050_v25 }
0x25e4   :  { %v5031_v0 = vpop.permute.xlu1 %5030  ;;  %v5036_v11 = vpop.permute.xlu0 %5035 }
0x25e5   :  { %v5058_v50 = vadd.f32 %v5057_v56, %v5051_v2  ;;  %v5052_v52 = vmul.f32 %v5031_v0, %v8389_v41  ;;  %v5053_v6 = vmul.f32 %v5036_v11, %v8436_v17  ;;  %v7500_v41 = vld [vmem:[#allocation19 + $0x94] ss:$12 sps:$4 sm:$0xff]   ;;  %v7501_v17 = vld [vmem:[#allocation19 + $0x90] ss:$12 sps:$4 sm:$0xff]  }
0x25e7   :  { %v5059_v32 = vadd.f32 %v5058_v50, %v5052_v52 }
0x25e8   :  { %v5041_v43 = vpop.permute.xlu1 %5040  ;;  %v5046_v8 = vpop.permute.xlu0 %5045 }
0x25e9   :  { %v5060_v12 = vadd.f32 %v5059_v32, %v5053_v6  ;;  %v5054_v30 = vmul.f32 %v5041_v43, %v8461_v62  ;;  %v5055_v42 = vmul.f32 %v5046_v8, %v8574_v29  ;;  %v7502_v62 = vld [vmem:[#allocation19 + $0x98] ss:$12 sps:$4 sm:$0xff]   ;;  %v7503_v29 = vld [vmem:[#allocation19 + $0x7c] ss:$12 sps:$4 sm:$0xff]  }
0x25eb   :  { %v5061_v59 = vadd.f32 %v5060_v12, %v5054_v30 }
0x25ed   :  { %v5062_v22 = vadd.f32 %v5061_v59, %v5055_v42 }
0x25ef   :  { %v5063_v55 = vpack.c.bf16 %v5062_v22, %v5062_v22 }
0x25f1   :  { %5098 = vmatmul.mubr.bf16.vlgmr.msra.gmra.mxu1 %v5063_v55  ;;  %5139 = vmatmul.mubr.bf16.vlgmr.msra.gmra.mxu0 %v5063_v55 }
0x25f2   :  { %5147 = vmatpush1.bf16.msra.mxu0 %v7498_v35  ;;  %6703 = vmatpush3.bf16.msra.mxu1 %v7499_v16 }
0x25f3   :  { %5148 = vmatprep.subr.bf16.mxu0 %v7500_v41  ;;  %6704 = vmatprep.subr.bf16.mxu1 %v10317_v34 }
0x25f4   :  { %5178 = vmatprep.mubr.bf16.mxu0 %v10318_v26  ;;  %6718 = vmatprep.mubr.msk.bf16.mxu1 %vm7824_vm1, %v10317_v34  ;;  %v7507_v26 = vld [vmem:[#allocation19 + $0x60] ss:$12 sps:$4 sm:$0xff]  }
0x25f6   :  { %5149 = vmatpush1.bf16.msra.mxu0 %v7501_v17  ;;  %6705 = vmatpush3.bf16.msra.mxu1 %v7502_v62 }
0x25f7   :  { %5150 = vmatprep.subr.bf16.mxu0 %v7503_v29  ;;  %6706 = vmatprep.subr.bf16.mxu1 %v10317_v34 }
0x25fa   :  { %5151 = vmatpush1.bf16.msra.mxu0 %v7504_v18  ;;  %6707 = vmatpush3.bf16.msra.mxu1 %v7505_v7 }
0x25fb   :  { %5152 = vmatprep.subr.bf16.mxu0 %v7506_v37  ;;  %6708 = vmatprep.subr.bf16.mxu1 %v10317_v34 }
0x25fe   :  { %5153 = vmatpush1.bf16.msra.mxu0 %v7507_v26  ;;  %6709 = vmatpush3.bf16.msra.mxu1 %v7508_v31 }
0x25ff   :  { %5154 = vmatprep.subr.bf16.mxu0 %v7509_v14  ;;  %6710 = vmatprep.subr.bf16.mxu1 %v10317_v34 }
0x2602   :  { %5155 = vmatpush1.bf16.msra.mxu0 %v7510_v54  ;;  %6711 = vmatpush3.bf16.msra.mxu1 %v7511_v49 }
0x2603   :  { %5156 = vmatprep.subr.bf16.mxu0 %v7512_v4  ;;  %6712 = vmatprep.subr.bf16.mxu1 %v10317_v34 }
0x2606   :  { %5157 = vmatpush1.bf16.msra.mxu0 %v7513_v28  ;;  %6713 = vmatpush3.bf16.msra.mxu1 %v7514_v44 }
0x2607   :  { %5158 = vmatprep.subr.bf16.mxu0 %v7515_v47  ;;  %6714 = vmatprep.subr.bf16.mxu1 %v10317_v34 }
0x260a   :  { %5159 = vmatpush1.bf16.msra.mxu0 %v7516_v58  ;;  %6715 = vmatpush3.bf16.msra.mxu1 %v7517_v27 }
0x260b   :  { %5160 = vmatprep.subr.bf16.mxu0 %v7518_v48  ;;  %6716 = vmatprep.subr.bf16.mxu1 %v10317_v34 }
0x260e   :  { %5161 = vmatpush1.bf16.msra.mxu0 %v7519_v36  ;;  %6717 = vmatpush3.bf16.msra.mxu1 %v7520_v21 }
0x260f   :  { %6722 = vmatprep.subr.bf16.mxu0 %v10317_v34 }
0x2611   :  { %5179 = vmatmul.mubr.bf16.vlgmr.msra.gmra.mxu0 %v9964_v61  ;;  %6719 = vmatmul.mubr.bf16.vlgmr.msra.gmra.mxu1 %v9964_v61  ;;  %v7525_v61 = vld [vmem:[#allocation20 + $0x18] sm:$0xff]  }
0x2612   :  { %6723 = vmatpush3.bf16.msra.mxu0 %v7521_v24  ;;  %6738 = vmatprep.mubr.msk.bf16.mxu0 %vm7824_vm1, %v10317_v34 }
0x2613   :  { %6724 = vmatprep.subr.bf16.mxu0 %v10317_v34 }
0x2616   :  { %6725 = vmatpush3.bf16.msra.mxu0 %v7522_v39 }
0x2617   :  { %6726 = vmatprep.subr.bf16.mxu0 %v10317_v34 }
0x261a   :  { %6727 = vmatpush3.bf16.msra.mxu0 %v7523_v5 }
0x261b   :  { %6728 = vmatprep.subr.bf16.mxu0 %v10317_v34 }
0x261e   :  { %6729 = vmatpush3.bf16.msra.mxu0 %v7524_v9 }
0x261f   :  { %6730 = vmatprep.subr.bf16.mxu0 %v10317_v34 }
0x2622   :  { %6731 = vmatpush3.bf16.msra.mxu0 %v7525_v61 }
0x2623   :  { %6732 = vmatprep.subr.bf16.mxu0 %v10317_v34 }
0x2626   :  { %6733 = vmatpush3.bf16.msra.mxu0 %v7526_v23 }
0x2627   :  { %6734 = vmatprep.subr.bf16.mxu0 %v10317_v34 }
0x262a   :  { %6735 = vmatpush3.bf16.msra.mxu0 %v7527_v45 }
0x262b   :  { %6736 = vmatprep.subr.bf16.mxu0 %v10317_v34 }
0x262e   :  { %6737 = vmatpush3.bf16.msra.mxu0 %v7528_v40 }
0x26b1   :  { %v5099_v15 = vpop.f32.mrf.mxu1  ;;  %v5974_v57 = vpop.f32.mrf.mxu0 }
0x26b2   :  { %v5100_v0 = vadd.f32 %v5099_v15, %v10618_v3 }
0x26b3   :  { %v5101_v33 = vpop.f32.mrf.mxu1  ;;  %v5975_v60 = vpop.f32.mrf.mxu0 }
0x26b4   :  { %v5976_v20 = vadd.f32 %v5975_v60, %v5974_v57  ;;  %v5102_v59 = vadd.f32 %v5101_v33, %v10621_v1 }
0x26b5   :  { %v5103_v10 = vpop.f32.mrf.mxu1  ;;  %v5977_v53 = vpop.f32.mrf.mxu0 }
0x26b6   :  { %v5141_v17 = vadd.f32 %v5976_v20, %v10623_v13 }
0x26b7   :  { %v5104_v19 = vpop.f32.mrf.mxu1  ;;  %v5978_v25 = vpop.f32.mrf.mxu0 }
0x26d1   :  { %v5180_v56 = vpop.f32.mrf.mxu0  ;;  %v5221_v2 = vpop.f32.mrf.mxu1 }
0x26d2   :  { %v5181_v11 = vadd.f32 %v5180_v56, %v10619_v38  ;;  %v5222_v16 = vadd.f32 %v5221_v2, %v10622_v51  ;;  %v7529_v51 = vld [vmem:[%s10102_s18] ss:$0 sm:$0xff]  ;;  %s7770_s18 = scalar_lea.vmem %s5311_s9, 640 }
0x26d3   :  { %v5182_v50 = vpop.f32.mrf.mxu0  ;;  %v6720_v52 = vpop.f32.mrf.mxu1  ;;  %p7771_p4 = scmp.ne.s32.totalorder %s5311_s9, %s7770_s18  ;;  %p7776_p6 = scmp.lt.s32.totalorder %s7770_s18, %s7770_s18 }
0x26d4   :  { %v5227_v34 = vadd.f32 %v5181_v11, %v5100_v0  ;;  %v5183_v8 = vadd.f32 %v5182_v50, %v10620_v63 }
0x26d5   :  { %v5184_v32 = vpop.f32.mrf.mxu0  ;;  %v5224_v6 = vpop.f32.mrf.mxu1  ;;  %p7777_p7 = por %p7776_p6, %p7775_p5 }
0x26d6   :  { %v5542_v43 = vmul.f32 -1.442695, %v5227_v34  ;;  %v5234_v42 = vadd.f32 %v5183_v8, %v5102_v59 }
0x26d7   :  { %v5185_v12 = vpop.f32.mrf.mxu0  ;;  %v6721_v30 = vpop.f32.mrf.mxu1  ;;  %p7778_p8 = pnand %p7777_p7, %p7771_p4 }
0x26d8   :  { %7281 = vpow2.f32 %v5542_v43  ;;  %v5543_v22 = vmul.f32 -1.442695, %v5234_v42 }
0x26da   :  { %7283 = vpow2.f32 %v5543_v22 }
0x26e5   :  { %v7282_v55 = vpop.eup %7281 }
0x26e6   :  { %v5231_v3 = vadd.f32 1.0, %v7282_v55 }
0x26e7   :  { %v7284_v38 = vpop.eup %7283 }
0x26e8   :  { %7285 = vrcp.f32 %v5231_v3  ;;  %v5238_v35 = vadd.f32 1.0, %v7284_v38 }
0x26ea   :  { %7287 = vrcp.f32 %v5238_v35 }
0x26f5   :  { %v7286_v41 = vpop.eup %7285 }
0x26f6   :  { %v5241_v62 = vmul.f32 %v7286_v41, %v5222_v16 }
0x26f7   :  { %v7288_v29 = vpop.eup %7287 }
0x26f8   :  { %v5242_v63 = vadd.f32 %v5241_v62, %v5141_v17  ;;  %v5244_v1 = vsub.f32 1.0, %v7288_v29  ;;  %v5246_v37 = vmul.f32 %v7288_v29, %v9960_v46 }
0x26fa   :  { %7289 = vtanh.f32 %v5242_v63 }
0x2707   :  { %v7290_v18 = vpop.eup %7289 }
0x2708   :  { %v5245_v7 = vmul.f32 %v7290_v18, %v5244_v1 }
0x270a   :  { %v5247_v26 = vadd.f32 %v5246_v37, %v5245_v7 }
0x270c   :  { %v5248_v31 = vpack.c.bf16 %v5247_v26, %v5247_v26 }
0x270e   :  { %6739 = vmatmul.mubr.bf16.vlgmr.msra.gmra.mxu0 %v5248_v31 }
0x27ce   :  { %v5283_v14 = vpop.f32.mrf.mxu0 }
0x27cf   :  { %v5284_v54 = vadd.f32 %v7529_v51, %v5283_v14 }
0x27d0   :  { %v6740_v13 = vpop.f32.mrf.mxu0 }
0x27d1   :  { %5289 = vmax.xlane.f32.xlu1 %v5284_v54 }
0x27d2   :  { %v5286_v49 = vpop.f32.mrf.mxu0 }
0x27d4   :  { %v6741_v4 = vpop.f32.mrf.mxu0 }
0x285a   :  { %v5290_v28 = vpop.xlane.xlu1 %5289 }
0x285b   :  { %v5291_v44 = vsub.f32 %v5284_v54, %v5290_v28 }
0x285d   :  { %v5292_v47 = vmul.f32 1.442695, %v5291_v44 }
0x285f   :  { %7291 = vpow2.f32 %v5292_v47 }
0x286c   :  { %v7292_v58 = vpop.eup %7291 }
0x286d   :  { %5294 = vadd.xlane.f32.xlu0 %v7292_v58 }
0x28f6   :  { %v5295_v46 = vpop.xlane.xlu0 %5294 }
0x28f7   :  { %7293 = vlog2.f32 %v5295_v46 }
0x2904   :  { %v7294_v27 = vpop.eup %7293 }
0x2905   :  { %v5297_v48 = vmul.f32 0.6931472, %v7294_v27 }
0x2907   :  { %v5298_v36 = vadd.f32 %v5297_v48, %v5290_v28 }
0x2909   :  { %v5299_v21 = vsub.f32 %v5284_v54, %v5298_v36 }
0x290b   :  { %5304 = vst [vmem:[#allocation22 + $0x20] sm:$0xff] %v5299_v21 }
0x290c   :  { %7781 = shalt.err (!%p7778_p8)
}
0x290d   :  { %s7827_s30 = smov 128   ;;  %s7828_s12 = smov 8  }
0x290e   :  { %5316 = dma.vmem_to_hbm [thread:$0]  %s5311_s9, 640, %s10103_s19, [#allocation4], %s7827_s30, %s7827_s30, %s7828_s12  }
0x290f   :  { %7804 = dma.done.wait [#allocation4], 640  }
0x2910   :  { %7805 = vsyncadd [#allocation4], 4294966656 }
0x2911   :  { %5320 = vsyncpa [#allocation3], 1 }
0x2912   :  { %5321 = vsyncpa [#allocation6], 1 }
0x2913   :  { %5322 = vsyncpa [#allocation9], 1 }
0x2914   :  { %5323 = vsyncpa [#allocation12], 1 }
0x2915   :  { %5324 = vsyncpa [#allocation15], 1 }
0x2916   :  { %5325 = vsyncpa [#allocation18], 1 }
0x2917   :  { %5326 = vsyncpa [#allocation21], 1 }
0x2918   :  { %5327 = vsyncpa [#allocation4], 1 }

</bundles_post_ra>
